<compile_context>
chip_gen: v5e
topology: v5e:2x2
jax: 0.10.0
libtpu: 0.0.40
codegen_flags: <defaults>
</compile_context>

<pallas_src>
import functools
import math

import jax
import jax.numpy as jnp
from jax.experimental import pallas as pl
from jax.experimental.pallas import tpu as pltpu


LEAKY_SLOPE = 0.01                      # nn.LeakyReLU default negative_slope
VMEM_LIMIT = 32 * 1024 * 1024           # safe on v5e / v6e / v7x
# Set to jnp.bfloat16 on v6e/v7x for ~1.5-2x conv throughput (small precision
# change); f32 keeps exact PyTorch forward semantics.
MATMUL_COMPUTE_DTYPE = jnp.float32


def _cparams(*sem):
    return pltpu.CompilerParams(dimension_semantics=tuple(sem),
                                vmem_limit_bytes=VMEM_LIMIT)


def _pick_tile(rows, row_bytes, budget=8 << 20):
    """Largest row tile that fits the VMEM budget; prefer >=2 grid steps."""
    cands = [t for t in (2048, 1024, 512, 256, 128, 64, 32, 16, 8)
             if rows % t == 0]
    for t in cands:
        if 4 * t * row_bytes <= budget and rows // t >= 2:
            return t
    for t in cands:
        if 4 * t * row_bytes <= budget:
            return t
    return cands[-1] if cands else rows


# ----------------------------------------------------------------------------
# Pallas kernels
# ----------------------------------------------------------------------------
def _matmul_bias_kernel(a_ref, w_ref, b_ref, o_ref):
    o_ref[...] = (
        jnp.dot(a_ref[...], w_ref[...], preferred_element_type=jnp.float32)
        + b_ref[...]
    )


def matmul_bias(a, w, b):
    """a: (M, K), w: (K, Cout), b: (Cout,) -> (M, Cout) float32 (MXU path)."""
    M, K = a.shape
    _, Cout = w.shape
    a = a.astype(MATMUL_COMPUTE_DTYPE)
    w = w.astype(MATMUL_COMPUTE_DTYPE)
    tm = _pick_tile(M, (K + Cout) * 4)
    return pl.pallas_call(
        _matmul_bias_kernel,
        out_shape=jax.ShapeDtypeStruct((M, Cout), jnp.float32),
        grid=(M // tm,),
        in_specs=[
            pl.BlockSpec((tm, K), lambda i: (i, 0)),
            pl.BlockSpec((K, Cout), lambda i: (0, 0)),
            pl.BlockSpec((1, Cout), lambda i: (0, 0)),
        ],
        out_specs=pl.BlockSpec((tm, Cout), lambda i: (i, 0)),
        compiler_params=_cparams("parallel"),
    )(a, w, b.reshape(1, Cout).astype(jnp.float32))


def _bn_stats_kernel(*args, widths):
    """Per-lane sum / sum-of-squares, accumulated into the resident output."""
    n = len(widths)
    x_refs, o_ref = args[:n], args[n]

    @pl.when(pl.program_id(0) == 0)
    def _init():
        o_ref[...] = jnp.zeros_like(o_ref)

    off = 0
    for r, w in zip(x_refs, widths):
        x = r[...]
        o_ref[0:1, off:off + w] += jnp.sum(x, axis=0, keepdims=True)
        o_ref[1:2, off:off + w] += jnp.sum(x * x, axis=0, keepdims=True)
        off += w


def _bn_act_kernel(*args, widths, slope):
    """y = x*scale + shift, LeakyReLU(slope); branches written to channel slices."""
    n = len(widths)
    x_refs, ss_ref, o_ref = args[:n], args[n], args[n + 1]
    off = 0
    for r, w in zip(x_refs, widths):
        y = r[...] * ss_ref[0:1, off:off + w] + ss_ref[1:2, off:off + w]
        o_ref[:, off:off + w] = jnp.where(y > 0, y, slope * y)
        off += w


def _maxpool_kernel(x_ref, o_ref, *, H, W, C):
    """3x3 / stride-1 max over a -inf padded (1, Hp, Wp*C) image block."""
    m = x_ref[0, 0:H, 0:W * C]
    for i in range(3):
        for j in range(3):
            if i == 0 and j == 0:
                continue
            m = jnp.maximum(m, x_ref[0, i:i + H, j * C:j * C + W * C])
    o_ref[0, :, :] = m


# ----------------------------------------------------------------------------
# layer wrappers (thin JAX glue around the Pallas kernels)
# ----------------------------------------------------------------------------
def _bn_stats(views, widths):
    rows = views[0].shape[0]
    ltot = sum(widths)
    tm = _pick_tile(rows, ltot * 4)
    kern = functools.partial(_bn_stats_kernel, widths=tuple(widths))
    in_specs = [pl.BlockSpec((tm, w), lambda i: (i, 0)) for w in widths]
    return pl.pallas_call(
        kern,
        out_shape=jax.ShapeDtypeStruct((2, ltot), jnp.float32),
        grid=(rows // tm,),
        in_specs=in_specs,
        out_specs=pl.BlockSpec((2, ltot), lambda i: (0, 0)),
        compiler_params=_cparams("arbitrary"),
    )(*views)


def _bn_apply(views, widths, ss, slope):
    rows = views[0].shape[0]
    ctot = int(ss.shape[1])
    tm = _pick_tile(rows, (sum(widths) + ctot) * 4)
    kern = functools.partial(_bn_act_kernel, widths=tuple(widths),
                             slope=float(slope))
    in_specs = [pl.BlockSpec((tm, w), lambda i: (i, 0)) for w in widths]
    in_specs.append(pl.BlockSpec((2, ctot), lambda i: (0, 0)))
    return pl.pallas_call(
        kern,
        out_shape=jax.ShapeDtypeStruct((rows, ctot), jnp.float32),
        grid=(rows // tm,),
        in_specs=in_specs,
        out_specs=pl.BlockSpec((tm, ctot), lambda i: (i, 0)),
        compiler_params=_cparams("parallel"),
    )(*views, ss)


def batchnorm_act(branches, gamma, beta, slope, eps=1e-5):
    """Training-mode BatchNorm2d (batch stats, biased var) + LeakyReLU(slope).

    `branches` is a list of flat (M, c_b) tensors; their channel concatenation
    (in list order) is normalized -- the concat is fused into the apply kernel.
    Returns flat (M, sum(c_b)).
    """
    widths = [int(b.shape[1]) for b in branches]
    M = int(branches[0].shape[0])
    ctot = sum(widths)

    # ---- pass 1: per-channel sum / sumsq via Pallas (lane-dense views) ----
    views, vwidths, groups = [], [], []
    for b, c in zip(branches, widths):
        if (M * c) % 128 == 0 and 128 % c == 0:
            g = 128 // c
            views.append(b.reshape((M * c) // 128, 128))
            vwidths.append(128)
            groups.append(g)
        else:
            views.append(b)
            vwidths.append(c)
            groups.append(1)
    if len({int(v.shape[0]) for v in views}) != 1:      # must share one grid
        views, vwidths, groups = branches, widths, [1] * len(branches)

    sums = _bn_stats(views, vwidths)                    # (2, sum(vwidths))

    per_ch, off = [], 0
    for c, vw, g in zip(widths, vwidths, groups):
        s = sums[:, off:off + vw]
        if g > 1:
            s = s.reshape(2, g, c).sum(axis=1)
        per_ch.append(s)
        off += vw
    s = jnp.concatenate(per_ch, axis=1) if len(per_ch) > 1 else per_ch[0]
    mean = s[0] / M
    var = jnp.maximum(s[1] / M - mean * mean, 0.0)      # biased variance
    scale = gamma * jax.lax.rsqrt(var + eps)
    shift = beta - mean * scale

    # ---- pass 2: normalize + LeakyReLU (+ fused concat) ----
    if len(branches) == 1 and (M * ctot) % 128 == 0 and 128 % ctot == 0:
        g = 128 // ctot
        xv = branches[0].reshape((M * ctot) // 128, 128)
        ss = jnp.stack([jnp.tile(scale, g), jnp.tile(shift, g)])
        out = _bn_apply([xv], [128], ss, slope)
        return out.reshape(M, ctot)
    ss = jnp.stack([scale, shift])
    return _bn_apply(branches, widths, ss, slope)


def maxpool3x3(x):
    """MaxPool2d(kernel=3, stride=1, padding=1); pads with -inf like PyTorch."""
    N, H, W, C = x.shape
    xp = jnp.pad(x, ((0, 0), (1, 1), (1, 1), (0, 0)),
                 constant_values=-jnp.inf)
    xp = xp.reshape(N, H + 2, (W + 2) * C)
    out = pl.pallas_call(
        functools.partial(_maxpool_kernel, H=H, W=W, C=C),
        out_shape=jax.ShapeDtypeStruct((N, H, W * C), jnp.float32),
        grid=(N,),
        in_specs=[pl.BlockSpec((1, H + 2, (W + 2) * C), lambda n: (n, 0, 0))],
        out_specs=pl.BlockSpec((1, H, W * C), lambda n: (n, 0, 0)),
        compiler_params=_cparams("parallel"),
    )(xp)
    return out.reshape(N, H, W, C)


def conv_kxk(x, wmat, b, k, pad):
    """k x k cross-correlation (PyTorch Conv2d), stride 1. Returns flat (M, Cout)."""
    N, H, W, Cin = x.shape
    xp = jnp.pad(x, ((0, 0), (pad, pad), (pad, pad), (0, 0)))
    # TODO(synk): im2col is still materialized by XLA (k*k activation copies);
    # an in-kernel halo-DMA tap accumulation would remove this traffic.
    cols = [xp[:, i:i + H, j:j + W, :] for i in range(k) for j in range(k)]
    a = jnp.concatenate(cols, axis=-1).reshape(N * H * W, k * k * Cin)
    return matmul_bias(a, wmat, b)


# ----------------------------------------------------------------------------
# parameter init (PyTorch-like) + static config
# ----------------------------------------------------------------------------
def _conv_init(key, cin, cout, kh, kw):
    wkey, bkey = jax.random.split(key)
    fan_in = cin * kh * kw
    bound = 1.0 / math.sqrt(fan_in)
    w = jax.random.uniform(wkey, (cout, cin, kh, kw), jnp.float32, -bound, bound)
    b = jax.random.uniform(bkey, (cout,), jnp.float32, -bound, bound)
    # pre-transform to matmul layout (K = kh*kw*cin, Cout); matches im2col
    # column order (i, j, cin).
    wm = jnp.transpose(w, (2, 3, 1, 0)).reshape(kh * kw * cin, cout)
    return wm, b


def _init_block(key, cin, cout, use_maxpool):
    reduce = (cin != cout)
    keys = jax.random.split(key, 6)
    p = {}
    if reduce:
        w1, b1 = _conv_init(keys[0], cin, cout, 1, 1)
        wr3, br3 = _conv_init(keys[1], cin, cout, 1, 1)
        wr5, br5 = _conv_init(keys[2], cin, cout, 1, 1)
        # fuse the three 1x1 convs that read the same input into one matmul
        p["w_head"] = jnp.concatenate([w1, wr3, wr5], axis=1)   # (cin, 3*cout)
        p["b_head"] = jnp.concatenate([b1, br3, br5])
        if use_maxpool:
            p["w_mp"], p["b_mp"] = _conv_init(keys[3], cin, cout, 1, 1)
    else:
        p["w_1x1"], p["b_1x1"] = _conv_init(keys[0], cin, cout, 1, 1)
    rc = cout                                   # reduce_channels
    p["w3"], p["b3"] = _conv_init(keys[4], rc, cout, 3, 3)
    p["w5"], p["b5"] = _conv_init(keys[5], rc, cout, 5, 5)
    bn_ch = cin if reduce else (4 * cout if use_maxpool else 3 * cout)
    p["bn_g"] = jnp.ones((bn_ch,), jnp.float32)
    p["bn_b"] = jnp.zeros((bn_ch,), jnp.float32)
    return p, {"reduce": reduce, "cin": cin, "cout": cout}


def init_inception_net(key, in_ch, out_ch, inc_ch, n_blocks=3, use_maxpool=True):
    factor = 4 if use_maxpool else 3
    keys = jax.random.split(key, n_blocks + 2)
    params = {}
    params["conv2_w"], params["conv2_b"] = _conv_init(keys[0], in_ch, inc_ch, 3, 3)
    params["bn1_g"] = jnp.ones((inc_ch,), jnp.float32)
    params["bn1_b"] = jnp.zeros((inc_ch,), jnp.float32)
    blocks_p, blocks_c = [], []
    cin = inc_ch
    for i in range(n_blocks):
        bp, bc = _init_block(keys[1 + i], cin, inc_ch, use_maxpool)
        blocks_p.append(bp)
        blocks_c.append(bc)
        cin = factor * inc_ch
    params["blocks"] = blocks_p
    params["out_w"], params["out_b"] = _conv_init(keys[-1], factor * inc_ch,
                                                  out_ch, 1, 1)
    params["out_bn_g"] = jnp.ones((out_ch,), jnp.float32)
    params["out_bn_b"] = jnp.zeros((out_ch,), jnp.float32)
    cfg = {"use_maxpool": use_maxpool, "blocks": blocks_c}
    return params, cfg


# ----------------------------------------------------------------------------
# forward pass (config is static Python, closed over -> no tracer branching)
# ----------------------------------------------------------------------------
def _inception_block(p, bcfg, use_maxpool, x):
    N, H, W, Cin = x.shape
    M = N * H * W
    c = bcfg["cout"]
    xf = x.reshape(M, Cin)
    if bcfg["reduce"]:
        head = matmul_bias(xf, p["w_head"], p["b_head"])      # fused 1x1 convs
        x1 = head[:, 0:c]
        x2 = conv_kxk(head[:, c:2 * c].reshape(N, H, W, c), p["w3"], p["b3"], 3, 1)
        x3 = conv_kxk(head[:, 2 * c:3 * c].reshape(N, H, W, c), p["w5"], p["b5"], 5, 2)
        branches = [x1, x2, x3]
        if use_maxpool:
            mp = maxpool3x3(x).reshape(M, Cin)
            branches.append(matmul_bias(mp, p["w_mp"], p["b_mp"]))
    else:
        x1 = matmul_bias(xf, p["w_1x1"], p["b_1x1"])
        x2 = conv_kxk(x, p["w3"], p["b3"], 3, 1)
        x3 = conv_kxk(x, p["w5"], p["b5"], 5, 2)
        branches = [x1, x2, x3]
        if use_maxpool:
            branches.append(maxpool3x3(x).reshape(M, Cin))
    out = batchnorm_act(branches, p["bn_g"], p["bn_b"], LEAKY_SLOPE)
    return out.reshape(N, H, W, -1)


def build_forward(cfg):
    use_maxpool = cfg["use_maxpool"]
    block_cfgs = cfg["blocks"]

    def forward(params, x_nchw):
        x = jnp.transpose(x_nchw, (0, 2, 3, 1)).astype(jnp.float32)  # NCHW->NHWC
        N, H, W, _ = x.shape
        M = N * H * W
        xf = conv_kxk(x, params["conv2_w"], params["conv2_b"], 3, 1)
        xf = batchnorm_act([xf], params["bn1_g"], params["bn1_b"], LEAKY_SLOPE)
        x = xf.reshape(N, H, W, -1)
        for bcfg, bp in zip(block_cfgs, params["blocks"]):
            x = _inception_block(bp, bcfg, use_maxpool, x)
        xf = matmul_bias(x.reshape(M, -1), params["out_w"], params["out_b"])
        xf = batchnorm_act([xf], params["out_bn_g"], params["out_bn_b"], 0.0)  # ReLU
        x = xf.reshape(N, H, W, -1)
        return jnp.transpose(x, (0, 3, 1, 2))                        # NHWC->NCHW

    return forward


# ----------------------------------------------------------------------------
# main
# ----------------------------------------------------------------------------
if __name__ == "__main__":
    key = jax.random.PRNGKey(0)
    pkey, xkey = jax.random.split(key)

    IN_CH, OUT_CH, INC_CH = 4, 8, 16
    params, cfg = init_inception_net(pkey, IN_CH, OUT_CH, INC_CH,
                                     n_blocks=3, use_maxpool=True)

    x = jax.random.normal(xkey, (2, IN_CH, 16, 16), jnp.float32)  # NCHW

    forward = jax.jit(build_forward(cfg))
    y = jax.block_until_ready(forward(params, x))

    assert y.shape == (2, OUT_CH, 16, 16), y.shape
    assert bool(jnp.all(jnp.isfinite(y)))
    assert bool(jnp.all(y >= 0.0))  # final ReLU

    print("KERNEL_OK")
</pallas_src>

<mosaic_0001>
module attributes {stable_mosaic.version = 11 : i64} {
  func.func @_matmul_bias_kernel(%arg0: i32, %arg1: memref<256x36xf32, #tpu.memory_space<vmem>>, %arg2: memref<36x16xf32, #tpu.memory_space<vmem>>, %arg3: memref<1x16xf32, #tpu.memory_space<vmem>>, %arg4: memref<256x16xf32, #tpu.memory_space<vmem>>) attributes {dimension_semantics = [#tpu.dimension_semantics<parallel>], iteration_bounds = array<i64: 2>, scalar_prefetch = 0 : i64, scratch_operands = 0 : i64, tpu.core_type = #tpu.core_type<tc>, window_params = [{transform_indices = @transform_0, window_bounds = array<i64: 256, 36>}, {pipeline_mode = #tpu.pipeline_mode<synchronous>, transform_indices = @transform_1, window_bounds = array<i64: 36, 16>}, {pipeline_mode = #tpu.pipeline_mode<synchronous>, transform_indices = @transform_2, window_bounds = array<i64: 1, 16>}, {transform_indices = @transform_3, window_bounds = array<i64: 256, 16>}]} {
    %c0 = arith.constant 0 : index
    %c0_0 = arith.constant 0 : index
    %0 = vector.load %arg1[%c0, %c0_0] : memref<256x36xf32, #tpu.memory_space<vmem>>, vector<256x36xf32>
    %c0_1 = arith.constant 0 : index
    %c0_2 = arith.constant 0 : index
    %1 = vector.load %arg2[%c0_1, %c0_2] : memref<36x16xf32, #tpu.memory_space<vmem>>, vector<36x16xf32>
    %cst = arith.constant dense<0.000000e+00> : vector<256x16xf32>
    %2 = tpu.matmul %0, %1, %cst {dimension_numbers = #tpu.dot_dimension_numbers<[1], [0], [0], [1], [0, 0, 1, 1], [], []>} : vector<256x36xf32>, vector<36x16xf32>, vector<256x16xf32> -> vector<256x16xf32>
    %c0_3 = arith.constant 0 : index
    %c0_4 = arith.constant 0 : index
    %3 = vector.load %arg3[%c0_3, %c0_4] : memref<1x16xf32, #tpu.memory_space<vmem>>, vector<1x16xf32>
    %4 = vector.broadcast %3 : vector<1x16xf32> to vector<256x16xf32>
    %5 = arith.addf %2, %4 : vector<256x16xf32>
    %c0_5 = arith.constant 0 : index
    %c0_6 = arith.constant 0 : index
    %6 = vector.load %arg4[%c0_5, %c0_6] : memref<256x16xf32, #tpu.memory_space<vmem>>, vector<256x16xf32>
    tpu.vector_store %arg4[%c0_5, %c0_6], %5 {strides = array<i32>} : memref<256x16xf32, #tpu.memory_space<vmem>>, vector<256x16xf32>,
    return
  }
  func.func @transform_0(%arg0: i32) -> (i32, i32) {
    %c0_i32 = arith.constant 0 : i32
    %c0_i32_0 = arith.constant 0 : i32
    return %arg0, %c0_i32 : i32, i32
  }
  func.func @transform_1(%arg0: i32) -> (i32, i32) {
    %c0_i32 = arith.constant 0 : i32
    %c0_i32_0 = arith.constant 0 : i32
    %c0_i32_1 = arith.constant 0 : i32
    return %c0_i32, %c0_i32_0 : i32, i32
  }
  func.func @transform_2(%arg0: i32) -> (i32, i32) {
    %c0_i32 = arith.constant 0 : i32
    %c0_i32_0 = arith.constant 0 : i32
    %c0_i32_1 = arith.constant 0 : i32
    return %c0_i32, %c0_i32_0 : i32, i32
  }
  func.func @transform_3(%arg0: i32) -> (i32, i32) {
    %c0_i32 = arith.constant 0 : i32
    %c0_i32_0 = arith.constant 0 : i32
    return %arg0, %c0_i32 : i32, i32
  }
}

module attributes {stable_mosaic.version = 11 : i64} {
  func.func @_bn_stats_kernel(%arg0: i32, %arg1: memref<32x128xf32, #tpu.memory_space<vmem>>, %arg2: memref<2x128xf32, #tpu.memory_space<vmem>>) attributes {dimension_semantics = [#tpu.dimension_semantics<arbitrary>], iteration_bounds = array<i64: 2>, scalar_prefetch = 0 : i64, scratch_operands = 0 : i64, tpu.core_type = #tpu.core_type<tc>, window_params = [{transform_indices = @transform_0, window_bounds = array<i64: 32, 128>}, {pipeline_mode = #tpu.pipeline_mode<synchronous>, transform_indices = @transform_1, window_bounds = array<i64: 2, 128>}]} {
    %c0_i32 = arith.constant 0 : i32
    %0 = arith.cmpi eq, %arg0, %c0_i32 : i32
    %1 = arith.extui %0 : i1 to i32
    %c0_i32_0 = arith.constant 0 : i32
    %2 = arith.cmpi ne, %1, %c0_i32_0 : i32
    scf.if %2 {
      %cst_10 = arith.constant 0.000000e+00 : f32
      %15 = vector.broadcast %cst_10 : f32 to vector<2x128xf32>
      %c0_11 = arith.constant 0 : index
      %c0_12 = arith.constant 0 : index
      %16 = vector.load %arg2[%c0_11, %c0_12] : memref<2x128xf32, #tpu.memory_space<vmem>>, vector<2x128xf32>
      tpu.vector_store %arg2[%c0_11, %c0_12], %15 {strides = array<i32>} : memref<2x128xf32, #tpu.memory_space<vmem>>, vector<2x128xf32>,
    } else {
    }
    %c0 = arith.constant 0 : index
    %c0_1 = arith.constant 0 : index
    %3 = vector.load %arg1[%c0, %c0_1] : memref<32x128xf32, #tpu.memory_space<vmem>>, vector<32x128xf32>
    %c0_2 = arith.constant 0 : index
    %c0_3 = arith.constant 0 : index
    %4 = vector.load %arg2[%c0_2, %c0_3] : memref<2x128xf32, #tpu.memory_space<vmem>>, vector<1x128xf32>
    %cst = arith.constant dense<0.000000e+00> : vector<128xf32>
    %5 = vector.multi_reduction <add>, %3, %cst [0] : vector<32x128xf32> to vector<128xf32>
    %6 = vector.shape_cast %5 : vector<128xf32> to vector<1x128xf32>
    %7 = arith.addf %4, %6 : vector<1x128xf32>
    %c0_4 = arith.constant 0 : index
    %c0_5 = arith.constant 0 : index
    %8 = vector.load %arg2[%c0_4, %c0_5] : memref<2x128xf32, #tpu.memory_space<vmem>>, vector<1x128xf32>
    tpu.vector_store %arg2[%c0_4, %c0_5], %7 {strides = array<i32>} : memref<2x128xf32, #tpu.memory_space<vmem>>, vector<1x128xf32>,
    %c1 = arith.constant 1 : index
    %c0_6 = arith.constant 0 : index
    %9 = vector.load %arg2[%c1, %c0_6] : memref<2x128xf32, #tpu.memory_space<vmem>>, vector<1x128xf32>
    %10 = arith.mulf %3, %3 : vector<32x128xf32>
    %cst_7 = arith.constant dense<0.000000e+00> : vector<128xf32>
    %11 = vector.multi_reduction <add>, %10, %cst_7 [0] : vector<32x128xf32> to vector<128xf32>
    %12 = vector.shape_cast %11 : vector<128xf32> to vector<1x128xf32>
    %13 = arith.addf %9, %12 : vector<1x128xf32>
    %c1_8 = arith.constant 1 : index
    %c0_9 = arith.constant 0 : index
    %14 = vector.load %arg2[%c1_8, %c0_9] : memref<2x128xf32, #tpu.memory_space<vmem>>, vector<1x128xf32>
    tpu.vector_store %arg2[%c1_8, %c0_9], %13 {strides = array<i32>} : memref<2x128xf32, #tpu.memory_space<vmem>>, vector<1x128xf32>,
    return
  }
  func.func @transform_0(%arg0: i32) -> (i32, i32) {
    %c0_i32 = arith.constant 0 : i32
    %c0_i32_0 = arith.constant 0 : i32
    return %arg0, %c0_i32 : i32, i32
  }
  func.func @transform_1(%arg0: i32) -> (i32, i32) {
    %c0_i32 = arith.constant 0 : i32
    %c0_i32_0 = arith.constant 0 : i32
    %c0_i32_1 = arith.constant 0 : i32
    return %c0_i32, %c0_i32_0 : i32, i32
  }
}

module attributes {stable_mosaic.version = 11 : i64} {
  func.func @_bn_act_kernel(%arg0: i32, %arg1: memref<32x128xf32, #tpu.memory_space<vmem>>, %arg2: memref<2x128xf32, #tpu.memory_space<vmem>>, %arg3: memref<32x128xf32, #tpu.memory_space<vmem>>) attributes {dimension_semantics = [#tpu.dimension_semantics<parallel>], iteration_bounds = array<i64: 2>, scalar_prefetch = 0 : i64, scratch_operands = 0 : i64, tpu.core_type = #tpu.core_type<tc>, window_params = [{transform_indices = @transform_0, window_bounds = array<i64: 32, 128>}, {pipeline_mode = #tpu.pipeline_mode<synchronous>, transform_indices = @transform_1, window_bounds = array<i64: 2, 128>}, {transform_indices = @transform_2, window_bounds = array<i64: 32, 128>}]} {
    %c0 = arith.constant 0 : index
    %c0_0 = arith.constant 0 : index
    %0 = vector.load %arg1[%c0, %c0_0] : memref<32x128xf32, #tpu.memory_space<vmem>>, vector<32x128xf32>
    %c0_1 = arith.constant 0 : index
    %c0_2 = arith.constant 0 : index
    %1 = vector.load %arg2[%c0_1, %c0_2] : memref<2x128xf32, #tpu.memory_space<vmem>>, vector<1x128xf32>
    %2 = vector.broadcast %1 : vector<1x128xf32> to vector<32x128xf32>
    %3 = arith.mulf %0, %2 : vector<32x128xf32>
    %c1 = arith.constant 1 : index
    %c0_3 = arith.constant 0 : index
    %4 = vector.load %arg2[%c1, %c0_3] : memref<2x128xf32, #tpu.memory_space<vmem>>, vector<1x128xf32>
    %5 = vector.broadcast %4 : vector<1x128xf32> to vector<32x128xf32>
    %6 = arith.addf %3, %5 : vector<32x128xf32>
    %cst = arith.constant 0.000000e+00 : f32
    %7 = vector.broadcast %cst : f32 to vector<32x128xf32>
    %8 = arith.cmpf ogt, %6, %7 : vector<32x128xf32>
    %cst_4 = arith.constant 0.00999999977 : f32
    %9 = vector.broadcast %cst_4 : f32 to vector<32x128xf32>
    %10 = arith.mulf %9, %6 : vector<32x128xf32>
    %11 = arith.select %8, %6, %10 : vector<32x128xi1>, vector<32x128xf32>
    %c0_5 = arith.constant 0 : index
    %c0_6 = arith.constant 0 : index
    %12 = vector.load %arg3[%c0_5, %c0_6] : memref<32x128xf32, #tpu.memory_space<vmem>>, vector<32x128xf32>
    tpu.vector_store %arg3[%c0_5, %c0_6], %11 {strides = array<i32>} : memref<32x128xf32, #tpu.memory_space<vmem>>, vector<32x128xf32>,
    return
  }
  func.func @transform_0(%arg0: i32) -> (i32, i32) {
    %c0_i32 = arith.constant 0 : i32
    %c0_i32_0 = arith.constant 0 : i32
    return %arg0, %c0_i32 : i32, i32
  }
  func.func @transform_1(%arg0: i32) -> (i32, i32) {
    %c0_i32 = arith.constant 0 : i32
    %c0_i32_0 = arith.constant 0 : i32
    %c0_i32_1 = arith.constant 0 : i32
    return %c0_i32, %c0_i32_0 : i32, i32
  }
  func.func @transform_2(%arg0: i32) -> (i32, i32) {
    %c0_i32 = arith.constant 0 : i32
    %c0_i32_0 = arith.constant 0 : i32
    return %arg0, %c0_i32 : i32, i32
  }
}

module attributes {stable_mosaic.version = 11 : i64} {
  func.func @_matmul_bias_kernel(%arg0: i32, %arg1: memref<256x16xf32, #tpu.memory_space<vmem>>, %arg2: memref<16x16xf32, #tpu.memory_space<vmem>>, %arg3: memref<1x16xf32, #tpu.memory_space<vmem>>, %arg4: memref<256x16xf32, #tpu.memory_space<vmem>>) attributes {dimension_semantics = [#tpu.dimension_semantics<parallel>], iteration_bounds = array<i64: 2>, scalar_prefetch = 0 : i64, scratch_operands = 0 : i64, tpu.core_type = #tpu.core_type<tc>, window_params = [{transform_indices = @transform_0, window_bounds = array<i64: 256, 16>}, {pipeline_mode = #tpu.pipeline_mode<synchronous>, transform_indices = @transform_1, window_bounds = array<i64: 16, 16>}, {pipeline_mode = #tpu.pipeline_mode<synchronous>, transform_indices = @transform_2, window_bounds = array<i64: 1, 16>}, {transform_indices = @transform_3, window_bounds = array<i64: 256, 16>}]} {
    %c0 = arith.constant 0 : index
    %c0_0 = arith.constant 0 : index
    %0 = vector.load %arg1[%c0, %c0_0] : memref<256x16xf32, #tpu.memory_space<vmem>>, vector<256x16xf32>
    %c0_1 = arith.constant 0 : index
    %c0_2 = arith.constant 0 : index
    %1 = vector.load %arg2[%c0_1, %c0_2] : memref<16x16xf32, #tpu.memory_space<vmem>>, vector<16x16xf32>
    %cst = arith.constant dense<0.000000e+00> : vector<256x16xf32>
    %2 = tpu.matmul %0, %1, %cst {dimension_numbers = #tpu.dot_dimension_numbers<[1], [0], [0], [1], [0, 0, 1, 1], [], []>} : vector<256x16xf32>, vector<16x16xf32>, vector<256x16xf32> -> vector<256x16xf32>
    %c0_3 = arith.constant 0 : index
    %c0_4 = arith.constant 0 : index
    %3 = vector.load %arg3[%c0_3, %c0_4] : memref<1x16xf32, #tpu.memory_space<vmem>>, vector<1x16xf32>
    %4 = vector.broadcast %3 : vector<1x16xf32> to vector<256x16xf32>
    %5 = arith.addf %2, %4 : vector<256x16xf32>
    %c0_5 = arith.constant 0 : index
    %c0_6 = arith.constant 0 : index
    %6 = vector.load %arg4[%c0_5, %c0_6] : memref<256x16xf32, #tpu.memory_space<vmem>>, vector<256x16xf32>
    tpu.vector_store %arg4[%c0_5, %c0_6], %5 {strides = array<i32>} : memref<256x16xf32, #tpu.memory_space<vmem>>, vector<256x16xf32>,
    return
  }
  func.func @transform_0(%arg0: i32) -> (i32, i32) {
    %c0_i32 = arith.constant 0 : i32
    %c0_i32_0 = arith.constant 0 : i32
    return %arg0, %c0_i32 : i32, i32
  }
  func.func @transform_1(%arg0: i32) -> (i32, i32) {
    %c0_i32 = arith.constant 0 : i32
    %c0_i32_0 = arith.constant 0 : i32
    %c0_i32_1 = arith.constant 0 : i32
    return %c0_i32, %c0_i32_0 : i32, i32
  }
  func.func @transform_2(%arg0: i32) -> (i32, i32) {
    %c0_i32 = arith.constant 0 : i32
    %c0_i32_0 = arith.constant 0 : i32
    %c0_i32_1 = arith.constant 0 : i32
    return %c0_i32, %c0_i32_0 : i32, i32
  }
  func.func @transform_3(%arg0: i32) -> (i32, i32) {
    %c0_i32 = arith.constant 0 : i32
    %c0_i32_0 = arith.constant 0 : i32
    return %arg0, %c0_i32 : i32, i32
  }
}

module attributes {stable_mosaic.version = 11 : i64} {
  func.func @_matmul_bias_kernel(%arg0: i32, %arg1: memref<256x144xf32, #tpu.memory_space<vmem>>, %arg2: memref<144x16xf32, #tpu.memory_space<vmem>>, %arg3: memref<1x16xf32, #tpu.memory_space<vmem>>, %arg4: memref<256x16xf32, #tpu.memory_space<vmem>>) attributes {dimension_semantics = [#tpu.dimension_semantics<parallel>], iteration_bounds = array<i64: 2>, scalar_prefetch = 0 : i64, scratch_operands = 0 : i64, tpu.core_type = #tpu.core_type<tc>, window_params = [{transform_indices = @transform_0, window_bounds = array<i64: 256, 144>}, {pipeline_mode = #tpu.pipeline_mode<synchronous>, transform_indices = @transform_1, window_bounds = array<i64: 144, 16>}, {pipeline_mode = #tpu.pipeline_mode<synchronous>, transform_indices = @transform_2, window_bounds = array<i64: 1, 16>}, {transform_indices = @transform_3, window_bounds = array<i64: 256, 16>}]} {
    %c0 = arith.constant 0 : index
    %c0_0 = arith.constant 0 : index
    %0 = vector.load %arg1[%c0, %c0_0] : memref<256x144xf32, #tpu.memory_space<vmem>>, vector<256x144xf32>
    %c0_1 = arith.constant 0 : index
    %c0_2 = arith.constant 0 : index
    %1 = vector.load %arg2[%c0_1, %c0_2] : memref<144x16xf32, #tpu.memory_space<vmem>>, vector<144x16xf32>
    %cst = arith.constant dense<0.000000e+00> : vector<256x16xf32>
    %2 = tpu.matmul %0, %1, %cst {dimension_numbers = #tpu.dot_dimension_numbers<[1], [0], [0], [1], [0, 0, 1, 1], [], []>} : vector<256x144xf32>, vector<144x16xf32>, vector<256x16xf32> -> vector<256x16xf32>
    %c0_3 = arith.constant 0 : index
    %c0_4 = arith.constant 0 : index
    %3 = vector.load %arg3[%c0_3, %c0_4] : memref<1x16xf32, #tpu.memory_space<vmem>>, vector<1x16xf32>
    %4 = vector.broadcast %3 : vector<1x16xf32> to vector<256x16xf32>
    %5 = arith.addf %2, %4 : vector<256x16xf32>
    %c0_5 = arith.constant 0 : index
    %c0_6 = arith.constant 0 : index
    %6 = vector.load %arg4[%c0_5, %c0_6] : memref<256x16xf32, #tpu.memory_space<vmem>>, vector<256x16xf32>
    tpu.vector_store %arg4[%c0_5, %c0_6], %5 {strides = array<i32>} : memref<256x16xf32, #tpu.memory_space<vmem>>, vector<256x16xf32>,
    return
  }
  func.func @transform_0(%arg0: i32) -> (i32, i32) {
    %c0_i32 = arith.constant 0 : i32
    %c0_i32_0 = arith.constant 0 : i32
    return %arg0, %c0_i32 : i32, i32
  }
  func.func @transform_1(%arg0: i32) -> (i32, i32) {
    %c0_i32 = arith.constant 0 : i32
    %c0_i32_0 = arith.constant 0 : i32
    %c0_i32_1 = arith.constant 0 : i32
    return %c0_i32, %c0_i32_0 : i32, i32
  }
  func.func @transform_2(%arg0: i32) -> (i32, i32) {
    %c0_i32 = arith.constant 0 : i32
    %c0_i32_0 = arith.constant 0 : i32
    %c0_i32_1 = arith.constant 0 : i32
    return %c0_i32, %c0_i32_0 : i32, i32
  }
  func.func @transform_3(%arg0: i32) -> (i32, i32) {
    %c0_i32 = arith.constant 0 : i32
    %c0_i32_0 = arith.constant 0 : i32
    return %arg0, %c0_i32 : i32, i32
  }
}

module attributes {stable_mosaic.version = 11 : i64} {
  func.func @_matmul_bias_kernel(%arg0: i32, %arg1: memref<256x400xf32, #tpu.memory_space<vmem>>, %arg2: memref<400x16xf32, #tpu.memory_space<vmem>>, %arg3: memref<1x16xf32, #tpu.memory_space<vmem>>, %arg4: memref<256x16xf32, #tpu.memory_space<vmem>>) attributes {dimension_semantics = [#tpu.dimension_semantics<parallel>], iteration_bounds = array<i64: 2>, scalar_prefetch = 0 : i64, scratch_operands = 0 : i64, tpu.core_type = #tpu.core_type<tc>, window_params = [{transform_indices = @transform_0, window_bounds = array<i64: 256, 400>}, {pipeline_mode = #tpu.pipeline_mode<synchronous>, transform_indices = @transform_1, window_bounds = array<i64: 400, 16>}, {pipeline_mode = #tpu.pipeline_mode<synchronous>, transform_indices = @transform_2, window_bounds = array<i64: 1, 16>}, {transform_indices = @transform_3, window_bounds = array<i64: 256, 16>}]} {
    %c0 = arith.constant 0 : index
    %c0_0 = arith.constant 0 : index
    %0 = vector.load %arg1[%c0, %c0_0] : memref<256x400xf32, #tpu.memory_space<vmem>>, vector<256x400xf32>
    %c0_1 = arith.constant 0 : index
    %c0_2 = arith.constant 0 : index
    %1 = vector.load %arg2[%c0_1, %c0_2] : memref<400x16xf32, #tpu.memory_space<vmem>>, vector<400x16xf32>
    %cst = arith.constant dense<0.000000e+00> : vector<256x16xf32>
    %2 = tpu.matmul %0, %1, %cst {dimension_numbers = #tpu.dot_dimension_numbers<[1], [0], [0], [1], [0, 0, 1, 1], [], []>} : vector<256x400xf32>, vector<400x16xf32>, vector<256x16xf32> -> vector<256x16xf32>
    %c0_3 = arith.constant 0 : index
    %c0_4 = arith.constant 0 : index
    %3 = vector.load %arg3[%c0_3, %c0_4] : memref<1x16xf32, #tpu.memory_space<vmem>>, vector<1x16xf32>
    %4 = vector.broadcast %3 : vector<1x16xf32> to vector<256x16xf32>
    %5 = arith.addf %2, %4 : vector<256x16xf32>
    %c0_5 = arith.constant 0 : index
    %c0_6 = arith.constant 0 : index
    %6 = vector.load %arg4[%c0_5, %c0_6] : memref<256x16xf32, #tpu.memory_space<vmem>>, vector<256x16xf32>
    tpu.vector_store %arg4[%c0_5, %c0_6], %5 {strides = array<i32>} : memref<256x16xf32, #tpu.memory_space<vmem>>, vector<256x16xf32>,
    return
  }
  func.func @transform_0(%arg0: i32) -> (i32, i32) {
    %c0_i32 = arith.constant 0 : i32
    %c0_i32_0 = arith.constant 0 : i32
    return %arg0, %c0_i32 : i32, i32
  }
  func.func @transform_1(%arg0: i32) -> (i32, i32) {
    %c0_i32 = arith.constant 0 : i32
    %c0_i32_0 = arith.constant 0 : i32
    %c0_i32_1 = arith.constant 0 : i32
    return %c0_i32, %c0_i32_0 : i32, i32
  }
  func.func @transform_2(%arg0: i32) -> (i32, i32) {
    %c0_i32 = arith.constant 0 : i32
    %c0_i32_0 = arith.constant 0 : i32
    %c0_i32_1 = arith.constant 0 : i32
    return %c0_i32, %c0_i32_0 : i32, i32
  }
  func.func @transform_3(%arg0: i32) -> (i32, i32) {
    %c0_i32 = arith.constant 0 : i32
    %c0_i32_0 = arith.constant 0 : i32
    return %arg0, %c0_i32 : i32, i32
  }
}

module attributes {stable_mosaic.version = 11 : i64} {
  func.func @_maxpool_kernel(%arg0: i32, %arg1: memref<1x18x288xf32, #tpu.memory_space<vmem>>, %arg2: memref<1x16x256xf32, #tpu.memory_space<vmem>>) attributes {dimension_semantics = [#tpu.dimension_semantics<parallel>], iteration_bounds = array<i64: 2>, scalar_prefetch = 0 : i64, scratch_operands = 0 : i64, tpu.core_type = #tpu.core_type<tc>, window_params = [{transform_indices = @transform_0, window_bounds = array<i64: 1, 18, 288>}, {transform_indices = @transform_1, window_bounds = array<i64: 1, 16, 256>}]} {
    %c0 = arith.constant 0 : index
    %c0_0 = arith.constant 0 : index
    %c0_1 = arith.constant 0 : index
    %0 = vector.load %arg1[%c0, %c0_0, %c0_1] : memref<1x18x288xf32, #tpu.memory_space<vmem>>, vector<1x16x256xf32>
    %1 = vector.shape_cast %0 : vector<1x16x256xf32> to vector<16x256xf32>
    %c0_2 = arith.constant 0 : index
    %c0_3 = arith.constant 0 : index
    %c16 = arith.constant 16 : index
    %2 = vector.load %arg1[%c0_2, %c0_3, %c16] : memref<1x18x288xf32, #tpu.memory_space<vmem>>, vector<1x16x256xf32>
    %3 = vector.shape_cast %2 : vector<1x16x256xf32> to vector<16x256xf32>
    %4 = arith.maximumf %1, %3 : vector<16x256xf32>
    %c0_4 = arith.constant 0 : index
    %c0_5 = arith.constant 0 : index
    %c32 = arith.constant 32 : index
    %5 = vector.load %arg1[%c0_4, %c0_5, %c32] : memref<1x18x288xf32, #tpu.memory_space<vmem>>, vector<1x16x256xf32>
    %6 = vector.shape_cast %5 : vector<1x16x256xf32> to vector<16x256xf32>
    %7 = arith.maximumf %4, %6 : vector<16x256xf32>
    %c0_6 = arith.constant 0 : index
    %c1 = arith.constant 1 : index
    %c0_7 = arith.constant 0 : index
    %8 = vector.load %arg1[%c0_6, %c1, %c0_7] : memref<1x18x288xf32, #tpu.memory_space<vmem>>, vector<1x16x256xf32>
    %9 = vector.shape_cast %8 : vector<1x16x256xf32> to vector<16x256xf32>
    %10 = arith.maximumf %7, %9 : vector<16x256xf32>
    %c0_8 = arith.constant 0 : index
    %c1_9 = arith.constant 1 : index
    %c16_10 = arith.constant 16 : index
    %11 = vector.load %arg1[%c0_8, %c1_9, %c16_10] : memref<1x18x288xf32, #tpu.memory_space<vmem>>, vector<1x16x256xf32>
    %12 = vector.shape_cast %11 : vector<1x16x256xf32> to vector<16x256xf32>
    %13 = arith.maximumf %10, %12 : vector<16x256xf32>
    %c0_11 = arith.constant 0 : index
    %c1_12 = arith.constant 1 : index
    %c32_13 = arith.constant 32 : index
    %14 = vector.load %arg1[%c0_11, %c1_12, %c32_13] : memref<1x18x288xf32, #tpu.memory_space<vmem>>, vector<1x16x256xf32>
    %15 = vector.shape_cast %14 : vector<1x16x256xf32> to vector<16x256xf32>
    %16 = arith.maximumf %13, %15 : vector<16x256xf32>
    %c0_14 = arith.constant 0 : index
    %c2 = arith.constant 2 : index
    %c0_15 = arith.constant 0 : index
    %17 = vector.load %arg1[%c0_14, %c2, %c0_15] : memref<1x18x288xf32, #tpu.memory_space<vmem>>, vector<1x16x256xf32>
    %18 = vector.shape_cast %17 : vector<1x16x256xf32> to vector<16x256xf32>
    %19 = arith.maximumf %16, %18 : vector<16x256xf32>
    %c0_16 = arith.constant 0 : index
    %c2_17 = arith.constant 2 : index
    %c16_18 = arith.constant 16 : index
    %20 = vector.load %arg1[%c0_16, %c2_17, %c16_18] : memref<1x18x288xf32, #tpu.memory_space<vmem>>, vector<1x16x256xf32>
    %21 = vector.shape_cast %20 : vector<1x16x256xf32> to vector<16x256xf32>
    %22 = arith.maximumf %19, %21 : vector<16x256xf32>
    %c0_19 = arith.constant 0 : index
    %c2_20 = arith.constant 2 : index
    %c32_21 = arith.constant 32 : index
    %23 = vector.load %arg1[%c0_19, %c2_20, %c32_21] : memref<1x18x288xf32, #tpu.memory_space<vmem>>, vector<1x16x256xf32>
    %24 = vector.shape_cast %23 : vector<1x16x256xf32> to vector<16x256xf32>
    %25 = arith.maximumf %22, %24 : vector<16x256xf32>
    %c0_22 = arith.constant 0 : index
    %c0_23 = arith.constant 0 : index
    %c0_24 = arith.constant 0 : index
    %26 = vector.load %arg2[%c0_22, %c0_23, %c0_24] : memref<1x16x256xf32, #tpu.memory_space<vmem>>, vector<1x16x256xf32>
    %27 = vector.shape_cast %26 : vector<1x16x256xf32> to vector<16x256xf32>
    %28 = vector.shape_cast %25 : vector<16x256xf32> to vector<1x16x256xf32>
    tpu.vector_store %arg2[%c0_22, %c0_23, %c0_24], %28 {strides = array<i32>} : memref<1x16x256xf32, #tpu.memory_space<vmem>>, vector<1x16x256xf32>,
    return
  }
  func.func @transform_0(%arg0: i32) -> (i32, i32, i32) {
    %c0_i32 = arith.constant 0 : i32
    %c0_i32_0 = arith.constant 0 : i32
    %c0_i32_1 = arith.constant 0 : i32
    return %arg0, %c0_i32, %c0_i32_0 : i32, i32, i32
  }
  func.func @transform_1(%arg0: i32) -> (i32, i32, i32) {
    %c0_i32 = arith.constant 0 : i32
    %c0_i32_0 = arith.constant 0 : i32
    %c0_i32_1 = arith.constant 0 : i32
    return %arg0, %c0_i32, %c0_i32_0 : i32, i32, i32
  }
}

module attributes {stable_mosaic.version = 11 : i64} {
  func.func @_bn_stats_kernel(%arg0: i32, %arg1: memref<32x128xf32, #tpu.memory_space<vmem>>, %arg2: memref<32x128xf32, #tpu.memory_space<vmem>>, %arg3: memref<32x128xf32, #tpu.memory_space<vmem>>, %arg4: memref<32x128xf32, #tpu.memory_space<vmem>>, %arg5: memref<2x512xf32, #tpu.memory_space<vmem>>) attributes {dimension_semantics = [#tpu.dimension_semantics<arbitrary>], iteration_bounds = array<i64: 2>, scalar_prefetch = 0 : i64, scratch_operands = 0 : i64, tpu.core_type = #tpu.core_type<tc>, window_params = [{transform_indices = @transform_0, window_bounds = array<i64: 32, 128>}, {transform_indices = @transform_1, window_bounds = array<i64: 32, 128>}, {transform_indices = @transform_2, window_bounds = array<i64: 32, 128>}, {transform_indices = @transform_3, window_bounds = array<i64: 32, 128>}, {pipeline_mode = #tpu.pipeline_mode<synchronous>, transform_indices = @transform_4, window_bounds = array<i64: 2, 512>}]} {
    %c0_i32 = arith.constant 0 : i32
    %0 = arith.cmpi eq, %arg0, %c0_i32 : i32
    %1 = arith.extui %0 : i1 to i32
    %c0_i32_0 = arith.constant 0 : i32
    %2 = arith.cmpi ne, %1, %c0_i32_0 : i32
    scf.if %2 {
      %cst_43 = arith.constant 0.000000e+00 : f32
      %51 = vector.broadcast %cst_43 : f32 to vector<2x512xf32>
      %c0_44 = arith.constant 0 : index
      %c0_45 = arith.constant 0 : index
      %52 = vector.load %arg5[%c0_44, %c0_45] : memref<2x512xf32, #tpu.memory_space<vmem>>, vector<2x512xf32>
      tpu.vector_store %arg5[%c0_44, %c0_45], %51 {strides = array<i32>} : memref<2x512xf32, #tpu.memory_space<vmem>>, vector<2x512xf32>,
    } else {
    }
    %c0 = arith.constant 0 : index
    %c0_1 = arith.constant 0 : index
    %3 = vector.load %arg1[%c0, %c0_1] : memref<32x128xf32, #tpu.memory_space<vmem>>, vector<32x128xf32>
    %c0_2 = arith.constant 0 : index
    %c0_3 = arith.constant 0 : index
    %4 = vector.load %arg5[%c0_2, %c0_3] : memref<2x512xf32, #tpu.memory_space<vmem>>, vector<1x128xf32>
    %cst = arith.constant dense<0.000000e+00> : vector<128xf32>
    %5 = vector.multi_reduction <add>, %3, %cst [0] : vector<32x128xf32> to vector<128xf32>
    %6 = vector.shape_cast %5 : vector<128xf32> to vector<1x128xf32>
    %7 = arith.addf %4, %6 : vector<1x128xf32>
    %c0_4 = arith.constant 0 : index
    %c0_5 = arith.constant 0 : index
    %8 = vector.load %arg5[%c0_4, %c0_5] : memref<2x512xf32, #tpu.memory_space<vmem>>, vector<1x128xf32>
    tpu.vector_store %arg5[%c0_4, %c0_5], %7 {strides = array<i32>} : memref<2x512xf32, #tpu.memory_space<vmem>>, vector<1x128xf32>,
    %c1 = arith.constant 1 : index
    %c0_6 = arith.constant 0 : index
    %9 = vector.load %arg5[%c1, %c0_6] : memref<2x512xf32, #tpu.memory_space<vmem>>, vector<1x128xf32>
    %10 = arith.mulf %3, %3 : vector<32x128xf32>
    %cst_7 = arith.constant dense<0.000000e+00> : vector<128xf32>
    %11 = vector.multi_reduction <add>, %10, %cst_7 [0] : vector<32x128xf32> to vector<128xf32>
    %12 = vector.shape_cast %11 : vector<128xf32> to vector<1x128xf32>
    %13 = arith.addf %9, %12 : vector<1x128xf32>
    %c1_8 = arith.constant 1 : index
    %c0_9 = arith.constant 0 : index
    %14 = vector.load %arg5[%c1_8, %c0_9] : memref<2x512xf32, #tpu.memory_space<vmem>>, vector<1x128xf32>
    tpu.vector_store %arg5[%c1_8, %c0_9], %13 {strides = array<i32>} : memref<2x512xf32, #tpu.memory_space<vmem>>, vector<1x128xf32>,
    %c0_10 = arith.constant 0 : index
    %c0_11 = arith.constant 0 : index
    %15 = vector.load %arg2[%c0_10, %c0_11] : memref<32x128xf32, #tpu.memory_space<vmem>>, vector<32x128xf32>
    %c0_12 = arith.constant 0 : index
    %c128 = arith.constant 128 : index
    %16 = vector.load %arg5[%c0_12, %c128] : memref<2x512xf32, #tpu.memory_space<vmem>>, vector<1x128xf32>
    %cst_13 = arith.constant dense<0.000000e+00> : vector<128xf32>
    %17 = vector.multi_reduction <add>, %15, %cst_13 [0] : vector<32x128xf32> to vector<128xf32>
    %18 = vector.shape_cast %17 : vector<128xf32> to vector<1x128xf32>
    %19 = arith.addf %16, %18 : vector<1x128xf32>
    %c0_14 = arith.constant 0 : index
    %c128_15 = arith.constant 128 : index
    %20 = vector.load %arg5[%c0_14, %c128_15] : memref<2x512xf32, #tpu.memory_space<vmem>>, vector<1x128xf32>
    tpu.vector_store %arg5[%c0_14, %c128_15], %19 {strides = array<i32>} : memref<2x512xf32, #tpu.memory_space<vmem>>, vector<1x128xf32>,
    %c1_16 = arith.constant 1 : index
    %c128_17 = arith.constant 128 : index
    %21 = vector.load %arg5[%c1_16, %c128_17] : memref<2x512xf32, #tpu.memory_space<vmem>>, vector<1x128xf32>
    %22 = arith.mulf %15, %15 : vector<32x128xf32>
    %cst_18 = arith.constant dense<0.000000e+00> : vector<128xf32>
    %23 = vector.multi_reduction <add>, %22, %cst_18 [0] : vector<32x128xf32> to vector<128xf32>
    %24 = vector.shape_cast %23 : vector<128xf32> to vector<1x128xf32>
    %25 = arith.addf %21, %24 : vector<1x128xf32>
    %c1_19 = arith.constant 1 : index
    %c128_20 = arith.constant 128 : index
    %26 = vector.load %arg5[%c1_19, %c128_20] : memref<2x512xf32, #tpu.memory_space<vmem>>, vector<1x128xf32>
    tpu.vector_store %arg5[%c1_19, %c128_20], %25 {strides = array<i32>} : memref<2x512xf32, #tpu.memory_space<vmem>>, vector<1x128xf32>,
    %c0_21 = arith.constant 0 : index
    %c0_22 = arith.constant 0 : index
    %27 = vector.load %arg3[%c0_21, %c0_22] : memref<32x128xf32, #tpu.memory_space<vmem>>, vector<32x128xf32>
    %c0_23 = arith.constant 0 : index
    %c256 = arith.constant 256 : index
    %28 = vector.load %arg5[%c0_23, %c256] : memref<2x512xf32, #tpu.memory_space<vmem>>, vector<1x128xf32>
    %cst_24 = arith.constant dense<0.000000e+00> : vector<128xf32>
    %29 = vector.multi_reduction <add>, %27, %cst_24 [0] : vector<32x128xf32> to vector<128xf32>
    %30 = vector.shape_cast %29 : vector<128xf32> to vector<1x128xf32>
    %31 = arith.addf %28, %30 : vector<1x128xf32>
    %c0_25 = arith.constant 0 : index
    %c256_26 = arith.constant 256 : index
    %32 = vector.load %arg5[%c0_25, %c256_26] : memref<2x512xf32, #tpu.memory_space<vmem>>, vector<1x128xf32>
    tpu.vector_store %arg5[%c0_25, %c256_26], %31 {strides = array<i32>} : memref<2x512xf32, #tpu.memory_space<vmem>>, vector<1x128xf32>,
    %c1_27 = arith.constant 1 : index
    %c256_28 = arith.constant 256 : index
    %33 = vector.load %arg5[%c1_27, %c256_28] : memref<2x512xf32, #tpu.memory_space<vmem>>, vector<1x128xf32>
    %34 = arith.mulf %27, %27 : vector<32x128xf32>
    %cst_29 = arith.constant dense<0.000000e+00> : vector<128xf32>
    %35 = vector.multi_reduction <add>, %34, %cst_29 [0] : vector<32x128xf32> to vector<128xf32>
    %36 = vector.shape_cast %35 : vector<128xf32> to vector<1x128xf32>
    %37 = arith.addf %33, %36 : vector<1x128xf32>
    %c1_30 = arith.constant 1 : index
    %c256_31 = arith.constant 256 : index
    %38 = vector.load %arg5[%c1_30, %c256_31] : memref<2x512xf32, #tpu.memory_space<vmem>>, vector<1x128xf32>
    tpu.vector_store %arg5[%c1_30, %c256_31], %37 {strides = array<i32>} : memref<2x512xf32, #tpu.memory_space<vmem>>, vector<1x128xf32>,
    %c0_32 = arith.constant 0 : index
    %c0_33 = arith.constant 0 : index
    %39 = vector.load %arg4[%c0_32, %c0_33] : memref<32x128xf32, #tpu.memory_space<vmem>>, vector<32x128xf32>
    %c0_34 = arith.constant 0 : index
    %c384 = arith.constant 384 : index
    %40 = vector.load %arg5[%c0_34, %c384] : memref<2x512xf32, #tpu.memory_space<vmem>>, vector<1x128xf32>
    %cst_35 = arith.constant dense<0.000000e+00> : vector<128xf32>
    %41 = vector.multi_reduction <add>, %39, %cst_35 [0] : vector<32x128xf32> to vector<128xf32>
    %42 = vector.shape_cast %41 : vector<128xf32> to vector<1x128xf32>
    %43 = arith.addf %40, %42 : vector<1x128xf32>
    %c0_36 = arith.constant 0 : index
    %c384_37 = arith.constant 384 : index
    %44 = vector.load %arg5[%c0_36, %c384_37] : memref<2x512xf32, #tpu.memory_space<vmem>>, vector<1x128xf32>
    tpu.vector_store %arg5[%c0_36, %c384_37], %43 {strides = array<i32>} : memref<2x512xf32, #tpu.memory_space<vmem>>, vector<1x128xf32>,
    %c1_38 = arith.constant 1 : index
    %c384_39 = arith.constant 384 : index
    %45 = vector.load %arg5[%c1_38, %c384_39] : memref<2x512xf32, #tpu.memory_space<vmem>>, vector<1x128xf32>
    %46 = arith.mulf %39, %39 : vector<32x128xf32>
    %cst_40 = arith.constant dense<0.000000e+00> : vector<128xf32>
    %47 = vector.multi_reduction <add>, %46, %cst_40 [0] : vector<32x128xf32> to vector<128xf32>
    %48 = vector.shape_cast %47 : vector<128xf32> to vector<1x128xf32>
    %49 = arith.addf %45, %48 : vector<1x128xf32>
    %c1_41 = arith.constant 1 : index
    %c384_42 = arith.constant 384 : index
    %50 = vector.load %arg5[%c1_41, %c384_42] : memref<2x512xf32, #tpu.memory_space<vmem>>, vector<1x128xf32>
    tpu.vector_store %arg5[%c1_41, %c384_42], %49 {strides = array<i32>} : memref<2x512xf32, #tpu.memory_space<vmem>>, vector<1x128xf32>,
    return
  }
  func.func @transform_0(%arg0: i32) -> (i32, i32) {
    %c0_i32 = arith.constant 0 : i32
    %c0_i32_0 = arith.constant 0 : i32
    return %arg0, %c0_i32 : i32, i32
  }
  func.func @transform_1(%arg0: i32) -> (i32, i32) {
    %c0_i32 = arith.constant 0 : i32
    %c0_i32_0 = arith.constant 0 : i32
    return %arg0, %c0_i32 : i32, i32
  }
  func.func @transform_2(%arg0: i32) -> (i32, i32) {
    %c0_i32 = arith.constant 0 : i32
    %c0_i32_0 = arith.constant 0 : i32
    return %arg0, %c0_i32 : i32, i32
  }
  func.func @transform_3(%arg0: i32) -> (i32, i32) {
    %c0_i32 = arith.constant 0 : i32
    %c0_i32_0 = arith.constant 0 : i32
    return %arg0, %c0_i32 : i32, i32
  }
  func.func @transform_4(%arg0: i32) -> (i32, i32) {
    %c0_i32 = arith.constant 0 : i32
    %c0_i32_0 = arith.constant 0 : i32
    %c0_i32_1 = arith.constant 0 : i32
    return %c0_i32, %c0_i32_0 : i32, i32
  }
}

module attributes {stable_mosaic.version = 11 : i64} {
  func.func @_bn_act_kernel(%arg0: i32, %arg1: memref<256x16xf32, #tpu.memory_space<vmem>>, %arg2: memref<256x16xf32, #tpu.memory_space<vmem>>, %arg3: memref<256x16xf32, #tpu.memory_space<vmem>>, %arg4: memref<256x16xf32, #tpu.memory_space<vmem>>, %arg5: memref<2x64xf32, #tpu.memory_space<vmem>>, %arg6: memref<256x64xf32, #tpu.memory_space<vmem>>) attributes {dimension_semantics = [#tpu.dimension_semantics<parallel>], iteration_bounds = array<i64: 2>, scalar_prefetch = 0 : i64, scratch_operands = 0 : i64, tpu.core_type = #tpu.core_type<tc>, window_params = [{transform_indices = @transform_0, window_bounds = array<i64: 256, 16>}, {transform_indices = @transform_1, window_bounds = array<i64: 256, 16>}, {transform_indices = @transform_2, window_bounds = array<i64: 256, 16>}, {transform_indices = @transform_3, window_bounds = array<i64: 256, 16>}, {pipeline_mode = #tpu.pipeline_mode<synchronous>, transform_indices = @transform_4, window_bounds = array<i64: 2, 64>}, {transform_indices = @transform_5, window_bounds = array<i64: 256, 64>}]} {
    %c0 = arith.constant 0 : index
    %c0_0 = arith.constant 0 : index
    %0 = vector.load %arg1[%c0, %c0_0] : memref<256x16xf32, #tpu.memory_space<vmem>>, vector<256x16xf32>
    %c0_1 = arith.constant 0 : index
    %c0_2 = arith.constant 0 : index
    %1 = vector.load %arg5[%c0_1, %c0_2] : memref<2x64xf32, #tpu.memory_space<vmem>>, vector<1x16xf32>
    %2 = vector.broadcast %1 : vector<1x16xf32> to vector<256x16xf32>
    %3 = arith.mulf %0, %2 : vector<256x16xf32>
    %c1 = arith.constant 1 : index
    %c0_3 = arith.constant 0 : index
    %4 = vector.load %arg5[%c1, %c0_3] : memref<2x64xf32, #tpu.memory_space<vmem>>, vector<1x16xf32>
    %5 = vector.broadcast %4 : vector<1x16xf32> to vector<256x16xf32>
    %6 = arith.addf %3, %5 : vector<256x16xf32>
    %cst = arith.constant 0.000000e+00 : f32
    %7 = vector.broadcast %cst : f32 to vector<256x16xf32>
    %8 = arith.cmpf ogt, %6, %7 : vector<256x16xf32>
    %cst_4 = arith.constant 0.00999999977 : f32
    %9 = vector.broadcast %cst_4 : f32 to vector<256x16xf32>
    %10 = arith.mulf %9, %6 : vector<256x16xf32>
    %11 = arith.select %8, %6, %10 : vector<256x16xi1>, vector<256x16xf32>
    %c0_5 = arith.constant 0 : index
    %c0_6 = arith.constant 0 : index
    %12 = vector.load %arg6[%c0_5, %c0_6] : memref<256x64xf32, #tpu.memory_space<vmem>>, vector<256x16xf32>
    tpu.vector_store %arg6[%c0_5, %c0_6], %11 {strides = array<i32>} : memref<256x64xf32, #tpu.memory_space<vmem>>, vector<256x16xf32>,
    %c0_7 = arith.constant 0 : index
    %c0_8 = arith.constant 0 : index
    %13 = vector.load %arg2[%c0_7, %c0_8] : memref<256x16xf32, #tpu.memory_space<vmem>>, vector<256x16xf32>
    %c0_9 = arith.constant 0 : index
    %c16 = arith.constant 16 : index
    %14 = vector.load %arg5[%c0_9, %c16] : memref<2x64xf32, #tpu.memory_space<vmem>>, vector<1x16xf32>
    %15 = vector.broadcast %14 : vector<1x16xf32> to vector<256x16xf32>
    %16 = arith.mulf %13, %15 : vector<256x16xf32>
    %c1_10 = arith.constant 1 : index
    %c16_11 = arith.constant 16 : index
    %17 = vector.load %arg5[%c1_10, %c16_11] : memref<2x64xf32, #tpu.memory_space<vmem>>, vector<1x16xf32>
    %18 = vector.broadcast %17 : vector<1x16xf32> to vector<256x16xf32>
    %19 = arith.addf %16, %18 : vector<256x16xf32>
    %cst_12 = arith.constant 0.000000e+00 : f32
    %20 = vector.broadcast %cst_12 : f32 to vector<256x16xf32>
    %21 = arith.cmpf ogt, %19, %20 : vector<256x16xf32>
    %cst_13 = arith.constant 0.00999999977 : f32
    %22 = vector.broadcast %cst_13 : f32 to vector<256x16xf32>
    %23 = arith.mulf %22, %19 : vector<256x16xf32>
    %24 = arith.select %21, %19, %23 : vector<256x16xi1>, vector<256x16xf32>
    %c0_14 = arith.constant 0 : index
    %c16_15 = arith.constant 16 : index
    %25 = vector.load %arg6[%c0_14, %c16_15] : memref<256x64xf32, #tpu.memory_space<vmem>>, vector<256x16xf32>
    tpu.vector_store %arg6[%c0_14, %c16_15], %24 {strides = array<i32>} : memref<256x64xf32, #tpu.memory_space<vmem>>, vector<256x16xf32>,
    %c0_16 = arith.constant 0 : index
    %c0_17 = arith.constant 0 : index
    %26 = vector.load %arg3[%c0_16, %c0_17] : memref<256x16xf32, #tpu.memory_space<vmem>>, vector<256x16xf32>
    %c0_18 = arith.constant 0 : index
    %c32 = arith.constant 32 : index
    %27 = vector.load %arg5[%c0_18, %c32] : memref<2x64xf32, #tpu.memory_space<vmem>>, vector<1x16xf32>
    %28 = vector.broadcast %27 : vector<1x16xf32> to vector<256x16xf32>
    %29 = arith.mulf %26, %28 : vector<256x16xf32>
    %c1_19 = arith.constant 1 : index
    %c32_20 = arith.constant 32 : index
    %30 = vector.load %arg5[%c1_19, %c32_20] : memref<2x64xf32, #tpu.memory_space<vmem>>, vector<1x16xf32>
    %31 = vector.broadcast %30 : vector<1x16xf32> to vector<256x16xf32>
    %32 = arith.addf %29, %31 : vector<256x16xf32>
    %cst_21 = arith.constant 0.000000e+00 : f32
    %33 = vector.broadcast %cst_21 : f32 to vector<256x16xf32>
    %34 = arith.cmpf ogt, %32, %33 : vector<256x16xf32>
    %cst_22 = arith.constant 0.00999999977 : f32
    %35 = vector.broadcast %cst_22 : f32 to vector<256x16xf32>
    %36 = arith.mulf %35, %32 : vector<256x16xf32>
    %37 = arith.select %34, %32, %36 : vector<256x16xi1>, vector<256x16xf32>
    %c0_23 = arith.constant 0 : index
    %c32_24 = arith.constant 32 : index
    %38 = vector.load %arg6[%c0_23, %c32_24] : memref<256x64xf32, #tpu.memory_space<vmem>>, vector<256x16xf32>
    tpu.vector_store %arg6[%c0_23, %c32_24], %37 {strides = array<i32>} : memref<256x64xf32, #tpu.memory_space<vmem>>, vector<256x16xf32>,
    %c0_25 = arith.constant 0 : index
    %c0_26 = arith.constant 0 : index
    %39 = vector.load %arg4[%c0_25, %c0_26] : memref<256x16xf32, #tpu.memory_space<vmem>>, vector<256x16xf32>
    %c0_27 = arith.constant 0 : index
    %c48 = arith.constant 48 : index
    %40 = vector.load %arg5[%c0_27, %c48] : memref<2x64xf32, #tpu.memory_space<vmem>>, vector<1x16xf32>
    %41 = vector.broadcast %40 : vector<1x16xf32> to vector<256x16xf32>
    %42 = arith.mulf %39, %41 : vector<256x16xf32>
    %c1_28 = arith.constant 1 : index
    %c48_29 = arith.constant 48 : index
    %43 = vector.load %arg5[%c1_28, %c48_29] : memref<2x64xf32, #tpu.memory_space<vmem>>, vector<1x16xf32>
    %44 = vector.broadcast %43 : vector<1x16xf32> to vector<256x16xf32>
    %45 = arith.addf %42, %44 : vector<256x16xf32>
    %cst_30 = arith.constant 0.000000e+00 : f32
    %46 = vector.broadcast %cst_30 : f32 to vector<256x16xf32>
    %47 = arith.cmpf ogt, %45, %46 : vector<256x16xf32>
    %cst_31 = arith.constant 0.00999999977 : f32
    %48 = vector.broadcast %cst_31 : f32 to vector<256x16xf32>
    %49 = arith.mulf %48, %45 : vector<256x16xf32>
    %50 = arith.select %47, %45, %49 : vector<256x16xi1>, vector<256x16xf32>
    %c0_32 = arith.constant 0 : index
    %c48_33 = arith.constant 48 : index
    %51 = vector.load %arg6[%c0_32, %c48_33] : memref<256x64xf32, #tpu.memory_space<vmem>>, vector<256x16xf32>
    tpu.vector_store %arg6[%c0_32, %c48_33], %50 {strides = array<i32>} : memref<256x64xf32, #tpu.memory_space<vmem>>, vector<256x16xf32>,
    return
  }
  func.func @transform_0(%arg0: i32) -> (i32, i32) {
    %c0_i32 = arith.constant 0 : i32
    %c0_i32_0 = arith.constant 0 : i32
    return %arg0, %c0_i32 : i32, i32
  }
  func.func @transform_1(%arg0: i32) -> (i32, i32) {
    %c0_i32 = arith.constant 0 : i32
    %c0_i32_0 = arith.constant 0 : i32
    return %arg0, %c0_i32 : i32, i32
  }
  func.func @transform_2(%arg0: i32) -> (i32, i32) {
    %c0_i32 = arith.constant 0 : i32
    %c0_i32_0 = arith.constant 0 : i32
    return %arg0, %c0_i32 : i32, i32
  }
  func.func @transform_3(%arg0: i32) -> (i32, i32) {
    %c0_i32 = arith.constant 0 : i32
    %c0_i32_0 = arith.constant 0 : i32
    return %arg0, %c0_i32 : i32, i32
  }
  func.func @transform_4(%arg0: i32) -> (i32, i32) {
    %c0_i32 = arith.constant 0 : i32
    %c0_i32_0 = arith.constant 0 : i32
    %c0_i32_1 = arith.constant 0 : i32
    return %c0_i32, %c0_i32_0 : i32, i32
  }
  func.func @transform_5(%arg0: i32) -> (i32, i32) {
    %c0_i32 = arith.constant 0 : i32
    %c0_i32_0 = arith.constant 0 : i32
    return %arg0, %c0_i32 : i32, i32
  }
}

module attributes {stable_mosaic.version = 11 : i64} {
  func.func @_matmul_bias_kernel(%arg0: i32, %arg1: memref<256x64xf32, #tpu.memory_space<vmem>>, %arg2: memref<64x48xf32, #tpu.memory_space<vmem>>, %arg3: memref<1x48xf32, #tpu.memory_space<vmem>>, %arg4: memref<256x48xf32, #tpu.memory_space<vmem>>) attributes {dimension_semantics = [#tpu.dimension_semantics<parallel>], iteration_bounds = array<i64: 2>, scalar_prefetch = 0 : i64, scratch_operands = 0 : i64, tpu.core_type = #tpu.core_type<tc>, window_params = [{transform_indices = @transform_0, window_bounds = array<i64: 256, 64>}, {pipeline_mode = #tpu.pipeline_mode<synchronous>, transform_indices = @transform_1, window_bounds = array<i64: 64, 48>}, {pipeline_mode = #tpu.pipeline_mode<synchronous>, transform_indices = @transform_2, window_bounds = array<i64: 1, 48>}, {transform_indices = @transform_3, window_bounds = array<i64: 256, 48>}]} {
    %c0 = arith.constant 0 : index
    %c0_0 = arith.constant 0 : index
    %0 = vector.load %arg1[%c0, %c0_0] : memref<256x64xf32, #tpu.memory_space<vmem>>, vector<256x64xf32>
    %c0_1 = arith.constant 0 : index
    %c0_2 = arith.constant 0 : index
    %1 = vector.load %arg2[%c0_1, %c0_2] : memref<64x48xf32, #tpu.memory_space<vmem>>, vector<64x48xf32>
    %cst = arith.constant dense<0.000000e+00> : vector<256x48xf32>
    %2 = tpu.matmul %0, %1, %cst {dimension_numbers = #tpu.dot_dimension_numbers<[1], [0], [0], [1], [0, 0, 1, 1], [], []>} : vector<256x64xf32>, vector<64x48xf32>, vector<256x48xf32> -> vector<256x48xf32>
    %c0_3 = arith.constant 0 : index
    %c0_4 = arith.constant 0 : index
    %3 = vector.load %arg3[%c0_3, %c0_4] : memref<1x48xf32, #tpu.memory_space<vmem>>, vector<1x48xf32>
    %4 = vector.broadcast %3 : vector<1x48xf32> to vector<256x48xf32>
    %5 = arith.addf %2, %4 : vector<256x48xf32>
    %c0_5 = arith.constant 0 : index
    %c0_6 = arith.constant 0 : index
    %6 = vector.load %arg4[%c0_5, %c0_6] : memref<256x48xf32, #tpu.memory_space<vmem>>, vector<256x48xf32>
    tpu.vector_store %arg4[%c0_5, %c0_6], %5 {strides = array<i32>} : memref<256x48xf32, #tpu.memory_space<vmem>>, vector<256x48xf32>,
    return
  }
  func.func @transform_0(%arg0: i32) -> (i32, i32) {
    %c0_i32 = arith.constant 0 : i32
    %c0_i32_0 = arith.constant 0 : i32
    return %arg0, %c0_i32 : i32, i32
  }
  func.func @transform_1(%arg0: i32) -> (i32, i32) {
    %c0_i32 = arith.constant 0 : i32
    %c0_i32_0 = arith.constant 0 : i32
    %c0_i32_1 = arith.constant 0 : i32
    return %c0_i32, %c0_i32_0 : i32, i32
  }
  func.func @transform_2(%arg0: i32) -> (i32, i32) {
    %c0_i32 = arith.constant 0 : i32
    %c0_i32_0 = arith.constant 0 : i32
    %c0_i32_1 = arith.constant 0 : i32
    return %c0_i32, %c0_i32_0 : i32, i32
  }
  func.func @transform_3(%arg0: i32) -> (i32, i32) {
    %c0_i32 = arith.constant 0 : i32
    %c0_i32_0 = arith.constant 0 : i32
    return %arg0, %c0_i32 : i32, i32
  }
}

module attributes {stable_mosaic.version = 11 : i64} {
  func.func @_maxpool_kernel(%arg0: i32, %arg1: memref<1x18x1152xf32, #tpu.memory_space<vmem>>, %arg2: memref<1x16x1024xf32, #tpu.memory_space<vmem>>) attributes {dimension_semantics = [#tpu.dimension_semantics<parallel>], iteration_bounds = array<i64: 2>, scalar_prefetch = 0 : i64, scratch_operands = 0 : i64, tpu.core_type = #tpu.core_type<tc>, window_params = [{transform_indices = @transform_0, window_bounds = array<i64: 1, 18, 1152>}, {transform_indices = @transform_1, window_bounds = array<i64: 1, 16, 1024>}]} {
    %c0 = arith.constant 0 : index
    %c0_0 = arith.constant 0 : index
    %c0_1 = arith.constant 0 : index
    %0 = vector.load %arg1[%c0, %c0_0, %c0_1] : memref<1x18x1152xf32, #tpu.memory_space<vmem>>, vector<1x16x1024xf32>
    %1 = vector.shape_cast %0 : vector<1x16x1024xf32> to vector<16x1024xf32>
    %c0_2 = arith.constant 0 : index
    %c0_3 = arith.constant 0 : index
    %c64 = arith.constant 64 : index
    %2 = vector.load %arg1[%c0_2, %c0_3, %c64] : memref<1x18x1152xf32, #tpu.memory_space<vmem>>, vector<1x16x1024xf32>
    %3 = vector.shape_cast %2 : vector<1x16x1024xf32> to vector<16x1024xf32>
    %4 = arith.maximumf %1, %3 : vector<16x1024xf32>
    %c0_4 = arith.constant 0 : index
    %c0_5 = arith.constant 0 : index
    %c128 = arith.constant 128 : index
    %5 = vector.load %arg1[%c0_4, %c0_5, %c128] : memref<1x18x1152xf32, #tpu.memory_space<vmem>>, vector<1x16x1024xf32>
    %6 = vector.shape_cast %5 : vector<1x16x1024xf32> to vector<16x1024xf32>
    %7 = arith.maximumf %4, %6 : vector<16x1024xf32>
    %c0_6 = arith.constant 0 : index
    %c1 = arith.constant 1 : index
    %c0_7 = arith.constant 0 : index
    %8 = vector.load %arg1[%c0_6, %c1, %c0_7] : memref<1x18x1152xf32, #tpu.memory_space<vmem>>, vector<1x16x1024xf32>
    %9 = vector.shape_cast %8 : vector<1x16x1024xf32> to vector<16x1024xf32>
    %10 = arith.maximumf %7, %9 : vector<16x1024xf32>
    %c0_8 = arith.constant 0 : index
    %c1_9 = arith.constant 1 : index
    %c64_10 = arith.constant 64 : index
    %11 = vector.load %arg1[%c0_8, %c1_9, %c64_10] : memref<1x18x1152xf32, #tpu.memory_space<vmem>>, vector<1x16x1024xf32>
    %12 = vector.shape_cast %11 : vector<1x16x1024xf32> to vector<16x1024xf32>
    %13 = arith.maximumf %10, %12 : vector<16x1024xf32>
    %c0_11 = arith.constant 0 : index
    %c1_12 = arith.constant 1 : index
    %c128_13 = arith.constant 128 : index
    %14 = vector.load %arg1[%c0_11, %c1_12, %c128_13] : memref<1x18x1152xf32, #tpu.memory_space<vmem>>, vector<1x16x1024xf32>
    %15 = vector.shape_cast %14 : vector<1x16x1024xf32> to vector<16x1024xf32>
    %16 = arith.maximumf %13, %15 : vector<16x1024xf32>
    %c0_14 = arith.constant 0 : index
    %c2 = arith.constant 2 : index
    %c0_15 = arith.constant 0 : index
    %17 = vector.load %arg1[%c0_14, %c2, %c0_15] : memref<1x18x1152xf32, #tpu.memory_space<vmem>>, vector<1x16x1024xf32>
    %18 = vector.shape_cast %17 : vector<1x16x1024xf32> to vector<16x1024xf32>
    %19 = arith.maximumf %16, %18 : vector<16x1024xf32>
    %c0_16 = arith.constant 0 : index
    %c2_17 = arith.constant 2 : index
    %c64_18 = arith.constant 64 : index
    %20 = vector.load %arg1[%c0_16, %c2_17, %c64_18] : memref<1x18x1152xf32, #tpu.memory_space<vmem>>, vector<1x16x1024xf32>
    %21 = vector.shape_cast %20 : vector<1x16x1024xf32> to vector<16x1024xf32>
    %22 = arith.maximumf %19, %21 : vector<16x1024xf32>
    %c0_19 = arith.constant 0 : index
    %c2_20 = arith.constant 2 : index
    %c128_21 = arith.constant 128 : index
    %23 = vector.load %arg1[%c0_19, %c2_20, %c128_21] : memref<1x18x1152xf32, #tpu.memory_space<vmem>>, vector<1x16x1024xf32>
    %24 = vector.shape_cast %23 : vector<1x16x1024xf32> to vector<16x1024xf32>
    %25 = arith.maximumf %22, %24 : vector<16x1024xf32>
    %c0_22 = arith.constant 0 : index
    %c0_23 = arith.constant 0 : index
    %c0_24 = arith.constant 0 : index
    %26 = vector.load %arg2[%c0_22, %c0_23, %c0_24] : memref<1x16x1024xf32, #tpu.memory_space<vmem>>, vector<1x16x1024xf32>
    %27 = vector.shape_cast %26 : vector<1x16x1024xf32> to vector<16x1024xf32>
    %28 = vector.shape_cast %25 : vector<16x1024xf32> to vector<1x16x1024xf32>
    tpu.vector_store %arg2[%c0_22, %c0_23, %c0_24], %28 {strides = array<i32>} : memref<1x16x1024xf32, #tpu.memory_space<vmem>>, vector<1x16x1024xf32>,
    return
  }
  func.func @transform_0(%arg0: i32) -> (i32, i32, i32) {
    %c0_i32 = arith.constant 0 : i32
    %c0_i32_0 = arith.constant 0 : i32
    %c0_i32_1 = arith.constant 0 : i32
    return %arg0, %c0_i32, %c0_i32_0 : i32, i32, i32
  }
  func.func @transform_1(%arg0: i32) -> (i32, i32, i32) {
    %c0_i32 = arith.constant 0 : i32
    %c0_i32_0 = arith.constant 0 : i32
    %c0_i32_1 = arith.constant 0 : i32
    return %arg0, %c0_i32, %c0_i32_0 : i32, i32, i32
  }
}

module attributes {stable_mosaic.version = 11 : i64} {
  func.func @_matmul_bias_kernel(%arg0: i32, %arg1: memref<256x64xf32, #tpu.memory_space<vmem>>, %arg2: memref<64x16xf32, #tpu.memory_space<vmem>>, %arg3: memref<1x16xf32, #tpu.memory_space<vmem>>, %arg4: memref<256x16xf32, #tpu.memory_space<vmem>>) attributes {dimension_semantics = [#tpu.dimension_semantics<parallel>], iteration_bounds = array<i64: 2>, scalar_prefetch = 0 : i64, scratch_operands = 0 : i64, tpu.core_type = #tpu.core_type<tc>, window_params = [{transform_indices = @transform_0, window_bounds = array<i64: 256, 64>}, {pipeline_mode = #tpu.pipeline_mode<synchronous>, transform_indices = @transform_1, window_bounds = array<i64: 64, 16>}, {pipeline_mode = #tpu.pipeline_mode<synchronous>, transform_indices = @transform_2, window_bounds = array<i64: 1, 16>}, {transform_indices = @transform_3, window_bounds = array<i64: 256, 16>}]} {
    %c0 = arith.constant 0 : index
    %c0_0 = arith.constant 0 : index
    %0 = vector.load %arg1[%c0, %c0_0] : memref<256x64xf32, #tpu.memory_space<vmem>>, vector<256x64xf32>
    %c0_1 = arith.constant 0 : index
    %c0_2 = arith.constant 0 : index
    %1 = vector.load %arg2[%c0_1, %c0_2] : memref<64x16xf32, #tpu.memory_space<vmem>>, vector<64x16xf32>
    %cst = arith.constant dense<0.000000e+00> : vector<256x16xf32>
    %2 = tpu.matmul %0, %1, %cst {dimension_numbers = #tpu.dot_dimension_numbers<[1], [0], [0], [1], [0, 0, 1, 1], [], []>} : vector<256x64xf32>, vector<64x16xf32>, vector<256x16xf32> -> vector<256x16xf32>
    %c0_3 = arith.constant 0 : index
    %c0_4 = arith.constant 0 : index
    %3 = vector.load %arg3[%c0_3, %c0_4] : memref<1x16xf32, #tpu.memory_space<vmem>>, vector<1x16xf32>
    %4 = vector.broadcast %3 : vector<1x16xf32> to vector<256x16xf32>
    %5 = arith.addf %2, %4 : vector<256x16xf32>
    %c0_5 = arith.constant 0 : index
    %c0_6 = arith.constant 0 : index
    %6 = vector.load %arg4[%c0_5, %c0_6] : memref<256x16xf32, #tpu.memory_space<vmem>>, vector<256x16xf32>
    tpu.vector_store %arg4[%c0_5, %c0_6], %5 {strides = array<i32>} : memref<256x16xf32, #tpu.memory_space<vmem>>, vector<256x16xf32>,
    return
  }
  func.func @transform_0(%arg0: i32) -> (i32, i32) {
    %c0_i32 = arith.constant 0 : i32
    %c0_i32_0 = arith.constant 0 : i32
    return %arg0, %c0_i32 : i32, i32
  }
  func.func @transform_1(%arg0: i32) -> (i32, i32) {
    %c0_i32 = arith.constant 0 : i32
    %c0_i32_0 = arith.constant 0 : i32
    %c0_i32_1 = arith.constant 0 : i32
    return %c0_i32, %c0_i32_0 : i32, i32
  }
  func.func @transform_2(%arg0: i32) -> (i32, i32) {
    %c0_i32 = arith.constant 0 : i32
    %c0_i32_0 = arith.constant 0 : i32
    %c0_i32_1 = arith.constant 0 : i32
    return %c0_i32, %c0_i32_0 : i32, i32
  }
  func.func @transform_3(%arg0: i32) -> (i32, i32) {
    %c0_i32 = arith.constant 0 : i32
    %c0_i32_0 = arith.constant 0 : i32
    return %arg0, %c0_i32 : i32, i32
  }
}

module attributes {stable_mosaic.version = 11 : i64} {
  func.func @_matmul_bias_kernel(%arg0: i32, %arg1: memref<256x64xf32, #tpu.memory_space<vmem>>, %arg2: memref<64x8xf32, #tpu.memory_space<vmem>>, %arg3: memref<1x8xf32, #tpu.memory_space<vmem>>, %arg4: memref<256x8xf32, #tpu.memory_space<vmem>>) attributes {dimension_semantics = [#tpu.dimension_semantics<parallel>], iteration_bounds = array<i64: 2>, scalar_prefetch = 0 : i64, scratch_operands = 0 : i64, tpu.core_type = #tpu.core_type<tc>, window_params = [{transform_indices = @transform_0, window_bounds = array<i64: 256, 64>}, {pipeline_mode = #tpu.pipeline_mode<synchronous>, transform_indices = @transform_1, window_bounds = array<i64: 64, 8>}, {pipeline_mode = #tpu.pipeline_mode<synchronous>, transform_indices = @transform_2, window_bounds = array<i64: 1, 8>}, {transform_indices = @transform_3, window_bounds = array<i64: 256, 8>}]} {
    %c0 = arith.constant 0 : index
    %c0_0 = arith.constant 0 : index
    %0 = vector.load %arg1[%c0, %c0_0] : memref<256x64xf32, #tpu.memory_space<vmem>>, vector<256x64xf32>
    %c0_1 = arith.constant 0 : index
    %c0_2 = arith.constant 0 : index
    %1 = vector.load %arg2[%c0_1, %c0_2] : memref<64x8xf32, #tpu.memory_space<vmem>>, vector<64x8xf32>
    %cst = arith.constant dense<0.000000e+00> : vector<256x8xf32>
    %2 = tpu.matmul %0, %1, %cst {dimension_numbers = #tpu.dot_dimension_numbers<[1], [0], [0], [1], [0, 0, 1, 1], [], []>} : vector<256x64xf32>, vector<64x8xf32>, vector<256x8xf32> -> vector<256x8xf32>
    %c0_3 = arith.constant 0 : index
    %c0_4 = arith.constant 0 : index
    %3 = vector.load %arg3[%c0_3, %c0_4] : memref<1x8xf32, #tpu.memory_space<vmem>>, vector<1x8xf32>
    %4 = vector.broadcast %3 : vector<1x8xf32> to vector<256x8xf32>
    %5 = arith.addf %2, %4 : vector<256x8xf32>
    %c0_5 = arith.constant 0 : index
    %c0_6 = arith.constant 0 : index
    %6 = vector.load %arg4[%c0_5, %c0_6] : memref<256x8xf32, #tpu.memory_space<vmem>>, vector<256x8xf32>
    tpu.vector_store %arg4[%c0_5, %c0_6], %5 {strides = array<i32>} : memref<256x8xf32, #tpu.memory_space<vmem>>, vector<256x8xf32>,
    return
  }
  func.func @transform_0(%arg0: i32) -> (i32, i32) {
    %c0_i32 = arith.constant 0 : i32
    %c0_i32_0 = arith.constant 0 : i32
    return %arg0, %c0_i32 : i32, i32
  }
  func.func @transform_1(%arg0: i32) -> (i32, i32) {
    %c0_i32 = arith.constant 0 : i32
    %c0_i32_0 = arith.constant 0 : i32
    %c0_i32_1 = arith.constant 0 : i32
    return %c0_i32, %c0_i32_0 : i32, i32
  }
  func.func @transform_2(%arg0: i32) -> (i32, i32) {
    %c0_i32 = arith.constant 0 : i32
    %c0_i32_0 = arith.constant 0 : i32
    %c0_i32_1 = arith.constant 0 : i32
    return %c0_i32, %c0_i32_0 : i32, i32
  }
  func.func @transform_3(%arg0: i32) -> (i32, i32) {
    %c0_i32 = arith.constant 0 : i32
    %c0_i32_0 = arith.constant 0 : i32
    return %arg0, %c0_i32 : i32, i32
  }
}

module attributes {stable_mosaic.version = 11 : i64} {
  func.func @_bn_stats_kernel(%arg0: i32, %arg1: memref<16x128xf32, #tpu.memory_space<vmem>>, %arg2: memref<2x128xf32, #tpu.memory_space<vmem>>) attributes {dimension_semantics = [#tpu.dimension_semantics<arbitrary>], iteration_bounds = array<i64: 2>, scalar_prefetch = 0 : i64, scratch_operands = 0 : i64, tpu.core_type = #tpu.core_type<tc>, window_params = [{transform_indices = @transform_0, window_bounds = array<i64: 16, 128>}, {pipeline_mode = #tpu.pipeline_mode<synchronous>, transform_indices = @transform_1, window_bounds = array<i64: 2, 128>}]} {
    %c0_i32 = arith.constant 0 : i32
    %0 = arith.cmpi eq, %arg0, %c0_i32 : i32
    %1 = arith.extui %0 : i1 to i32
    %c0_i32_0 = arith.constant 0 : i32
    %2 = arith.cmpi ne, %1, %c0_i32_0 : i32
    scf.if %2 {
      %cst_10 = arith.constant 0.000000e+00 : f32
      %15 = vector.broadcast %cst_10 : f32 to vector<2x128xf32>
      %c0_11 = arith.constant 0 : index
      %c0_12 = arith.constant 0 : index
      %16 = vector.load %arg2[%c0_11, %c0_12] : memref<2x128xf32, #tpu.memory_space<vmem>>, vector<2x128xf32>
      tpu.vector_store %arg2[%c0_11, %c0_12], %15 {strides = array<i32>} : memref<2x128xf32, #tpu.memory_space<vmem>>, vector<2x128xf32>,
    } else {
    }
    %c0 = arith.constant 0 : index
    %c0_1 = arith.constant 0 : index
    %3 = vector.load %arg1[%c0, %c0_1] : memref<16x128xf32, #tpu.memory_space<vmem>>, vector<16x128xf32>
    %c0_2 = arith.constant 0 : index
    %c0_3 = arith.constant 0 : index
    %4 = vector.load %arg2[%c0_2, %c0_3] : memref<2x128xf32, #tpu.memory_space<vmem>>, vector<1x128xf32>
    %cst = arith.constant dense<0.000000e+00> : vector<128xf32>
    %5 = vector.multi_reduction <add>, %3, %cst [0] : vector<16x128xf32> to vector<128xf32>
    %6 = vector.shape_cast %5 : vector<128xf32> to vector<1x128xf32>
    %7 = arith.addf %4, %6 : vector<1x128xf32>
    %c0_4 = arith.constant 0 : index
    %c0_5 = arith.constant 0 : index
    %8 = vector.load %arg2[%c0_4, %c0_5] : memref<2x128xf32, #tpu.memory_space<vmem>>, vector<1x128xf32>
    tpu.vector_store %arg2[%c0_4, %c0_5], %7 {strides = array<i32>} : memref<2x128xf32, #tpu.memory_space<vmem>>, vector<1x128xf32>,
    %c1 = arith.constant 1 : index
    %c0_6 = arith.constant 0 : index
    %9 = vector.load %arg2[%c1, %c0_6] : memref<2x128xf32, #tpu.memory_space<vmem>>, vector<1x128xf32>
    %10 = arith.mulf %3, %3 : vector<16x128xf32>
    %cst_7 = arith.constant dense<0.000000e+00> : vector<128xf32>
    %11 = vector.multi_reduction <add>, %10, %cst_7 [0] : vector<16x128xf32> to vector<128xf32>
    %12 = vector.shape_cast %11 : vector<128xf32> to vector<1x128xf32>
    %13 = arith.addf %9, %12 : vector<1x128xf32>
    %c1_8 = arith.constant 1 : index
    %c0_9 = arith.constant 0 : index
    %14 = vector.load %arg2[%c1_8, %c0_9] : memref<2x128xf32, #tpu.memory_space<vmem>>, vector<1x128xf32>
    tpu.vector_store %arg2[%c1_8, %c0_9], %13 {strides = array<i32>} : memref<2x128xf32, #tpu.memory_space<vmem>>, vector<1x128xf32>,
    return
  }
  func.func @transform_0(%arg0: i32) -> (i32, i32) {
    %c0_i32 = arith.constant 0 : i32
    %c0_i32_0 = arith.constant 0 : i32
    return %arg0, %c0_i32 : i32, i32
  }
  func.func @transform_1(%arg0: i32) -> (i32, i32) {
    %c0_i32 = arith.constant 0 : i32
    %c0_i32_0 = arith.constant 0 : i32
    %c0_i32_1 = arith.constant 0 : i32
    return %c0_i32, %c0_i32_0 : i32, i32
  }
}

module attributes {stable_mosaic.version = 11 : i64} {
  func.func @_bn_act_kernel(%arg0: i32, %arg1: memref<16x128xf32, #tpu.memory_space<vmem>>, %arg2: memref<2x128xf32, #tpu.memory_space<vmem>>, %arg3: memref<16x128xf32, #tpu.memory_space<vmem>>) attributes {dimension_semantics = [#tpu.dimension_semantics<parallel>], iteration_bounds = array<i64: 2>, scalar_prefetch = 0 : i64, scratch_operands = 0 : i64, tpu.core_type = #tpu.core_type<tc>, window_params = [{transform_indices = @transform_0, window_bounds = array<i64: 16, 128>}, {pipeline_mode = #tpu.pipeline_mode<synchronous>, transform_indices = @transform_1, window_bounds = array<i64: 2, 128>}, {transform_indices = @transform_2, window_bounds = array<i64: 16, 128>}]} {
    %c0 = arith.constant 0 : index
    %c0_0 = arith.constant 0 : index
    %0 = vector.load %arg1[%c0, %c0_0] : memref<16x128xf32, #tpu.memory_space<vmem>>, vector<16x128xf32>
    %c0_1 = arith.constant 0 : index
    %c0_2 = arith.constant 0 : index
    %1 = vector.load %arg2[%c0_1, %c0_2] : memref<2x128xf32, #tpu.memory_space<vmem>>, vector<1x128xf32>
    %2 = vector.broadcast %1 : vector<1x128xf32> to vector<16x128xf32>
    %3 = arith.mulf %0, %2 : vector<16x128xf32>
    %c1 = arith.constant 1 : index
    %c0_3 = arith.constant 0 : index
    %4 = vector.load %arg2[%c1, %c0_3] : memref<2x128xf32, #tpu.memory_space<vmem>>, vector<1x128xf32>
    %5 = vector.broadcast %4 : vector<1x128xf32> to vector<16x128xf32>
    %6 = arith.addf %3, %5 : vector<16x128xf32>
    %cst = arith.constant 0.000000e+00 : f32
    %7 = vector.broadcast %cst : f32 to vector<16x128xf32>
    %8 = arith.cmpf ogt, %6, %7 : vector<16x128xf32>
    %cst_4 = arith.constant 0.000000e+00 : f32
    %9 = vector.broadcast %cst_4 : f32 to vector<16x128xf32>
    %10 = arith.mulf %9, %6 : vector<16x128xf32>
    %11 = arith.select %8, %6, %10 : vector<16x128xi1>, vector<16x128xf32>
    %c0_5 = arith.constant 0 : index
    %c0_6 = arith.constant 0 : index
    %12 = vector.load %arg3[%c0_5, %c0_6] : memref<16x128xf32, #tpu.memory_space<vmem>>, vector<16x128xf32>
    tpu.vector_store %arg3[%c0_5, %c0_6], %11 {strides = array<i32>} : memref<16x128xf32, #tpu.memory_space<vmem>>, vector<16x128xf32>,
    return
  }
  func.func @transform_0(%arg0: i32) -> (i32, i32) {
    %c0_i32 = arith.constant 0 : i32
    %c0_i32_0 = arith.constant 0 : i32
    return %arg0, %c0_i32 : i32, i32
  }
  func.func @transform_1(%arg0: i32) -> (i32, i32) {
    %c0_i32 = arith.constant 0 : i32
    %c0_i32_0 = arith.constant 0 : i32
    %c0_i32_1 = arith.constant 0 : i32
    return %c0_i32, %c0_i32_0 : i32, i32
  }
  func.func @transform_2(%arg0: i32) -> (i32, i32) {
    %c0_i32 = arith.constant 0 : i32
    %c0_i32_0 = arith.constant 0 : i32
    return %arg0, %c0_i32 : i32, i32
  }
}

</mosaic_0001>

<bundles_post_ra>
// kernel: forward.26
= control target key start
LH: loop header
LB: loop body
LE: loop exit
PB: predicated region body
PF: predicated region fallthrough
CT: control target
= control target key end

     0   :  { %s614_s12 = smov 0   ;;  %s822_s0 = inlined_call_operand.vmem [shape: f32[512,36], index: 0, kind: input, shape index: {}]   ;;  %s823_s1 = inlined_call_operand.vmem [shape: f32[36,16], index: 1, kind: input, shape index: {}]   ;;  %s824_s2 = inlined_call_operand.vmem [shape: f32[1,16], index: 2, kind: input, shape index: {}]   ;;  %s825_s3 = inlined_call_operand.vmem [shape: f32[512,16], index: 3, kind: output, shape index: {}]  }
   0x1 LB: > { %s518_s13 = sadd.s32 4294967295, %s592_s12   ;;  %p522_p0 = scmp.ge.s32.totalorder %s592_s12, 1  ;;  %s592_s12 = sphi %s614_s12, %s13_s12  }
   0x2   : > { %p138_p1 = scmp.lt.s32.totalorder %s592_s12, 3 }
   0x4   : > { %p139_p2 = pnand %p522_p0, %p138_p1 }
   0x5   : > { %s523_s18 = sshll.u32 (!%p139_p2), %s518_s13, 5 }
   0x6   : > { %142 = sbr.rel (%p139_p2) target bundleno = 213 (0xd5), region = 32  ;;  %p163_p3 = scmp.lt.s32.totalorder (!%p139_p2), %s523_s18, 63 }
   0xb   : > { %v210_v0 = vld [vmem:[%s823_s1 + $0x20] sm:$0xf]  ;;  %vm312_vm0 = vcmask 1043456   ;;  %v209_v1 = vld [vmem:[%s823_s1 + $0x18] sm:$0xff]  ;;  %v208_v2 = vld [vmem:[%s823_s1 + $0x10] sm:$0xff]  ;;  %s827_s18 = smov (!%p163_p3, %s523_s18), 63 }
   0xc   : > { %563 = vmatpush.msk.msra.mxu2 %vm312_vm0, %v210_v0  ;;  %564 = vmatpush.msk.msra.mxu3 %vm312_vm0, %v210_v0  ;;  %v207_v3 = vld [vmem:[%s823_s1 + $0x8] sm:$0xff]  ;;  %s524_s23 = sshll.u32 %s827_s18, 3  ;;  %v206_v4 = vld [vmem:[%s823_s1] sm:$0xff]  ;;  %vm215_vm1 = vcmask 293888   ;;  %vm429_vm2 = vcmask 130048  }
   0xd   : > { %527 = vmatpush.msk.msra.mxu0 %vm312_vm0, %v210_v0  ;;  %562 = vmatpush.msk.msra.mxu1 %vm312_vm0, %v210_v0  ;;  %s645_s28 = scalar_lea.vmem %s822_s0, %s524_s23  ;;  %v714_v37 = vld [vmem:[%s824_s2] ss:$0 sm:$0xff]  ;;  %s721_s6 = scalar_lea.vmem %s825_s3, %s524_s23 }
   0xe   : > { %566 = vmatpush.msra.mxu2 %v209_v1  ;;  %567 = vmatpush.msra.mxu3 %v209_v1  ;;  %v190_v5 = vld [vmem:[%s645_s28 + $0x80] sm:$0xff]  ;;  %v191_v9 = vld [vmem:[%s645_s28 + $0x88] sm:$0xff]  ;;  %v192_v13 = vld [vmem:[%s645_s28 + $0x90] sm:$0xff] }
   0xf   : > { %328 = vmatpush.msra.mxu0 %v209_v1  ;;  %565 = vmatpush.msra.mxu1 %v209_v1  ;;  %v198_v6 = vld [vmem:[%s645_s28 + $0xc0] sm:$0xff]  ;;  %v199_v10 = vld [vmem:[%s645_s28 + $0xc8] sm:$0xff]  ;;  %v200_v14 = vld [vmem:[%s645_s28 + $0xd0] sm:$0xff] }
  0x10   : > { %569 = vmatpush.msra.mxu2 %v208_v2  ;;  %570 = vmatpush.msra.mxu3 %v208_v2  ;;  %v174_v7 = vld [vmem:[%s645_s28] sm:$0xff]  ;;  %v175_v11 = vld [vmem:[%s645_s28 + $0x8] sm:$0xff]  ;;  %v176_v15 = vld [vmem:[%s645_s28 + $0x10] sm:$0xff] }
  0x11   : > { %329 = vmatpush.msra.mxu0 %v208_v2  ;;  %568 = vmatpush.msra.mxu1 %v208_v2  ;;  %v182_v8 = vld [vmem:[%s645_s28 + $0x40] sm:$0xff]  ;;  %v183_v12 = vld [vmem:[%s645_s28 + $0x48] sm:$0xff]  ;;  %v184_v16 = vld [vmem:[%s645_s28 + $0x50] sm:$0xff] }
  0x12   : > { %572 = vmatpush.msra.mxu2 %v207_v3  ;;  %573 = vmatpush.msra.mxu3 %v207_v3  ;;  %v193_v17 = vld [vmem:[%s645_s28 + $0x98] sm:$0xff]  ;;  %v194_v21 = vld [vmem:[%s645_s28 + $0xa0] sm:$0xff]  ;;  %v195_v25 = vld [vmem:[%s645_s28 + $0xa8] sm:$0xff] }
  0x13   : > { %330 = vmatpush.msra.mxu0 %v207_v3  ;;  %571 = vmatpush.msra.mxu1 %v207_v3  ;;  %v201_v18 = vld [vmem:[%s645_s28 + $0xd8] sm:$0xff]  ;;  %v202_v22 = vld [vmem:[%s645_s28 + $0xe0] sm:$0xff]  ;;  %v203_v26 = vld [vmem:[%s645_s28 + $0xe8] sm:$0xff] }
  0x14   : > { %575 = vmatpush.msra.mxu2 %v206_v4  ;;  %576 = vmatpush.msra.mxu3 %v206_v4  ;;  %v177_v19 = vld [vmem:[%s645_s28 + $0x18] sm:$0xff]  ;;  %v178_v23 = vld [vmem:[%s645_s28 + $0x20] sm:$0xff]  ;;  %v179_v27 = vld [vmem:[%s645_s28 + $0x28] sm:$0xff] }
  0x15   : > { %544 = vmatmul.msk.f32.vlgmr.msra.gmra.mxu2 %vm215_vm1, %v190_v5  ;;  %552 = vmatmul.msk.f32.vlgmr.msra.gmra.mxu3 %vm215_vm1, %v198_v6  ;;  %v185_v20 = vld [vmem:[%s645_s28 + $0x58] sm:$0xff]  ;;  %v186_v24 = vld [vmem:[%s645_s28 + $0x60] sm:$0xff]  ;;  %v187_v28 = vld [vmem:[%s645_s28 + $0x68] sm:$0xff] }
  0x16   : > { %331 = vmatpush.msra.mxu0 %v206_v4  ;;  %574 = vmatpush.msra.mxu1 %v206_v4  ;;  %v196_v29 = vld [vmem:[%s645_s28 + $0xb0] sm:$0xff]  ;;  %v197_v33 = vld [vmem:[%s645_s28 + $0xb8] sm:$0xff] }
  0x17   : > { %528 = vmatmul.msk.f32.vlgmr.msra.gmra.mxu0 %vm215_vm1, %v174_v7  ;;  %536 = vmatmul.msk.f32.vlgmr.msra.gmra.mxu1 %vm215_vm1, %v182_v8  ;;  %v204_v30 = vld [vmem:[%s645_s28 + $0xf0] sm:$0xff]  ;;  %v205_v34 = vld [vmem:[%s645_s28 + $0xf8] sm:$0xff] }
  0x18   : > { %v180_v31 = vld [vmem:[%s645_s28 + $0x30] sm:$0xff]  ;;  %v181_v35 = vld [vmem:[%s645_s28 + $0x38] sm:$0xff] }
  0x19   : > { %v188_v32 = vld [vmem:[%s645_s28 + $0x70] sm:$0xff]  ;;  %v189_v36 = vld [vmem:[%s645_s28 + $0x78] sm:$0xff] }
  0x1d   : > { %545 = vmatmul.msk.f32.gmra.mxu2 %vm215_vm1, %v191_v9  ;;  %553 = vmatmul.msk.f32.gmra.mxu3 %vm215_vm1, %v199_v10 }
  0x1f   : > { %529 = vmatmul.msk.f32.gmra.mxu0 %vm215_vm1, %v175_v11  ;;  %537 = vmatmul.msk.f32.gmra.mxu1 %vm215_vm1, %v183_v12 }
  0x25   : > { %546 = vmatmul.msk.f32.gmra.mxu2 %vm215_vm1, %v192_v13  ;;  %554 = vmatmul.msk.f32.gmra.mxu3 %vm215_vm1, %v200_v14 }
  0x27   : > { %530 = vmatmul.msk.f32.gmra.mxu0 %vm215_vm1, %v176_v15  ;;  %538 = vmatmul.msk.f32.gmra.mxu1 %vm215_vm1, %v184_v16 }
  0x2d   : > { %547 = vmatmul.msk.f32.gmra.mxu2 %vm215_vm1, %v193_v17  ;;  %555 = vmatmul.msk.f32.gmra.mxu3 %vm215_vm1, %v201_v18 }
  0x2f   : > { %531 = vmatmul.msk.f32.gmra.mxu0 %vm215_vm1, %v177_v19  ;;  %539 = vmatmul.msk.f32.gmra.mxu1 %vm215_vm1, %v185_v20 }
  0x35   : > { %548 = vmatmul.msk.f32.gmra.mxu2 %vm215_vm1, %v194_v21  ;;  %556 = vmatmul.msk.f32.gmra.mxu3 %vm215_vm1, %v202_v22 }
  0x37   : > { %532 = vmatmul.msk.f32.gmra.mxu0 %vm215_vm1, %v178_v23  ;;  %540 = vmatmul.msk.f32.gmra.mxu1 %vm215_vm1, %v186_v24 }
  0x3d   : > { %549 = vmatmul.msk.f32.gmra.mxu2 %vm215_vm1, %v195_v25  ;;  %557 = vmatmul.msk.f32.gmra.mxu3 %vm215_vm1, %v203_v26 }
  0x3f   : > { %533 = vmatmul.msk.f32.gmra.mxu0 %vm215_vm1, %v179_v27  ;;  %541 = vmatmul.msk.f32.gmra.mxu1 %vm215_vm1, %v187_v28 }
  0x45   : > { %550 = vmatmul.msk.f32.gmra.mxu2 %vm215_vm1, %v196_v29  ;;  %558 = vmatmul.msk.f32.gmra.mxu3 %vm215_vm1, %v204_v30 }
  0x47   : > { %534 = vmatmul.msk.f32.gmra.mxu0 %vm215_vm1, %v180_v31  ;;  %542 = vmatmul.msk.f32.gmra.mxu1 %vm215_vm1, %v188_v32 }
  0x4d   : > { %551 = vmatmul.msk.f32.gmra.mxu2 %vm215_vm1, %v197_v33  ;;  %559 = vmatmul.msk.f32.gmra.mxu3 %vm215_vm1, %v205_v34 }
  0x4f   : > { %535 = vmatmul.msk.f32.gmra.mxu0 %vm215_vm1, %v181_v35  ;;  %543 = vmatmul.msk.f32.gmra.mxu1 %vm215_vm1, %v189_v36 }
  0x94   : > { %v333_v38 = vpop.f32.mrf.mxu0  ;;  %v357_v39 = vpop.f32.mrf.mxu1 }
  0x95   : > { %v334_v40 = vadd.f32 %v714_v37, %v333_v38  ;;  %v358_v41 = vadd.f32 %v714_v37, %v357_v39 }
  0x97   : > { %430 = vst.msk [vmem:[%s721_s6] sm:$0xff] %vm429_vm2, %v334_v40 }
  0x98   : > { %438 = vst.msk [vmem:[%s721_s6 + $0x40] sm:$0xff] %vm429_vm2, %v358_v41  ;;  %v381_v42 = vpop.f32.mrf.mxu2  ;;  %v405_v43 = vpop.f32.mrf.mxu3 }
  0x99   : > { %v382_v44 = vadd.f32 %v714_v37, %v381_v42  ;;  %v406_v45 = vadd.f32 %v714_v37, %v405_v43 }
  0x9b   : > { %446 = vst.msk [vmem:[%s721_s6 + $0x80] sm:$0xff] %vm429_vm2, %v382_v44 }
  0x9c   : > { %454 = vst.msk [vmem:[%s721_s6 + $0xc0] sm:$0xff] %vm429_vm2, %v406_v45  ;;  %v336_v46 = vpop.f32.mrf.mxu0  ;;  %v360_v47 = vpop.f32.mrf.mxu1 }
  0x9d   : > { %v337_v48 = vadd.f32 %v714_v37, %v336_v46  ;;  %v361_v49 = vadd.f32 %v714_v37, %v360_v47 }
  0x9f   : > { %431 = vst.msk [vmem:[%s721_s6 + $0x8] sm:$0xff] %vm429_vm2, %v337_v48 }
  0xa0   : > { %439 = vst.msk [vmem:[%s721_s6 + $0x48] sm:$0xff] %vm429_vm2, %v361_v49  ;;  %v384_v50 = vpop.f32.mrf.mxu2  ;;  %v408_v51 = vpop.f32.mrf.mxu3 }
  0xa1   : > { %v385_v52 = vadd.f32 %v714_v37, %v384_v50  ;;  %v409_v53 = vadd.f32 %v714_v37, %v408_v51 }
  0xa3   : > { %447 = vst.msk [vmem:[%s721_s6 + $0x88] sm:$0xff] %vm429_vm2, %v385_v52 }
  0xa4   : > { %455 = vst.msk [vmem:[%s721_s6 + $0xc8] sm:$0xff] %vm429_vm2, %v409_v53  ;;  %v339_v54 = vpop.f32.mrf.mxu0  ;;  %v363_v55 = vpop.f32.mrf.mxu1 }
  0xa5   : > { %v340_v56 = vadd.f32 %v714_v37, %v339_v54  ;;  %v364_v57 = vadd.f32 %v714_v37, %v363_v55 }
  0xa7   : > { %432 = vst.msk [vmem:[%s721_s6 + $0x10] sm:$0xff] %vm429_vm2, %v340_v56 }
  0xa8   : > { %440 = vst.msk [vmem:[%s721_s6 + $0x50] sm:$0xff] %vm429_vm2, %v364_v57  ;;  %v387_v58 = vpop.f32.mrf.mxu2  ;;  %v411_v59 = vpop.f32.mrf.mxu3 }
  0xa9   : > { %v388_v60 = vadd.f32 %v714_v37, %v387_v58  ;;  %v412_v61 = vadd.f32 %v714_v37, %v411_v59 }
  0xab   : > { %448 = vst.msk [vmem:[%s721_s6 + $0x90] sm:$0xff] %vm429_vm2, %v388_v60 }
  0xac   : > { %456 = vst.msk [vmem:[%s721_s6 + $0xd0] sm:$0xff] %vm429_vm2, %v412_v61  ;;  %v342_v62 = vpop.f32.mrf.mxu0  ;;  %v366_v63 = vpop.f32.mrf.mxu1 }
  0xad   : > { %v343_v0 = vadd.f32 %v714_v37, %v342_v62  ;;  %v367_v1 = vadd.f32 %v714_v37, %v366_v63 }
  0xaf   : > { %433 = vst.msk [vmem:[%s721_s6 + $0x18] sm:$0xff] %vm429_vm2, %v343_v0 }
  0xb0   : > { %441 = vst.msk [vmem:[%s721_s6 + $0x58] sm:$0xff] %vm429_vm2, %v367_v1  ;;  %v390_v2 = vpop.f32.mrf.mxu2  ;;  %v414_v3 = vpop.f32.mrf.mxu3 }
  0xb1   : > { %v391_v4 = vadd.f32 %v714_v37, %v390_v2  ;;  %v415_v5 = vadd.f32 %v714_v37, %v414_v3 }
  0xb3   : > { %449 = vst.msk [vmem:[%s721_s6 + $0x98] sm:$0xff] %vm429_vm2, %v391_v4 }
  0xb4   : > { %457 = vst.msk [vmem:[%s721_s6 + $0xd8] sm:$0xff] %vm429_vm2, %v415_v5  ;;  %v345_v6 = vpop.f32.mrf.mxu0  ;;  %v369_v7 = vpop.f32.mrf.mxu1 }
  0xb5   : > { %v346_v8 = vadd.f32 %v714_v37, %v345_v6  ;;  %v370_v9 = vadd.f32 %v714_v37, %v369_v7 }
  0xb7   : > { %434 = vst.msk [vmem:[%s721_s6 + $0x20] sm:$0xff] %vm429_vm2, %v346_v8 }
  0xb8   : > { %442 = vst.msk [vmem:[%s721_s6 + $0x60] sm:$0xff] %vm429_vm2, %v370_v9  ;;  %v393_v10 = vpop.f32.mrf.mxu2  ;;  %v417_v11 = vpop.f32.mrf.mxu3 }
  0xb9   : > { %v394_v12 = vadd.f32 %v714_v37, %v393_v10  ;;  %v418_v13 = vadd.f32 %v714_v37, %v417_v11 }
  0xbb   : > { %450 = vst.msk [vmem:[%s721_s6 + $0xa0] sm:$0xff] %vm429_vm2, %v394_v12 }
  0xbc   : > { %458 = vst.msk [vmem:[%s721_s6 + $0xe0] sm:$0xff] %vm429_vm2, %v418_v13  ;;  %v348_v14 = vpop.f32.mrf.mxu0  ;;  %v372_v15 = vpop.f32.mrf.mxu1 }
  0xbd   : > { %v349_v16 = vadd.f32 %v714_v37, %v348_v14  ;;  %v373_v17 = vadd.f32 %v714_v37, %v372_v15 }
  0xbf   : > { %435 = vst.msk [vmem:[%s721_s6 + $0x28] sm:$0xff] %vm429_vm2, %v349_v16 }
  0xc0   : > { %443 = vst.msk [vmem:[%s721_s6 + $0x68] sm:$0xff] %vm429_vm2, %v373_v17  ;;  %v396_v18 = vpop.f32.mrf.mxu2  ;;  %v420_v19 = vpop.f32.mrf.mxu3 }
  0xc1   : > { %v397_v20 = vadd.f32 %v714_v37, %v396_v18  ;;  %v421_v21 = vadd.f32 %v714_v37, %v420_v19 }
  0xc3   : > { %451 = vst.msk [vmem:[%s721_s6 + $0xa8] sm:$0xff] %vm429_vm2, %v397_v20 }
  0xc4   : > { %459 = vst.msk [vmem:[%s721_s6 + $0xe8] sm:$0xff] %vm429_vm2, %v421_v21  ;;  %v351_v22 = vpop.f32.mrf.mxu0  ;;  %v375_v23 = vpop.f32.mrf.mxu1 }
  0xc5   : > { %v352_v24 = vadd.f32 %v714_v37, %v351_v22  ;;  %v376_v25 = vadd.f32 %v714_v37, %v375_v23 }
  0xc7   : > { %436 = vst.msk [vmem:[%s721_s6 + $0x30] sm:$0xff] %vm429_vm2, %v352_v24 }
  0xc8   : > { %444 = vst.msk [vmem:[%s721_s6 + $0x70] sm:$0xff] %vm429_vm2, %v376_v25  ;;  %v399_v26 = vpop.f32.mrf.mxu2  ;;  %v423_v27 = vpop.f32.mrf.mxu3 }
  0xc9   : > { %v400_v28 = vadd.f32 %v714_v37, %v399_v26  ;;  %v424_v29 = vadd.f32 %v714_v37, %v423_v27 }
  0xcb   : > { %452 = vst.msk [vmem:[%s721_s6 + $0xb0] sm:$0xff] %vm429_vm2, %v400_v28 }
  0xcc   : > { %460 = vst.msk [vmem:[%s721_s6 + $0xf0] sm:$0xff] %vm429_vm2, %v424_v29  ;;  %v354_v30 = vpop.f32.mrf.mxu0  ;;  %v378_v31 = vpop.f32.mrf.mxu1 }
  0xcd   : > { %v355_v32 = vadd.f32 %v714_v37, %v354_v30  ;;  %v379_v33 = vadd.f32 %v714_v37, %v378_v31 }
  0xcf   : > { %437 = vst.msk [vmem:[%s721_s6 + $0x38] sm:$0xff] %vm429_vm2, %v355_v32 }
  0xd0   : > { %445 = vst.msk [vmem:[%s721_s6 + $0x78] sm:$0xff] %vm429_vm2, %v379_v33  ;;  %v402_v34 = vpop.f32.mrf.mxu2  ;;  %v426_v35 = vpop.f32.mrf.mxu3 }
  0xd1   : > { %v403_v36 = vadd.f32 %v714_v37, %v402_v34  ;;  %v427_v38 = vadd.f32 %v714_v37, %v426_v35 }
  0xd3   : > { %453 = vst.msk [vmem:[%s721_s6 + $0xb8] sm:$0xff] %vm429_vm2, %v403_v36 }
  0xd4   : > { %461 = vst.msk [vmem:[%s721_s6 + $0xf8] sm:$0xff] %vm429_vm2, %v427_v38 }
  0xd5 PF: > { %s13_s12 = sadd.s32 1, %s592_s12  }
  0xd6   : > { %p10_p4 = scmp.ge.s32.totalorder %s13_s12, 4  }
  0xd8   :  { %12 = sbr.rel (!%p10_p4) target bundleno = 1 (0x1), region = 62 }

// kernel: tile.27
= control target key start
LH: loop header
LB: loop body
LE: loop exit
PB: predicated region body
PF: predicated region fallthrough
CT: control target
= control target key end

     0   :  { %s22_s0 = inlined_call_operand.vmem [shape: f32[16], index: 0, kind: input, shape index: {}]   ;;  %s23_s1 = inlined_call_operand.vmem [shape: f32[8,16], index: 1, kind: output, shape index: {}]  }
   0x1   :  { %v4_v0 = vld [vmem:[%s22_s0] ss:$0 sm:$0xff] }
   0x2   :  { %5 = vst [vmem:[%s23_s1] sm:$0xff] %v4_v0 }

// kernel: tile.29
= control target key start
LH: loop header
LB: loop body
LE: loop exit
PB: predicated region body
PF: predicated region fallthrough
CT: control target
= control target key end

     0   :  { %s67_s10 = smov 112   ;;  %s68_s11 = smov 80   ;;  %vm3_vm0 = vcmask 130048   ;;  %vm9_vm1 = vcmask 1048448   ;;  %vm15_vm2 = vcmask 917248   ;;  %vm21_vm3 = vcmask 786048   ;;  %s111_s0 = inlined_call_operand.vmem [shape: f32[8,16], index: 0, kind: input, shape index: {}]   ;;  %s112_s1 = inlined_call_operand.vmem [shape: f32[1,128], index: 1, kind: output, shape index: {}]  }
   0x1   :  { %v53_v0 = vld [vmem:[%s111_s0 + $0x7] sm:$0x1]   ;;  %v55_v1 = vld [vmem:[%s111_s0 + $0x5] sm:$0x1]   ;;  %v57_v2 = vld [vmem:[%s111_s0 + $0x3] sm:$0x1]  }
   0x2   :  { %7 = vrot.lane.b32.xlu0 %v53_v0, %s67_s10  ;;  %19 = vrot.lane.b32.xlu1 %v55_v1, %s68_s11  ;;  %s69_s14 = smov 48   ;;  %v54_v3 = vld [vmem:[%s111_s0 + $0x6] sm:$0x1]   ;;  %v56_v4 = vld [vmem:[%s111_s0 + $0x4] sm:$0x1]   ;;  %s70_s21 = smov 96  }
   0x3   :  { %31 = vrot.lane.b32.xlu2 %v57_v2, %s69_s14  ;;  %v58_v5 = vld [vmem:[%s111_s0 + $0x2] sm:$0x1]   ;;  %s71_s22 = smov 64   ;;  %s72_s23 = smov 32   ;;  %v59_v6 = vld [vmem:[%s111_s0 + $0x1] sm:$0x1]  }
   0x4   :  { %s73_s26 = smov 16   ;;  %v2_v7 = vld [vmem:[%s111_s0] sm:$0x1]   ;;  %vm27_vm4 = vcmask 654848   ;;  %vm33_vm5 = vcmask 523648   ;;  %vm39_vm6 = vcmask 392448  }
   0x5   :  { %4 = vst.msk [vmem:[#allocation0] sm:$0x1] %vm3_vm0, %v2_v7   ;;  %vm45_vm7 = vcmask 261248  }
   0xa   :  { %13 = vrot.lane.b32.xlu0 %v54_v3, %s70_s21  ;;  %25 = vrot.lane.b32.xlu1 %v56_v4, %s71_s22 }
   0xb   :  { %37 = vrot.lane.b32.xlu2 %v58_v5, %s72_s23 }
  0x12   :  { %43 = vrot.lane.b32.xlu0 %v59_v6, %s73_s26 }
  0x5d   :  { %v32_v8 = vpop.permute.xlu2 %31  }
  0x65   :  { %v38_v9 = vpop.permute.xlu2 %37  }
  0x74   :  { %v8_v10 = vpop.permute.xlu0 %7   ;;  %v20_v11 = vpop.permute.xlu1 %19  }
  0x75   :  { %10 = vst.msk [vmem:[#allocation0] sm:$0x1] %vm9_vm1, %v8_v10  }
  0x7c   :  { %v14_v12 = vpop.permute.xlu0 %13   ;;  %v26_v13 = vpop.permute.xlu1 %25  }
  0x7d   :  { %16 = vst.msk [vmem:[#allocation0] sm:$0x1] %vm15_vm2, %v14_v12  }
  0x7e   :  { %22 = vst.msk [vmem:[#allocation0] sm:$0x1] %vm21_vm3, %v20_v11  }
  0x7f   :  { %28 = vst.msk [vmem:[#allocation0] sm:$0x1] %vm27_vm4, %v26_v13  }
  0x80   :  { %34 = vst.msk [vmem:[#allocation0] sm:$0x1] %vm33_vm5, %v32_v8  }
  0x81   :  { %40 = vst.msk [vmem:[#allocation0] sm:$0x1] %vm39_vm6, %v38_v9  }
  0x84   :  { %v44_v14 = vpop.permute.xlu0 %43  }
  0x85   :  { %46 = vst.msk [vmem:[#allocation0] sm:$0x1] %vm45_vm7, %v44_v14  }
  0x8c   :  { %v49_v15 = vld [vmem:[#allocation0] sm:$0x1] }
  0x8d   :  { %52 = vst [vmem:[%s112_s1] sm:$0x1] %v49_v15 }

// kernel: forward.27
= control target key start
LH: loop header
LB: loop body
LE: loop exit
PB: predicated region body
PF: predicated region fallthrough
CT: control target
= control target key end

     0   :  { %s206_s6 = smov 0   ;;  %s235_s0 = inlined_call_operand.vmem [shape: f32[64,128], index: 0, kind: input, shape index: {}]   ;;  %s236_s1 = inlined_call_operand.vmem [shape: f32[2,128], index: 1, kind: output, shape index: {}]  }
   0x1 LB: > { %s169_s7 = sadd.s32 4294967295, %s193_s6   ;;  %p172_p0 = scmp.ge.s32.totalorder %s193_s6, 1  ;;  %s193_s6 = sphi %s206_s6, %s11_s6  }
   0x2   : > { %p83_p1 = scmp.lt.s32.totalorder %s193_s6, 3 }
   0x4   : > { %p84_p2 = pnand %p172_p0, %p83_p1 }
   0x5   : > { %s173_s8 = sshll.u32 (!%p84_p2), %s169_s7, 2  ;;  %p175_p4 = scmp.ne.s32.totalorder (!%p84_p2), %s169_s7, 0 }
   0x6   : > { %87 = sbr.rel (%p84_p2) target bundleno = 42 (0x2a), region = 24  ;;  %p99_p3 = scmp.lt.s32.totalorder (!%p84_p2), %s173_s8, 7 }
   0xb   : > { %s238_s8 = smov (!%p99_p3, %s173_s8), 7  ;;  %107 = sbr.rel (%p175_p4) target bundleno = 18 (0x12), region = 28 }
   0xc   : > { %s174_s9 = sshll.u32 %s238_s8, 3 }
   0xd   : > { %s102_s12 = scalar_lea.vmem %s235_s0, %s174_s9 }
  0x10   : > { %v195_v0 = vmov 0.0  }
  0x11   : > { %108 = vst [vmem:[%s236_s1] sm:$0x3] %v195_v0 }
  0x12 PF: > { %v109_v1 = vld [vmem:[%s102_s12] sm:$0xff]  ;;  %v110_v2 = vld [vmem:[%s102_s12 + $0x8] sm:$0xff]  ;;  %v111_v3 = vld [vmem:[%s102_s12 + $0x10] sm:$0xff] }
  0x13   : > { %v112_v4 = vld [vmem:[%s102_s12 + $0x18] sm:$0xff]  ;;  %v114_v5 = vadd.f32 %v110_v2, %v109_v1  ;;  %v126_v6 = vmul.f32 %v109_v1, %v109_v1  ;;  %v127_v7 = vmul.f32 %v110_v2, %v110_v2  ;;  %v128_v8 = vmul.f32 %v111_v3, %v111_v3 }
  0x14   : > { %v129_v10 = vmul.f32 %v112_v4, %v112_v4 }
  0x15   : > { %v115_v9 = vadd.f32 %v114_v5, %v111_v3  ;;  %v130_v11 = vadd.f32 %v127_v7, %v126_v6 }
  0x17   : > { %v116_v12 = vadd.f32 %v115_v9, %v112_v4  ;;  %v131_v13 = vadd.f32 %v130_v11, %v128_v8 }
  0x18   : > { %v113_v24 = vld [vmem:[%s236_s1] sm:$0x1]  ;;  %v125_v27 = vld [vmem:[%s236_s1 + $0x1] sm:$0x1] }
  0x19   : > { %v117_v14 = vrot.slane %v116_v12, 4  ;;  %v132_v15 = vadd.f32 %v131_v13, %v129_v10 }
  0x1b   : > { %v118_v16 = vadd.f32 %v117_v14, %v116_v12  ;;  %v133_v17 = vrot.slane %v132_v15, 4 }
  0x1d   : > { %v119_v18 = vrot.slane %v118_v16, 2  ;;  %v134_v19 = vadd.f32 %v133_v17, %v132_v15 }
  0x1f   : > { %v120_v20 = vadd.f32 %v119_v18, %v118_v16  ;;  %v135_v21 = vrot.slane %v134_v19, 2 }
  0x21   : > { %v121_v22 = vrot.slane %v120_v20, 1  ;;  %v136_v23 = vadd.f32 %v135_v21, %v134_v19 }
  0x23   : > { %v122_v25 = vadd.f32 %v121_v22, %v120_v20  ;;  %v137_v26 = vrot.slane %v136_v23, 1 }
  0x25   : > { %v123_v28 = vadd.f32 %v122_v25, %v113_v24  ;;  %v138_v29 = vadd.f32 %v137_v26, %v136_v23 }
  0x27   : > { %124 = vst [vmem:[%s236_s1] sm:$0x1] %v123_v28  ;;  %v139_v30 = vadd.f32 %v138_v29, %v125_v27 }
  0x29   : > { %140 = vst [vmem:[%s236_s1 + $0x1] sm:$0x1] %v139_v30 }
  0x2a PF: > { %s11_s6 = sadd.s32 1, %s193_s6  }
  0x2b   : > { %p8_p5 = scmp.ge.s32.totalorder %s11_s6, 4  }
  0x2d   :  { %10 = sbr.rel (!%p8_p5) target bundleno = 1 (0x1), region = 54 }

// kernel: forward.28
= control target key start
LH: loop header
LB: loop body
LE: loop exit
PB: predicated region body
PF: predicated region fallthrough
CT: control target
= control target key end

     0   :  { %s279_s9 = smov 0   ;;  %s302_s0 = inlined_call_operand.vmem [shape: f32[64,128], index: 0, kind: input, shape index: {}]   ;;  %s303_s1 = inlined_call_operand.vmem [shape: f32[2,128], index: 1, kind: input, shape index: {}]   ;;  %s304_s2 = inlined_call_operand.vmem [shape: f32[64,128], index: 2, kind: output, shape index: {}]  }
   0x1 LB: > { %s235_s10 = sadd.s32 4294967295, %s262_s9   ;;  %p239_p0 = scmp.ge.s32.totalorder %s262_s9, 1  ;;  %s262_s9 = sphi %s279_s9, %s12_s9  }
   0x2   : > { %p113_p1 = scmp.lt.s32.totalorder %s262_s9, 3 }
   0x4   : > { %p114_p2 = pnand %p239_p0, %p113_p1 }
   0x5   : > { %s240_s11 = sshll.u32 (!%p114_p2), %s235_s10, 2 }
   0x6   : > { %117 = sbr.rel (%p114_p2) target bundleno = 26 (0x1a), region = 28  ;;  %p136_p3 = scmp.lt.s32.totalorder (!%p114_p2), %s240_s11, 7 }
   0xb   : > { %s306_s11 = smov (!%p136_p3, %s240_s11), 7  ;;  %v254_v0 = vld [vmem:[%s303_s1] ss:$0 sm:$0xff]  ;;  %v255_v1 = vld [vmem:[%s303_s1 + $0x1] ss:$0 sm:$0xff] }
   0xc   : > { %s241_s14 = sshll.u32 %s306_s11, 3 }
   0xd   : > { %s139_s17 = scalar_lea.vmem %s302_s0, %s241_s14  ;;  %s145_s22 = scalar_lea.vmem %s304_s2, %s241_s14 }
   0xe   : > { %v147_v2 = vld [vmem:[%s139_s17] sm:$0xff]  ;;  %v148_v3 = vld [vmem:[%s139_s17 + $0x8] sm:$0xff]  ;;  %v149_v4 = vld [vmem:[%s139_s17 + $0x10] sm:$0xff] }
   0xf   : > { %v153_v5 = vmul.f32 %v254_v0, %v147_v2  ;;  %v154_v6 = vmul.f32 %v254_v0, %v148_v3  ;;  %v155_v7 = vmul.f32 %v254_v0, %v149_v4  ;;  %v150_v8 = vld [vmem:[%s139_s17 + $0x18] sm:$0xff] }
  0x10   : > { %v156_v9 = vmul.f32 %v254_v0, %v150_v8 }
  0x11   : > { %v159_v10 = vadd.f32 %v255_v1, %v153_v5  ;;  %v160_v11 = vadd.f32 %v255_v1, %v154_v6  ;;  %v161_v12 = vadd.f32 %v255_v1, %v155_v7 }
  0x12   : > { %v162_v13 = vadd.f32 %v255_v1, %v156_v9 }
  0x13   : > { %vm163_vm0 = vcmp.gt.f32.partialorder %v159_v10, 0.0  ;;  %v167_v14 = vmul.f32 0.01, %v159_v10  ;;  %vm164_vm1 = vcmp.gt.f32.partialorder %v160_v11, 0.0  ;;  %v168_v15 = vmul.f32 0.01, %v160_v11 }
  0x14   : > { %vm165_vm2 = vcmp.gt.f32.partialorder %v161_v12, 0.0  ;;  %v169_v16 = vmul.f32 0.01, %v161_v12  ;;  %vm166_vm3 = vcmp.gt.f32.partialorder %v162_v13, 0.0  ;;  %v170_v17 = vmul.f32 0.01, %v162_v13 }
  0x15   : > { %v171_v18 = vsel %vm163_vm0, %v159_v10, %v167_v14  ;;  %v172_v19 = vsel %vm164_vm1, %v160_v11, %v168_v15 }
  0x16   : > { %175 = vst [vmem:[%s145_s22] sm:$0xff] %v171_v18  ;;  %v173_v20 = vsel %vm165_vm2, %v161_v12, %v169_v16  ;;  %v174_v21 = vsel %vm166_vm3, %v162_v13, %v170_v17 }
  0x17   : > { %176 = vst [vmem:[%s145_s22 + $0x8] sm:$0xff] %v172_v19 }
  0x18   : > { %177 = vst [vmem:[%s145_s22 + $0x10] sm:$0xff] %v173_v20 }
  0x19   : > { %178 = vst [vmem:[%s145_s22 + $0x18] sm:$0xff] %v174_v21 }
  0x1a PF: > { %s12_s9 = sadd.s32 1, %s262_s9  }
  0x1b   : > { %p9_p4 = scmp.ge.s32.totalorder %s12_s9, 4  }
  0x1d   :  { %11 = sbr.rel (!%p9_p4) target bundleno = 1 (0x1), region = 58 }

// kernel: forward.29
= control target key start
LH: loop header
LB: loop body
LE: loop exit
PB: predicated region body
PF: predicated region fallthrough
CT: control target
= control target key end

     0   :  { %s596_s12 = smov 0   ;;  %s795_s0 = inlined_call_operand.vmem [shape: f32[512,16], index: 0, kind: input, shape index: {}]   ;;  %s796_s1 = inlined_call_operand.vmem [shape: f32[16,16], index: 1, kind: input, shape index: {}]   ;;  %s797_s2 = inlined_call_operand.vmem [shape: f32[1,16], index: 2, kind: input, shape index: {}]   ;;  %s798_s3 = inlined_call_operand.vmem [shape: f32[512,16], index: 3, kind: output, shape index: {}]  }
   0x1 LB: > { %s510_s13 = sadd.s32 4294967295, %s574_s12   ;;  %p514_p0 = scmp.ge.s32.totalorder %s574_s12, 1  ;;  %s574_s12 = sphi %s596_s12, %s13_s12  }
   0x2   : > { %p138_p1 = scmp.lt.s32.totalorder %s574_s12, 3 }
   0x4   : > { %p139_p2 = pnand %p514_p0, %p138_p1 }
   0x5   : > { %s515_s18 = sshll.u32 (!%p139_p2), %s510_s13, 5 }
   0x6   : > { %142 = sbr.rel (%p139_p2) target bundleno = 208 (0xd0), region = 32  ;;  %p163_p3 = scmp.lt.s32.totalorder (!%p139_p2), %s515_s18, 63 }
   0xb   : > { %v207_v0 = vld [vmem:[%s796_s1 + $0x8] sm:$0xff]  ;;  %v206_v1 = vld [vmem:[%s796_s1] sm:$0xff]  ;;  %s800_s18 = smov (!%p163_p3, %s515_s18), 63  ;;  %vm212_vm0 = vcmask 130048  }
   0xc   : > { %554 = vmatpush.msra.mxu2 %v207_v0  ;;  %555 = vmatpush.msra.mxu3 %v207_v0  ;;  %s516_s19 = sshll.u32 %s800_s18, 3  ;;  %v687_v34 = vld [vmem:[%s797_s2] ss:$0 sm:$0xff] }
   0xd   : > { %323 = vmatpush.msra.mxu0 %v207_v0  ;;  %553 = vmatpush.msra.mxu1 %v207_v0  ;;  %s618_s22 = scalar_lea.vmem %s795_s0, %s516_s19  ;;  %s694_s27 = scalar_lea.vmem %s798_s3, %s516_s19 }
   0xe   : > { %557 = vmatpush.msra.mxu2 %v206_v1  ;;  %558 = vmatpush.msra.mxu3 %v206_v1  ;;  %v190_v2 = vld [vmem:[%s618_s22 + $0x80] sm:$0xff]  ;;  %v191_v6 = vld [vmem:[%s618_s22 + $0x88] sm:$0xff]  ;;  %v192_v10 = vld [vmem:[%s618_s22 + $0x90] sm:$0xff] }
   0xf   : > { %324 = vmatpush.msra.mxu0 %v206_v1  ;;  %556 = vmatpush.msra.mxu1 %v206_v1  ;;  %v198_v3 = vld [vmem:[%s618_s22 + $0xc0] sm:$0xff]  ;;  %v199_v7 = vld [vmem:[%s618_s22 + $0xc8] sm:$0xff]  ;;  %v200_v11 = vld [vmem:[%s618_s22 + $0xd0] sm:$0xff] }
  0x10   : > { %v174_v4 = vld [vmem:[%s618_s22] sm:$0xff]  ;;  %535 = vmatmul.msk.f32.vlgmr.msra.gmra.mxu2 %vm212_vm0, %v190_v2  ;;  %543 = vmatmul.msk.f32.vlgmr.msra.gmra.mxu3 %vm212_vm0, %v198_v3  ;;  %v175_v8 = vld [vmem:[%s618_s22 + $0x8] sm:$0xff]  ;;  %v176_v12 = vld [vmem:[%s618_s22 + $0x10] sm:$0xff] }
  0x11   : > { %v182_v5 = vld [vmem:[%s618_s22 + $0x40] sm:$0xff]  ;;  %519 = vmatmul.msk.f32.vlgmr.msra.gmra.mxu0 %vm212_vm0, %v174_v4  ;;  %v183_v9 = vld [vmem:[%s618_s22 + $0x48] sm:$0xff]  ;;  %v184_v13 = vld [vmem:[%s618_s22 + $0x50] sm:$0xff] }
  0x12   : > { %527 = vmatmul.msk.f32.vlgmr.msra.gmra.mxu1 %vm212_vm0, %v182_v5  ;;  %v193_v14 = vld [vmem:[%s618_s22 + $0x98] sm:$0xff]  ;;  %v194_v18 = vld [vmem:[%s618_s22 + $0xa0] sm:$0xff]  ;;  %v195_v22 = vld [vmem:[%s618_s22 + $0xa8] sm:$0xff] }
  0x13   : > { %v201_v15 = vld [vmem:[%s618_s22 + $0xd8] sm:$0xff]  ;;  %v202_v19 = vld [vmem:[%s618_s22 + $0xe0] sm:$0xff]  ;;  %v203_v23 = vld [vmem:[%s618_s22 + $0xe8] sm:$0xff] }
  0x14   : > { %v177_v16 = vld [vmem:[%s618_s22 + $0x18] sm:$0xff]  ;;  %v178_v20 = vld [vmem:[%s618_s22 + $0x20] sm:$0xff]  ;;  %v179_v24 = vld [vmem:[%s618_s22 + $0x28] sm:$0xff] }
  0x15   : > { %v185_v17 = vld [vmem:[%s618_s22 + $0x58] sm:$0xff]  ;;  %v186_v21 = vld [vmem:[%s618_s22 + $0x60] sm:$0xff]  ;;  %v187_v25 = vld [vmem:[%s618_s22 + $0x68] sm:$0xff] }
  0x16   : > { %v196_v26 = vld [vmem:[%s618_s22 + $0xb0] sm:$0xff]  ;;  %v197_v30 = vld [vmem:[%s618_s22 + $0xb8] sm:$0xff] }
  0x17   : > { %v204_v27 = vld [vmem:[%s618_s22 + $0xf0] sm:$0xff]  ;;  %v205_v31 = vld [vmem:[%s618_s22 + $0xf8] sm:$0xff] }
  0x18   : > { %536 = vmatmul.msk.f32.gmra.mxu2 %vm212_vm0, %v191_v6  ;;  %544 = vmatmul.msk.f32.gmra.mxu3 %vm212_vm0, %v199_v7  ;;  %v180_v28 = vld [vmem:[%s618_s22 + $0x30] sm:$0xff]  ;;  %v181_v32 = vld [vmem:[%s618_s22 + $0x38] sm:$0xff] }
  0x19   : > { %520 = vmatmul.msk.f32.gmra.mxu0 %vm212_vm0, %v175_v8  ;;  %v188_v29 = vld [vmem:[%s618_s22 + $0x70] sm:$0xff]  ;;  %v189_v33 = vld [vmem:[%s618_s22 + $0x78] sm:$0xff] }
  0x1a   : > { %528 = vmatmul.msk.f32.gmra.mxu1 %vm212_vm0, %v183_v9 }
  0x20   : > { %537 = vmatmul.msk.f32.gmra.mxu2 %vm212_vm0, %v192_v10  ;;  %545 = vmatmul.msk.f32.gmra.mxu3 %vm212_vm0, %v200_v11 }
  0x21   : > { %521 = vmatmul.msk.f32.gmra.mxu0 %vm212_vm0, %v176_v12 }
  0x22   : > { %529 = vmatmul.msk.f32.gmra.mxu1 %vm212_vm0, %v184_v13 }
  0x28   : > { %538 = vmatmul.msk.f32.gmra.mxu2 %vm212_vm0, %v193_v14  ;;  %546 = vmatmul.msk.f32.gmra.mxu3 %vm212_vm0, %v201_v15 }
  0x29   : > { %522 = vmatmul.msk.f32.gmra.mxu0 %vm212_vm0, %v177_v16 }
  0x2a   : > { %530 = vmatmul.msk.f32.gmra.mxu1 %vm212_vm0, %v185_v17 }
  0x30   : > { %539 = vmatmul.msk.f32.gmra.mxu2 %vm212_vm0, %v194_v18  ;;  %547 = vmatmul.msk.f32.gmra.mxu3 %vm212_vm0, %v202_v19 }
  0x31   : > { %523 = vmatmul.msk.f32.gmra.mxu0 %vm212_vm0, %v178_v20 }
  0x32   : > { %531 = vmatmul.msk.f32.gmra.mxu1 %vm212_vm0, %v186_v21 }
  0x38   : > { %540 = vmatmul.msk.f32.gmra.mxu2 %vm212_vm0, %v195_v22  ;;  %548 = vmatmul.msk.f32.gmra.mxu3 %vm212_vm0, %v203_v23 }
  0x39   : > { %524 = vmatmul.msk.f32.gmra.mxu0 %vm212_vm0, %v179_v24 }
  0x3a   : > { %532 = vmatmul.msk.f32.gmra.mxu1 %vm212_vm0, %v187_v25 }
  0x40   : > { %541 = vmatmul.msk.f32.gmra.mxu2 %vm212_vm0, %v196_v26  ;;  %549 = vmatmul.msk.f32.gmra.mxu3 %vm212_vm0, %v204_v27 }
  0x41   : > { %525 = vmatmul.msk.f32.gmra.mxu0 %vm212_vm0, %v180_v28 }
  0x42   : > { %533 = vmatmul.msk.f32.gmra.mxu1 %vm212_vm0, %v188_v29 }
  0x48   : > { %542 = vmatmul.msk.f32.gmra.mxu2 %vm212_vm0, %v197_v30  ;;  %550 = vmatmul.msk.f32.gmra.mxu3 %vm212_vm0, %v205_v31 }
  0x49   : > { %526 = vmatmul.msk.f32.gmra.mxu0 %vm212_vm0, %v181_v32 }
  0x4a   : > { %534 = vmatmul.msk.f32.gmra.mxu1 %vm212_vm0, %v189_v33 }
  0x8e   : > { %v326_v35 = vpop.f32.mrf.mxu0 }
  0x8f   : > { %v350_v36 = vpop.f32.mrf.mxu1  ;;  %v327_v37 = vadd.f32 %v687_v34, %v326_v35 }
  0x90   : > { %v351_v38 = vadd.f32 %v687_v34, %v350_v36 }
  0x91   : > { %422 = vst.msk [vmem:[%s694_s27] sm:$0xff] %vm212_vm0, %v327_v37 }
  0x92   : > { %430 = vst.msk [vmem:[%s694_s27 + $0x40] sm:$0xff] %vm212_vm0, %v351_v38 }
  0x93   : > { %v374_v39 = vpop.f32.mrf.mxu2  ;;  %v398_v40 = vpop.f32.mrf.mxu3 }
  0x94   : > { %v375_v41 = vadd.f32 %v687_v34, %v374_v39  ;;  %v399_v42 = vadd.f32 %v687_v34, %v398_v40 }
  0x96   : > { %438 = vst.msk [vmem:[%s694_s27 + $0x80] sm:$0xff] %vm212_vm0, %v375_v41  ;;  %v329_v43 = vpop.f32.mrf.mxu0 }
  0x97   : > { %v353_v44 = vpop.f32.mrf.mxu1  ;;  %446 = vst.msk [vmem:[%s694_s27 + $0xc0] sm:$0xff] %vm212_vm0, %v399_v42  ;;  %v330_v45 = vadd.f32 %v687_v34, %v329_v43 }
  0x98   : > { %v354_v46 = vadd.f32 %v687_v34, %v353_v44 }
  0x99   : > { %423 = vst.msk [vmem:[%s694_s27 + $0x8] sm:$0xff] %vm212_vm0, %v330_v45 }
  0x9a   : > { %431 = vst.msk [vmem:[%s694_s27 + $0x48] sm:$0xff] %vm212_vm0, %v354_v46 }
  0x9b   : > { %v377_v47 = vpop.f32.mrf.mxu2  ;;  %v401_v48 = vpop.f32.mrf.mxu3 }
  0x9c   : > { %v378_v49 = vadd.f32 %v687_v34, %v377_v47  ;;  %v402_v50 = vadd.f32 %v687_v34, %v401_v48 }
  0x9e   : > { %439 = vst.msk [vmem:[%s694_s27 + $0x88] sm:$0xff] %vm212_vm0, %v378_v49  ;;  %v332_v51 = vpop.f32.mrf.mxu0 }
  0x9f   : > { %v356_v52 = vpop.f32.mrf.mxu1  ;;  %447 = vst.msk [vmem:[%s694_s27 + $0xc8] sm:$0xff] %vm212_vm0, %v402_v50  ;;  %v333_v53 = vadd.f32 %v687_v34, %v332_v51 }
  0xa0   : > { %v357_v54 = vadd.f32 %v687_v34, %v356_v52 }
  0xa1   : > { %424 = vst.msk [vmem:[%s694_s27 + $0x10] sm:$0xff] %vm212_vm0, %v333_v53 }
  0xa2   : > { %432 = vst.msk [vmem:[%s694_s27 + $0x50] sm:$0xff] %vm212_vm0, %v357_v54 }
  0xa3   : > { %v380_v55 = vpop.f32.mrf.mxu2  ;;  %v404_v56 = vpop.f32.mrf.mxu3 }
  0xa4   : > { %v381_v57 = vadd.f32 %v687_v34, %v380_v55  ;;  %v405_v58 = vadd.f32 %v687_v34, %v404_v56 }
  0xa6   : > { %440 = vst.msk [vmem:[%s694_s27 + $0x90] sm:$0xff] %vm212_vm0, %v381_v57  ;;  %v335_v59 = vpop.f32.mrf.mxu0 }
  0xa7   : > { %v359_v60 = vpop.f32.mrf.mxu1  ;;  %448 = vst.msk [vmem:[%s694_s27 + $0xd0] sm:$0xff] %vm212_vm0, %v405_v58  ;;  %v336_v61 = vadd.f32 %v687_v34, %v335_v59 }
  0xa8   : > { %v360_v62 = vadd.f32 %v687_v34, %v359_v60 }
  0xa9   : > { %425 = vst.msk [vmem:[%s694_s27 + $0x18] sm:$0xff] %vm212_vm0, %v336_v61 }
  0xaa   : > { %433 = vst.msk [vmem:[%s694_s27 + $0x58] sm:$0xff] %vm212_vm0, %v360_v62 }
  0xab   : > { %v383_v63 = vpop.f32.mrf.mxu2  ;;  %v407_v0 = vpop.f32.mrf.mxu3 }
  0xac   : > { %v384_v1 = vadd.f32 %v687_v34, %v383_v63  ;;  %v408_v2 = vadd.f32 %v687_v34, %v407_v0 }
  0xae   : > { %441 = vst.msk [vmem:[%s694_s27 + $0x98] sm:$0xff] %vm212_vm0, %v384_v1  ;;  %v338_v3 = vpop.f32.mrf.mxu0 }
  0xaf   : > { %v362_v4 = vpop.f32.mrf.mxu1  ;;  %449 = vst.msk [vmem:[%s694_s27 + $0xd8] sm:$0xff] %vm212_vm0, %v408_v2  ;;  %v339_v5 = vadd.f32 %v687_v34, %v338_v3 }
  0xb0   : > { %v363_v6 = vadd.f32 %v687_v34, %v362_v4 }
  0xb1   : > { %426 = vst.msk [vmem:[%s694_s27 + $0x20] sm:$0xff] %vm212_vm0, %v339_v5 }
  0xb2   : > { %434 = vst.msk [vmem:[%s694_s27 + $0x60] sm:$0xff] %vm212_vm0, %v363_v6 }
  0xb3   : > { %v386_v7 = vpop.f32.mrf.mxu2  ;;  %v410_v8 = vpop.f32.mrf.mxu3 }
  0xb4   : > { %v387_v9 = vadd.f32 %v687_v34, %v386_v7  ;;  %v411_v10 = vadd.f32 %v687_v34, %v410_v8 }
  0xb6   : > { %442 = vst.msk [vmem:[%s694_s27 + $0xa0] sm:$0xff] %vm212_vm0, %v387_v9  ;;  %v341_v11 = vpop.f32.mrf.mxu0 }
  0xb7   : > { %v365_v12 = vpop.f32.mrf.mxu1  ;;  %450 = vst.msk [vmem:[%s694_s27 + $0xe0] sm:$0xff] %vm212_vm0, %v411_v10  ;;  %v342_v13 = vadd.f32 %v687_v34, %v341_v11 }
  0xb8   : > { %v366_v14 = vadd.f32 %v687_v34, %v365_v12 }
  0xb9   : > { %427 = vst.msk [vmem:[%s694_s27 + $0x28] sm:$0xff] %vm212_vm0, %v342_v13 }
  0xba   : > { %435 = vst.msk [vmem:[%s694_s27 + $0x68] sm:$0xff] %vm212_vm0, %v366_v14 }
  0xbb   : > { %v389_v15 = vpop.f32.mrf.mxu2  ;;  %v413_v16 = vpop.f32.mrf.mxu3 }
  0xbc   : > { %v390_v17 = vadd.f32 %v687_v34, %v389_v15  ;;  %v414_v18 = vadd.f32 %v687_v34, %v413_v16 }
  0xbe   : > { %443 = vst.msk [vmem:[%s694_s27 + $0xa8] sm:$0xff] %vm212_vm0, %v390_v17  ;;  %v344_v19 = vpop.f32.mrf.mxu0 }
  0xbf   : > { %v368_v20 = vpop.f32.mrf.mxu1  ;;  %451 = vst.msk [vmem:[%s694_s27 + $0xe8] sm:$0xff] %vm212_vm0, %v414_v18  ;;  %v345_v21 = vadd.f32 %v687_v34, %v344_v19 }
  0xc0   : > { %v369_v22 = vadd.f32 %v687_v34, %v368_v20 }
  0xc1   : > { %428 = vst.msk [vmem:[%s694_s27 + $0x30] sm:$0xff] %vm212_vm0, %v345_v21 }
  0xc2   : > { %436 = vst.msk [vmem:[%s694_s27 + $0x70] sm:$0xff] %vm212_vm0, %v369_v22 }
  0xc3   : > { %v392_v23 = vpop.f32.mrf.mxu2  ;;  %v416_v24 = vpop.f32.mrf.mxu3 }
  0xc4   : > { %v393_v25 = vadd.f32 %v687_v34, %v392_v23  ;;  %v417_v26 = vadd.f32 %v687_v34, %v416_v24 }
  0xc6   : > { %444 = vst.msk [vmem:[%s694_s27 + $0xb0] sm:$0xff] %vm212_vm0, %v393_v25  ;;  %v347_v27 = vpop.f32.mrf.mxu0 }
  0xc7   : > { %v371_v28 = vpop.f32.mrf.mxu1  ;;  %452 = vst.msk [vmem:[%s694_s27 + $0xf0] sm:$0xff] %vm212_vm0, %v417_v26  ;;  %v348_v29 = vadd.f32 %v687_v34, %v347_v27 }
  0xc8   : > { %v372_v30 = vadd.f32 %v687_v34, %v371_v28 }
  0xc9   : > { %429 = vst.msk [vmem:[%s694_s27 + $0x38] sm:$0xff] %vm212_vm0, %v348_v29 }
  0xca   : > { %437 = vst.msk [vmem:[%s694_s27 + $0x78] sm:$0xff] %vm212_vm0, %v372_v30 }
  0xcb   : > { %v395_v31 = vpop.f32.mrf.mxu2  ;;  %v419_v32 = vpop.f32.mrf.mxu3 }
  0xcc   : > { %v396_v33 = vadd.f32 %v687_v34, %v395_v31  ;;  %v420_v35 = vadd.f32 %v687_v34, %v419_v32 }
  0xce   : > { %445 = vst.msk [vmem:[%s694_s27 + $0xb8] sm:$0xff] %vm212_vm0, %v396_v33 }
  0xcf   : > { %453 = vst.msk [vmem:[%s694_s27 + $0xf8] sm:$0xff] %vm212_vm0, %v420_v35 }
  0xd0 PF: > { %s13_s12 = sadd.s32 1, %s574_s12  }
  0xd1   : > { %p10_p4 = scmp.ge.s32.totalorder %s13_s12, 4  }
  0xd3   :  { %12 = sbr.rel (!%p10_p4) target bundleno = 1 (0x1), region = 62 }

// kernel: forward.30
= control target key start
LH: loop header
LB: loop body
LE: loop exit
PB: predicated region body
PF: predicated region fallthrough
CT: control target
= control target key end

     0   :  { %s790_s12 = smov 0   ;;  %s1086_s0 = inlined_call_operand.vmem [shape: f32[512,144], index: 0, kind: input, shape index: {}]   ;;  %s1087_s1 = inlined_call_operand.vmem [shape: f32[144,16], index: 1, kind: input, shape index: {}]   ;;  %s1088_s2 = inlined_call_operand.vmem [shape: f32[1,16], index: 2, kind: input, shape index: {}]   ;;  %s1089_s3 = inlined_call_operand.vmem [shape: f32[512,16], index: 3, kind: output, shape index: {}]  }
   0x1 LB: > { %s674_s13 = sadd.s32 4294967295, %s768_s12   ;;  %p678_p0 = scmp.ge.s32.totalorder %s768_s12, 1  ;;  %s768_s12 = sphi %s790_s12, %s13_s12  }
   0x2   : > { %p139_p1 = scmp.lt.s32.totalorder %s768_s12, 3 }
   0x4   : > { %p140_p2 = pnand %p678_p0, %p139_p1 }
   0x5   : > { %s679_s18 = sshll.u32 (!%p140_p2), %s674_s13, 5 }
   0x6   : > { %143 = sbr.rel (%p140_p2) target bundleno = 301 (0x12d), region = 32  ;;  %p165_p3 = scmp.lt.s32.totalorder (!%p140_p2), %s679_s18, 63 }
   0xb   : > { %v256_v0 = vld [vmem:[%s1087_s1 + $0x78] sm:$0xff]  ;;  %v255_v1 = vld [vmem:[%s1087_s1 + $0x70] sm:$0xff]  ;;  %v807_v2 = vld [vmem:[%s1087_s1 + $0x88] sm:$0xff]  ;;  %s1091_s18 = smov (!%p165_p3, %s679_s18), 63  ;;  %vm263_vm0 = vcmask 130048  }
   0xc   : > { %360 = vmatpush.msra.mxu0 %v256_v0  ;;  %719 = vmatpush.msra.mxu2 %v256_v0  ;;  %v812_v3 = vld [vmem:[%s1087_s1 + $0x80] sm:$0xff]  ;;  %v254_v4 = vld [vmem:[%s1087_s1 + $0x68] sm:$0xff]  ;;  %s718_s27 = sshll.u32 %s1091_s18, 4  ;;  %v252_v6 = vld [vmem:[%s1087_s1 + $0x58] sm:$0xff]  ;;  %s683_s6 = sshll.u32 %s1091_s18, 3 }
   0xd   : > { %720 = vmatpush.msra.mxu3 %v256_v0  ;;  %487 = vmatpush.msra.mxu1 %v807_v2  ;;  %v253_v5 = vld [vmem:[%s1087_s1 + $0x60] sm:$0xff]  ;;  %s828_s30 = scalar_lea.vmem %s1086_s0, %s718_s27  ;;  %v251_v8 = vld [vmem:[%s1087_s1 + $0x50] sm:$0xff]  ;;  %v250_v9 = vld [vmem:[%s1087_s1 + $0x48] sm:$0xff]  ;;  %s974_s9 = scalar_lea.vmem %s1089_s3, %s683_s6 }
   0xe   : > { %361 = vmatpush.msra.mxu0 %v255_v1  ;;  %721 = vmatpush.msra.mxu2 %v255_v1  ;;  %v178_v7 = vld [vmem:[%s828_s30 + $0x8] sm:$0xff]  ;;  %v249_v10 = vld [vmem:[%s1087_s1 + $0x40] sm:$0xff]  ;;  %v180_v11 = vld [vmem:[%s828_s30 + $0x18] sm:$0xff] }
   0xf   : > { %722 = vmatpush.msra.mxu3 %v255_v1  ;;  %488 = vmatpush.msra.mxu1 %v812_v3  ;;  %v248_v12 = vld [vmem:[%s1087_s1 + $0x38] sm:$0xff]  ;;  %v247_v13 = vld [vmem:[%s1087_s1 + $0x30] sm:$0xff]  ;;  %v246_v14 = vld [vmem:[%s1087_s1 + $0x28] sm:$0xff] }
  0x10   : > { %362 = vmatpush.msra.mxu0 %v254_v4  ;;  %723 = vmatpush.msra.mxu2 %v254_v4  ;;  %v245_v15 = vld [vmem:[%s1087_s1 + $0x20] sm:$0xff]  ;;  %v182_v16 = vld [vmem:[%s828_s30 + $0x28] sm:$0xff]  ;;  %v244_v17 = vld [vmem:[%s1087_s1 + $0x18] sm:$0xff] }
  0x11   : > { %724 = vmatpush.msra.mxu3 %v254_v4  ;;  %684 = vmatmul.msk.f32.vlgmr.msra.gmra.mxu1 %vm263_vm0, %v178_v7  ;;  %v243_v18 = vld [vmem:[%s1087_s1 + $0x10] sm:$0xff]  ;;  %v242_v19 = vld [vmem:[%s1087_s1 + $0x8] sm:$0xff]  ;;  %v241_v20 = vld [vmem:[%s1087_s1] sm:$0xff] }
  0x12   : > { %363 = vmatpush.msra.mxu0 %v253_v5  ;;  %725 = vmatpush.msra.mxu2 %v253_v5  ;;  %v177_v21 = vld [vmem:[%s828_s30] sm:$0xff]  ;;  %v207_v22 = vld [vmem:[%s828_s30 + $0xf0] sm:$0xff]  ;;  %v184_v24 = vld [vmem:[%s828_s30 + $0x38] sm:$0xff] }
  0x13   : > { %726 = vmatpush.msra.mxu3 %v253_v5  ;;  %v239_v23 = vld [vmem:[%s828_s30 + $0x1f0] sm:$0xff]  ;;  %v209_v26 = vld [vmem:[%s828_s30 + $0x100] sm:$0xff]  ;;  %v214_v27 = vld [vmem:[%s828_s30 + $0x128] sm:$0xff] }
  0x14   : > { %364 = vmatpush.msra.mxu0 %v252_v6  ;;  %727 = vmatpush.msra.mxu2 %v252_v6  ;;  %v179_v25 = vld [vmem:[%s828_s30 + $0x10] sm:$0xff]  ;;  %v186_v28 = vld [vmem:[%s828_s30 + $0x48] sm:$0xff]  ;;  %v181_v29 = vld [vmem:[%s828_s30 + $0x20] sm:$0xff] }
  0x15   : > { %728 = vmatpush.msra.mxu3 %v252_v6  ;;  %v211_v30 = vld [vmem:[%s828_s30 + $0x110] sm:$0xff]  ;;  %v216_v31 = vld [vmem:[%s828_s30 + $0x138] sm:$0xff]  ;;  %v213_v34 = vld [vmem:[%s828_s30 + $0x120] sm:$0xff] }
  0x16   : > { %365 = vmatpush.msra.mxu0 %v251_v8  ;;  %729 = vmatpush.msra.mxu2 %v251_v8  ;;  %v188_v32 = vld [vmem:[%s828_s30 + $0x58] sm:$0xff]  ;;  %v183_v33 = vld [vmem:[%s828_s30 + $0x30] sm:$0xff]  ;;  %v218_v35 = vld [vmem:[%s828_s30 + $0x148] sm:$0xff] }
  0x17   : > { %730 = vmatpush.msra.mxu3 %v251_v8  ;;  %v190_v36 = vld [vmem:[%s828_s30 + $0x68] sm:$0xff]  ;;  %v185_v37 = vld [vmem:[%s828_s30 + $0x40] sm:$0xff]  ;;  %v215_v38 = vld [vmem:[%s828_s30 + $0x130] sm:$0xff] }
  0x18   : > { %366 = vmatpush.msra.mxu0 %v250_v9  ;;  %731 = vmatpush.msra.mxu2 %v250_v9  ;;  %v220_v39 = vld [vmem:[%s828_s30 + $0x158] sm:$0xff]  ;;  %v187_v41 = vld [vmem:[%s828_s30 + $0x50] sm:$0xff]  ;;  %v217_v42 = vld [vmem:[%s828_s30 + $0x140] sm:$0xff] }
  0x19   : > { %732 = vmatpush.msra.mxu3 %v250_v9  ;;  %685 = vmatmul.msk.f32.gmra.mxu1 %vm263_vm0, %v180_v11  ;;  %v192_v40 = vld [vmem:[%s828_s30 + $0x78] sm:$0xff]  ;;  %v222_v43 = vld [vmem:[%s828_s30 + $0x168] sm:$0xff]  ;;  %v189_v45 = vld [vmem:[%s828_s30 + $0x60] sm:$0xff] }
  0x1a   : > { %367 = vmatpush.msra.mxu0 %v249_v10  ;;  %733 = vmatpush.msra.mxu2 %v249_v10  ;;  %v194_v44 = vld [vmem:[%s828_s30 + $0x88] sm:$0xff]  ;;  %v219_v46 = vld [vmem:[%s828_s30 + $0x150] sm:$0xff]  ;;  %v224_v47 = vld [vmem:[%s828_s30 + $0x178] sm:$0xff] }
  0x1b   : > { %734 = vmatpush.msra.mxu3 %v249_v10  ;;  %v196_v48 = vld [vmem:[%s828_s30 + $0x98] sm:$0xff]  ;;  %v191_v49 = vld [vmem:[%s828_s30 + $0x70] sm:$0xff]  ;;  %v221_v50 = vld [vmem:[%s828_s30 + $0x160] sm:$0xff] }
  0x1c   : > { %368 = vmatpush.msra.mxu0 %v248_v12  ;;  %735 = vmatpush.msra.mxu2 %v248_v12  ;;  %v226_v51 = vld [vmem:[%s828_s30 + $0x188] sm:$0xff]  ;;  %v193_v53 = vld [vmem:[%s828_s30 + $0x80] sm:$0xff]  ;;  %v223_v54 = vld [vmem:[%s828_s30 + $0x170] sm:$0xff] }
  0x1d   : > { %736 = vmatpush.msra.mxu3 %v248_v12  ;;  %v198_v52 = vld [vmem:[%s828_s30 + $0xa8] sm:$0xff]  ;;  %v228_v55 = vld [vmem:[%s828_s30 + $0x198] sm:$0xff]  ;;  %v195_v57 = vld [vmem:[%s828_s30 + $0x90] sm:$0xff] }
  0x1e   : > { %369 = vmatpush.msra.mxu0 %v247_v13  ;;  %737 = vmatpush.msra.mxu2 %v247_v13  ;;  %v200_v56 = vld [vmem:[%s828_s30 + $0xb8] sm:$0xff]  ;;  %v225_v58 = vld [vmem:[%s828_s30 + $0x180] sm:$0xff]  ;;  %v230_v59 = vld [vmem:[%s828_s30 + $0x1a8] sm:$0xff] }
  0x1f   : > { %738 = vmatpush.msra.mxu3 %v247_v13  ;;  %v202_v60 = vld [vmem:[%s828_s30 + $0xc8] sm:$0xff]  ;;  %v197_v61 = vld [vmem:[%s828_s30 + $0xa0] sm:$0xff]  ;;  %v227_v62 = vld [vmem:[%s828_s30 + $0x190] sm:$0xff] }
  0x20   : > { %370 = vmatpush.msra.mxu0 %v246_v14  ;;  %739 = vmatpush.msra.mxu2 %v246_v14  ;;  %v232_v63 = vld [vmem:[%s828_s30 + $0x1b8] sm:$0xff]  ;;  %v199_v1 = vld [vmem:[%s828_s30 + $0xb0] sm:$0xff]  ;;  %v206_v4 = vld [vmem:[%s828_s30 + $0xe8] sm:$0xff] }
  0x21   : > { %740 = vmatpush.msra.mxu3 %v246_v14  ;;  %686 = vmatmul.msk.f32.gmra.mxu1 %vm263_vm0, %v182_v16  ;;  %v204_v0 = vld [vmem:[%s828_s30 + $0xd8] sm:$0xff]  ;;  %v201_v5 = vld [vmem:[%s828_s30 + $0xc0] sm:$0xff]  ;;  %v231_v6 = vld [vmem:[%s828_s30 + $0x1b0] sm:$0xff] }
  0x22   : > { %371 = vmatpush.msra.mxu0 %v245_v15  ;;  %741 = vmatpush.msra.mxu2 %v245_v15  ;;  %v236_v7 = vld [vmem:[%s828_s30 + $0x1d8] sm:$0xff]  ;;  %v203_v10 = vld [vmem:[%s828_s30 + $0xd0] sm:$0xff]  ;;  %v233_v11 = vld [vmem:[%s828_s30 + $0x1c0] sm:$0xff] }
  0x23   : > { %742 = vmatpush.msra.mxu3 %v245_v15  ;;  %v208_v8 = vld [vmem:[%s828_s30 + $0xf8] sm:$0xff]  ;;  %v238_v12 = vld [vmem:[%s828_s30 + $0x1e8] sm:$0xff]  ;;  %v205_v15 = vld [vmem:[%s828_s30 + $0xe0] sm:$0xff] }
  0x24   : > { %372 = vmatpush.msra.mxu0 %v244_v17  ;;  %743 = vmatpush.msra.mxu2 %v244_v17  ;;  %v210_v13 = vld [vmem:[%s828_s30 + $0x108] sm:$0xff]  ;;  %v235_v16 = vld [vmem:[%s828_s30 + $0x1d0] sm:$0xff] }
  0x25   : > { %744 = vmatpush.msra.mxu3 %v244_v17  ;;  %v240_v17 = vld [vmem:[%s828_s30 + $0x1f8] sm:$0xff] }
  0x26   : > { %373 = vmatpush.msra.mxu0 %v243_v18  ;;  %745 = vmatpush.msra.mxu2 %v243_v18 }
  0x27   : > { %746 = vmatpush.msra.mxu3 %v243_v18  ;;  %v212_v18 = vld [vmem:[%s828_s30 + $0x118] sm:$0xff] }
  0x28   : > { %374 = vmatpush.msra.mxu0 %v242_v19  ;;  %747 = vmatpush.msra.mxu2 %v242_v19 }
  0x29   : > { %748 = vmatpush.msra.mxu3 %v242_v19  ;;  %687 = vmatmul.msk.f32.gmra.mxu1 %vm263_vm0, %v184_v24 }
  0x2a   : > { %375 = vmatpush.msra.mxu0 %v241_v20  ;;  %749 = vmatpush.msra.mxu2 %v241_v20 }
  0x2b   : > { %750 = vmatpush.msra.mxu3 %v241_v20  ;;  %376 = vmatmul.f32.vlgmr.msra.gmra.mxu0 %v177_v21  ;;  %v237_v20 = vld [vmem:[%s828_s30 + $0x1e0] sm:$0xff] }
  0x2c   : > { %421 = vmatmul.f32.vlgmr.msra.gmra.mxu2 %v207_v22  ;;  %469 = vmatmul.f32.vlgmr.msra.gmra.mxu3 %v239_v23  ;;  %v967_v21 = vld [vmem:[%s1088_s2] ss:$0 sm:$0xff] }
  0x2d   : > { %751 = vmatpush.msrb.mxu3 %v807_v2  ;;  %v229_v2 = vld [vmem:[%s828_s30 + $0x1a0] sm:$0xff] }
  0x2f   : > { %752 = vmatpush.msrb.mxu3 %v812_v3  ;;  %v234_v3 = vld [vmem:[%s828_s30 + $0x1c8] sm:$0xff] }
  0x31   : > { %688 = vmatmul.msk.f32.gmra.mxu1 %vm263_vm0, %v186_v28 }
  0x33   : > { %379 = vmatmul.f32.gmra.mxu0 %v179_v25 }
  0x34   : > { %424 = vmatmul.f32.gmra.mxu2 %v209_v26  ;;  %702 = vmatmul.msk.f32.vlgmr.msrb.gmra.mxu3 %vm263_vm0, %v214_v27 }
  0x39   : > { %689 = vmatmul.msk.f32.gmra.mxu1 %vm263_vm0, %v188_v32 }
  0x3b   : > { %382 = vmatmul.f32.gmra.mxu0 %v181_v29 }
  0x3c   : > { %427 = vmatmul.f32.gmra.mxu2 %v211_v30  ;;  %703 = vmatmul.msk.f32.gmra.mxu3 %vm263_vm0, %v216_v31 }
  0x41   : > { %690 = vmatmul.msk.f32.gmra.mxu1 %vm263_vm0, %v190_v36 }
  0x43   : > { %385 = vmatmul.f32.gmra.mxu0 %v183_v33 }
  0x44   : > { %430 = vmatmul.f32.gmra.mxu2 %v213_v34  ;;  %704 = vmatmul.msk.f32.gmra.mxu3 %vm263_vm0, %v218_v35 }
  0x49   : > { %691 = vmatmul.msk.f32.gmra.mxu1 %vm263_vm0, %v192_v40 }
  0x4b   : > { %388 = vmatmul.f32.gmra.mxu0 %v185_v37 }
  0x4c   : > { %433 = vmatmul.f32.gmra.mxu2 %v215_v38  ;;  %705 = vmatmul.msk.f32.gmra.mxu3 %vm263_vm0, %v220_v39 }
  0x51   : > { %692 = vmatmul.msk.f32.gmra.mxu1 %vm263_vm0, %v194_v44 }
  0x53   : > { %391 = vmatmul.f32.gmra.mxu0 %v187_v41 }
  0x54   : > { %436 = vmatmul.f32.gmra.mxu2 %v217_v42  ;;  %706 = vmatmul.msk.f32.gmra.mxu3 %vm263_vm0, %v222_v43 }
  0x59   : > { %693 = vmatmul.msk.f32.gmra.mxu1 %vm263_vm0, %v196_v48 }
  0x5b   : > { %394 = vmatmul.f32.gmra.mxu0 %v189_v45 }
  0x5c   : > { %439 = vmatmul.f32.gmra.mxu2 %v219_v46  ;;  %707 = vmatmul.msk.f32.gmra.mxu3 %vm263_vm0, %v224_v47 }
  0x61   : > { %694 = vmatmul.msk.f32.gmra.mxu1 %vm263_vm0, %v198_v52 }
  0x63   : > { %397 = vmatmul.f32.gmra.mxu0 %v191_v49 }
  0x64   : > { %442 = vmatmul.f32.gmra.mxu2 %v221_v50  ;;  %708 = vmatmul.msk.f32.gmra.mxu3 %vm263_vm0, %v226_v51 }
  0x69   : > { %695 = vmatmul.msk.f32.gmra.mxu1 %vm263_vm0, %v200_v56 }
  0x6b   : > { %400 = vmatmul.f32.gmra.mxu0 %v193_v53 }
  0x6c   : > { %445 = vmatmul.f32.gmra.mxu2 %v223_v54  ;;  %709 = vmatmul.msk.f32.gmra.mxu3 %vm263_vm0, %v228_v55 }
  0x71   : > { %696 = vmatmul.msk.f32.gmra.mxu1 %vm263_vm0, %v202_v60 }
  0x73   : > { %403 = vmatmul.f32.gmra.mxu0 %v195_v57 }
  0x74   : > { %448 = vmatmul.f32.gmra.mxu2 %v225_v58  ;;  %710 = vmatmul.msk.f32.gmra.mxu3 %vm263_vm0, %v230_v59 }
  0x79   : > { %697 = vmatmul.msk.f32.gmra.mxu1 %vm263_vm0, %v204_v0 }
  0x7b   : > { %406 = vmatmul.f32.gmra.mxu0 %v197_v61 }
  0x7c   : > { %451 = vmatmul.f32.gmra.mxu2 %v227_v62  ;;  %711 = vmatmul.msk.f32.gmra.mxu3 %vm263_vm0, %v232_v63 }
  0x81   : > { %698 = vmatmul.msk.f32.gmra.mxu1 %vm263_vm0, %v206_v4 }
  0x83   : > { %409 = vmatmul.f32.gmra.mxu0 %v199_v1 }
  0x84   : > { %454 = vmatmul.f32.gmra.mxu2 %v229_v2  ;;  %712 = vmatmul.msk.f32.gmra.mxu3 %vm263_vm0, %v234_v3 }
  0x89   : > { %699 = vmatmul.msk.f32.gmra.mxu1 %vm263_vm0, %v208_v8 }
  0x8b   : > { %412 = vmatmul.f32.gmra.mxu0 %v201_v5 }
  0x8c   : > { %457 = vmatmul.f32.gmra.mxu2 %v231_v6  ;;  %713 = vmatmul.msk.f32.gmra.mxu3 %vm263_vm0, %v236_v7 }
  0x8e   : > { %v490_v9 = vpop.f32.mrf.mxu1 }
  0x91   : > { %700 = vmatmul.msk.f32.gmra.mxu1 %vm263_vm0, %v210_v13 }
  0x93   : > { %415 = vmatmul.f32.gmra.mxu0 %v203_v10 }
  0x94   : > { %460 = vmatmul.f32.gmra.mxu2 %v233_v11  ;;  %714 = vmatmul.msk.f32.gmra.mxu3 %vm263_vm0, %v238_v12 }
  0x96   : > { %v493_v14 = vpop.f32.mrf.mxu1 }
  0x99   : > { %701 = vmatmul.msk.f32.gmra.mxu1 %vm263_vm0, %v212_v18 }
  0x9b   : > { %418 = vmatmul.f32.gmra.mxu0 %v205_v15 }
  0x9c   : > { %463 = vmatmul.f32.gmra.mxu2 %v235_v16  ;;  %715 = vmatmul.msk.f32.gmra.mxu3 %vm263_vm0, %v240_v17 }
  0x9e   : > { %v496_v19 = vpop.f32.mrf.mxu1 }
  0xa4   : > { %466 = vmatmul.f32.gmra.mxu2 %v237_v20 }
  0xa6   : > { %v499_v24 = vpop.f32.mrf.mxu1 }
  0xa8   : > { %v377_v22 = vpop.f32.mrf.mxu0 }
  0xa9   : > { %v378_v23 = vadd.f32 %v967_v21, %v377_v22 }
  0xab   : > { %v491_v25 = vadd.f32 %v490_v9, %v378_v23 }
  0xad   : > { %586 = vst.msk [vmem:[%s974_s9] sm:$0xff] %vm263_vm0, %v491_v25 }
  0xae   : > { %v502_v30 = vpop.f32.mrf.mxu1 }
  0xaf   : > { %v978_v26 = vpop.f32.mrf.mxu2  ;;  %v980_v27 = vpop.f32.mrf.mxu3 }
  0xb0   : > { %v380_v28 = vpop.f32.mrf.mxu0 }
  0xb1   : > { %v381_v29 = vadd.f32 %v967_v21, %v380_v28 }
  0xb3   : > { %v494_v31 = vadd.f32 %v493_v14, %v381_v29 }
  0xb5   : > { %587 = vst.msk [vmem:[%s974_s9 + $0x8] sm:$0xff] %vm263_vm0, %v494_v31 }
  0xb6   : > { %v505_v36 = vpop.f32.mrf.mxu1 }
  0xb7   : > { %v985_v32 = vpop.f32.mrf.mxu2  ;;  %v544_v33 = vpop.f32.mrf.mxu3 }
  0xb8   : > { %v383_v34 = vpop.f32.mrf.mxu0 }
  0xb9   : > { %v384_v35 = vadd.f32 %v967_v21, %v383_v34 }
  0xbb   : > { %v497_v37 = vadd.f32 %v496_v19, %v384_v35 }
  0xbd   : > { %588 = vst.msk [vmem:[%s974_s9 + $0x10] sm:$0xff] %vm263_vm0, %v497_v37 }
  0xbe   : > { %v508_v42 = vpop.f32.mrf.mxu1 }
  0xbf   : > { %v990_v38 = vpop.f32.mrf.mxu2  ;;  %v547_v39 = vpop.f32.mrf.mxu3 }
  0xc0   : > { %v386_v40 = vpop.f32.mrf.mxu0 }
  0xc1   : > { %v387_v41 = vadd.f32 %v967_v21, %v386_v40 }
  0xc3   : > { %v500_v43 = vadd.f32 %v499_v24, %v387_v41 }
  0xc5   : > { %589 = vst.msk [vmem:[%s974_s9 + $0x18] sm:$0xff] %vm263_vm0, %v500_v43 }
  0xc6   : > { %v511_v50 = vpop.f32.mrf.mxu1 }
  0xc7   : > { %v431_v44 = vpop.f32.mrf.mxu2  ;;  %v550_v45 = vpop.f32.mrf.mxu3 }
  0xc8   : > { %v432_v46 = vadd.f32 %v967_v21, %v431_v44  ;;  %v389_v47 = vpop.f32.mrf.mxu0 }
  0xc9   : > { %v390_v48 = vadd.f32 %v967_v21, %v389_v47 }
  0xca   : > { %v545_v49 = vadd.f32 %v544_v33, %v432_v46 }
  0xcb   : > { %v503_v51 = vadd.f32 %v502_v30, %v390_v48 }
  0xcc   : > { %604 = vst.msk [vmem:[%s974_s9 + $0x90] sm:$0xff] %vm263_vm0, %v545_v49 }
  0xcd   : > { %590 = vst.msk [vmem:[%s974_s9 + $0x20] sm:$0xff] %vm263_vm0, %v503_v51 }
  0xce   : > { %v514_v58 = vpop.f32.mrf.mxu1 }
  0xcf   : > { %v434_v52 = vpop.f32.mrf.mxu2  ;;  %v553_v53 = vpop.f32.mrf.mxu3 }
  0xd0   : > { %v435_v54 = vadd.f32 %v967_v21, %v434_v52  ;;  %v392_v55 = vpop.f32.mrf.mxu0 }
  0xd1   : > { %v393_v56 = vadd.f32 %v967_v21, %v392_v55 }
  0xd2   : > { %v548_v57 = vadd.f32 %v547_v39, %v435_v54 }
  0xd3   : > { %v506_v59 = vadd.f32 %v505_v36, %v393_v56 }
  0xd4   : > { %605 = vst.msk [vmem:[%s974_s9 + $0x98] sm:$0xff] %vm263_vm0, %v548_v57 }
  0xd5   : > { %591 = vst.msk [vmem:[%s974_s9 + $0x28] sm:$0xff] %vm263_vm0, %v506_v59 }
  0xd6   : > { %v517_v2 = vpop.f32.mrf.mxu1 }
  0xd7   : > { %v437_v60 = vpop.f32.mrf.mxu2  ;;  %v556_v61 = vpop.f32.mrf.mxu3 }
  0xd8   : > { %v438_v62 = vadd.f32 %v967_v21, %v437_v60  ;;  %v395_v63 = vpop.f32.mrf.mxu0 }
  0xd9   : > { %v396_v0 = vadd.f32 %v967_v21, %v395_v63 }
  0xda   : > { %v551_v1 = vadd.f32 %v550_v45, %v438_v62  ;;  %v426_v62 = vadd.f32 %v967_v21, %v985_v32 }
  0xdb   : > { %v509_v3 = vadd.f32 %v508_v42, %v396_v0 }
  0xdc   : > { %606 = vst.msk [vmem:[%s974_s9 + $0xa0] sm:$0xff] %vm263_vm0, %v551_v1 }
  0xdd   : > { %592 = vst.msk [vmem:[%s974_s9 + $0x30] sm:$0xff] %vm263_vm0, %v509_v3 }
  0xde   : > { %v520_v10 = vpop.f32.mrf.mxu1 }
  0xdf   : > { %v440_v4 = vpop.f32.mrf.mxu2  ;;  %v559_v5 = vpop.f32.mrf.mxu3 }
  0xe0   : > { %v441_v6 = vadd.f32 %v967_v21, %v440_v4  ;;  %v398_v7 = vpop.f32.mrf.mxu0 }
  0xe1   : > { %v399_v8 = vadd.f32 %v967_v21, %v398_v7  ;;  %v429_v7 = vadd.f32 %v967_v21, %v990_v38 }
  0xe2   : > { %v554_v9 = vadd.f32 %v553_v53, %v441_v6  ;;  %v423_v53 = vadd.f32 %v967_v21, %v978_v26 }
  0xe3   : > { %v512_v11 = vadd.f32 %v511_v50, %v399_v8 }
  0xe4   : > { %607 = vst.msk [vmem:[%s974_s9 + $0xa8] sm:$0xff] %vm263_vm0, %v554_v9 }
  0xe5   : > { %593 = vst.msk [vmem:[%s974_s9 + $0x38] sm:$0xff] %vm263_vm0, %v512_v11 }
  0xe6   : > { %v523_v18 = vpop.f32.mrf.mxu1 }
  0xe7   : > { %v443_v12 = vpop.f32.mrf.mxu2  ;;  %v562_v13 = vpop.f32.mrf.mxu3 }
  0xe8   : > { %v444_v14 = vadd.f32 %v967_v21, %v443_v12  ;;  %v401_v15 = vpop.f32.mrf.mxu0 }
  0xe9   : > { %v402_v16 = vadd.f32 %v967_v21, %v401_v15 }
  0xea   : > { %v557_v17 = vadd.f32 %v556_v61, %v444_v14 }
  0xeb   : > { %v515_v19 = vadd.f32 %v514_v58, %v402_v16 }
  0xec   : > { %608 = vst.msk [vmem:[%s974_s9 + $0xb0] sm:$0xff] %vm263_vm0, %v557_v17 }
  0xed   : > { %594 = vst.msk [vmem:[%s974_s9 + $0x40] sm:$0xff] %vm263_vm0, %v515_v19 }
  0xee   : > { %v526_v29 = vpop.f32.mrf.mxu1 }
  0xef   : > { %v446_v20 = vpop.f32.mrf.mxu2  ;;  %v565_v22 = vpop.f32.mrf.mxu3 }
  0xf0   : > { %v447_v23 = vadd.f32 %v967_v21, %v446_v20  ;;  %v404_v24 = vpop.f32.mrf.mxu0 }
  0xf1   : > { %v405_v25 = vadd.f32 %v967_v21, %v404_v24 }
  0xf2   : > { %v560_v28 = vadd.f32 %v559_v5, %v447_v23 }
  0xf3   : > { %v518_v30 = vadd.f32 %v517_v2, %v405_v25 }
  0xf4   : > { %609 = vst.msk [vmem:[%s974_s9 + $0xb8] sm:$0xff] %vm263_vm0, %v560_v28 }
  0xf5   : > { %595 = vst.msk [vmem:[%s974_s9 + $0x48] sm:$0xff] %vm263_vm0, %v518_v30 }
  0xf6   : > { %v529_v39 = vpop.f32.mrf.mxu1 }
  0xf7   : > { %v449_v31 = vpop.f32.mrf.mxu2  ;;  %v568_v33 = vpop.f32.mrf.mxu3 }
  0xf8   : > { %v450_v34 = vadd.f32 %v967_v21, %v449_v31  ;;  %v407_v35 = vpop.f32.mrf.mxu0 }
  0xf9   : > { %v408_v36 = vadd.f32 %v967_v21, %v407_v35 }
  0xfa   : > { %v563_v37 = vadd.f32 %v562_v13, %v450_v34  ;;  %v471_v13 = vadd.f32 %v967_v21, %v980_v27 }
  0xfb   : > { %v521_v40 = vadd.f32 %v520_v10, %v408_v36 }
  0xfc   : > { %610 = vst.msk [vmem:[%s974_s9 + $0xc0] sm:$0xff] %vm263_vm0, %v563_v37 }
  0xfd   : > { %596 = vst.msk [vmem:[%s974_s9 + $0x50] sm:$0xff] %vm263_vm0, %v521_v40 }
  0xfe   : > { %v532_v47 = vpop.f32.mrf.mxu1 }
  0xff   : > { %v452_v41 = vpop.f32.mrf.mxu2  ;;  %v571_v42 = vpop.f32.mrf.mxu3 }
 0x100   : > { %v453_v43 = vadd.f32 %v967_v21, %v452_v41  ;;  %v410_v44 = vpop.f32.mrf.mxu0 }
 0x101   : > { %v411_v45 = vadd.f32 %v967_v21, %v410_v44 }
 0x102   : > { %v566_v46 = vadd.f32 %v565_v22, %v453_v43 }
 0x103   : > { %v524_v48 = vadd.f32 %v523_v18, %v411_v45 }
 0x104   : > { %611 = vst.msk [vmem:[%s974_s9 + $0xc8] sm:$0xff] %vm263_vm0, %v566_v46 }
 0x105   : > { %597 = vst.msk [vmem:[%s974_s9 + $0x58] sm:$0xff] %vm263_vm0, %v524_v48 }
 0x106   : > { %v535_v56 = vpop.f32.mrf.mxu1 }
 0x107   : > { %v455_v49 = vpop.f32.mrf.mxu2  ;;  %v574_v50 = vpop.f32.mrf.mxu3  ;;  %v536_v58 = vadd.f32 %v535_v56, %v423_v53 }
 0x108   : > { %v456_v51 = vadd.f32 %v967_v21, %v455_v49  ;;  %v413_v52 = vpop.f32.mrf.mxu0 }
 0x109   : > { %v414_v54 = vadd.f32 %v967_v21, %v413_v52  ;;  %601 = vst.msk [vmem:[%s974_s9 + $0x78] sm:$0xff] %vm263_vm0, %v536_v58 }
 0x10a   : > { %v569_v55 = vadd.f32 %v568_v33, %v456_v51 }
 0x10b   : > { %v527_v57 = vadd.f32 %v526_v29, %v414_v54 }
 0x10c   : > { %612 = vst.msk [vmem:[%s974_s9 + $0xd0] sm:$0xff] %vm263_vm0, %v569_v55 }
 0x10d   : > { %598 = vst.msk [vmem:[%s974_s9 + $0x60] sm:$0xff] %vm263_vm0, %v527_v57 }
 0x10e   : > { %v538_v1 = vpop.f32.mrf.mxu1 }
 0x10f   : > { %v458_v59 = vpop.f32.mrf.mxu2  ;;  %v577_v60 = vpop.f32.mrf.mxu3  ;;  %v539_v3 = vadd.f32 %v538_v1, %v426_v62 }
 0x110   : > { %v459_v61 = vadd.f32 %v967_v21, %v458_v59  ;;  %v416_v26 = vpop.f32.mrf.mxu0 }
 0x111   : > { %v417_v63 = vadd.f32 %v967_v21, %v416_v26  ;;  %602 = vst.msk [vmem:[%s974_s9 + $0x80] sm:$0xff] %vm263_vm0, %v539_v3 }
 0x112   : > { %v572_v0 = vadd.f32 %v571_v42, %v459_v61 }
 0x113   : > { %v530_v2 = vadd.f32 %v529_v39, %v417_v63 }
 0x114   : > { %613 = vst.msk [vmem:[%s974_s9 + $0xd8] sm:$0xff] %vm263_vm0, %v572_v0 }
 0x115   : > { %599 = vst.msk [vmem:[%s974_s9 + $0x68] sm:$0xff] %vm263_vm0, %v530_v2 }
 0x116   : > { %v541_v10 = vpop.f32.mrf.mxu1 }
 0x117   : > { %v461_v4 = vpop.f32.mrf.mxu2  ;;  %v580_v5 = vpop.f32.mrf.mxu3  ;;  %v542_v12 = vadd.f32 %v541_v10, %v429_v7 }
 0x118   : > { %v462_v6 = vadd.f32 %v967_v21, %v461_v4  ;;  %v419_v32 = vpop.f32.mrf.mxu0 }
 0x119   : > { %v420_v8 = vadd.f32 %v967_v21, %v419_v32  ;;  %603 = vst.msk [vmem:[%s974_s9 + $0x88] sm:$0xff] %vm263_vm0, %v542_v12 }
 0x11a   : > { %v575_v9 = vadd.f32 %v574_v50, %v462_v6 }
 0x11b   : > { %v533_v11 = vadd.f32 %v532_v47, %v420_v8 }
 0x11c   : > { %614 = vst.msk [vmem:[%s974_s9 + $0xe0] sm:$0xff] %vm263_vm0, %v575_v9 }
 0x11d   : > { %600 = vst.msk [vmem:[%s974_s9 + $0x70] sm:$0xff] %vm263_vm0, %v533_v11 }
 0x11f   : > { %v464_v14 = vpop.f32.mrf.mxu2  ;;  %v583_v15 = vpop.f32.mrf.mxu3 }
 0x120   : > { %v465_v38 = vadd.f32 %v967_v21, %v464_v14  ;;  %v584_v16 = vadd.f32 %v583_v15, %v471_v13 }
 0x122   : > { %v578_v17 = vadd.f32 %v577_v60, %v465_v38  ;;  %617 = vst.msk [vmem:[%s974_s9 + $0xf8] sm:$0xff] %vm263_vm0, %v584_v16 }
 0x124   : > { %615 = vst.msk [vmem:[%s974_s9 + $0xe8] sm:$0xff] %vm263_vm0, %v578_v17 }
 0x127   : > { %v467_v18 = vpop.f32.mrf.mxu2 }
 0x128   : > { %v468_v19 = vadd.f32 %v967_v21, %v467_v18 }
 0x12a   : > { %v581_v20 = vadd.f32 %v580_v5, %v468_v19 }
 0x12c   : > { %616 = vst.msk [vmem:[%s974_s9 + $0xf0] sm:$0xff] %vm263_vm0, %v581_v20 }
 0x12d PF: > { %s13_s12 = sadd.s32 1, %s768_s12  }
 0x12e   : > { %p10_p4 = scmp.ge.s32.totalorder %s13_s12, 4  }
 0x130   :  { %12 = sbr.rel (!%p10_p4) target bundleno = 1 (0x1), region = 62 }

// kernel: forward.31
= control target key start
LH: loop header
LB: loop body
LE: loop exit
PB: predicated region body
PF: predicated region fallthrough
CT: control target
= control target key end

     0   :  { %s1078_s12 = smov 0   ;;  %s1514_s0 = inlined_call_operand.vmem [shape: f32[512,400], index: 0, kind: input, shape index: {}]   ;;  %s1515_s1 = inlined_call_operand.vmem [shape: f32[400,16], index: 1, kind: input, shape index: {}]   ;;  %s1516_s2 = inlined_call_operand.vmem [shape: f32[1,16], index: 2, kind: input, shape index: {}]   ;;  %s1517_s3 = inlined_call_operand.vmem [shape: f32[512,16], index: 3, kind: output, shape index: {}]  }
   0x1 LB: > { %s996_s13 = sadd.s32 4294967295, %s1056_s12   ;;  %p1000_p0 = scmp.ge.s32.totalorder %s1056_s12, 1  ;;  %s1056_s12 = sphi %s1078_s12, %s13_s12  }
   0x2   : > { %p139_p1 = scmp.lt.s32.totalorder %s1056_s12, 3 }
   0x4   : > { %p140_p2 = pnand %p1000_p0, %p139_p1 }
   0x5   : > { %s1001_s30 = sshll.u32 (!%p140_p2), %s996_s13, 5 }
   0x6   : > { %143 = sbr.rel (%p140_p2) target bundleno = 428 (0x1ac), region = 32  ;;  %p165_p3 = scmp.lt.s32.totalorder (!%p140_p2), %s1001_s30, 63 }
   0xb   : > { %v352_v0 = vld [vmem:[%s1515_s1 + $0x178] sm:$0xff]  ;;  %v351_v2 = vld [vmem:[%s1515_s1 + $0x170] sm:$0xff]  ;;  %v350_v5 = vld [vmem:[%s1515_s1 + $0x168] sm:$0xff]  ;;  %s1519_s30 = smov (!%p165_p3, %s1001_s30), 63  ;;  %vm359_vm0 = vcmask 130048  }
   0xc   : > { %v320_v1 = vld [vmem:[%s1515_s1 + $0x78] sm:$0xff]  ;;  %682 = vmatpush.msra.mxu2 %v352_v0  ;;  %v319_v3 = vld [vmem:[%s1515_s1 + $0x70] sm:$0xff]  ;;  %v318_v6 = vld [vmem:[%s1515_s1 + $0x68] sm:$0xff]  ;;  %s1040_s11 = sshll.u32 %s1519_s30, 5  ;;  %s1005_s21 = sshll.u32 %s1519_s30, 3 }
   0xd   : > { %456 = vmatpush.msra.mxu0 %v320_v1  ;;  %v336_v4 = vld [vmem:[%s1515_s1 + $0xf8] sm:$0xff]  ;;  %v335_v7 = vld [vmem:[%s1515_s1 + $0xf0] sm:$0xff]  ;;  %v334_v8 = vld [vmem:[%s1515_s1 + $0xe8] sm:$0xff]  ;;  %s1182_s27 = scalar_lea.vmem %s1514_s0, %s1040_s11  ;;  %s1343_s24 = scalar_lea.vmem %s1517_s3, %s1005_s21 }
   0xe   : > { %569 = vmatpush.msra.mxu1 %v336_v4  ;;  %683 = vmatpush.msra.mxu2 %v351_v2  ;;  %v349_v9 = vld [vmem:[%s1515_s1 + $0x160] sm:$0xff]  ;;  %v348_v12 = vld [vmem:[%s1515_s1 + $0x158] sm:$0xff]  ;;  %v347_v15 = vld [vmem:[%s1515_s1 + $0x150] sm:$0xff] }
   0xf   : > { %457 = vmatpush.msra.mxu0 %v319_v3  ;;  %v317_v10 = vld [vmem:[%s1515_s1 + $0x60] sm:$0xff]  ;;  %v316_v13 = vld [vmem:[%s1515_s1 + $0x58] sm:$0xff]  ;;  %v315_v16 = vld [vmem:[%s1515_s1 + $0x50] sm:$0xff] }
  0x10   : > { %570 = vmatpush.msra.mxu1 %v335_v7  ;;  %684 = vmatpush.msra.mxu2 %v350_v5  ;;  %v333_v11 = vld [vmem:[%s1515_s1 + $0xe0] sm:$0xff]  ;;  %v332_v14 = vld [vmem:[%s1515_s1 + $0xd8] sm:$0xff]  ;;  %v331_v17 = vld [vmem:[%s1515_s1 + $0xd0] sm:$0xff] }
  0x11   : > { %458 = vmatpush.msra.mxu0 %v318_v6  ;;  %v346_v18 = vld [vmem:[%s1515_s1 + $0x148] sm:$0xff]  ;;  %v345_v21 = vld [vmem:[%s1515_s1 + $0x140] sm:$0xff]  ;;  %v344_v24 = vld [vmem:[%s1515_s1 + $0x138] sm:$0xff] }
  0x12   : > { %571 = vmatpush.msra.mxu1 %v334_v8  ;;  %685 = vmatpush.msra.mxu2 %v349_v9  ;;  %v314_v19 = vld [vmem:[%s1515_s1 + $0x48] sm:$0xff]  ;;  %v313_v22 = vld [vmem:[%s1515_s1 + $0x40] sm:$0xff]  ;;  %v312_v25 = vld [vmem:[%s1515_s1 + $0x38] sm:$0xff] }
  0x13   : > { %459 = vmatpush.msra.mxu0 %v317_v10  ;;  %v330_v20 = vld [vmem:[%s1515_s1 + $0xc8] sm:$0xff]  ;;  %v329_v23 = vld [vmem:[%s1515_s1 + $0xc0] sm:$0xff]  ;;  %v328_v26 = vld [vmem:[%s1515_s1 + $0xb8] sm:$0xff] }
  0x14   : > { %572 = vmatpush.msra.mxu1 %v333_v11  ;;  %686 = vmatpush.msra.mxu2 %v348_v12  ;;  %v354_v27 = vld [vmem:[%s1515_s1 + $0x188] sm:$0xff]  ;;  %v343_v28 = vld [vmem:[%s1515_s1 + $0x130] sm:$0xff]  ;;  %v353_v30 = vld [vmem:[%s1515_s1 + $0x180] sm:$0xff] }
  0x15   : > { %460 = vmatpush.msra.mxu0 %v316_v13  ;;  %v311_v29 = vld [vmem:[%s1515_s1 + $0x30] sm:$0xff]  ;;  %809 = vmatpush.msra.mxu3 %v354_v27  ;;  %v180_v32 = vld [vmem:[%s1182_s27 + $0x18] sm:$0xff]  ;;  %v342_v33 = vld [vmem:[%s1515_s1 + $0x128] sm:$0xff] }
  0x16   : > { %573 = vmatpush.msra.mxu1 %v332_v14  ;;  %687 = vmatpush.msra.mxu2 %v347_v15  ;;  %v327_v31 = vld [vmem:[%s1515_s1 + $0xb0] sm:$0xff]  ;;  %v310_v34 = vld [vmem:[%s1515_s1 + $0x28] sm:$0xff]  ;;  %v341_v36 = vld [vmem:[%s1515_s1 + $0x120] sm:$0xff] }
  0x17   : > { %461 = vmatpush.msra.mxu0 %v315_v16  ;;  %810 = vmatpush.msra.mxu3 %v353_v30  ;;  %v326_v35 = vld [vmem:[%s1515_s1 + $0xa8] sm:$0xff]  ;;  %v309_v37 = vld [vmem:[%s1515_s1 + $0x20] sm:$0xff]  ;;  %v340_v39 = vld [vmem:[%s1515_s1 + $0x118] sm:$0xff] }
  0x18   : > { %574 = vmatpush.msra.mxu1 %v331_v17  ;;  %688 = vmatpush.msra.mxu2 %v346_v18  ;;  %v325_v38 = vld [vmem:[%s1515_s1 + $0xa0] sm:$0xff]  ;;  %v308_v40 = vld [vmem:[%s1515_s1 + $0x18] sm:$0xff]  ;;  %v339_v42 = vld [vmem:[%s1515_s1 + $0x110] sm:$0xff] }
  0x19   : > { %462 = vmatpush.msra.mxu0 %v314_v19  ;;  %1006 = vmatmul.msk.f32.vlgmr.msra.gmra.mxu3 %vm359_vm0, %v180_v32  ;;  %v324_v41 = vld [vmem:[%s1515_s1 + $0x98] sm:$0xff]  ;;  %v307_v43 = vld [vmem:[%s1515_s1 + $0x10] sm:$0xff]  ;;  %v338_v46 = vld [vmem:[%s1515_s1 + $0x108] sm:$0xff] }
  0x1a   : > { %575 = vmatpush.msra.mxu1 %v330_v20  ;;  %689 = vmatpush.msra.mxu2 %v345_v21  ;;  %v323_v44 = vld [vmem:[%s1515_s1 + $0x90] sm:$0xff]  ;;  %v184_v45 = vld [vmem:[%s1182_s27 + $0x38] sm:$0xff]  ;;  %v306_v47 = vld [vmem:[%s1515_s1 + $0x8] sm:$0xff] }
  0x1b   : > { %463 = vmatpush.msra.mxu0 %v313_v22  ;;  %v322_v48 = vld [vmem:[%s1515_s1 + $0x88] sm:$0xff]  ;;  %v337_v49 = vld [vmem:[%s1515_s1 + $0x100] sm:$0xff]  ;;  %v179_v51 = vld [vmem:[%s1182_s27 + $0x10] sm:$0xff] }
  0x1c   : > { %576 = vmatpush.msra.mxu1 %v329_v23  ;;  %690 = vmatpush.msra.mxu2 %v344_v24  ;;  %v305_v50 = vld [vmem:[%s1515_s1] sm:$0xff]  ;;  %v178_v54 = vld [vmem:[%s1182_s27 + $0x8] sm:$0xff]  ;;  %v188_v55 = vld [vmem:[%s1182_s27 + $0x58] sm:$0xff] }
  0x1d   : > { %464 = vmatpush.msra.mxu0 %v312_v25  ;;  %v177_v52 = vld [vmem:[%s1182_s27] sm:$0xff]  ;;  %v183_v56 = vld [vmem:[%s1182_s27 + $0x30] sm:$0xff]  ;;  %v182_v58 = vld [vmem:[%s1182_s27 + $0x28] sm:$0xff] }
  0x1e   : > { %577 = vmatpush.msra.mxu1 %v328_v26  ;;  %691 = vmatpush.msra.mxu2 %v343_v28  ;;  %v321_v53 = vld [vmem:[%s1515_s1 + $0x80] sm:$0xff]  ;;  %v192_v59 = vld [vmem:[%s1182_s27 + $0x78] sm:$0xff]  ;;  %v187_v60 = vld [vmem:[%s1182_s27 + $0x50] sm:$0xff] }
  0x1f   : > { %465 = vmatpush.msra.mxu0 %v311_v29  ;;  %v181_v57 = vld [vmem:[%s1182_s27 + $0x20] sm:$0xff]  ;;  %v186_v62 = vld [vmem:[%s1182_s27 + $0x48] sm:$0xff]  ;;  %v196_v63 = vld [vmem:[%s1182_s27 + $0x98] sm:$0xff] }
  0x20   : > { %578 = vmatpush.msra.mxu1 %v327_v31  ;;  %692 = vmatpush.msra.mxu2 %v342_v33  ;;  %v185_v61 = vld [vmem:[%s1182_s27 + $0x40] sm:$0xff]  ;;  %v191_v0 = vld [vmem:[%s1182_s27 + $0x70] sm:$0xff]  ;;  %v190_v2 = vld [vmem:[%s1182_s27 + $0x68] sm:$0xff] }
  0x21   : > { %466 = vmatpush.msra.mxu0 %v310_v34  ;;  %1007 = vmatmul.msk.f32.gmra.mxu3 %vm359_vm0, %v184_v45  ;;  %v189_v1 = vld [vmem:[%s1182_s27 + $0x60] sm:$0xff]  ;;  %v200_v3 = vld [vmem:[%s1182_s27 + $0xb8] sm:$0xff]  ;;  %v195_v4 = vld [vmem:[%s1182_s27 + $0x90] sm:$0xff] }
  0x22   : > { %579 = vmatpush.msra.mxu1 %v326_v35  ;;  %693 = vmatpush.msra.mxu2 %v341_v36  ;;  %v193_v5 = vld [vmem:[%s1182_s27 + $0x80] sm:$0xff]  ;;  %v194_v6 = vld [vmem:[%s1182_s27 + $0x88] sm:$0xff]  ;;  %v204_v7 = vld [vmem:[%s1182_s27 + $0xd8] sm:$0xff] }
  0x23   : > { %467 = vmatpush.msra.mxu0 %v309_v37  ;;  %v199_v8 = vld [vmem:[%s1182_s27 + $0xb0] sm:$0xff]  ;;  %v197_v9 = vld [vmem:[%s1182_s27 + $0xa0] sm:$0xff]  ;;  %v198_v10 = vld [vmem:[%s1182_s27 + $0xa8] sm:$0xff] }
  0x24   : > { %580 = vmatpush.msra.mxu1 %v325_v38  ;;  %694 = vmatpush.msra.mxu2 %v340_v39  ;;  %v208_v11 = vld [vmem:[%s1182_s27 + $0xf8] sm:$0xff]  ;;  %v203_v12 = vld [vmem:[%s1182_s27 + $0xd0] sm:$0xff]  ;;  %v201_v13 = vld [vmem:[%s1182_s27 + $0xc0] sm:$0xff] }
  0x25   : > { %468 = vmatpush.msra.mxu0 %v308_v40  ;;  %v202_v14 = vld [vmem:[%s1182_s27 + $0xc8] sm:$0xff]  ;;  %v212_v15 = vld [vmem:[%s1182_s27 + $0x118] sm:$0xff]  ;;  %v207_v16 = vld [vmem:[%s1182_s27 + $0xf0] sm:$0xff] }
  0x26   : > { %581 = vmatpush.msra.mxu1 %v324_v41  ;;  %695 = vmatpush.msra.mxu2 %v339_v42  ;;  %v205_v17 = vld [vmem:[%s1182_s27 + $0xe0] sm:$0xff]  ;;  %v206_v18 = vld [vmem:[%s1182_s27 + $0xe8] sm:$0xff]  ;;  %v216_v19 = vld [vmem:[%s1182_s27 + $0x138] sm:$0xff] }
  0x27   : > { %469 = vmatpush.msra.mxu0 %v307_v43  ;;  %v211_v20 = vld [vmem:[%s1182_s27 + $0x110] sm:$0xff]  ;;  %v209_v21 = vld [vmem:[%s1182_s27 + $0x100] sm:$0xff]  ;;  %v210_v22 = vld [vmem:[%s1182_s27 + $0x108] sm:$0xff] }
  0x28   : > { %582 = vmatpush.msra.mxu1 %v323_v44  ;;  %696 = vmatpush.msra.mxu2 %v338_v46  ;;  %v220_v23 = vld [vmem:[%s1182_s27 + $0x158] sm:$0xff]  ;;  %v215_v24 = vld [vmem:[%s1182_s27 + $0x130] sm:$0xff]  ;;  %v213_v25 = vld [vmem:[%s1182_s27 + $0x120] sm:$0xff] }
  0x29   : > { %470 = vmatpush.msra.mxu0 %v306_v47  ;;  %1008 = vmatmul.msk.f32.gmra.mxu3 %vm359_vm0, %v188_v55  ;;  %v214_v26 = vld [vmem:[%s1182_s27 + $0x128] sm:$0xff]  ;;  %v224_v27 = vld [vmem:[%s1182_s27 + $0x178] sm:$0xff]  ;;  %v219_v28 = vld [vmem:[%s1182_s27 + $0x150] sm:$0xff] }
  0x2a   : > { %583 = vmatpush.msra.mxu1 %v322_v48  ;;  %697 = vmatpush.msra.mxu2 %v337_v49  ;;  %v217_v29 = vld [vmem:[%s1182_s27 + $0x140] sm:$0xff]  ;;  %v218_v30 = vld [vmem:[%s1182_s27 + $0x148] sm:$0xff]  ;;  %v228_v31 = vld [vmem:[%s1182_s27 + $0x198] sm:$0xff] }
  0x2b   : > { %471 = vmatpush.msra.mxu0 %v305_v50  ;;  %698 = vmatmul.f32.vlgmr.msra.gmra.mxu2 %v179_v51  ;;  %v223_v32 = vld [vmem:[%s1182_s27 + $0x170] sm:$0xff]  ;;  %v221_v33 = vld [vmem:[%s1182_s27 + $0x160] sm:$0xff]  ;;  %v222_v34 = vld [vmem:[%s1182_s27 + $0x168] sm:$0xff] }
  0x2c   : > { %472 = vmatmul.f32.vlgmr.msra.gmra.mxu0 %v177_v52  ;;  %584 = vmatpush.msra.mxu1 %v321_v53  ;;  %v232_v35 = vld [vmem:[%s1182_s27 + $0x1b8] sm:$0xff]  ;;  %v227_v36 = vld [vmem:[%s1182_s27 + $0x190] sm:$0xff]  ;;  %v225_v37 = vld [vmem:[%s1182_s27 + $0x180] sm:$0xff] }
  0x2d   : > { %585 = vmatmul.f32.vlgmr.msra.gmra.mxu1 %v178_v54  ;;  %v226_v38 = vld [vmem:[%s1182_s27 + $0x188] sm:$0xff]  ;;  %v236_v39 = vld [vmem:[%s1182_s27 + $0x1d8] sm:$0xff]  ;;  %v231_v40 = vld [vmem:[%s1182_s27 + $0x1b0] sm:$0xff] }
  0x2e   : > { %v229_v41 = vld [vmem:[%s1182_s27 + $0x1a0] sm:$0xff]  ;;  %v230_v42 = vld [vmem:[%s1182_s27 + $0x1a8] sm:$0xff]  ;;  %v240_v43 = vld [vmem:[%s1182_s27 + $0x1f8] sm:$0xff] }
  0x2f   : > { %v235_v44 = vld [vmem:[%s1182_s27 + $0x1d0] sm:$0xff]  ;;  %v233_v45 = vld [vmem:[%s1182_s27 + $0x1c0] sm:$0xff]  ;;  %v234_v46 = vld [vmem:[%s1182_s27 + $0x1c8] sm:$0xff] }
  0x30   : > { %v244_v47 = vld [vmem:[%s1182_s27 + $0x218] sm:$0xff]  ;;  %v239_v48 = vld [vmem:[%s1182_s27 + $0x1f0] sm:$0xff]  ;;  %v237_v49 = vld [vmem:[%s1182_s27 + $0x1e0] sm:$0xff] }
  0x31   : > { %1009 = vmatmul.msk.f32.gmra.mxu3 %vm359_vm0, %v192_v59  ;;  %v238_v50 = vld [vmem:[%s1182_s27 + $0x1e8] sm:$0xff]  ;;  %v248_v52 = vld [vmem:[%s1182_s27 + $0x238] sm:$0xff]  ;;  %v1330_v53 = vld [vmem:[%s1516_s2] ss:$0 sm:$0xff] }
  0x32   : > { %v243_v55 = vld [vmem:[%s1182_s27 + $0x210] sm:$0xff]  ;;  %v242_v59 = vld [vmem:[%s1182_s27 + $0x208] sm:$0xff] }
  0x33   : > { %701 = vmatmul.f32.gmra.mxu2 %v183_v56  ;;  %v241_v56 = vld [vmem:[%s1182_s27 + $0x200] sm:$0xff] }
  0x34   : > { %475 = vmatmul.f32.gmra.mxu0 %v181_v57 }
  0x35   : > { %588 = vmatmul.f32.gmra.mxu1 %v182_v58 }
  0x39   : > { %1010 = vmatmul.msk.f32.gmra.mxu3 %vm359_vm0, %v196_v63 }
  0x3b   : > { %704 = vmatmul.f32.gmra.mxu2 %v187_v60 }
  0x3c   : > { %478 = vmatmul.f32.gmra.mxu0 %v185_v61 }
  0x3d   : > { %591 = vmatmul.f32.gmra.mxu1 %v186_v62  ;;  %v252_v62 = vld [vmem:[%s1182_s27 + $0x258] sm:$0xff] }
  0x41   : > { %1011 = vmatmul.msk.f32.gmra.mxu3 %vm359_vm0, %v200_v3  ;;  %v245_v3 = vld [vmem:[%s1182_s27 + $0x220] sm:$0xff] }
  0x43   : > { %707 = vmatmul.f32.gmra.mxu2 %v191_v0 }
  0x44   : > { %481 = vmatmul.f32.gmra.mxu0 %v189_v1 }
  0x45   : > { %594 = vmatmul.f32.gmra.mxu1 %v190_v2  ;;  %v247_v2 = vld [vmem:[%s1182_s27 + $0x230] sm:$0xff] }
  0x49   : > { %1012 = vmatmul.msk.f32.gmra.mxu3 %vm359_vm0, %v204_v7  ;;  %v246_v7 = vld [vmem:[%s1182_s27 + $0x228] sm:$0xff] }
  0x4b   : > { %710 = vmatmul.f32.gmra.mxu2 %v195_v4 }
  0x4c   : > { %484 = vmatmul.f32.gmra.mxu0 %v193_v5 }
  0x4d   : > { %597 = vmatmul.f32.gmra.mxu1 %v194_v6 }
  0x51   : > { %1013 = vmatmul.msk.f32.gmra.mxu3 %vm359_vm0, %v208_v11 }
  0x53   : > { %713 = vmatmul.f32.gmra.mxu2 %v199_v8 }
  0x54   : > { %487 = vmatmul.f32.gmra.mxu0 %v197_v9 }
  0x55   : > { %600 = vmatmul.f32.gmra.mxu1 %v198_v10  ;;  %v256_v10 = vld [vmem:[%s1182_s27 + $0x278] sm:$0xff] }
  0x59   : > { %1014 = vmatmul.msk.f32.gmra.mxu3 %vm359_vm0, %v212_v15  ;;  %v249_v15 = vld [vmem:[%s1182_s27 + $0x240] sm:$0xff] }
  0x5b   : > { %716 = vmatmul.f32.gmra.mxu2 %v203_v12 }
  0x5c   : > { %490 = vmatmul.f32.gmra.mxu0 %v201_v13 }
  0x5d   : > { %603 = vmatmul.f32.gmra.mxu1 %v202_v14  ;;  %v251_v14 = vld [vmem:[%s1182_s27 + $0x250] sm:$0xff] }
  0x61   : > { %1015 = vmatmul.msk.f32.gmra.mxu3 %vm359_vm0, %v216_v19  ;;  %v250_v19 = vld [vmem:[%s1182_s27 + $0x248] sm:$0xff] }
  0x63   : > { %719 = vmatmul.f32.gmra.mxu2 %v207_v16 }
  0x64   : > { %493 = vmatmul.f32.gmra.mxu0 %v205_v17 }
  0x65   : > { %606 = vmatmul.f32.gmra.mxu1 %v206_v18 }
  0x69   : > { %1016 = vmatmul.msk.f32.gmra.mxu3 %vm359_vm0, %v220_v23 }
  0x6b   : > { %722 = vmatmul.f32.gmra.mxu2 %v211_v20 }
  0x6c   : > { %496 = vmatmul.f32.gmra.mxu0 %v209_v21 }
  0x6d   : > { %609 = vmatmul.f32.gmra.mxu1 %v210_v22  ;;  %v260_v22 = vld [vmem:[%s1182_s27 + $0x298] sm:$0xff] }
  0x71   : > { %1017 = vmatmul.msk.f32.gmra.mxu3 %vm359_vm0, %v224_v27  ;;  %v253_v27 = vld [vmem:[%s1182_s27 + $0x260] sm:$0xff] }
  0x73   : > { %725 = vmatmul.f32.gmra.mxu2 %v215_v24 }
  0x74   : > { %499 = vmatmul.f32.gmra.mxu0 %v213_v25 }
  0x75   : > { %612 = vmatmul.f32.gmra.mxu1 %v214_v26  ;;  %v255_v26 = vld [vmem:[%s1182_s27 + $0x270] sm:$0xff] }
  0x79   : > { %1018 = vmatmul.msk.f32.gmra.mxu3 %vm359_vm0, %v228_v31  ;;  %v254_v31 = vld [vmem:[%s1182_s27 + $0x268] sm:$0xff] }
  0x7b   : > { %728 = vmatmul.f32.gmra.mxu2 %v219_v28 }
  0x7c   : > { %502 = vmatmul.f32.gmra.mxu0 %v217_v29 }
  0x7d   : > { %615 = vmatmul.f32.gmra.mxu1 %v218_v30 }
  0x81   : > { %1019 = vmatmul.msk.f32.gmra.mxu3 %vm359_vm0, %v232_v35 }
  0x83   : > { %731 = vmatmul.f32.gmra.mxu2 %v223_v32 }
  0x84   : > { %505 = vmatmul.f32.gmra.mxu0 %v221_v33 }
  0x85   : > { %618 = vmatmul.f32.gmra.mxu1 %v222_v34  ;;  %v264_v34 = vld [vmem:[%s1182_s27 + $0x2b8] sm:$0xff] }
  0x89   : > { %1020 = vmatmul.msk.f32.gmra.mxu3 %vm359_vm0, %v236_v39  ;;  %v257_v39 = vld [vmem:[%s1182_s27 + $0x280] sm:$0xff] }
  0x8b   : > { %734 = vmatmul.f32.gmra.mxu2 %v227_v36 }
  0x8c   : > { %508 = vmatmul.f32.gmra.mxu0 %v225_v37 }
  0x8d   : > { %621 = vmatmul.f32.gmra.mxu1 %v226_v38  ;;  %v259_v38 = vld [vmem:[%s1182_s27 + $0x290] sm:$0xff] }
  0x91   : > { %1021 = vmatmul.msk.f32.gmra.mxu3 %vm359_vm0, %v240_v43  ;;  %v258_v43 = vld [vmem:[%s1182_s27 + $0x288] sm:$0xff] }
  0x93   : > { %737 = vmatmul.f32.gmra.mxu2 %v231_v40 }
  0x94   : > { %511 = vmatmul.f32.gmra.mxu0 %v229_v41 }
  0x95   : > { %624 = vmatmul.f32.gmra.mxu1 %v230_v42 }
  0x99   : > { %1022 = vmatmul.msk.f32.gmra.mxu3 %vm359_vm0, %v244_v47 }
  0x9b   : > { %740 = vmatmul.f32.gmra.mxu2 %v235_v44 }
  0x9c   : > { %514 = vmatmul.f32.gmra.mxu0 %v233_v45  ;;  %v812_v51 = vpop.f32.mrf.mxu3 }
  0x9d   : > { %627 = vmatmul.f32.gmra.mxu1 %v234_v46  ;;  %v268_v46 = vld [vmem:[%s1182_s27 + $0x2d8] sm:$0xff] }
  0xa1   : > { %1023 = vmatmul.msk.f32.gmra.mxu3 %vm359_vm0, %v248_v52 }
  0xa3   : > { %743 = vmatmul.f32.gmra.mxu2 %v239_v48 }
  0xa4   : > { %517 = vmatmul.f32.gmra.mxu0 %v237_v49  ;;  %v815_v60 = vpop.f32.mrf.mxu3 }
  0xa5   : > { %630 = vmatmul.f32.gmra.mxu1 %v238_v50  ;;  %v263_v50 = vld [vmem:[%s1182_s27 + $0x2b0] sm:$0xff] }
  0xa9   : > { %v473_v54 = vpop.f32.mrf.mxu0  ;;  %1024 = vmatmul.msk.f32.gmra.mxu3 %vm359_vm0, %v252_v62 }
  0xaa   : > { %v474_v57 = vadd.f32 %v1330_v53, %v473_v54  ;;  %v586_v58 = vpop.f32.mrf.mxu1 }
  0xab   : > { %746 = vmatmul.f32.gmra.mxu2 %v243_v55 }
  0xac   : > { %v587_v61 = vadd.f32 %v586_v58, %v474_v57  ;;  %520 = vmatmul.f32.gmra.mxu0 %v241_v56  ;;  %v818_v8 = vpop.f32.mrf.mxu3  ;;  %v262_v56 = vld [vmem:[%s1182_s27 + $0x2a8] sm:$0xff] }
  0xad   : > { %633 = vmatmul.f32.gmra.mxu1 %v242_v59  ;;  %v272_v59 = vld [vmem:[%s1182_s27 + $0x2f8] sm:$0xff] }
  0xae   : > { %v699_v63 = vpop.f32.mrf.mxu2 }
  0xaf   : > { %v700_v0 = vadd.f32 %v699_v63, %v587_v61  ;;  %v267_v63 = vld [vmem:[%s1182_s27 + $0x2d0] sm:$0xff] }
  0xb1   : > { %v476_v1 = vpop.f32.mrf.mxu0  ;;  %v813_v4 = vadd.f32 %v812_v51, %v700_v0  ;;  %1025 = vmatmul.msk.f32.gmra.mxu3 %vm359_vm0, %v256_v10  ;;  %v261_v51 = vld [vmem:[%s1182_s27 + $0x2a0] sm:$0xff] }
  0xb2   : > { %v477_v5 = vadd.f32 %v1330_v53, %v476_v1  ;;  %v589_v6 = vpop.f32.mrf.mxu1  ;;  %v265_v0 = vld [vmem:[%s1182_s27 + $0x2c0] sm:$0xff] }
  0xb3   : > { %908 = vst.msk [vmem:[%s1343_s24] sm:$0xff] %vm359_vm0, %v813_v4  ;;  %749 = vmatmul.f32.gmra.mxu2 %v247_v2  ;;  %v266_v4 = vld [vmem:[%s1182_s27 + $0x2c8] sm:$0xff] }
  0xb4   : > { %v590_v9 = vadd.f32 %v589_v6, %v477_v5  ;;  %523 = vmatmul.f32.gmra.mxu0 %v245_v3  ;;  %v821_v20 = vpop.f32.mrf.mxu3 }
  0xb5   : > { %636 = vmatmul.f32.gmra.mxu1 %v246_v7  ;;  %v276_v7 = vld [vmem:[%s1182_s27 + $0x318] sm:$0xff] }
  0xb6   : > { %v702_v11 = vpop.f32.mrf.mxu2 }
  0xb7   : > { %v703_v12 = vadd.f32 %v702_v11, %v590_v9  ;;  %v271_v11 = vld [vmem:[%s1182_s27 + $0x2f0] sm:$0xff] }
  0xb9   : > { %v479_v13 = vpop.f32.mrf.mxu0  ;;  %v816_v16 = vadd.f32 %v815_v60, %v703_v12  ;;  %1026 = vmatmul.msk.f32.gmra.mxu3 %vm359_vm0, %v260_v22  ;;  %v269_v12 = vld [vmem:[%s1182_s27 + $0x2e0] sm:$0xff] }
  0xba   : > { %v480_v17 = vadd.f32 %v1330_v53, %v479_v13  ;;  %v592_v18 = vpop.f32.mrf.mxu1 }
  0xbb   : > { %909 = vst.msk [vmem:[%s1343_s24 + $0x8] sm:$0xff] %vm359_vm0, %v816_v16  ;;  %752 = vmatmul.f32.gmra.mxu2 %v251_v14  ;;  %v270_v16 = vld [vmem:[%s1182_s27 + $0x2e8] sm:$0xff] }
  0xbc   : > { %v593_v21 = vadd.f32 %v592_v18, %v480_v17  ;;  %526 = vmatmul.f32.gmra.mxu0 %v249_v15  ;;  %v824_v32 = vpop.f32.mrf.mxu3 }
  0xbd   : > { %639 = vmatmul.f32.gmra.mxu1 %v250_v19  ;;  %v280_v19 = vld [vmem:[%s1182_s27 + $0x338] sm:$0xff] }
  0xbe   : > { %v705_v23 = vpop.f32.mrf.mxu2 }
  0xbf   : > { %v706_v24 = vadd.f32 %v705_v23, %v593_v21  ;;  %v275_v23 = vld [vmem:[%s1182_s27 + $0x310] sm:$0xff] }
  0xc1   : > { %v482_v25 = vpop.f32.mrf.mxu0  ;;  %v819_v28 = vadd.f32 %v818_v8, %v706_v24  ;;  %1027 = vmatmul.msk.f32.gmra.mxu3 %vm359_vm0, %v264_v34  ;;  %v273_v24 = vld [vmem:[%s1182_s27 + $0x300] sm:$0xff] }
  0xc2   : > { %v483_v29 = vadd.f32 %v1330_v53, %v482_v25  ;;  %v595_v30 = vpop.f32.mrf.mxu1 }
  0xc3   : > { %910 = vst.msk [vmem:[%s1343_s24 + $0x10] sm:$0xff] %vm359_vm0, %v819_v28  ;;  %755 = vmatmul.f32.gmra.mxu2 %v255_v26  ;;  %v274_v28 = vld [vmem:[%s1182_s27 + $0x308] sm:$0xff] }
  0xc4   : > { %v596_v33 = vadd.f32 %v595_v30, %v483_v29  ;;  %529 = vmatmul.f32.gmra.mxu0 %v253_v27  ;;  %v827_v44 = vpop.f32.mrf.mxu3 }
  0xc5   : > { %642 = vmatmul.f32.gmra.mxu1 %v254_v31  ;;  %v284_v31 = vld [vmem:[%s1182_s27 + $0x358] sm:$0xff] }
  0xc6   : > { %v708_v35 = vpop.f32.mrf.mxu2 }
  0xc7   : > { %v709_v36 = vadd.f32 %v708_v35, %v596_v33  ;;  %v279_v35 = vld [vmem:[%s1182_s27 + $0x330] sm:$0xff] }
  0xc9   : > { %v485_v37 = vpop.f32.mrf.mxu0  ;;  %v822_v40 = vadd.f32 %v821_v20, %v709_v36  ;;  %1028 = vmatmul.msk.f32.gmra.mxu3 %vm359_vm0, %v268_v46  ;;  %v277_v36 = vld [vmem:[%s1182_s27 + $0x320] sm:$0xff] }
  0xca   : > { %v486_v41 = vadd.f32 %v1330_v53, %v485_v37  ;;  %v598_v42 = vpop.f32.mrf.mxu1 }
  0xcb   : > { %911 = vst.msk [vmem:[%s1343_s24 + $0x18] sm:$0xff] %vm359_vm0, %v822_v40  ;;  %758 = vmatmul.f32.gmra.mxu2 %v259_v38  ;;  %v278_v40 = vld [vmem:[%s1182_s27 + $0x328] sm:$0xff] }
  0xcc   : > { %v599_v45 = vadd.f32 %v598_v42, %v486_v41  ;;  %532 = vmatmul.f32.gmra.mxu0 %v257_v39  ;;  %v830_v57 = vpop.f32.mrf.mxu3 }
  0xcd   : > { %645 = vmatmul.f32.gmra.mxu1 %v258_v43  ;;  %v288_v43 = vld [vmem:[%s1182_s27 + $0x378] sm:$0xff] }
  0xce   : > { %v711_v47 = vpop.f32.mrf.mxu2 }
  0xcf   : > { %v712_v48 = vadd.f32 %v711_v47, %v599_v45  ;;  %v283_v47 = vld [vmem:[%s1182_s27 + $0x350] sm:$0xff] }
  0xd1   : > { %v488_v49 = vpop.f32.mrf.mxu0  ;;  %v825_v52 = vadd.f32 %v824_v32, %v712_v48  ;;  %1029 = vmatmul.msk.f32.gmra.mxu3 %vm359_vm0, %v272_v59  ;;  %v281_v48 = vld [vmem:[%s1182_s27 + $0x340] sm:$0xff] }
  0xd2   : > { %v489_v54 = vadd.f32 %v1330_v53, %v488_v49  ;;  %v601_v55 = vpop.f32.mrf.mxu1 }
  0xd3   : > { %912 = vst.msk [vmem:[%s1343_s24 + $0x20] sm:$0xff] %vm359_vm0, %v825_v52  ;;  %761 = vmatmul.f32.gmra.mxu2 %v263_v50  ;;  %v282_v52 = vld [vmem:[%s1182_s27 + $0x348] sm:$0xff] }
  0xd4   : > { %v602_v58 = vadd.f32 %v601_v55, %v489_v54  ;;  %535 = vmatmul.f32.gmra.mxu0 %v261_v51  ;;  %v833_v5 = vpop.f32.mrf.mxu3 }
  0xd5   : > { %648 = vmatmul.f32.gmra.mxu1 %v262_v56  ;;  %v292_v56 = vld [vmem:[%s1182_s27 + $0x398] sm:$0xff] }
  0xd6   : > { %v714_v60 = vpop.f32.mrf.mxu2 }
  0xd7   : > { %v715_v61 = vadd.f32 %v714_v60, %v602_v58  ;;  %v287_v60 = vld [vmem:[%s1182_s27 + $0x370] sm:$0xff] }
  0xd9   : > { %v491_v62 = vpop.f32.mrf.mxu0  ;;  %v828_v1 = vadd.f32 %v827_v44, %v715_v61  ;;  %1030 = vmatmul.msk.f32.gmra.mxu3 %vm359_vm0, %v276_v7  ;;  %v285_v61 = vld [vmem:[%s1182_s27 + $0x360] sm:$0xff] }
  0xda   : > { %v492_v2 = vadd.f32 %v1330_v53, %v491_v62  ;;  %v604_v3 = vpop.f32.mrf.mxu1 }
  0xdb   : > { %913 = vst.msk [vmem:[%s1343_s24 + $0x28] sm:$0xff] %vm359_vm0, %v828_v1  ;;  %764 = vmatmul.f32.gmra.mxu2 %v267_v63  ;;  %v286_v1 = vld [vmem:[%s1182_s27 + $0x368] sm:$0xff] }
  0xdc   : > { %v605_v6 = vadd.f32 %v604_v3, %v492_v2  ;;  %538 = vmatmul.f32.gmra.mxu0 %v265_v0  ;;  %v836_v17 = vpop.f32.mrf.mxu3 }
  0xdd   : > { %651 = vmatmul.f32.gmra.mxu1 %v266_v4  ;;  %v296_v4 = vld [vmem:[%s1182_s27 + $0x3b8] sm:$0xff] }
  0xde   : > { %v717_v8 = vpop.f32.mrf.mxu2 }
  0xdf   : > { %v718_v9 = vadd.f32 %v717_v8, %v605_v6  ;;  %v291_v8 = vld [vmem:[%s1182_s27 + $0x390] sm:$0xff] }
  0xe1   : > { %v494_v10 = vpop.f32.mrf.mxu0  ;;  %v831_v13 = vadd.f32 %v830_v57, %v718_v9  ;;  %1031 = vmatmul.msk.f32.gmra.mxu3 %vm359_vm0, %v280_v19  ;;  %v289_v9 = vld [vmem:[%s1182_s27 + $0x380] sm:$0xff] }
  0xe2   : > { %v495_v14 = vadd.f32 %v1330_v53, %v494_v10  ;;  %v607_v15 = vpop.f32.mrf.mxu1 }
  0xe3   : > { %914 = vst.msk [vmem:[%s1343_s24 + $0x30] sm:$0xff] %vm359_vm0, %v831_v13  ;;  %767 = vmatmul.f32.gmra.mxu2 %v271_v11  ;;  %v290_v13 = vld [vmem:[%s1182_s27 + $0x388] sm:$0xff] }
  0xe4   : > { %v608_v18 = vadd.f32 %v607_v15, %v495_v14  ;;  %541 = vmatmul.f32.gmra.mxu0 %v269_v12  ;;  %v839_v29 = vpop.f32.mrf.mxu3 }
  0xe5   : > { %654 = vmatmul.f32.gmra.mxu1 %v270_v16  ;;  %v300_v16 = vld [vmem:[%s1182_s27 + $0x3d8] sm:$0xff] }
  0xe6   : > { %v720_v20 = vpop.f32.mrf.mxu2 }
  0xe7   : > { %v721_v21 = vadd.f32 %v720_v20, %v608_v18  ;;  %v295_v20 = vld [vmem:[%s1182_s27 + $0x3b0] sm:$0xff] }
  0xe9   : > { %v497_v22 = vpop.f32.mrf.mxu0  ;;  %v834_v25 = vadd.f32 %v833_v5, %v721_v21  ;;  %1032 = vmatmul.msk.f32.gmra.mxu3 %vm359_vm0, %v284_v31  ;;  %v293_v21 = vld [vmem:[%s1182_s27 + $0x3a0] sm:$0xff] }
  0xea   : > { %v498_v26 = vadd.f32 %v1330_v53, %v497_v22  ;;  %v610_v27 = vpop.f32.mrf.mxu1 }
  0xeb   : > { %915 = vst.msk [vmem:[%s1343_s24 + $0x38] sm:$0xff] %vm359_vm0, %v834_v25  ;;  %770 = vmatmul.f32.gmra.mxu2 %v275_v23  ;;  %v294_v25 = vld [vmem:[%s1182_s27 + $0x3a8] sm:$0xff] }
  0xec   : > { %v611_v30 = vadd.f32 %v610_v27, %v498_v26  ;;  %544 = vmatmul.f32.gmra.mxu0 %v273_v24  ;;  %v842_v41 = vpop.f32.mrf.mxu3 }
  0xed   : > { %657 = vmatmul.f32.gmra.mxu1 %v274_v28  ;;  %v304_v28 = vld [vmem:[%s1182_s27 + $0x3f8] sm:$0xff] }
  0xee   : > { %v723_v32 = vpop.f32.mrf.mxu2 }
  0xef   : > { %v724_v33 = vadd.f32 %v723_v32, %v611_v30  ;;  %v299_v32 = vld [vmem:[%s1182_s27 + $0x3d0] sm:$0xff] }
  0xf1   : > { %v500_v34 = vpop.f32.mrf.mxu0  ;;  %v837_v37 = vadd.f32 %v836_v17, %v724_v33  ;;  %1033 = vmatmul.msk.f32.gmra.mxu3 %vm359_vm0, %v288_v43  ;;  %v297_v33 = vld [vmem:[%s1182_s27 + $0x3c0] sm:$0xff]  ;;  %v303_v43 = vld [vmem:[%s1182_s27 + $0x3f0] sm:$0xff] }
  0xf2   : > { %v501_v38 = vadd.f32 %v1330_v53, %v500_v34  ;;  %v613_v39 = vpop.f32.mrf.mxu1 }
  0xf3   : > { %916 = vst.msk [vmem:[%s1343_s24 + $0x40] sm:$0xff] %vm359_vm0, %v837_v37  ;;  %773 = vmatmul.f32.gmra.mxu2 %v279_v35  ;;  %v298_v37 = vld [vmem:[%s1182_s27 + $0x3c8] sm:$0xff] }
  0xf4   : > { %v614_v42 = vadd.f32 %v613_v39, %v501_v38  ;;  %547 = vmatmul.f32.gmra.mxu0 %v277_v36  ;;  %v845_v54 = vpop.f32.mrf.mxu3 }
  0xf5   : > { %660 = vmatmul.f32.gmra.mxu1 %v278_v40 }
  0xf6   : > { %v726_v44 = vpop.f32.mrf.mxu2 }
  0xf7   : > { %v727_v45 = vadd.f32 %v726_v44, %v614_v42  ;;  %v301_v44 = vld [vmem:[%s1182_s27 + $0x3e0] sm:$0xff] }
  0xf9   : > { %v503_v46 = vpop.f32.mrf.mxu0  ;;  %v840_v49 = vadd.f32 %v839_v29, %v727_v45  ;;  %1034 = vmatmul.msk.f32.gmra.mxu3 %vm359_vm0, %v292_v56 }
  0xfa   : > { %v504_v50 = vadd.f32 %v1330_v53, %v503_v46  ;;  %v616_v51 = vpop.f32.mrf.mxu1 }
  0xfb   : > { %917 = vst.msk [vmem:[%s1343_s24 + $0x48] sm:$0xff] %vm359_vm0, %v840_v49  ;;  %776 = vmatmul.f32.gmra.mxu2 %v283_v47 }
  0xfc   : > { %v617_v55 = vadd.f32 %v616_v51, %v504_v50  ;;  %550 = vmatmul.f32.gmra.mxu0 %v281_v48  ;;  %v848_v2 = vpop.f32.mrf.mxu3  ;;  %v302_v48 = vld [vmem:[%s1182_s27 + $0x3e8] sm:$0xff] }
  0xfd   : > { %663 = vmatmul.f32.gmra.mxu1 %v282_v52 }
  0xfe   : > { %v729_v57 = vpop.f32.mrf.mxu2 }
  0xff   : > { %v730_v58 = vadd.f32 %v729_v57, %v617_v55 }
 0x101   : > { %v506_v59 = vpop.f32.mrf.mxu0  ;;  %v843_v62 = vadd.f32 %v842_v41, %v730_v58  ;;  %1035 = vmatmul.msk.f32.gmra.mxu3 %vm359_vm0, %v296_v4 }
 0x102   : > { %v507_v63 = vadd.f32 %v1330_v53, %v506_v59  ;;  %v619_v0 = vpop.f32.mrf.mxu1 }
 0x103   : > { %918 = vst.msk [vmem:[%s1343_s24 + $0x50] sm:$0xff] %vm359_vm0, %v843_v62  ;;  %779 = vmatmul.f32.gmra.mxu2 %v287_v60 }
 0x104   : > { %v620_v3 = vadd.f32 %v619_v0, %v507_v63  ;;  %553 = vmatmul.f32.gmra.mxu0 %v285_v61  ;;  %v851_v14 = vpop.f32.mrf.mxu3 }
 0x105   : > { %666 = vmatmul.f32.gmra.mxu1 %v286_v1 }
 0x106   : > { %v732_v5 = vpop.f32.mrf.mxu2 }
 0x107   : > { %v733_v6 = vadd.f32 %v732_v5, %v620_v3 }
 0x109   : > { %v509_v7 = vpop.f32.mrf.mxu0  ;;  %v846_v10 = vadd.f32 %v845_v54, %v733_v6  ;;  %1036 = vmatmul.msk.f32.gmra.mxu3 %vm359_vm0, %v300_v16 }
 0x10a   : > { %v510_v11 = vadd.f32 %v1330_v53, %v509_v7  ;;  %v622_v12 = vpop.f32.mrf.mxu1 }
 0x10b   : > { %919 = vst.msk [vmem:[%s1343_s24 + $0x58] sm:$0xff] %vm359_vm0, %v846_v10  ;;  %782 = vmatmul.f32.gmra.mxu2 %v291_v8 }
 0x10c   : > { %v623_v15 = vadd.f32 %v622_v12, %v510_v11  ;;  %556 = vmatmul.f32.gmra.mxu0 %v289_v9  ;;  %v854_v26 = vpop.f32.mrf.mxu3 }
 0x10d   : > { %669 = vmatmul.f32.gmra.mxu1 %v290_v13 }
 0x10e   : > { %v735_v17 = vpop.f32.mrf.mxu2 }
 0x10f   : > { %v736_v18 = vadd.f32 %v735_v17, %v623_v15 }
 0x111   : > { %v512_v19 = vpop.f32.mrf.mxu0  ;;  %v849_v22 = vadd.f32 %v848_v2, %v736_v18  ;;  %1037 = vmatmul.msk.f32.gmra.mxu3 %vm359_vm0, %v304_v28 }
 0x112   : > { %v513_v23 = vadd.f32 %v1330_v53, %v512_v19  ;;  %v625_v24 = vpop.f32.mrf.mxu1 }
 0x113   : > { %920 = vst.msk [vmem:[%s1343_s24 + $0x60] sm:$0xff] %vm359_vm0, %v849_v22  ;;  %785 = vmatmul.f32.gmra.mxu2 %v295_v20 }
 0x114   : > { %v626_v27 = vadd.f32 %v625_v24, %v513_v23  ;;  %559 = vmatmul.f32.gmra.mxu0 %v293_v21  ;;  %v857_v38 = vpop.f32.mrf.mxu3 }
 0x115   : > { %672 = vmatmul.f32.gmra.mxu1 %v294_v25 }
 0x116   : > { %v738_v29 = vpop.f32.mrf.mxu2 }
 0x117   : > { %v739_v30 = vadd.f32 %v738_v29, %v626_v27 }
 0x119   : > { %v515_v31 = vpop.f32.mrf.mxu0  ;;  %v852_v34 = vadd.f32 %v851_v14, %v739_v30 }
 0x11a   : > { %v516_v35 = vadd.f32 %v1330_v53, %v515_v31  ;;  %v628_v36 = vpop.f32.mrf.mxu1 }
 0x11b   : > { %921 = vst.msk [vmem:[%s1343_s24 + $0x68] sm:$0xff] %vm359_vm0, %v852_v34  ;;  %788 = vmatmul.f32.gmra.mxu2 %v299_v32 }
 0x11c   : > { %v629_v39 = vadd.f32 %v628_v36, %v516_v35  ;;  %562 = vmatmul.f32.gmra.mxu0 %v297_v33  ;;  %v860_v49 = vpop.f32.mrf.mxu3 }
 0x11d   : > { %675 = vmatmul.f32.gmra.mxu1 %v298_v37 }
 0x11e   : > { %v741_v40 = vpop.f32.mrf.mxu2 }
 0x11f   : > { %v742_v41 = vadd.f32 %v741_v40, %v629_v39 }
 0x121   : > { %v518_v42 = vpop.f32.mrf.mxu0  ;;  %v855_v45 = vadd.f32 %v854_v26, %v742_v41 }
 0x122   : > { %v519_v46 = vadd.f32 %v1330_v53, %v518_v42  ;;  %v631_v47 = vpop.f32.mrf.mxu1 }
 0x123   : > { %922 = vst.msk [vmem:[%s1343_s24 + $0x70] sm:$0xff] %vm359_vm0, %v855_v45  ;;  %791 = vmatmul.f32.gmra.mxu2 %v303_v43 }
 0x124   : > { %v632_v50 = vadd.f32 %v631_v47, %v519_v46  ;;  %565 = vmatmul.f32.gmra.mxu0 %v301_v44  ;;  %v863_v58 = vpop.f32.mrf.mxu3 }
 0x125   : > { %678 = vmatmul.f32.gmra.mxu1 %v302_v48 }
 0x126   : > { %v744_v51 = vpop.f32.mrf.mxu2 }
 0x127   : > { %v745_v52 = vadd.f32 %v744_v51, %v632_v50 }
 0x129   : > { %v521_v54 = vpop.f32.mrf.mxu0  ;;  %v858_v55 = vadd.f32 %v857_v38, %v745_v52 }
 0x12a   : > { %v522_v56 = vadd.f32 %v1330_v53, %v521_v54  ;;  %v634_v57 = vpop.f32.mrf.mxu1 }
 0x12b   : > { %923 = vst.msk [vmem:[%s1343_s24 + $0x78] sm:$0xff] %vm359_vm0, %v858_v55 }
 0x12c   : > { %v635_v59 = vadd.f32 %v634_v57, %v522_v56  ;;  %v866_v2 = vpop.f32.mrf.mxu3 }
 0x12e   : > { %v747_v60 = vpop.f32.mrf.mxu2 }
 0x12f   : > { %v748_v61 = vadd.f32 %v747_v60, %v635_v59 }
 0x131   : > { %v524_v62 = vpop.f32.mrf.mxu0  ;;  %v861_v63 = vadd.f32 %v860_v49, %v748_v61 }
 0x132   : > { %v525_v0 = vadd.f32 %v1330_v53, %v524_v62  ;;  %v637_v1 = vpop.f32.mrf.mxu1 }
 0x133   : > { %924 = vst.msk [vmem:[%s1343_s24 + $0x80] sm:$0xff] %vm359_vm0, %v861_v63 }
 0x134   : > { %v638_v3 = vadd.f32 %v637_v1, %v525_v0  ;;  %v869_v10 = vpop.f32.mrf.mxu3 }
 0x136   : > { %v750_v4 = vpop.f32.mrf.mxu2 }
 0x137   : > { %v751_v5 = vadd.f32 %v750_v4, %v638_v3 }
 0x139   : > { %v527_v6 = vpop.f32.mrf.mxu0  ;;  %v864_v7 = vadd.f32 %v863_v58, %v751_v5 }
 0x13a   : > { %v528_v8 = vadd.f32 %v1330_v53, %v527_v6  ;;  %v640_v9 = vpop.f32.mrf.mxu1 }
 0x13b   : > { %925 = vst.msk [vmem:[%s1343_s24 + $0x88] sm:$0xff] %vm359_vm0, %v864_v7 }
 0x13c   : > { %v641_v11 = vadd.f32 %v640_v9, %v528_v8  ;;  %v872_v18 = vpop.f32.mrf.mxu3 }
 0x13e   : > { %v753_v12 = vpop.f32.mrf.mxu2 }
 0x13f   : > { %v754_v13 = vadd.f32 %v753_v12, %v641_v11 }
 0x141   : > { %v530_v14 = vpop.f32.mrf.mxu0  ;;  %v867_v15 = vadd.f32 %v866_v2, %v754_v13 }
 0x142   : > { %v531_v16 = vadd.f32 %v1330_v53, %v530_v14  ;;  %v643_v17 = vpop.f32.mrf.mxu1 }
 0x143   : > { %926 = vst.msk [vmem:[%s1343_s24 + $0x90] sm:$0xff] %vm359_vm0, %v867_v15 }
 0x144   : > { %v644_v19 = vadd.f32 %v643_v17, %v531_v16  ;;  %v875_v26 = vpop.f32.mrf.mxu3 }
 0x146   : > { %v756_v20 = vpop.f32.mrf.mxu2 }
 0x147   : > { %v757_v21 = vadd.f32 %v756_v20, %v644_v19 }
 0x149   : > { %v533_v22 = vpop.f32.mrf.mxu0  ;;  %v870_v23 = vadd.f32 %v869_v10, %v757_v21 }
 0x14a   : > { %v534_v24 = vadd.f32 %v1330_v53, %v533_v22  ;;  %v646_v25 = vpop.f32.mrf.mxu1 }
 0x14b   : > { %927 = vst.msk [vmem:[%s1343_s24 + $0x98] sm:$0xff] %vm359_vm0, %v870_v23 }
 0x14c   : > { %v647_v27 = vadd.f32 %v646_v25, %v534_v24  ;;  %v878_v34 = vpop.f32.mrf.mxu3 }
 0x14e   : > { %v759_v28 = vpop.f32.mrf.mxu2 }
 0x14f   : > { %v760_v29 = vadd.f32 %v759_v28, %v647_v27 }
 0x151   : > { %v536_v30 = vpop.f32.mrf.mxu0  ;;  %v873_v31 = vadd.f32 %v872_v18, %v760_v29 }
 0x152   : > { %v537_v32 = vadd.f32 %v1330_v53, %v536_v30  ;;  %v649_v33 = vpop.f32.mrf.mxu1 }
 0x153   : > { %928 = vst.msk [vmem:[%s1343_s24 + $0xa0] sm:$0xff] %vm359_vm0, %v873_v31 }
 0x154   : > { %v650_v35 = vadd.f32 %v649_v33, %v537_v32  ;;  %v881_v42 = vpop.f32.mrf.mxu3 }
 0x156   : > { %v762_v36 = vpop.f32.mrf.mxu2 }
 0x157   : > { %v763_v37 = vadd.f32 %v762_v36, %v650_v35 }
 0x159   : > { %v539_v38 = vpop.f32.mrf.mxu0  ;;  %v876_v39 = vadd.f32 %v875_v26, %v763_v37 }
 0x15a   : > { %v540_v40 = vadd.f32 %v1330_v53, %v539_v38  ;;  %v652_v41 = vpop.f32.mrf.mxu1 }
 0x15b   : > { %929 = vst.msk [vmem:[%s1343_s24 + $0xa8] sm:$0xff] %vm359_vm0, %v876_v39 }
 0x15c   : > { %v653_v43 = vadd.f32 %v652_v41, %v540_v40  ;;  %v884_v50 = vpop.f32.mrf.mxu3 }
 0x15e   : > { %v765_v44 = vpop.f32.mrf.mxu2 }
 0x15f   : > { %v766_v45 = vadd.f32 %v765_v44, %v653_v43 }
 0x161   : > { %v542_v46 = vpop.f32.mrf.mxu0  ;;  %v879_v47 = vadd.f32 %v878_v34, %v766_v45 }
 0x162   : > { %v543_v48 = vadd.f32 %v1330_v53, %v542_v46  ;;  %v655_v49 = vpop.f32.mrf.mxu1 }
 0x163   : > { %930 = vst.msk [vmem:[%s1343_s24 + $0xb0] sm:$0xff] %vm359_vm0, %v879_v47 }
 0x164   : > { %v656_v51 = vadd.f32 %v655_v49, %v543_v48  ;;  %v887_v59 = vpop.f32.mrf.mxu3 }
 0x166   : > { %v768_v52 = vpop.f32.mrf.mxu2 }
 0x167   : > { %v769_v54 = vadd.f32 %v768_v52, %v656_v51 }
 0x169   : > { %v545_v55 = vpop.f32.mrf.mxu0  ;;  %v882_v56 = vadd.f32 %v881_v42, %v769_v54 }
 0x16a   : > { %v546_v57 = vadd.f32 %v1330_v53, %v545_v55  ;;  %v658_v58 = vpop.f32.mrf.mxu1 }
 0x16b   : > { %931 = vst.msk [vmem:[%s1343_s24 + $0xb8] sm:$0xff] %vm359_vm0, %v882_v56 }
 0x16c   : > { %v659_v60 = vadd.f32 %v658_v58, %v546_v57  ;;  %v890_v4 = vpop.f32.mrf.mxu3 }
 0x16e   : > { %v771_v61 = vpop.f32.mrf.mxu2 }
 0x16f   : > { %v772_v62 = vadd.f32 %v771_v61, %v659_v60 }
 0x171   : > { %v548_v63 = vpop.f32.mrf.mxu0  ;;  %v885_v0 = vadd.f32 %v884_v50, %v772_v62 }
 0x172   : > { %v549_v1 = vadd.f32 %v1330_v53, %v548_v63  ;;  %v661_v2 = vpop.f32.mrf.mxu1 }
 0x173   : > { %932 = vst.msk [vmem:[%s1343_s24 + $0xc0] sm:$0xff] %vm359_vm0, %v885_v0 }
 0x174   : > { %v662_v3 = vadd.f32 %v661_v2, %v549_v1  ;;  %v893_v13 = vpop.f32.mrf.mxu3 }
 0x176   : > { %v774_v5 = vpop.f32.mrf.mxu2 }
 0x177   : > { %v775_v6 = vadd.f32 %v774_v5, %v662_v3 }
 0x179   : > { %v551_v7 = vpop.f32.mrf.mxu0  ;;  %v888_v8 = vadd.f32 %v887_v59, %v775_v6 }
 0x17a   : > { %v552_v9 = vadd.f32 %v1330_v53, %v551_v7  ;;  %v664_v10 = vpop.f32.mrf.mxu1 }
 0x17b   : > { %933 = vst.msk [vmem:[%s1343_s24 + $0xc8] sm:$0xff] %vm359_vm0, %v888_v8 }
 0x17c   : > { %v665_v11 = vadd.f32 %v664_v10, %v552_v9  ;;  %v896_v23 = vpop.f32.mrf.mxu3 }
 0x17e   : > { %v777_v12 = vpop.f32.mrf.mxu2 }
 0x17f   : > { %v778_v14 = vadd.f32 %v777_v12, %v665_v11 }
 0x181   : > { %v554_v15 = vpop.f32.mrf.mxu0  ;;  %v891_v16 = vadd.f32 %v890_v4, %v778_v14 }
 0x182   : > { %v555_v17 = vadd.f32 %v1330_v53, %v554_v15  ;;  %v667_v18 = vpop.f32.mrf.mxu1 }
 0x183   : > { %934 = vst.msk [vmem:[%s1343_s24 + $0xd0] sm:$0xff] %vm359_vm0, %v891_v16 }
 0x184   : > { %v668_v19 = vadd.f32 %v667_v18, %v555_v17  ;;  %v899_v34 = vpop.f32.mrf.mxu3 }
 0x186   : > { %v780_v20 = vpop.f32.mrf.mxu2 }
 0x187   : > { %v781_v21 = vadd.f32 %v780_v20, %v668_v19 }
 0x189   : > { %v557_v22 = vpop.f32.mrf.mxu0  ;;  %v894_v24 = vadd.f32 %v893_v13, %v781_v21 }
 0x18a   : > { %v558_v25 = vadd.f32 %v1330_v53, %v557_v22  ;;  %v670_v26 = vpop.f32.mrf.mxu1 }
 0x18b   : > { %935 = vst.msk [vmem:[%s1343_s24 + $0xd8] sm:$0xff] %vm359_vm0, %v894_v24 }
 0x18c   : > { %v671_v27 = vadd.f32 %v670_v26, %v558_v25  ;;  %v902_v43 = vpop.f32.mrf.mxu3 }
 0x18e   : > { %v783_v28 = vpop.f32.mrf.mxu2 }
 0x18f   : > { %v784_v29 = vadd.f32 %v783_v28, %v671_v27 }
 0x191   : > { %v560_v30 = vpop.f32.mrf.mxu0  ;;  %v897_v31 = vadd.f32 %v896_v23, %v784_v29 }
 0x192   : > { %v561_v32 = vadd.f32 %v1330_v53, %v560_v30  ;;  %v673_v33 = vpop.f32.mrf.mxu1 }
 0x193   : > { %936 = vst.msk [vmem:[%s1343_s24 + $0xe0] sm:$0xff] %vm359_vm0, %v897_v31 }
 0x194   : > { %v674_v35 = vadd.f32 %v673_v33, %v561_v32  ;;  %v905_v52 = vpop.f32.mrf.mxu3 }
 0x196   : > { %v786_v36 = vpop.f32.mrf.mxu2 }
 0x197   : > { %v787_v37 = vadd.f32 %v786_v36, %v674_v35 }
 0x199   : > { %v563_v38 = vpop.f32.mrf.mxu0  ;;  %v900_v39 = vadd.f32 %v899_v34, %v787_v37 }
 0x19a   : > { %v564_v40 = vadd.f32 %v1330_v53, %v563_v38  ;;  %v676_v41 = vpop.f32.mrf.mxu1 }
 0x19b   : > { %937 = vst.msk [vmem:[%s1343_s24 + $0xe8] sm:$0xff] %vm359_vm0, %v900_v39 }
 0x19c   : > { %v677_v42 = vadd.f32 %v676_v41, %v564_v40 }
 0x19e   : > { %v789_v44 = vpop.f32.mrf.mxu2 }
 0x19f   : > { %v790_v45 = vadd.f32 %v789_v44, %v677_v42 }
 0x1a1   : > { %v566_v46 = vpop.f32.mrf.mxu0  ;;  %v903_v47 = vadd.f32 %v902_v43, %v790_v45 }
 0x1a2   : > { %v567_v48 = vadd.f32 %v1330_v53, %v566_v46  ;;  %v679_v49 = vpop.f32.mrf.mxu1 }
 0x1a3   : > { %938 = vst.msk [vmem:[%s1343_s24 + $0xf0] sm:$0xff] %vm359_vm0, %v903_v47 }
 0x1a4   : > { %v680_v50 = vadd.f32 %v679_v49, %v567_v48 }
 0x1a6   : > { %v792_v51 = vpop.f32.mrf.mxu2 }
 0x1a7   : > { %v793_v54 = vadd.f32 %v792_v51, %v680_v50 }
 0x1a9   : > { %v906_v55 = vadd.f32 %v905_v52, %v793_v54 }
 0x1ab   : > { %939 = vst.msk [vmem:[%s1343_s24 + $0xf8] sm:$0xff] %vm359_vm0, %v906_v55 }
 0x1ac PF: > { %s13_s12 = sadd.s32 1, %s1056_s12  }
 0x1ad   : > { %p10_p4 = scmp.ge.s32.totalorder %s13_s12, 4  }
 0x1af   :  { %12 = sbr.rel (!%p10_p4) target bundleno = 1 (0x1), region = 62 }

// kernel: forward.32
= control target key start
LH: loop header
LB: loop body
LE: loop exit
PB: predicated region body
PF: predicated region fallthrough
CT: control target
= control target key end

     0   :  { %s448_s6 = smov 0   ;;  %s631_s0 = inlined_call_operand.vmem [shape: f32[2,18,288], index: 0, kind: input, shape index: {}]   ;;  %s632_s1 = inlined_call_operand.vmem [shape: f32[2,16,256], index: 1, kind: output, shape index: {}]  }
   0x1 LB: > { %s406_s7 = sadd.s32 4294967295, %s434_s6   ;;  %p410_p0 = scmp.ge.s32.totalorder %s434_s6, 1  ;;  %s434_s6 = sphi %s448_s6, %s11_s6  }
   0x2   : > { %p87_p1 = scmp.lt.s32.totalorder %s434_s6, 3 }
   0x4   : > { %p88_p2 = pnand %p410_p0, %p87_p1 }
   0x5   : > { %p107_p3 = scmp.lt.s32.totalorder (!%p88_p2), %s406_s7, 1  ;;  %s436_s12 = smov (!%p88_p2), 112  }
   0x6   : > { %91 = sbr.rel (%p88_p2) target bundleno = 224 (0xe0), region = 24  ;;  %s437_s13 = smov (!%p88_p2), 96  }
   0xb   : > { %s634_s7 = smov (!%p107_p3, %s406_s7), 1  ;;  %vm187_vm0 = vcmask 1046528   ;;  %vm271_vm1 = vcmask 1045504   ;;  %vm141_vm2 = vcmask 916480   ;;  %vm166_vm3 = vcmask 785408  }
   0xc   : > { %s417_s8 = smul.u32 72, %s634_s7  ;;  %s416_s14 = sshll.u32 %s634_s7, 5 }
   0xd   : > { %s116_s17 = scalar_lea.vmem %s632_s1, %s416_s14 }
   0xe   : > { %s462_s11 = scalar_lea.vmem %s631_s0, %s417_s8 }
   0xf   : > { %v121_v0 = vld [vmem:[%s462_s11 + $0x10] sm:$0xff]  ;;  %v466_v1 = vld [vmem:[%s462_s11] sm:$0xff]  ;;  %v477_v3 = vld [vmem:[%s462_s11 + $0x18] sm:$0xff] }
  0x10   : > { %133 = vrot.lane.b32.xlu1 %v121_v0, %s436_s12  ;;  %129 = vrot.lane.b32.xlu0 %v466_v1, %s436_s12  ;;  %v472_v2 = vld [vmem:[%s462_s11 + $0x20] sm:$0xff]  ;;  %v480_v4 = vld [vmem:[%s462_s11 + $0x8] sm:$0xff]  ;;  %v189_v12 = vrot.slane %v477_v3, 1  ;;  %v273_v33 = vrot.slane %v477_v3, 2 }
  0x11   : > { %137 = vrot.lane.b32.xlu2 %v472_v2, %s436_s12  ;;  %v483_v5 = vld [vmem:[%s462_s11 + $0x28] sm:$0xff]  ;;  %v179_v7 = vld [vmem:[%s462_s11] sm:$0xfe]  ;;  %v206_v8 = vld [vmem:[%s462_s11 + $0x10] sm:$0xfe]  ;;  %v192_v10 = vrot.slane %v472_v2, 1 }
  0x12   : > { %v180_v6 = vld [vmem:[%s462_s11 + $0x8] sm:$0xfe]  ;;  %v188_v11 = vrot.slane %v179_v7, 1  ;;  %v210_v13 = vrot.slane %v206_v8, 1  ;;  %v211_v14 = vrot.slane %v483_v5, 1  ;;  %v276_v31 = vrot.slane %v472_v2, 2 }
  0x13   : > { %v191_v9 = vrot.slane %v180_v6, 1  ;;  %v182_v17 = vld [vmem:[%s462_s11 + $0x38] sm:$0x1]  ;;  %v181_v18 = vld [vmem:[%s462_s11 + $0x30] sm:$0x1]  ;;  %v295_v35 = vrot.slane %v483_v5, 2 }
  0x14   : > { %v512_v16 = vsel %vm187_vm0, %v188_v11, %v189_v12  ;;  %v212_v19 = vsel %vm187_vm0, %v210_v13, %v211_v14  ;;  %v207_v20 = vld [vmem:[%s462_s11 + $0x40] sm:$0x1]  ;;  %v196_v21 = vrot.slane %v182_v17, 1  ;;  %v194_v22 = vrot.slane %v181_v18, 1  ;;  %v264_v27 = vld [vmem:[%s462_s11 + $0x8] sm:$0xfc] }
  0x15   : > { %v509_v15 = vsel %vm187_vm0, %v191_v9, %v192_v10  ;;  %v213_v23 = vrot.slane %v207_v20, 1  ;;  %v263_v28 = vld [vmem:[%s462_s11] sm:$0xfc]  ;;  %v290_v29 = vld [vmem:[%s462_s11 + $0x10] sm:$0xfc]  ;;  %v275_v30 = vrot.slane %v264_v27, 2 }
  0x16   : > { %v524_v24 = vsel %vm187_vm0, %v192_v10, %v196_v21  ;;  %v527_v25 = vsel %vm187_vm0, %v189_v12, %v194_v22  ;;  %v272_v32 = vrot.slane %v263_v28, 2  ;;  %v294_v34 = vrot.slane %v290_v29, 2  ;;  %v266_v38 = vld [vmem:[%s462_s11 + $0x38] sm:$0x3]  ;;  %v265_v39 = vld [vmem:[%s462_s11 + $0x30] sm:$0x3] }
  0x17   : > { %v214_v26 = vsel %vm187_vm0, %v211_v14, %v213_v23  ;;  %v552_v36 = vsel %vm271_vm1, %v275_v30, %v276_v31  ;;  %v291_v41 = vld [vmem:[%s462_s11 + $0x40] sm:$0x3]  ;;  %v280_v42 = vrot.slane %v266_v38, 2  ;;  %v278_v43 = vrot.slane %v265_v39, 2 }
  0x18   : > { %135 = vrot.lane.b32.xlu1 %v477_v3, %s436_s12  ;;  %131 = vrot.lane.b32.xlu0 %v480_v4, %s436_s12  ;;  %v555_v37 = vsel %vm271_vm1, %v272_v32, %v273_v33  ;;  %v296_v40 = vsel %vm271_vm1, %v294_v34, %v295_v35  ;;  %v297_v44 = vrot.slane %v291_v41, 2 }
  0x19   : > { %139 = vrot.lane.b32.xlu2 %v483_v5, %s436_s12  ;;  %v567_v45 = vsel %vm271_vm1, %v276_v31, %v280_v42  ;;  %v570_v46 = vsel %vm271_vm1, %v273_v33, %v278_v43 }
  0x1a   : > { %v298_v47 = vsel %vm271_vm1, %v295_v35, %v297_v44 }
  0x20   : > { %156 = vrot.lane.b32.xlu1 %v480_v4, %s437_s13  ;;  %154 = vrot.lane.b32.xlu0 %v466_v1, %s437_s13 }
  0x21   : > { %158 = vrot.lane.b32.xlu2 %v121_v0, %s437_s13 }
  0x28   : > { %162 = vrot.lane.b32.xlu1 %v472_v2, %s437_s13  ;;  %160 = vrot.lane.b32.xlu0 %v477_v3, %s437_s13 }
  0x29   : > { %164 = vrot.lane.b32.xlu2 %v483_v5, %s437_s13 }
  0x30   : > { %217 = vrot.lane.b32.xlu1 %v509_v15, %s436_s12  ;;  %215 = vrot.lane.b32.xlu0 %v512_v16, %s436_s12 }
  0x31   : > { %219 = vrot.lane.b32.xlu2 %v212_v19, %s436_s12 }
  0x38   : > { %223 = vrot.lane.b32.xlu1 %v524_v24, %s436_s12  ;;  %221 = vrot.lane.b32.xlu0 %v527_v25, %s436_s12 }
  0x39   : > { %225 = vrot.lane.b32.xlu2 %v214_v26, %s436_s12 }
  0x40   : > { %241 = vrot.lane.b32.xlu1 %v509_v15, %s437_s13  ;;  %239 = vrot.lane.b32.xlu0 %v512_v16, %s437_s13 }
  0x41   : > { %243 = vrot.lane.b32.xlu2 %v212_v19, %s437_s13 }
  0x48   : > { %247 = vrot.lane.b32.xlu1 %v524_v24, %s437_s13  ;;  %245 = vrot.lane.b32.xlu0 %v527_v25, %s437_s13 }
  0x49   : > { %249 = vrot.lane.b32.xlu2 %v214_v26, %s437_s13 }
  0x50   : > { %301 = vrot.lane.b32.xlu1 %v552_v36, %s436_s12  ;;  %299 = vrot.lane.b32.xlu0 %v555_v37, %s436_s12 }
  0x51   : > { %303 = vrot.lane.b32.xlu2 %v296_v40, %s436_s12 }
  0x58   : > { %307 = vrot.lane.b32.xlu1 %v567_v45, %s436_s12  ;;  %305 = vrot.lane.b32.xlu0 %v570_v46, %s436_s12 }
  0x59   : > { %309 = vrot.lane.b32.xlu2 %v298_v47, %s436_s12 }
  0x60   : > { %325 = vrot.lane.b32.xlu1 %v552_v36, %s437_s13  ;;  %323 = vrot.lane.b32.xlu0 %v555_v37, %s437_s13 }
  0x61   : > { %327 = vrot.lane.b32.xlu2 %v296_v40, %s437_s13 }
  0x68   : > { %331 = vrot.lane.b32.xlu1 %v567_v45, %s437_s13  ;;  %329 = vrot.lane.b32.xlu0 %v570_v46, %s437_s13 }
  0x69   : > { %333 = vrot.lane.b32.xlu2 %v298_v47, %s437_s13 }
  0x6b   : > { %v138_v48 = vpop.permute.xlu2 %137 }
  0x73   : > { %v140_v49 = vpop.permute.xlu2 %139 }
  0x74   : > { %v145_v50 = vsel %vm141_vm2, %v138_v48, %v140_v49 }
  0x75   : > { %v153_v38 = vmax.f32 %v472_v2, %v145_v50 }
  0x7b   : > { %v159_v51 = vpop.permute.xlu2 %158 }
  0x82   : > { %v134_v52 = vpop.permute.xlu1 %133  ;;  %v130_v53 = vpop.permute.xlu0 %129 }
  0x83   : > { %v165_v54 = vpop.permute.xlu2 %164 }
  0x8a   : > { %v136_v55 = vpop.permute.xlu1 %135  ;;  %v132_v56 = vpop.permute.xlu0 %131 }
  0x8b   : > { %v144_v57 = vsel %vm141_vm2, %v136_v55, %v138_v48  ;;  %v220_v58 = vpop.permute.xlu2 %219  ;;  %v142_v17 = vsel %vm141_vm2, %v130_v53, %v132_v56  ;;  %v143_v18 = vsel %vm141_vm2, %v132_v56, %v134_v52 }
  0x8c   : > { %v150_v21 = vmax.f32 %v466_v1, %v142_v17  ;;  %v151_v22 = vmax.f32 %v480_v4, %v143_v18  ;;  %v152_v39 = vmax.f32 %v477_v3, %v144_v57 }
  0x92   : > { %v157_v59 = vpop.permute.xlu1 %156  ;;  %v155_v60 = vpop.permute.xlu0 %154 }
  0x93   : > { %v226_v63 = vpop.permute.xlu2 %225  ;;  %v168_v19 = vsel %vm166_vm3, %v157_v59, %v159_v51  ;;  %v167_v20 = vsel %vm166_vm3, %v155_v60, %v157_v59 }
  0x94   : > { %v176_v27 = vmax.f32 %v151_v22, %v168_v19  ;;  %v175_v28 = vmax.f32 %v150_v21, %v167_v20 }
  0x96   : > { %v203_v32 = vmax.f32 %v176_v27, %v509_v15  ;;  %v202_v33 = vmax.f32 %v175_v28, %v512_v16 }
  0x9a   : > { %v163_v61 = vpop.permute.xlu1 %162  ;;  %v161_v62 = vpop.permute.xlu0 %160 }
  0x9b   : > { %v244_v6 = vpop.permute.xlu2 %243  ;;  %v170_v34 = vsel %vm166_vm3, %v163_v61, %v165_v54  ;;  %v169_v35 = vsel %vm166_vm3, %v161_v62, %v163_v61 }
  0x9c   : > { %v178_v15 = vmax.f32 %v153_v38, %v170_v34  ;;  %v177_v44 = vmax.f32 %v152_v39, %v169_v35 }
  0x9e   : > { %v205_v3 = vmax.f32 %v178_v15, %v524_v24  ;;  %v204_v50 = vmax.f32 %v177_v44, %v527_v25 }
  0xa2   : > { %v218_v0 = vpop.permute.xlu1 %217  ;;  %v216_v5 = vpop.permute.xlu0 %215 }
  0xa3   : > { %v250_v9 = vpop.permute.xlu2 %249  ;;  %v228_v30 = vsel %vm141_vm2, %v218_v0, %v220_v58  ;;  %v227_v31 = vsel %vm141_vm2, %v216_v5, %v218_v0 }
  0xa4   : > { %v236_v40 = vmax.f32 %v203_v32, %v228_v30  ;;  %v235_v41 = vmax.f32 %v202_v33, %v227_v31 }
  0xaa   : > { %v224_v7 = vpop.permute.xlu1 %223  ;;  %v222_v8 = vpop.permute.xlu0 %221 }
  0xab   : > { %v304_v12 = vpop.permute.xlu2 %303  ;;  %v230_v49 = vsel %vm141_vm2, %v224_v7, %v226_v63  ;;  %v229_v51 = vsel %vm141_vm2, %v222_v8, %v224_v7 }
  0xac   : > { %v238_v57 = vmax.f32 %v205_v3, %v230_v49  ;;  %v237_v58 = vmax.f32 %v204_v50, %v229_v51 }
  0xb2   : > { %v242_v10 = vpop.permute.xlu1 %241  ;;  %v240_v11 = vpop.permute.xlu0 %239 }
  0xb3   : > { %v310_v29 = vpop.permute.xlu2 %309  ;;  %v252_v1 = vsel %vm166_vm3, %v242_v10, %v244_v6  ;;  %v251_v4 = vsel %vm166_vm3, %v240_v11, %v242_v10 }
  0xb4   : > { %v260_v16 = vmax.f32 %v236_v40, %v252_v1  ;;  %v259_v47 = vmax.f32 %v235_v41, %v251_v4 }
  0xb6   : > { %v287_v53 = vmax.f32 %v260_v16, %v552_v36  ;;  %v286_v54 = vmax.f32 %v259_v47, %v555_v37 }
  0xba   : > { %v248_v13 = vpop.permute.xlu1 %247  ;;  %v246_v14 = vpop.permute.xlu0 %245 }
  0xbb   : > { %v328_v48 = vpop.permute.xlu2 %327  ;;  %v254_v55 = vsel %vm166_vm3, %v248_v13, %v250_v9  ;;  %v253_v56 = vsel %vm166_vm3, %v246_v14, %v248_v13 }
  0xbc   : > { %v262_v36 = vmax.f32 %v238_v57, %v254_v55  ;;  %v261_v37 = vmax.f32 %v237_v58, %v253_v56 }
  0xbe   : > { %v289_v7 = vmax.f32 %v262_v36, %v567_v45  ;;  %v288_v8 = vmax.f32 %v261_v37, %v570_v46 }
  0xc2   : > { %v302_v23 = vpop.permute.xlu1 %301  ;;  %v300_v26 = vpop.permute.xlu0 %299 }
  0xc3   : > { %v312_v52 = vsel %vm141_vm2, %v302_v23, %v304_v12  ;;  %v311_v2 = vsel %vm141_vm2, %v300_v26, %v302_v23  ;;  %v334_v9 = vpop.permute.xlu2 %333 }
  0xc4   : > { %v320_v59 = vmax.f32 %v287_v53, %v312_v52  ;;  %v319_v60 = vmax.f32 %v286_v54, %v311_v2 }
  0xca   : > { %v308_v42 = vpop.permute.xlu1 %307  ;;  %v306_v43 = vpop.permute.xlu0 %305 }
  0xcb   : > { %v314_v5 = vsel %vm141_vm2, %v308_v42, %v310_v29  ;;  %v313_v6 = vsel %vm141_vm2, %v306_v43, %v308_v42 }
  0xcc   : > { %v322_v10 = vmax.f32 %v289_v7, %v314_v5  ;;  %v321_v11 = vmax.f32 %v288_v8, %v313_v6 }
  0xd2   : > { %v326_v61 = vpop.permute.xlu1 %325  ;;  %v324_v62 = vpop.permute.xlu0 %323 }
  0xd3   : > { %v336_v24 = vsel %vm166_vm3, %v326_v61, %v328_v48  ;;  %v335_v25 = vsel %vm166_vm3, %v324_v62, %v326_v61 }
  0xd4   : > { %v344_v63 = vmax.f32 %v320_v59, %v336_v24  ;;  %v343_v0 = vmax.f32 %v319_v60, %v335_v25 }
  0xd6   : > { %348 = vst [vmem:[%s116_s17 + $0x8] sm:$0xff] %v344_v63 }
  0xd7   : > { %347 = vst [vmem:[%s116_s17] sm:$0xff] %v343_v0 }
  0xda   : > { %v332_v12 = vpop.permute.xlu1 %331  ;;  %v330_v13 = vpop.permute.xlu0 %329 }
  0xdb   : > { %v338_v14 = vsel %vm166_vm3, %v332_v12, %v334_v9  ;;  %v337_v17 = vsel %vm166_vm3, %v330_v13, %v332_v12 }
  0xdc   : > { %v346_v18 = vmax.f32 %v322_v10, %v338_v14  ;;  %v345_v19 = vmax.f32 %v321_v11, %v337_v17 }
  0xde   : > { %350 = vst [vmem:[%s116_s17 + $0x18] sm:$0xff] %v346_v18 }
  0xdf   : > { %349 = vst [vmem:[%s116_s17 + $0x10] sm:$0xff] %v345_v19 }
  0xe0 PF: > { %s11_s6 = sadd.s32 1, %s434_s6  }
  0xe1   : > { %p8_p4 = scmp.ge.s32.totalorder %s11_s6, 4  }
  0xe3   :  { %10 = sbr.rel (!%p8_p4) target bundleno = 1 (0x1), region = 54 }

// kernel: forward.33
= control target key start
LH: loop header
LB: loop body
LE: loop exit
PB: predicated region body
PF: predicated region fallthrough
CT: control target
= control target key end

     0   :  { %s506_s15 = smov 0   ;;  %s592_s0 = inlined_call_operand.vmem [shape: f32[64,128], index: 0, kind: input, shape index: {}]   ;;  %s593_s1 = inlined_call_operand.vmem [shape: f32[64,128], index: 1, kind: input, shape index: {}]   ;;  %s594_s2 = inlined_call_operand.vmem [shape: f32[64,128], index: 2, kind: input, shape index: {}]   ;;  %s595_s3 = inlined_call_operand.vmem [shape: f32[64,128], index: 3, kind: input, shape index: {}]   ;;  %s596_s4 = inlined_call_operand.vmem [shape: f32[2,512], index: 4, kind: output, shape index: {}]  }
   0x1 LB: > { %s448_s16 = sadd.s32 4294967295, %s478_s15   ;;  %p451_p0 = scmp.ge.s32.totalorder %s478_s15, 1  ;;  %s478_s15 = sphi %s506_s15, %s14_s15  }
   0x2   : > { %p191_p1 = scmp.lt.s32.totalorder %s478_s15, 3 }
   0x4   : > { %p192_p2 = pnand %p451_p0, %p191_p1 }
   0x5   : > { %s452_s17 = sshll.u32 (!%p192_p2), %s448_s16, 2  ;;  %p460_p4 = scmp.ne.s32.totalorder (!%p192_p2), %s448_s16, 0 }
   0x6   : > { %195 = sbr.rel (%p192_p2) target bundleno = 55 (0x37), region = 36  ;;  %p228_p3 = scmp.lt.s32.totalorder (!%p192_p2), %s452_s17, 7 }
   0xb   : > { %s598_s17 = smov (!%p228_p3, %s452_s17), 7  ;;  %254 = sbr.rel (%p460_p4) target bundleno = 18 (0x12), region = 40 }
   0xc   : > { %s453_s18 = sshll.u32 %s598_s17, 3 }
   0xd   : > { %s231_s21 = scalar_lea.vmem %s592_s0, %s453_s18  ;;  %s237_s24 = scalar_lea.vmem %s593_s1, %s453_s18 }
   0xe   : > { %s523_s27 = scalar_lea.vmem %s594_s2, %s453_s18  ;;  %s528_s30 = scalar_lea.vmem %s595_s3, %s453_s18 }
  0x10   : > { %v480_v0 = vmov 0.0  }
  0x11   : > { %255 = vst [vmem:[%s596_s4] sm:$0xff] %v480_v0 }
  0x12 PF: > { %v256_v1 = vld [vmem:[%s231_s21] sm:$0xff]  ;;  %v257_v2 = vld [vmem:[%s231_s21 + $0x8] sm:$0xff]  ;;  %v258_v3 = vld [vmem:[%s231_s21 + $0x10] sm:$0xff] }
  0x13   : > { %v259_v4 = vld [vmem:[%s231_s21 + $0x18] sm:$0xff]  ;;  %v261_v5 = vadd.f32 %v257_v2, %v256_v1  ;;  %v273_v6 = vmul.f32 %v256_v1, %v256_v1  ;;  %v274_v7 = vmul.f32 %v257_v2, %v257_v2  ;;  %v275_v8 = vmul.f32 %v258_v3, %v258_v3  ;;  %v288_v10 = vld [vmem:[%s237_s24] sm:$0xff]  ;;  %v289_v11 = vld [vmem:[%s237_s24 + $0x8] sm:$0xff] }
  0x14   : > { %v276_v9 = vmul.f32 %v259_v4, %v259_v4  ;;  %v290_v12 = vld [vmem:[%s237_s24 + $0x10] sm:$0xff]  ;;  %v291_v15 = vld [vmem:[%s237_s24 + $0x18] sm:$0xff]  ;;  %v293_v16 = vadd.f32 %v289_v11, %v288_v10  ;;  %v305_v17 = vmul.f32 %v288_v10, %v288_v10  ;;  %v306_v18 = vmul.f32 %v289_v11, %v289_v11  ;;  %v320_v21 = vld [vmem:[%s523_s27] sm:$0xff] }
  0x15   : > { %v262_v13 = vadd.f32 %v261_v5, %v258_v3  ;;  %v277_v14 = vadd.f32 %v274_v7, %v273_v6  ;;  %v307_v19 = vmul.f32 %v290_v12, %v290_v12  ;;  %v308_v20 = vmul.f32 %v291_v15, %v291_v15  ;;  %v321_v22 = vld [vmem:[%s523_s27 + $0x8] sm:$0xff]  ;;  %v322_v23 = vld [vmem:[%s523_s27 + $0x10] sm:$0xff]  ;;  %v323_v27 = vld [vmem:[%s523_s27 + $0x18] sm:$0xff] }
  0x16   : > { %v294_v26 = vadd.f32 %v293_v16, %v290_v12  ;;  %v325_v28 = vadd.f32 %v321_v22, %v320_v21  ;;  %v309_v29 = vadd.f32 %v306_v18, %v305_v17  ;;  %v337_v30 = vmul.f32 %v320_v21, %v320_v21  ;;  %v352_v37 = vld [vmem:[%s528_s30] sm:$0xff]  ;;  %v353_v38 = vld [vmem:[%s528_s30 + $0x8] sm:$0xff]  ;;  %v354_v47 = vld [vmem:[%s528_s30 + $0x10] sm:$0xff] }
  0x17   : > { %v263_v24 = vadd.f32 %v262_v13, %v259_v4  ;;  %v278_v25 = vadd.f32 %v277_v14, %v275_v8  ;;  %v338_v31 = vmul.f32 %v321_v22, %v321_v22  ;;  %v339_v32 = vmul.f32 %v322_v23, %v322_v23  ;;  %v355_v56 = vld [vmem:[%s528_s30 + $0x18] sm:$0xff] }
  0x18   : > { %v295_v35 = vadd.f32 %v294_v26, %v291_v15  ;;  %v326_v36 = vadd.f32 %v325_v28, %v322_v23  ;;  %v310_v39 = vadd.f32 %v309_v29, %v307_v19  ;;  %v340_v40 = vmul.f32 %v323_v27, %v323_v27  ;;  %v272_v18 = vld [vmem:[%s596_s4 + $0x1] sm:$0x1]  ;;  %v292_v19 = vld [vmem:[%s596_s4 + $0x2] sm:$0x1]  ;;  %v324_v29 = vld [vmem:[%s596_s4 + $0x4] sm:$0x1] }
  0x19   : > { %v264_v33 = vrot.slane %v263_v24, 4  ;;  %v279_v34 = vadd.f32 %v278_v25, %v276_v9  ;;  %v341_v41 = vadd.f32 %v338_v31, %v337_v30  ;;  %v357_v42 = vadd.f32 %v353_v38, %v352_v37  ;;  %v260_v9 = vld [vmem:[%s596_s4] sm:$0x1] }
  0x1a   : > { %v296_v45 = vrot.slane %v295_v35, 4  ;;  %v327_v46 = vadd.f32 %v326_v36, %v323_v27  ;;  %v311_v48 = vadd.f32 %v310_v39, %v308_v20  ;;  %v369_v51 = vmul.f32 %v352_v37, %v352_v37 }
  0x1b   : > { %v265_v43 = vadd.f32 %v264_v33, %v263_v24  ;;  %v280_v44 = vrot.slane %v279_v34, 4  ;;  %v342_v49 = vadd.f32 %v341_v41, %v339_v32  ;;  %v358_v50 = vadd.f32 %v357_v42, %v354_v47  ;;  %v336_v42 = vld [vmem:[%s596_s4 + $0x5] sm:$0x1] }
  0x1c   : > { %v297_v54 = vadd.f32 %v296_v45, %v295_v35  ;;  %v328_v55 = vrot.slane %v327_v46, 4  ;;  %v312_v57 = vrot.slane %v311_v48, 4  ;;  %v370_v60 = vmul.f32 %v353_v38, %v353_v38  ;;  %v304_v35 = vld [vmem:[%s596_s4 + $0x3] sm:$0x1] }
  0x1d   : > { %v266_v52 = vrot.slane %v265_v43, 2  ;;  %v281_v53 = vadd.f32 %v280_v44, %v279_v34  ;;  %v343_v58 = vadd.f32 %v342_v49, %v340_v40  ;;  %v359_v59 = vadd.f32 %v358_v50, %v355_v56 }
  0x1e   : > { %v298_v63 = vrot.slane %v297_v54, 2  ;;  %v329_v0 = vadd.f32 %v328_v55, %v327_v46  ;;  %v313_v1 = vadd.f32 %v312_v57, %v311_v48  ;;  %v371_v4 = vmul.f32 %v354_v47, %v354_v47 }
  0x1f   : > { %v267_v61 = vadd.f32 %v266_v52, %v265_v43  ;;  %v282_v62 = vrot.slane %v281_v53, 2  ;;  %v344_v2 = vrot.slane %v343_v58, 4  ;;  %v360_v3 = vrot.slane %v359_v59, 4  ;;  %v356_v43 = vld [vmem:[%s596_s4 + $0x6] sm:$0x1] }
  0x20   : > { %v299_v7 = vadd.f32 %v298_v63, %v297_v54  ;;  %v330_v8 = vrot.slane %v329_v0, 2  ;;  %v314_v10 = vrot.slane %v313_v1, 2  ;;  %v372_v13 = vmul.f32 %v355_v56, %v355_v56  ;;  %v368_v54 = vld [vmem:[%s596_s4 + $0x7] sm:$0x1] }
  0x21   : > { %v268_v5 = vrot.slane %v267_v61, 1  ;;  %v283_v6 = vadd.f32 %v282_v62, %v281_v53  ;;  %v345_v11 = vadd.f32 %v344_v2, %v343_v58  ;;  %v361_v12 = vadd.f32 %v360_v3, %v359_v59 }
  0x22   : > { %v300_v16 = vrot.slane %v299_v7, 1  ;;  %v331_v17 = vadd.f32 %v330_v8, %v329_v0  ;;  %v315_v20 = vadd.f32 %v314_v10, %v313_v1  ;;  %v373_v23 = vadd.f32 %v370_v60, %v369_v51 }
  0x23   : > { %v269_v14 = vadd.f32 %v268_v5, %v267_v61  ;;  %v284_v15 = vrot.slane %v283_v6, 1  ;;  %v346_v21 = vrot.slane %v345_v11, 2  ;;  %v362_v22 = vrot.slane %v361_v12, 2 }
  0x24   : > { %v301_v26 = vadd.f32 %v300_v16, %v299_v7  ;;  %v332_v27 = vrot.slane %v331_v17, 1  ;;  %v316_v28 = vrot.slane %v315_v20, 1  ;;  %v374_v32 = vadd.f32 %v373_v23, %v371_v4 }
  0x25   : > { %v270_v24 = vadd.f32 %v269_v14, %v260_v9  ;;  %v285_v25 = vadd.f32 %v284_v15, %v283_v6  ;;  %v347_v30 = vadd.f32 %v346_v21, %v345_v11  ;;  %v363_v31 = vadd.f32 %v362_v22, %v361_v12 }
  0x26   : > { %v302_v34 = vadd.f32 %v301_v26, %v292_v19  ;;  %v333_v36 = vadd.f32 %v332_v27, %v331_v17  ;;  %v317_v37 = vadd.f32 %v316_v28, %v315_v20  ;;  %v375_v40 = vadd.f32 %v374_v32, %v372_v13 }
  0x27   : > { %271 = vst [vmem:[%s596_s4] sm:$0x1] %v270_v24  ;;  %v286_v33 = vadd.f32 %v285_v25, %v272_v18  ;;  %v348_v38 = vrot.slane %v347_v30, 1  ;;  %v364_v39 = vrot.slane %v363_v31, 1 }
  0x28   : > { %v334_v41 = vadd.f32 %v333_v36, %v324_v29  ;;  %303 = vst [vmem:[%s596_s4 + $0x2] sm:$0x1] %v302_v34  ;;  %v318_v44 = vadd.f32 %v317_v37, %v304_v35  ;;  %v376_v47 = vrot.slane %v375_v40, 4 }
  0x29   : > { %287 = vst [vmem:[%s596_s4 + $0x1] sm:$0x1] %v286_v33  ;;  %v349_v45 = vadd.f32 %v348_v38, %v347_v30  ;;  %v365_v46 = vadd.f32 %v364_v39, %v363_v31 }
  0x2a   : > { %335 = vst [vmem:[%s596_s4 + $0x4] sm:$0x1] %v334_v41  ;;  %v377_v50 = vadd.f32 %v376_v47, %v375_v40 }
  0x2b   : > { %319 = vst [vmem:[%s596_s4 + $0x3] sm:$0x1] %v318_v44  ;;  %v350_v48 = vadd.f32 %v349_v45, %v336_v42  ;;  %v366_v49 = vadd.f32 %v365_v46, %v356_v43 }
  0x2c   : > { %v378_v51 = vrot.slane %v377_v50, 2 }
  0x2d   : > { %351 = vst [vmem:[%s596_s4 + $0x5] sm:$0x1] %v350_v48 }
  0x2e   : > { %367 = vst [vmem:[%s596_s4 + $0x6] sm:$0x1] %v366_v49  ;;  %v379_v52 = vadd.f32 %v378_v51, %v377_v50 }
  0x30   : > { %v380_v53 = vrot.slane %v379_v52, 1 }
  0x32   : > { %v381_v55 = vadd.f32 %v380_v53, %v379_v52 }
  0x34   : > { %v382_v56 = vadd.f32 %v381_v55, %v368_v54 }
  0x36   : > { %383 = vst [vmem:[%s596_s4 + $0x7] sm:$0x1] %v382_v56 }
  0x37 PF: > { %s14_s15 = sadd.s32 1, %s478_s15  }
  0x38   : > { %p11_p5 = scmp.ge.s32.totalorder %s14_s15, 4  }
  0x3a   :  { %13 = sbr.rel (!%p11_p5) target bundleno = 1 (0x1), region = 75 }

// kernel: forward.35
= control target key start
LH: loop header
LB: loop body
LE: loop exit
PB: predicated region body
PF: predicated region fallthrough
CT: control target
= control target key end

     0   :  { %s621_s12 = smov 0   ;;  %s838_s0 = inlined_call_operand.vmem [shape: f32[512,64], index: 0, kind: input, shape index: {}]   ;;  %s839_s1 = inlined_call_operand.vmem [shape: f32[64,48], index: 1, kind: input, shape index: {}]   ;;  %s840_s2 = inlined_call_operand.vmem [shape: f32[1,48], index: 2, kind: input, shape index: {}]   ;;  %s841_s3 = inlined_call_operand.vmem [shape: f32[512,48], index: 3, kind: output, shape index: {}]  }
   0x1 LB: > { %s517_s13 = sadd.s32 4294967295, %s599_s12   ;;  %p521_p0 = scmp.ge.s32.totalorder %s599_s12, 1  ;;  %s599_s12 = sphi %s621_s12, %s13_s12  }
   0x2   : > { %p138_p1 = scmp.lt.s32.totalorder %s599_s12, 3 }
   0x4   : > { %p139_p2 = pnand %p521_p0, %p138_p1 }
   0x5   : > { %s522_s18 = sshll.u32 (!%p139_p2), %s517_s13, 5 }
   0x6   : > { %142 = sbr.rel (%p139_p2) target bundleno = 219 (0xdb), region = 32  ;;  %p163_p3 = scmp.lt.s32.totalorder (!%p139_p2), %s522_s18, 63 }
   0xb   : > { %v213_v0 = vld [vmem:[%s839_s1 + $0x38] sm:$0xff]  ;;  %v212_v1 = vld [vmem:[%s839_s1 + $0x30] sm:$0xff]  ;;  %v211_v2 = vld [vmem:[%s839_s1 + $0x28] sm:$0xff]  ;;  %s843_s18 = smov (!%p163_p3, %s522_s18), 63  ;;  %vm218_vm0 = vcmask 523264   ;;  %vm428_vm1 = vcmask 392192  }
   0xc   : > { %561 = vmatpush.msra.mxu2 %v213_v0  ;;  %562 = vmatpush.msra.mxu3 %v213_v0  ;;  %v210_v3 = vld [vmem:[%s839_s1 + $0x20] sm:$0xff]  ;;  %v209_v4 = vld [vmem:[%s839_s1 + $0x18] sm:$0xff]  ;;  %s523_s25 = sshll.u32 %s843_s18, 3  ;;  %v208_v5 = vld [vmem:[%s839_s1 + $0x10] sm:$0xff] }
   0xd   : > { %323 = vmatpush.msra.mxu0 %v213_v0  ;;  %560 = vmatpush.msra.mxu1 %v213_v0  ;;  %v207_v6 = vld [vmem:[%s839_s1 + $0x8] sm:$0xff]  ;;  %s658_s5 = scalar_lea.vmem %s838_s0, %s523_s25  ;;  %v206_v7 = vld [vmem:[%s839_s1] sm:$0xff]  ;;  %s737_s13 = scalar_lea.vmem %s841_s3, %s523_s25 }
   0xe   : > { %564 = vmatpush.msra.mxu2 %v212_v1  ;;  %565 = vmatpush.msra.mxu3 %v212_v1  ;;  %v190_v8 = vld [vmem:[%s658_s5 + $0x80] sm:$0xff]  ;;  %v191_v12 = vld [vmem:[%s658_s5 + $0x88] sm:$0xff]  ;;  %v192_v16 = vld [vmem:[%s658_s5 + $0x90] sm:$0xff] }
   0xf   : > { %324 = vmatpush.msra.mxu0 %v212_v1  ;;  %563 = vmatpush.msra.mxu1 %v212_v1  ;;  %v198_v9 = vld [vmem:[%s658_s5 + $0xc0] sm:$0xff]  ;;  %v199_v13 = vld [vmem:[%s658_s5 + $0xc8] sm:$0xff]  ;;  %v200_v17 = vld [vmem:[%s658_s5 + $0xd0] sm:$0xff] }
  0x10   : > { %567 = vmatpush.msra.mxu2 %v211_v2  ;;  %568 = vmatpush.msra.mxu3 %v211_v2  ;;  %v174_v10 = vld [vmem:[%s658_s5] sm:$0xff]  ;;  %v175_v14 = vld [vmem:[%s658_s5 + $0x8] sm:$0xff]  ;;  %v176_v18 = vld [vmem:[%s658_s5 + $0x10] sm:$0xff] }
  0x11   : > { %325 = vmatpush.msra.mxu0 %v211_v2  ;;  %566 = vmatpush.msra.mxu1 %v211_v2  ;;  %v182_v11 = vld [vmem:[%s658_s5 + $0x40] sm:$0xff]  ;;  %v183_v15 = vld [vmem:[%s658_s5 + $0x48] sm:$0xff]  ;;  %v184_v19 = vld [vmem:[%s658_s5 + $0x50] sm:$0xff] }
  0x12   : > { %570 = vmatpush.msra.mxu2 %v210_v3  ;;  %571 = vmatpush.msra.mxu3 %v210_v3  ;;  %v193_v20 = vld [vmem:[%s658_s5 + $0x98] sm:$0xff]  ;;  %v194_v24 = vld [vmem:[%s658_s5 + $0xa0] sm:$0xff]  ;;  %v195_v28 = vld [vmem:[%s658_s5 + $0xa8] sm:$0xff] }
  0x13   : > { %326 = vmatpush.msra.mxu0 %v210_v3  ;;  %569 = vmatpush.msra.mxu1 %v210_v3  ;;  %v201_v21 = vld [vmem:[%s658_s5 + $0xd8] sm:$0xff]  ;;  %v202_v25 = vld [vmem:[%s658_s5 + $0xe0] sm:$0xff]  ;;  %v203_v29 = vld [vmem:[%s658_s5 + $0xe8] sm:$0xff] }
  0x14   : > { %573 = vmatpush.msra.mxu2 %v209_v4  ;;  %574 = vmatpush.msra.mxu3 %v209_v4  ;;  %v177_v22 = vld [vmem:[%s658_s5 + $0x18] sm:$0xff]  ;;  %v178_v26 = vld [vmem:[%s658_s5 + $0x20] sm:$0xff]  ;;  %v179_v30 = vld [vmem:[%s658_s5 + $0x28] sm:$0xff] }
  0x15   : > { %327 = vmatpush.msra.mxu0 %v209_v4  ;;  %572 = vmatpush.msra.mxu1 %v209_v4  ;;  %v185_v23 = vld [vmem:[%s658_s5 + $0x58] sm:$0xff]  ;;  %v186_v27 = vld [vmem:[%s658_s5 + $0x60] sm:$0xff]  ;;  %v187_v31 = vld [vmem:[%s658_s5 + $0x68] sm:$0xff] }
  0x16   : > { %576 = vmatpush.msra.mxu2 %v208_v5  ;;  %577 = vmatpush.msra.mxu3 %v208_v5  ;;  %v196_v32 = vld [vmem:[%s658_s5 + $0xb0] sm:$0xff]  ;;  %v197_v36 = vld [vmem:[%s658_s5 + $0xb8] sm:$0xff]  ;;  %v730_v40 = vld [vmem:[%s840_s2] ss:$0 sm:$0xff] }
  0x17   : > { %328 = vmatpush.msra.mxu0 %v208_v5  ;;  %575 = vmatpush.msra.mxu1 %v208_v5  ;;  %v204_v33 = vld [vmem:[%s658_s5 + $0xf0] sm:$0xff]  ;;  %v205_v37 = vld [vmem:[%s658_s5 + $0xf8] sm:$0xff] }
  0x18   : > { %579 = vmatpush.msra.mxu2 %v207_v6  ;;  %580 = vmatpush.msra.mxu3 %v207_v6  ;;  %v180_v34 = vld [vmem:[%s658_s5 + $0x30] sm:$0xff]  ;;  %v181_v38 = vld [vmem:[%s658_s5 + $0x38] sm:$0xff] }
  0x19   : > { %329 = vmatpush.msra.mxu0 %v207_v6  ;;  %578 = vmatpush.msra.mxu1 %v207_v6  ;;  %v188_v35 = vld [vmem:[%s658_s5 + $0x70] sm:$0xff]  ;;  %v189_v39 = vld [vmem:[%s658_s5 + $0x78] sm:$0xff] }
  0x1a   : > { %582 = vmatpush.msra.mxu2 %v206_v7  ;;  %583 = vmatpush.msra.mxu3 %v206_v7 }
  0x1b   : > { %542 = vmatmul.msk.f32.vlgmr.msra.gmra.mxu2 %vm218_vm0, %v190_v8  ;;  %550 = vmatmul.msk.f32.vlgmr.msra.gmra.mxu3 %vm218_vm0, %v198_v9 }
  0x1c   : > { %330 = vmatpush.msra.mxu0 %v206_v7  ;;  %581 = vmatpush.msra.mxu1 %v206_v7 }
  0x1d   : > { %526 = vmatmul.msk.f32.vlgmr.msra.gmra.mxu0 %vm218_vm0, %v174_v10  ;;  %534 = vmatmul.msk.f32.vlgmr.msra.gmra.mxu1 %vm218_vm0, %v182_v11 }
  0x23   : > { %543 = vmatmul.msk.f32.gmra.mxu2 %vm218_vm0, %v191_v12  ;;  %551 = vmatmul.msk.f32.gmra.mxu3 %vm218_vm0, %v199_v13 }
  0x25   : > { %527 = vmatmul.msk.f32.gmra.mxu0 %vm218_vm0, %v175_v14  ;;  %535 = vmatmul.msk.f32.gmra.mxu1 %vm218_vm0, %v183_v15 }
  0x2b   : > { %544 = vmatmul.msk.f32.gmra.mxu2 %vm218_vm0, %v192_v16  ;;  %552 = vmatmul.msk.f32.gmra.mxu3 %vm218_vm0, %v200_v17 }
  0x2d   : > { %528 = vmatmul.msk.f32.gmra.mxu0 %vm218_vm0, %v176_v18  ;;  %536 = vmatmul.msk.f32.gmra.mxu1 %vm218_vm0, %v184_v19 }
  0x33   : > { %545 = vmatmul.msk.f32.gmra.mxu2 %vm218_vm0, %v193_v20  ;;  %553 = vmatmul.msk.f32.gmra.mxu3 %vm218_vm0, %v201_v21 }
  0x35   : > { %529 = vmatmul.msk.f32.gmra.mxu0 %vm218_vm0, %v177_v22  ;;  %537 = vmatmul.msk.f32.gmra.mxu1 %vm218_vm0, %v185_v23 }
  0x3b   : > { %546 = vmatmul.msk.f32.gmra.mxu2 %vm218_vm0, %v194_v24  ;;  %554 = vmatmul.msk.f32.gmra.mxu3 %vm218_vm0, %v202_v25 }
  0x3d   : > { %530 = vmatmul.msk.f32.gmra.mxu0 %vm218_vm0, %v178_v26  ;;  %538 = vmatmul.msk.f32.gmra.mxu1 %vm218_vm0, %v186_v27 }
  0x43   : > { %547 = vmatmul.msk.f32.gmra.mxu2 %vm218_vm0, %v195_v28  ;;  %555 = vmatmul.msk.f32.gmra.mxu3 %vm218_vm0, %v203_v29 }
  0x45   : > { %531 = vmatmul.msk.f32.gmra.mxu0 %vm218_vm0, %v179_v30  ;;  %539 = vmatmul.msk.f32.gmra.mxu1 %vm218_vm0, %v187_v31 }
  0x4b   : > { %548 = vmatmul.msk.f32.gmra.mxu2 %vm218_vm0, %v196_v32  ;;  %556 = vmatmul.msk.f32.gmra.mxu3 %vm218_vm0, %v204_v33 }
  0x4d   : > { %532 = vmatmul.msk.f32.gmra.mxu0 %vm218_vm0, %v180_v34  ;;  %540 = vmatmul.msk.f32.gmra.mxu1 %vm218_vm0, %v188_v35 }
  0x53   : > { %549 = vmatmul.msk.f32.gmra.mxu2 %vm218_vm0, %v197_v36  ;;  %557 = vmatmul.msk.f32.gmra.mxu3 %vm218_vm0, %v205_v37 }
  0x55   : > { %533 = vmatmul.msk.f32.gmra.mxu0 %vm218_vm0, %v181_v38  ;;  %541 = vmatmul.msk.f32.gmra.mxu1 %vm218_vm0, %v189_v39 }
  0x9a   : > { %v332_v41 = vpop.f32.mrf.mxu0  ;;  %v356_v42 = vpop.f32.mrf.mxu1 }
  0x9b   : > { %v333_v43 = vadd.f32 %v730_v40, %v332_v41  ;;  %v357_v44 = vadd.f32 %v730_v40, %v356_v42 }
  0x9d   : > { %429 = vst.msk [vmem:[%s737_s13] sm:$0xff] %vm428_vm1, %v333_v43 }
  0x9e   : > { %437 = vst.msk [vmem:[%s737_s13 + $0x40] sm:$0xff] %vm428_vm1, %v357_v44  ;;  %v380_v45 = vpop.f32.mrf.mxu2  ;;  %v404_v46 = vpop.f32.mrf.mxu3 }
  0x9f   : > { %v381_v47 = vadd.f32 %v730_v40, %v380_v45  ;;  %v405_v48 = vadd.f32 %v730_v40, %v404_v46 }
  0xa1   : > { %445 = vst.msk [vmem:[%s737_s13 + $0x80] sm:$0xff] %vm428_vm1, %v381_v47 }
  0xa2   : > { %453 = vst.msk [vmem:[%s737_s13 + $0xc0] sm:$0xff] %vm428_vm1, %v405_v48  ;;  %v335_v49 = vpop.f32.mrf.mxu0  ;;  %v359_v50 = vpop.f32.mrf.mxu1 }
  0xa3   : > { %v336_v51 = vadd.f32 %v730_v40, %v335_v49  ;;  %v360_v52 = vadd.f32 %v730_v40, %v359_v50 }
  0xa5   : > { %430 = vst.msk [vmem:[%s737_s13 + $0x8] sm:$0xff] %vm428_vm1, %v336_v51 }
  0xa6   : > { %438 = vst.msk [vmem:[%s737_s13 + $0x48] sm:$0xff] %vm428_vm1, %v360_v52  ;;  %v383_v53 = vpop.f32.mrf.mxu2  ;;  %v407_v54 = vpop.f32.mrf.mxu3 }
  0xa7   : > { %v384_v55 = vadd.f32 %v730_v40, %v383_v53  ;;  %v408_v56 = vadd.f32 %v730_v40, %v407_v54 }
  0xa9   : > { %446 = vst.msk [vmem:[%s737_s13 + $0x88] sm:$0xff] %vm428_vm1, %v384_v55 }
  0xaa   : > { %454 = vst.msk [vmem:[%s737_s13 + $0xc8] sm:$0xff] %vm428_vm1, %v408_v56  ;;  %v338_v57 = vpop.f32.mrf.mxu0  ;;  %v362_v58 = vpop.f32.mrf.mxu1 }
  0xab   : > { %v339_v59 = vadd.f32 %v730_v40, %v338_v57  ;;  %v363_v60 = vadd.f32 %v730_v40, %v362_v58 }
  0xad   : > { %431 = vst.msk [vmem:[%s737_s13 + $0x10] sm:$0xff] %vm428_vm1, %v339_v59 }
  0xae   : > { %439 = vst.msk [vmem:[%s737_s13 + $0x50] sm:$0xff] %vm428_vm1, %v363_v60  ;;  %v386_v61 = vpop.f32.mrf.mxu2  ;;  %v410_v62 = vpop.f32.mrf.mxu3 }
  0xaf   : > { %v387_v63 = vadd.f32 %v730_v40, %v386_v61  ;;  %v411_v0 = vadd.f32 %v730_v40, %v410_v62 }
  0xb1   : > { %447 = vst.msk [vmem:[%s737_s13 + $0x90] sm:$0xff] %vm428_vm1, %v387_v63 }
  0xb2   : > { %455 = vst.msk [vmem:[%s737_s13 + $0xd0] sm:$0xff] %vm428_vm1, %v411_v0  ;;  %v341_v1 = vpop.f32.mrf.mxu0  ;;  %v365_v2 = vpop.f32.mrf.mxu1 }
  0xb3   : > { %v342_v3 = vadd.f32 %v730_v40, %v341_v1  ;;  %v366_v4 = vadd.f32 %v730_v40, %v365_v2 }
  0xb5   : > { %432 = vst.msk [vmem:[%s737_s13 + $0x18] sm:$0xff] %vm428_vm1, %v342_v3 }
  0xb6   : > { %440 = vst.msk [vmem:[%s737_s13 + $0x58] sm:$0xff] %vm428_vm1, %v366_v4  ;;  %v389_v5 = vpop.f32.mrf.mxu2  ;;  %v413_v6 = vpop.f32.mrf.mxu3 }
  0xb7   : > { %v390_v7 = vadd.f32 %v730_v40, %v389_v5  ;;  %v414_v8 = vadd.f32 %v730_v40, %v413_v6 }
  0xb9   : > { %448 = vst.msk [vmem:[%s737_s13 + $0x98] sm:$0xff] %vm428_vm1, %v390_v7 }
  0xba   : > { %456 = vst.msk [vmem:[%s737_s13 + $0xd8] sm:$0xff] %vm428_vm1, %v414_v8  ;;  %v344_v9 = vpop.f32.mrf.mxu0  ;;  %v368_v10 = vpop.f32.mrf.mxu1 }
  0xbb   : > { %v345_v11 = vadd.f32 %v730_v40, %v344_v9  ;;  %v369_v12 = vadd.f32 %v730_v40, %v368_v10 }
  0xbd   : > { %433 = vst.msk [vmem:[%s737_s13 + $0x20] sm:$0xff] %vm428_vm1, %v345_v11 }
  0xbe   : > { %441 = vst.msk [vmem:[%s737_s13 + $0x60] sm:$0xff] %vm428_vm1, %v369_v12  ;;  %v392_v13 = vpop.f32.mrf.mxu2  ;;  %v416_v14 = vpop.f32.mrf.mxu3 }
  0xbf   : > { %v393_v15 = vadd.f32 %v730_v40, %v392_v13  ;;  %v417_v16 = vadd.f32 %v730_v40, %v416_v14 }
  0xc1   : > { %449 = vst.msk [vmem:[%s737_s13 + $0xa0] sm:$0xff] %vm428_vm1, %v393_v15 }
  0xc2   : > { %457 = vst.msk [vmem:[%s737_s13 + $0xe0] sm:$0xff] %vm428_vm1, %v417_v16  ;;  %v347_v17 = vpop.f32.mrf.mxu0  ;;  %v371_v18 = vpop.f32.mrf.mxu1 }
  0xc3   : > { %v348_v19 = vadd.f32 %v730_v40, %v347_v17  ;;  %v372_v20 = vadd.f32 %v730_v40, %v371_v18 }
  0xc5   : > { %434 = vst.msk [vmem:[%s737_s13 + $0x28] sm:$0xff] %vm428_vm1, %v348_v19 }
  0xc6   : > { %442 = vst.msk [vmem:[%s737_s13 + $0x68] sm:$0xff] %vm428_vm1, %v372_v20  ;;  %v395_v21 = vpop.f32.mrf.mxu2  ;;  %v419_v22 = vpop.f32.mrf.mxu3 }
  0xc7   : > { %v396_v23 = vadd.f32 %v730_v40, %v395_v21  ;;  %v420_v24 = vadd.f32 %v730_v40, %v419_v22 }
  0xc9   : > { %450 = vst.msk [vmem:[%s737_s13 + $0xa8] sm:$0xff] %vm428_vm1, %v396_v23 }
  0xca   : > { %458 = vst.msk [vmem:[%s737_s13 + $0xe8] sm:$0xff] %vm428_vm1, %v420_v24  ;;  %v350_v25 = vpop.f32.mrf.mxu0  ;;  %v374_v26 = vpop.f32.mrf.mxu1 }
  0xcb   : > { %v351_v27 = vadd.f32 %v730_v40, %v350_v25  ;;  %v375_v28 = vadd.f32 %v730_v40, %v374_v26 }
  0xcd   : > { %435 = vst.msk [vmem:[%s737_s13 + $0x30] sm:$0xff] %vm428_vm1, %v351_v27 }
  0xce   : > { %443 = vst.msk [vmem:[%s737_s13 + $0x70] sm:$0xff] %vm428_vm1, %v375_v28  ;;  %v398_v29 = vpop.f32.mrf.mxu2  ;;  %v422_v30 = vpop.f32.mrf.mxu3 }
  0xcf   : > { %v399_v31 = vadd.f32 %v730_v40, %v398_v29  ;;  %v423_v32 = vadd.f32 %v730_v40, %v422_v30 }
  0xd1   : > { %451 = vst.msk [vmem:[%s737_s13 + $0xb0] sm:$0xff] %vm428_vm1, %v399_v31 }
  0xd2   : > { %459 = vst.msk [vmem:[%s737_s13 + $0xf0] sm:$0xff] %vm428_vm1, %v423_v32  ;;  %v353_v33 = vpop.f32.mrf.mxu0  ;;  %v377_v34 = vpop.f32.mrf.mxu1 }
  0xd3   : > { %v354_v35 = vadd.f32 %v730_v40, %v353_v33  ;;  %v378_v36 = vadd.f32 %v730_v40, %v377_v34 }
  0xd5   : > { %436 = vst.msk [vmem:[%s737_s13 + $0x38] sm:$0xff] %vm428_vm1, %v354_v35 }
  0xd6   : > { %444 = vst.msk [vmem:[%s737_s13 + $0x78] sm:$0xff] %vm428_vm1, %v378_v36  ;;  %v401_v37 = vpop.f32.mrf.mxu2  ;;  %v425_v38 = vpop.f32.mrf.mxu3 }
  0xd7   : > { %v402_v39 = vadd.f32 %v730_v40, %v401_v37  ;;  %v426_v41 = vadd.f32 %v730_v40, %v425_v38 }
  0xd9   : > { %452 = vst.msk [vmem:[%s737_s13 + $0xb8] sm:$0xff] %vm428_vm1, %v402_v39 }
  0xda   : > { %460 = vst.msk [vmem:[%s737_s13 + $0xf8] sm:$0xff] %vm428_vm1, %v426_v41 }
  0xdb PF: > { %s13_s12 = sadd.s32 1, %s599_s12  }
  0xdc   : > { %p10_p4 = scmp.ge.s32.totalorder %s13_s12, 4  }
  0xde   :  { %12 = sbr.rel (!%p10_p4) target bundleno = 1 (0x1), region = 62 }

// kernel: forward.34
= control target key start
LH: loop header
LB: loop body
LE: loop exit
PB: predicated region body
PF: predicated region fallthrough
CT: control target
= control target key end

     0   :  { %s1795_s18 = smov 0   ;;  %s2667_s0 = inlined_call_operand.vmem [shape: f32[512,16], index: 0, kind: input, shape index: {}]   ;;  %s2668_s1 = inlined_call_operand.vmem [shape: f32[512,16], index: 1, kind: input, shape index: {}]   ;;  %s2669_s2 = inlined_call_operand.vmem [shape: f32[512,16], index: 2, kind: input, shape index: {}]   ;;  %s2670_s3 = inlined_call_operand.vmem [shape: f32[512,16], index: 3, kind: input, shape index: {}]   ;;  %s2671_s4 = inlined_call_operand.vmem [shape: f32[2,64], index: 4, kind: input, shape index: {}]   ;;  %s2672_s5 = inlined_call_operand.vmem [shape: f32[512,64], index: 5, kind: output, shape index: {}]  }
   0x1 LB: > { %s1710_s19 = sadd.s32 4294967295, %s1757_s18   ;;  %p1714_p0 = scmp.ge.s32.totalorder %s1757_s18, 1  ;;  %s1757_s18 = sphi %s1795_s18, %s15_s18  }
   0x2   : > { %p221_p1 = scmp.lt.s32.totalorder %s1757_s18, 3 }
   0x4   : > { %p222_p2 = pnand %p1714_p0, %p221_p1 }
   0x5   : > { %s1759_s22 = smov (!%p222_p2), 112   ;;  %s1760_s27 = smov (!%p222_p2), 96  }
   0x6   : > { %225 = sbr.rel (%p222_p2) target bundleno = 625 (0x271), region = 40  ;;  %s1715_s30 = sshll.u32 (!%p222_p2), %s1710_s19, 5 }
   0x7   : > { %p265_p3 = scmp.lt.s32.totalorder (!%p222_p2), %s1715_s30, 63  ;;  %s1761_s10 = smov (!%p222_p2), 16  }
   0x8   : > { %s1762_s25 = smov (!%p222_p2), 32  }
   0xb   : > { %v1741_v0 = vld [vmem:[%s2671_s4] ss:$0 sm:$0xff]  ;;  %v1744_v2 = vld [vmem:[%s2671_s4 + $0x1] ss:$0 sm:$0xff]  ;;  %s2674_s30 = smov (!%p265_p3, %s1715_s30), 63 }
   0xc   : > { %558 = vrot.lane.b32.xlu0 %v1741_v0, %s1759_s22  ;;  %v1743_v1 = vld [vmem:[%s2671_s4] ss:$0 sm:$0xff]  ;;  %961 = vrot.lane.b32.xlu2 %v1744_v2, %s1760_s27  ;;  %v1742_v3 = vld [vmem:[%s2671_s4 + $0x1] ss:$0 sm:$0xff]  ;;  %s1815_s6 = sshll.u32 %s2674_s30, 3 }
   0xd   : > { %923 = vrot.lane.b32.xlu1 %v1743_v1, %s1760_s27  ;;  %s1821_s9 = scalar_lea.vmem %s2668_s1, %s1815_s6  ;;  %s1960_s13 = scalar_lea.vmem %s2667_s0, %s1815_s6 }
   0xe   : > { %v527_v5 = vld [vmem:[%s1821_s9 + $0x20] sm:$0xff]  ;;  %v525_v6 = vld [vmem:[%s1821_s9 + $0x10] sm:$0xff]  ;;  %v546_v10 = vld [vmem:[%s1821_s9 + $0xb8] sm:$0xff]  ;;  %s1983_s21 = scalar_lea.vmem %s2669_s2, %s1815_s6  ;;  %s1996_s24 = scalar_lea.vmem %s2672_s5, %s1815_s6 }
   0xf   : > { %v523_v7 = vld [vmem:[%s1821_s9] sm:$0xff]  ;;  %v554_v11 = vld [vmem:[%s1821_s9 + $0xf8] sm:$0xff]  ;;  %v549_v13 = vld [vmem:[%s1821_s9 + $0xd0] sm:$0xff] }
  0x10   : > { %v551_v8 = vld [vmem:[%s1821_s9 + $0xe0] sm:$0xff]  ;;  %v550_v12 = vld [vmem:[%s1821_s9 + $0xd8] sm:$0xff]  ;;  %v553_v14 = vld [vmem:[%s1821_s9 + $0xf0] sm:$0xff] }
  0x11   : > { %v547_v9 = vld [vmem:[%s1821_s9 + $0xc0] sm:$0xff]  ;;  %v552_v15 = vld [vmem:[%s1821_s9 + $0xe8] sm:$0xff]  ;;  %v530_v19 = vld [vmem:[%s1821_s9 + $0x38] sm:$0xff] }
  0x12   : > { %v526_v20 = vld [vmem:[%s1821_s9 + $0x18] sm:$0xff]  ;;  %v524_v33 = vld [vmem:[%s1821_s9 + $0x8] sm:$0xff]  ;;  %v533_v46 = vld [vmem:[%s1821_s9 + $0x50] sm:$0xff] }
  0x13   : > { %v529_v47 = vld [vmem:[%s1821_s9 + $0x30] sm:$0xff]  ;;  %v528_v50 = vld [vmem:[%s1821_s9 + $0x28] sm:$0xff]  ;;  %v531_v1 = vld [vmem:[%s1821_s9 + $0x40] sm:$0xff] }
  0x14   : > { %596 = vrot.lane.b32.xlu0 %v1742_v3, %s1759_s22  ;;  %v536_v61 = vld [vmem:[%s1821_s9 + $0x68] sm:$0xff] }
  0x15   : > { %v532_v62 = vld [vmem:[%s1821_s9 + $0x48] sm:$0xff] }
  0x7e   : > { %v1823_v4 = vpop.permute.xlu0 %558 }
  0x7f   : > { %v565_v16 = vmul.f32 %v1823_v4, %v527_v5  ;;  %v563_v17 = vmul.f32 %v1823_v4, %v525_v6  ;;  %v561_v18 = vmul.f32 %v1823_v4, %v523_v7  ;;  %v1842_v21 = vmul.f32 %v1823_v4, %v551_v8 }
  0x80   : > { %v1845_v22 = vmul.f32 %v1823_v4, %v547_v9  ;;  %v1848_v23 = vmul.f32 %v1823_v4, %v546_v10  ;;  %v1851_v24 = vmul.f32 %v1823_v4, %v554_v11  ;;  %v1856_v26 = vmul.f32 %v1823_v4, %v550_v12 }
  0x81   : > { %v1859_v27 = vmul.f32 %v1823_v4, %v549_v13  ;;  %v1862_v28 = vmul.f32 %v1823_v4, %v553_v14  ;;  %v1865_v29 = vmul.f32 %v1823_v4, %v552_v15  ;;  %v568_v34 = vmul.f32 %v1823_v4, %v530_v19  ;;  %v539_v13 = vld [vmem:[%s1821_s9 + $0x80] sm:$0xff] }
  0x82   : > { %v564_v35 = vmul.f32 %v1823_v4, %v526_v20  ;;  %v562_v39 = vmul.f32 %v1823_v4, %v524_v33  ;;  %v571_v52 = vmul.f32 %v1823_v4, %v533_v46  ;;  %v567_v53 = vmul.f32 %v1823_v4, %v529_v47  ;;  %v535_v14 = vld [vmem:[%s1821_s9 + $0x60] sm:$0xff] }
  0x83   : > { %v566_v54 = vmul.f32 %v1823_v4, %v528_v50  ;;  %v574_v3 = vmul.f32 %v1823_v4, %v536_v61  ;;  %v570_v5 = vmul.f32 %v1823_v4, %v532_v62  ;;  %v569_v6 = vmul.f32 %v1823_v4, %v531_v1 }
  0x84   : > { %v577_v19 = vmul.f32 %v1823_v4, %v539_v13  ;;  %v573_v20 = vmul.f32 %v1823_v4, %v535_v14 }
  0x86   : > { %v1853_v25 = vpop.permute.xlu0 %596 }
  0x87   : > { %v603_v30 = vadd.f32 %v1853_v25, %v565_v16  ;;  %v601_v31 = vadd.f32 %v1853_v25, %v563_v17  ;;  %v599_v32 = vadd.f32 %v1853_v25, %v561_v18  ;;  %v606_v42 = vadd.f32 %v1853_v25, %v568_v34  ;;  %v534_v17 = vld [vmem:[%s1821_s9 + $0x58] sm:$0xff] }
  0x88   : > { %v602_v43 = vadd.f32 %v1853_v25, %v564_v35  ;;  %v600_v45 = vadd.f32 %v1853_v25, %v562_v39  ;;  %v609_v57 = vadd.f32 %v1853_v25, %v571_v52  ;;  %v605_v58 = vadd.f32 %v1853_v25, %v567_v53  ;;  %v545_v52 = vld [vmem:[%s1821_s9 + $0xb0] sm:$0xff] }
  0x89   : > { %vm635_vm0 = vcmp.gt.f32.partialorder %v603_v30, 0.0  ;;  %v667_v36 = vmul.f32 0.01, %v603_v30  ;;  %vm633_vm1 = vcmp.gt.f32.partialorder %v601_v31, 0.0  ;;  %v665_v37 = vmul.f32 0.01, %v601_v31 }
  0x8a   : > { %vm631_vm2 = vcmp.gt.f32.partialorder %v599_v32, 0.0  ;;  %v663_v38 = vmul.f32 0.01, %v599_v32  ;;  %v670_v48 = vmul.f32 0.01, %v606_v42  ;;  %vm638_vm3 = vcmp.gt.f32.partialorder %v606_v42, 0.0 }
  0x8b   : > { %v699_v40 = vsel %vm635_vm0, %v603_v30, %v667_v36  ;;  %v697_v41 = vsel %vm633_vm1, %v601_v31, %v665_v37  ;;  %v666_v49 = vmul.f32 0.01, %v602_v43  ;;  %vm634_vm4 = vcmp.gt.f32.partialorder %v602_v43, 0.0  ;;  %v542_v37 = vld [vmem:[%s1821_s9 + $0x98] sm:$0xff]  ;;  %v541_v53 = vld [vmem:[%s1821_s9 + $0x90] sm:$0xff] }
  0x8c   : > { %767 = vrot.lane.b32.xlu0 %v699_v40, %s1761_s10  ;;  %763 = vrot.lane.b32.xlu2 %v697_v41, %s1761_s10  ;;  %v695_v44 = vsel %vm631_vm2, %v599_v32, %v663_v38  ;;  %v664_v51 = vmul.f32 0.01, %v600_v45  ;;  %vm632_vm5 = vcmp.gt.f32.partialorder %v600_v45, 0.0  ;;  %v702_v55 = vsel %vm638_vm3, %v606_v42, %v670_v48  ;;  %v538_v38 = vld [vmem:[%s1821_s9 + $0x78] sm:$0xff]  ;;  %v537_v41 = vld [vmem:[%s1821_s9 + $0x70] sm:$0xff] }
  0x8d   : > { %759 = vrot.lane.b32.xlu1 %v695_v44, %s1761_s10  ;;  %v698_v56 = vsel %vm634_vm4, %v602_v43, %v666_v49  ;;  %v604_v60 = vadd.f32 %v1853_v25, %v566_v54  ;;  %v673_v63 = vmul.f32 0.01, %v609_v57  ;;  %v669_v0 = vmul.f32 0.01, %v605_v58 }
  0x8e   : > { %v696_v59 = vsel %vm632_vm5, %v600_v45, %v664_v51  ;;  %vm641_vm6 = vcmp.gt.f32.partialorder %v609_v57, 0.0  ;;  %vm637_vm7 = vcmp.gt.f32.partialorder %v605_v58, 0.0  ;;  %v612_v9 = vadd.f32 %v1853_v25, %v574_v3  ;;  %v548_v3 = vld [vmem:[%s1821_s9 + $0xc8] sm:$0xff] }
  0x8f   : > { %v668_v2 = vmul.f32 0.01, %v604_v60  ;;  %vm636_vm8 = vcmp.gt.f32.partialorder %v604_v60, 0.0  ;;  %v705_v7 = vsel %vm641_vm6, %v609_v57, %v673_v63  ;;  %v701_v8 = vsel %vm637_vm7, %v605_v58, %v669_v0 }
  0x90   : > { %v608_v10 = vadd.f32 %v1853_v25, %v570_v5  ;;  %v607_v12 = vadd.f32 %v1853_v25, %v569_v6  ;;  %v676_v15 = vmul.f32 0.01, %v612_v9  ;;  %vm644_vm9 = vcmp.gt.f32.partialorder %v612_v9, 0.0  ;;  %v544_v5 = vld [vmem:[%s1821_s9 + $0xa8] sm:$0xff] }
  0x91   : > { %v700_v11 = vsel %vm636_vm8, %v604_v60, %v668_v2  ;;  %v572_v30 = vmul.f32 %v1823_v4, %v534_v17  ;;  %v615_v33 = vadd.f32 %v1853_v25, %v577_v19  ;;  %v611_v34 = vadd.f32 %v1853_v25, %v573_v20 }
  0x92   : > { %v672_v16 = vmul.f32 0.01, %v608_v10  ;;  %vm640_vm10 = vcmp.gt.f32.partialorder %v608_v10, 0.0  ;;  %v671_v18 = vmul.f32 0.01, %v607_v12  ;;  %vm639_vm11 = vcmp.gt.f32.partialorder %v607_v12, 0.0 }
  0x93   : > { %v708_v31 = vsel %vm644_vm9, %v612_v9, %v676_v15  ;;  %v610_v36 = vadd.f32 %v1853_v25, %v572_v30  ;;  %v679_v39 = vmul.f32 0.01, %v615_v33  ;;  %v675_v40 = vmul.f32 0.01, %v611_v34 }
  0x94   : > { %773 = vrot.lane.b32.xlu0 %v702_v55, %s1761_s10  ;;  %765 = vrot.lane.b32.xlu2 %v698_v56, %s1761_s10  ;;  %v704_v32 = vsel %vm640_vm10, %v608_v10, %v672_v16  ;;  %v703_v35 = vsel %vm639_vm11, %v607_v12, %v671_v18  ;;  %vm647_vm12 = vcmp.gt.f32.partialorder %v615_v33, 0.0  ;;  %vm643_vm13 = vcmp.gt.f32.partialorder %v611_v34, 0.0  ;;  %v540_v56 = vld [vmem:[%s1821_s9 + $0x88] sm:$0xff] }
  0x95   : > { %761 = vrot.lane.b32.xlu1 %v696_v59, %s1761_s10  ;;  %v674_v42 = vmul.f32 0.01, %v610_v36  ;;  %vm642_vm14 = vcmp.gt.f32.partialorder %v610_v36, 0.0  ;;  %v580_v43 = vmul.f32 %v1823_v4, %v542_v37  ;;  %v576_v44 = vmul.f32 %v1823_v4, %v538_v38 }
  0x96   : > { %v575_v45 = vmul.f32 %v1823_v4, %v537_v41  ;;  %v711_v46 = vsel %vm647_vm12, %v615_v33, %v679_v39  ;;  %v707_v47 = vsel %vm643_vm13, %v611_v34, %v675_v40  ;;  %v583_v58 = vmul.f32 %v1823_v4, %v545_v52 }
  0x97   : > { %v618_v48 = vadd.f32 %v1853_v25, %v580_v43  ;;  %v614_v49 = vadd.f32 %v1853_v25, %v576_v44  ;;  %v706_v50 = vsel %vm642_vm14, %v610_v36, %v674_v42  ;;  %v579_v59 = vmul.f32 %v1823_v4, %v541_v53  ;;  %v296_v36 = vld [vmem:[%s1960_s13 + $0x10] sm:$0xff]  ;;  %v2009_v53 = vpop.permute.xlu2 %961 }
  0x98   : > { %v613_v51 = vadd.f32 %v1853_v25, %v575_v45  ;;  %v578_v60 = vmul.f32 %v1823_v4, %v540_v56  ;;  %v621_v63 = vadd.f32 %v1853_v25, %v583_v58  ;;  %v586_v10 = vmul.f32 %v1823_v4, %v548_v3  ;;  %v891_v58 = vld [vmem:[%s1983_s21 + $0x18] sm:$0xff] }
  0x99   : > { %v682_v54 = vmul.f32 0.01, %v618_v48  ;;  %v678_v55 = vmul.f32 0.01, %v614_v49  ;;  %vm650_vm15 = vcmp.gt.f32.partialorder %v618_v48, 0.0  ;;  %vm646_vm0 = vcmp.gt.f32.partialorder %v614_v49, 0.0 }
  0x9a   : > { %v677_v57 = vmul.f32 0.01, %v613_v51  ;;  %vm645_vm1 = vcmp.gt.f32.partialorder %v613_v51, 0.0  ;;  %v617_v0 = vadd.f32 %v1853_v25, %v579_v59  ;;  %v616_v2 = vadd.f32 %v1853_v25, %v578_v60 }
  0x9b   : > { %v714_v61 = vsel %vm650_vm15, %v618_v48, %v682_v54  ;;  %v710_v62 = vsel %vm646_vm0, %v614_v49, %v678_v55  ;;  %v685_v6 = vmul.f32 0.01, %v621_v63  ;;  %vm653_vm2 = vcmp.gt.f32.partialorder %v621_v63, 0.0  ;;  %v297_v49 = vld [vmem:[%s1960_s13 + $0x18] sm:$0xff] }
  0x9c   : > { %779 = vrot.lane.b32.xlu0 %v705_v7, %s1761_s10  ;;  %771 = vrot.lane.b32.xlu2 %v701_v8, %s1761_s10  ;;  %v709_v1 = vsel %vm645_vm1, %v613_v51, %v677_v57  ;;  %v681_v7 = vmul.f32 0.01, %v617_v0  ;;  %v543_v8 = vld [vmem:[%s1821_s9 + $0xa0] sm:$0xff]  ;;  %vm649_vm3 = vcmp.gt.f32.partialorder %v617_v0, 0.0  ;;  %v680_v9 = vmul.f32 0.01, %v616_v2 }
  0x9d   : > { %769 = vrot.lane.b32.xlu1 %v700_v11, %s1761_s10  ;;  %vm648_vm4 = vcmp.gt.f32.partialorder %v616_v2, 0.0  ;;  %v582_v11 = vmul.f32 %v1823_v4, %v544_v5  ;;  %v581_v12 = vmul.f32 %v1823_v4, %v543_v8  ;;  %v717_v13 = vsel %vm653_vm2, %v621_v63, %v685_v6 }
  0x9e   : > { %v713_v14 = vsel %vm649_vm3, %v617_v0, %v681_v7  ;;  %v624_v15 = vadd.f32 %v1853_v25, %v586_v10  ;;  %v712_v17 = vsel %vm648_vm4, %v616_v2, %v680_v9  ;;  %v623_v33 = vadd.f32 %v1853_v25, %v1845_v22  ;;  %v1975_v22 = vld [vmem:[%s2671_s4 + $0x1] ss:$0 sm:$0xff]  ;;  %v300_v7 = vld [vmem:[%s1960_s13 + $0x30] sm:$0xff] }
  0x9f   : > { %v620_v16 = vadd.f32 %v1853_v25, %v582_v11  ;;  %v619_v18 = vadd.f32 %v1853_v25, %v581_v12  ;;  %v630_v40 = vadd.f32 %v1853_v25, %v1851_v24  ;;  %v626_v44 = vadd.f32 %v1853_v25, %v1856_v26 }
  0xa0   : > { %v688_v19 = vmul.f32 0.01, %v624_v15  ;;  %vm656_vm5 = vcmp.gt.f32.partialorder %v624_v15, 0.0  ;;  %v687_v38 = vmul.f32 0.01, %v623_v33  ;;  %vm655_vm9 = vcmp.gt.f32.partialorder %v623_v33, 0.0 }
  0xa1   : > { %v684_v20 = vmul.f32 0.01, %v620_v16  ;;  %vm652_vm6 = vcmp.gt.f32.partialorder %v620_v16, 0.0  ;;  %v683_v4 = vmul.f32 0.01, %v619_v18  ;;  %vm651_vm7 = vcmp.gt.f32.partialorder %v619_v18, 0.0 }
  0xa2   : > { %v720_v30 = vsel %vm656_vm5, %v624_v15, %v688_v19  ;;  %v719_v43 = vsel %vm655_vm9, %v623_v33, %v687_v38  ;;  %v625_v45 = vadd.f32 %v1853_v25, %v1859_v27  ;;  %vm490_vm11 = vcmask 130048  }
  0xa3   : > { %v715_v34 = vsel %vm651_vm7, %v619_v18, %v683_v4  ;;  %v694_v27 = vmul.f32 0.01, %v630_v40  ;;  %vm662_vm13 = vcmp.gt.f32.partialorder %v630_v40, 0.0  ;;  %vm658_vm14 = vcmp.gt.f32.partialorder %v626_v44, 0.0 }
  0xa4   : > { %785 = vrot.lane.b32.xlu0 %v708_v31, %s1761_s10  ;;  %777 = vrot.lane.b32.xlu2 %v704_v32, %s1761_s10  ;;  %v716_v31 = vsel %vm652_vm6, %v620_v16, %v684_v20  ;;  %v627_v32 = vadd.f32 %v1853_v25, %v1842_v21  ;;  %v1970_v21 = vld [vmem:[%s2671_s4] ss:$0 sm:$0xff]  ;;  %v689_v54 = vmul.f32 0.01, %v625_v45  ;;  %vm657_vm15 = vcmp.gt.f32.partialorder %v625_v45, 0.0 }
  0xa5   : > { %775 = vrot.lane.b32.xlu1 %v703_v35, %s1761_s10  ;;  %v622_v35 = vadd.f32 %v1853_v25, %v1848_v23  ;;  %v330_v39 = vmul.f32 %v1970_v21, %v296_v36  ;;  %v331_v52 = vmul.f32 %v1970_v21, %v297_v49  ;;  %v726_v56 = vsel %vm662_vm13, %v630_v40, %v694_v27  ;;  %v892_v20 = vld [vmem:[%s1983_s21 + $0x20] sm:$0xff] }
  0xa6   : > { %v691_v37 = vmul.f32 0.01, %v627_v32  ;;  %vm659_vm8 = vcmp.gt.f32.partialorder %v627_v32, 0.0  ;;  %v629_v57 = vadd.f32 %v1853_v25, %v1862_v28  ;;  %v721_v63 = vsel %vm657_vm15, %v625_v45, %v689_v54 }
  0xa7   : > { %v686_v23 = vmul.f32 0.01, %v622_v35  ;;  %vm654_vm10 = vcmp.gt.f32.partialorder %v622_v35, 0.0  ;;  %v364_v41 = vadd.f32 %v1975_v22, %v330_v39  ;;  %v365_v55 = vadd.f32 %v1975_v22, %v331_v52  ;;  %v294_v39 = vld [vmem:[%s1960_s13] sm:$0xff] }
  0xa8   : > { %v723_v42 = vsel %vm659_vm8, %v627_v32, %v691_v37  ;;  %v628_v0 = vadd.f32 %v1853_v25, %v1865_v29  ;;  %vm661_vm1 = vcmp.gt.f32.partialorder %v629_v57, 0.0  ;;  %v693_v6 = vmul.f32 0.01, %v629_v57  ;;  %v298_v32 = vld [vmem:[%s1960_s13 + $0x20] sm:$0xff] }
  0xa9   : > { %v718_v24 = vsel %vm654_vm10, %v622_v35, %v686_v23  ;;  %vm396_vm12 = vcmp.gt.f32.partialorder %v364_v41, 0.0  ;;  %v428_v26 = vmul.f32 0.01, %v364_v41  ;;  %vm397_vm0 = vcmp.gt.f32.partialorder %v365_v55, 0.0  ;;  %v303_v35 = vld [vmem:[%s1960_s13 + $0x48] sm:$0xff] }
  0xaa   : > { %v692_v8 = vmul.f32 0.01, %v628_v0  ;;  %v334_v29 = vmul.f32 %v1970_v21, %v300_v7  ;;  %vm660_vm3 = vcmp.gt.f32.partialorder %v628_v0, 0.0  ;;  %v337_v38 = vmul.f32 %v1970_v21, %v303_v35 }
  0xab   : > { %v460_v48 = vsel %vm396_vm12, %v364_v41, %v428_v26  ;;  %v328_v41 = vmul.f32 %v1970_v21, %v294_v39  ;;  %vm855_vm8 = vcmask 261248  }
  0xac   : > { %791 = vrot.lane.b32.xlu0 %v711_v46, %s1761_s10  ;;  %783 = vrot.lane.b32.xlu2 %v707_v47, %s1761_s10  ;;  %v2000_v46 = vpop.permute.xlu1 %923  ;;  %v888_v47 = vld [vmem:[%s1983_s21] sm:$0xff]  ;;  %493 = vst.msk [vmem:[%s1996_s24 + $0x10] sm:$0xff] %vm490_vm11, %v460_v48  ;;  %v368_v11 = vadd.f32 %v1975_v22, %v334_v29  ;;  %v724_v15 = vsel %vm660_vm3, %v628_v0, %v692_v8 }
  0xad   : > { %781 = vrot.lane.b32.xlu1 %v706_v50, %s1761_s10  ;;  %v690_v50 = vmul.f32 0.01, %v626_v44  ;;  %v926_v51 = vmul.f32 %v2000_v46, %v888_v47  ;;  %v929_v28 = vmul.f32 %v2000_v46, %v891_v58  ;;  %v930_v37 = vmul.f32 %v2000_v46, %v892_v20  ;;  %v896_v47 = vld [vmem:[%s1983_s21 + $0x40] sm:$0xff] }
  0xae   : > { %vm400_vm4 = vcmp.gt.f32.partialorder %v368_v11, 0.0  ;;  %v432_v18 = vmul.f32 0.01, %v368_v11  ;;  %v362_v27 = vadd.f32 %v1975_v22, %v328_v41  ;;  %v934_v58 = vmul.f32 %v2000_v46, %v896_v47  ;;  %v306_v0 = vld [vmem:[%s1960_s13 + $0x60] sm:$0xff] }
  0xaf   : > { %v722_v59 = vsel %vm658_vm14, %v626_v44, %v690_v50  ;;  %v964_v60 = vadd.f32 %v2009_v53, %v926_v51  ;;  %v967_v9 = vadd.f32 %v2009_v53, %v929_v28  ;;  %v371_v44 = vadd.f32 %v1975_v22, %v337_v38  ;;  %v895_v51 = vld [vmem:[%s1983_s21 + $0x38] sm:$0xff]  ;;  %v900_v29 = vld [vmem:[%s1983_s21 + $0x60] sm:$0xff] }
  0xb0   : > { %v968_v49 = vadd.f32 %v2009_v53, %v930_v37  ;;  %vm394_vm12 = vcmp.gt.f32.partialorder %v362_v27, 0.0  ;;  %v426_v54 = vmul.f32 0.01, %v362_v27  ;;  %v309_v37 = vld [vmem:[%s1960_s13 + $0x78] sm:$0xff] }
  0xb1   : > { %v1028_v5 = vmul.f32 0.01, %v964_v60  ;;  %vm996_vm2 = vcmp.gt.f32.partialorder %v964_v60, 0.0  ;;  %v1031_v19 = vmul.f32 0.01, %v967_v9  ;;  %vm999_vm5 = vcmp.gt.f32.partialorder %v967_v9, 0.0 }
  0xb2   : > { %vm403_vm10 = vcmp.gt.f32.partialorder %v371_v44, 0.0  ;;  %v435_v50 = vmul.f32 0.01, %v371_v44  ;;  %v1032_v28 = vmul.f32 0.01, %v968_v49  ;;  %vm1000_vm15 = vcmp.gt.f32.partialorder %v968_v49, 0.0 }
  0xb3   : > { %v1060_v12 = vsel %vm996_vm2, %v964_v60, %v1028_v5  ;;  %v1063_v23 = vsel %vm999_vm5, %v967_v9, %v1031_v19  ;;  %v301_v60 = vld [vmem:[%s1960_s13 + $0x38] sm:$0xff] }
  0xb4   : > { %797 = vrot.lane.b32.xlu0 %v714_v61, %s1761_s10  ;;  %789 = vrot.lane.b32.xlu2 %v710_v62, %s1761_s10  ;;  %v890_v61 = vld [vmem:[%s1983_s21 + $0x10] sm:$0xff]  ;;  %v429_v62 = vmul.f32 0.01, %v365_v55 }
  0xb5   : > { %787 = vrot.lane.b32.xlu1 %v709_v1, %s1761_s10  ;;  %v889_v1 = vld [vmem:[%s1983_s21 + $0x8] sm:$0xff]  ;;  %v928_v3 = vmul.f32 %v2000_v46, %v890_v61 }
  0xb6   : > { %v461_v2 = vsel %vm397_vm0, %v365_v55, %v429_v62  ;;  %v927_v25 = vmul.f32 %v2000_v46, %v889_v1  ;;  %v458_v62 = vsel %vm394_vm12, %v362_v27, %v426_v54  ;;  %v933_v1 = vmul.f32 %v2000_v46, %v895_v51  ;;  %v902_v51 = vld [vmem:[%s1983_s21 + $0x70] sm:$0xff]  ;;  %v901_v54 = vld [vmem:[%s1983_s21 + $0x68] sm:$0xff] }
  0xb7   : > { %494 = vst.msk [vmem:[%s1996_s24 + $0x18] sm:$0xff] %vm490_vm11, %v461_v2  ;;  %v966_v10 = vadd.f32 %v2009_v53, %v928_v3  ;;  %v340_v2 = vmul.f32 %v1970_v21, %v306_v0  ;;  %v295_v3 = vld [vmem:[%s1960_s13 + $0x8] sm:$0xff] }
  0xb8   : > { %v965_v16 = vadd.f32 %v2009_v53, %v927_v25  ;;  %491 = vst.msk [vmem:[%s1996_s24] sm:$0xff] %vm490_vm11, %v458_v62  ;;  %v972_v25 = vadd.f32 %v2009_v53, %v934_v58  ;;  %v307_v62 = vld [vmem:[%s1960_s13 + $0x68] sm:$0xff] }
  0xb9   : > { %v1030_v4 = vmul.f32 0.01, %v966_v10  ;;  %vm998_vm6 = vcmp.gt.f32.partialorder %v966_v10, 0.0  ;;  %v374_v9 = vadd.f32 %v1975_v22, %v340_v2 }
  0xba   : > { %v1029_v36 = vmul.f32 0.01, %v965_v16  ;;  %vm997_vm7 = vcmp.gt.f32.partialorder %v965_v16, 0.0 }
  0xbc   : > { %803 = vrot.lane.b32.xlu0 %v717_v13, %s1761_s10  ;;  %795 = vrot.lane.b32.xlu2 %v713_v14, %s1761_s10  ;;  %v725_v13 = vsel %vm661_vm1, %v629_v57, %v693_v6  ;;  %v894_v14 = vld [vmem:[%s1983_s21 + $0x30] sm:$0xff]  ;;  %v1061_v48 = vsel %vm997_vm7, %v965_v16, %v1029_v36  ;;  %v329_v6 = vmul.f32 %v1970_v21, %v295_v3  ;;  %vm406_vm1 = vcmp.gt.f32.partialorder %v374_v9, 0.0 }
  0xbd   : > { %793 = vrot.lane.b32.xlu1 %v712_v17, %s1761_s10  ;;  %v893_v17 = vld [vmem:[%s1983_s21 + $0x28] sm:$0xff]  ;;  %v438_v16 = vmul.f32 0.01, %v374_v9  ;;  %v939_v3 = vmul.f32 %v2000_v46, %v901_v54 }
  0xbe   : > { %v931_v33 = vmul.f32 %v2000_v46, %v893_v17  ;;  %v938_v17 = vmul.f32 %v2000_v46, %v900_v29 }
  0xc0   : > { %v969_v45 = vadd.f32 %v2009_v53, %v931_v33  ;;  %v304_v33 = vld [vmem:[%s1960_s13 + $0x50] sm:$0xff]  ;;  %v976_v41 = vadd.f32 %v2009_v53, %v938_v17  ;;  %v977_v17 = vadd.f32 %v2009_v53, %v939_v3 }
  0xc1   : > { %v338_v36 = vmul.f32 %v1970_v21, %v304_v33 }
  0xc2   : > { %v1033_v61 = vmul.f32 0.01, %v969_v45  ;;  %vm1001_vm14 = vcmp.gt.f32.partialorder %v969_v45, 0.0  ;;  %v1040_v58 = vmul.f32 0.01, %v976_v41 }
  0xc4   : > { %809 = vrot.lane.b32.xlu0 %v720_v30, %s1761_s10  ;;  %801 = vrot.lane.b32.xlu2 %v716_v31, %s1761_s10  ;;  %v932_v30 = vmul.f32 %v2000_v46, %v894_v14  ;;  %v464_v31 = vsel %vm400_vm4, %v368_v11, %v432_v18  ;;  %v899_v11 = vld [vmem:[%s1983_s21 + $0x58] sm:$0xff]  ;;  %v1064_v14 = vsel %vm1000_vm15, %v968_v49, %v1032_v28  ;;  %v898_v18 = vld [vmem:[%s1983_s21 + $0x50] sm:$0xff]  ;;  %vm1004_vm4 = vcmp.gt.f32.partialorder %v972_v25, 0.0 }
  0xc5   : > { %799 = vrot.lane.b32.xlu1 %v715_v34, %s1761_s10  ;;  %497 = vst.msk [vmem:[%s1996_s24 + $0x30] sm:$0xff] %vm490_vm11, %v464_v31  ;;  %v332_v34 = vmul.f32 %v1970_v21, %v298_v32  ;;  %v937_v31 = vmul.f32 %v2000_v46, %v899_v11  ;;  %v470_v32 = vsel %vm406_vm1, %v374_v9, %v438_v16 }
  0xc6   : > { %v936_v39 = vmul.f32 %v2000_v46, %v898_v18  ;;  %503 = vst.msk [vmem:[%s1996_s24 + $0x60] sm:$0xff] %vm490_vm11, %v470_v32  ;;  %v341_v28 = vmul.f32 %v1970_v21, %v307_v62  ;;  %v904_v18 = vld [vmem:[%s1983_s21 + $0x80] sm:$0xff] }
  0xc7   : > { %v366_v40 = vadd.f32 %v1975_v22, %v332_v34  ;;  %v1036_v34 = vmul.f32 0.01, %v972_v25 }
  0xc9   : > { %vm398_vm9 = vcmp.gt.f32.partialorder %v366_v40, 0.0  ;;  %v430_v26 = vmul.f32 0.01, %v366_v40  ;;  %v1068_v47 = vsel %vm1004_vm4, %v972_v25, %v1036_v34 }
  0xcb   : > { %v462_v52 = vsel %vm398_vm9, %v366_v40, %v430_v26  ;;  %v299_v40 = vld [vmem:[%s1960_s13 + $0x28] sm:$0xff]  ;;  %v903_v26 = vld [vmem:[%s1983_s21 + $0x78] sm:$0xff]  ;;  %vm1008_vm9 = vcmp.gt.f32.partialorder %v976_v41, 0.0 }
  0xcc   : > { %815 = vrot.lane.b32.xlu0 %v723_v42, %s1761_s10  ;;  %807 = vrot.lane.b32.xlu2 %v719_v43, %s1761_s10  ;;  %v1062_v42 = vsel %vm998_vm6, %v966_v10, %v1030_v4  ;;  %v970_v43 = vadd.f32 %v2009_v53, %v932_v30  ;;  %495 = vst.msk [vmem:[%s1996_s24 + $0x20] sm:$0xff] %vm490_vm11, %v462_v52 }
  0xcd   : > { %805 = vrot.lane.b32.xlu1 %v718_v24, %s1761_s10  ;;  %v897_v24 = vld [vmem:[%s1983_s21 + $0x48] sm:$0xff]  ;;  %v1065_v10 = vsel %vm1001_vm14, %v969_v45, %v1033_v61  ;;  %v975_v45 = vadd.f32 %v2009_v53, %v937_v31  ;;  %v1072_v25 = vsel %vm1008_vm9, %v976_v41, %v1040_v58  ;;  %v1041_v41 = vmul.f32 0.01, %v977_v17 }
  0xce   : > { %v935_v57 = vmul.f32 %v2000_v46, %v897_v24  ;;  %vm1002_vm13 = vcmp.gt.f32.partialorder %v970_v43, 0.0 }
  0xcf   : > { %vm1007_vm12 = vcmp.gt.f32.partialorder %v975_v45, 0.0 }
  0xd0   : > { %v973_v8 = vadd.f32 %v2009_v53, %v935_v57 }
  0xd2   : > { %v1037_v30 = vmul.f32 0.01, %v973_v8  ;;  %vm1005_vm3 = vcmp.gt.f32.partialorder %v973_v8, 0.0 }
  0xd4   : > { %821 = vrot.lane.b32.xlu0 %v726_v56, %s1761_s10  ;;  %813 = vrot.lane.b32.xlu2 %v722_v59, %s1761_s10  ;;  %v1034_v56 = vmul.f32 0.01, %v970_v43  ;;  %v467_v59 = vsel %vm403_vm10, %v371_v44, %v435_v50  ;;  %v1069_v44 = vsel %vm1005_vm3, %v973_v8, %v1037_v30  ;;  %v974_v50 = vadd.f32 %v2009_v53, %v936_v39 }
  0xd5   : > { %811 = vrot.lane.b32.xlu1 %v721_v63, %s1761_s10  ;;  %v335_v63 = vmul.f32 %v1970_v21, %v301_v60  ;;  %500 = vst.msk [vmem:[%s1996_s24 + $0x48] sm:$0xff] %vm490_vm11, %v467_v59  ;;  %v1039_v59 = vmul.f32 0.01, %v975_v45  ;;  %v941_v60 = vmul.f32 %v2000_v46, %v903_v26  ;;  %vm1009_vm3 = vcmp.gt.f32.partialorder %v977_v17, 0.0 }
  0xd6   : > { %v1066_v7 = vsel %vm1002_vm13, %v970_v43, %v1034_v56  ;;  %v333_v43 = vmul.f32 %v1970_v21, %v299_v40  ;;  %v1038_v2 = vmul.f32 0.01, %v974_v50  ;;  %vm1006_vm13 = vcmp.gt.f32.partialorder %v974_v50, 0.0  ;;  %v315_v40 = vld [vmem:[%s1960_s13 + $0xa8] sm:$0xff] }
  0xd7   : > { %v369_v5 = vadd.f32 %v1975_v22, %v335_v63  ;;  %v940_v63 = vmul.f32 %v2000_v46, %v902_v51  ;;  %v1071_v29 = vsel %vm1007_vm12, %v975_v45, %v1039_v59  ;;  %v979_v9 = vadd.f32 %v2009_v53, %v941_v60  ;;  %v908_v51 = vld [vmem:[%s1983_s21 + $0xa0] sm:$0xff]  ;;  %v907_v59 = vld [vmem:[%s1983_s21 + $0x98] sm:$0xff] }
  0xd8   : > { %v1070_v16 = vsel %vm1006_vm13, %v974_v50, %v1038_v2 }
  0xd9   : > { %vm401_vm0 = vcmp.gt.f32.partialorder %v369_v5, 0.0  ;;  %v978_v11 = vadd.f32 %v2009_v53, %v940_v63  ;;  %vm1011_vm1 = vcmp.gt.f32.partialorder %v979_v9, 0.0  ;;  %v1043_v32 = vmul.f32 0.01, %v979_v9 }
  0xdc   : > { %1124 = vrot.lane.b32.xlu0 %v1060_v12, %s1762_s25  ;;  %819 = vrot.lane.b32.xlu2 %v725_v13, %s1761_s10  ;;  %v433_v12 = vmul.f32 0.01, %v369_v5  ;;  %v363_v13 = vadd.f32 %v1975_v22, %v329_v6  ;;  %v302_v6 = vld [vmem:[%s1960_s13 + $0x40] sm:$0xff] }
  0xdd   : > { %817 = vrot.lane.b32.xlu1 %v724_v15, %s1761_s10  ;;  %v971_v15 = vadd.f32 %v2009_v53, %v933_v1  ;;  %v312_v1 = vld [vmem:[%s1960_s13 + $0x90] sm:$0xff]  ;;  %v336_v8 = vmul.f32 %v1970_v21, %v302_v6  ;;  %s1763_s10 = smov 80  }
  0xde   : > { %v465_v19 = vsel %vm401_vm0, %v369_v5, %v433_v12  ;;  %vm395_vm2 = vcmp.gt.f32.partialorder %v363_v13, 0.0  ;;  %v427_v20 = vmul.f32 0.01, %v363_v13  ;;  %v346_v5 = vmul.f32 %v1970_v21, %v312_v1  ;;  %v906_v12 = vld [vmem:[%s1983_s21 + $0x90] sm:$0xff]  ;;  %v313_v1 = vld [vmem:[%s1960_s13 + $0x98] sm:$0xff] }
  0xdf   : > { %498 = vst.msk [vmem:[%s1996_s24 + $0x38] sm:$0xff] %vm490_vm11, %v465_v19  ;;  %v1035_v38 = vmul.f32 0.01, %v971_v15  ;;  %vm1003_vm5 = vcmp.gt.f32.partialorder %v971_v15, 0.0  ;;  %v944_v33 = vmul.f32 %v2000_v46, %v906_v12  ;;  %v347_v6 = vmul.f32 %v1970_v21, %v313_v1 }
  0xe0   : > { %v459_v35 = vsel %vm395_vm2, %v363_v13, %v427_v20  ;;  %v905_v13 = vld [vmem:[%s1983_s21 + $0x88] sm:$0xff]  ;;  %vm1010_vm2 = vcmp.gt.f32.partialorder %v978_v11, 0.0 }
  0xe1   : > { %492 = vst.msk [vmem:[%s1996_s24 + $0x8] sm:$0xff] %vm490_vm11, %v459_v35  ;;  %v1067_v49 = vsel %vm1003_vm5, %v971_v15, %v1035_v38  ;;  %v370_v15 = vadd.f32 %v1975_v22, %v336_v8  ;;  %v943_v34 = vmul.f32 %v2000_v46, %v905_v13  ;;  %v310_v35 = vld [vmem:[%s1960_s13 + $0x80] sm:$0xff]  ;;  %v942_v38 = vmul.f32 %v2000_v46, %v904_v18 }
  0xe2   : > { %v982_v26 = vadd.f32 %v2009_v53, %v944_v33  ;;  %v381_v12 = vadd.f32 %v1975_v22, %v347_v6  ;;  %v912_v18 = vld [vmem:[%s1983_s21 + $0xc0] sm:$0xff]  ;;  %v910_v33 = vld [vmem:[%s1983_s21 + $0xb0] sm:$0xff] }
  0xe3   : > { %vm402_vm0 = vcmp.gt.f32.partialorder %v370_v15, 0.0 }
  0xe4   : > { %1130 = vrot.lane.b32.xlu0 %v1063_v23, %s1762_s25  ;;  %1128 = vrot.lane.b32.xlu2 %v1062_v42, %s1762_s25  ;;  %v343_v23 = vmul.f32 %v1970_v21, %v309_v37  ;;  %v372_v42 = vadd.f32 %v1975_v22, %v338_v36  ;;  %v1042_v37 = vmul.f32 0.01, %v978_v11  ;;  %vm413_vm12 = vcmp.gt.f32.partialorder %v381_v12, 0.0 }
  0xe5   : > { %1126 = vrot.lane.b32.xlu1 %v1061_v48, %s1762_s25  ;;  %v367_v48 = vadd.f32 %v1975_v22, %v333_v43  ;;  %v349_v43 = vmul.f32 %v1970_v21, %v315_v40  ;;  %v316_v40 = vld [vmem:[%s1960_s13 + $0xb0] sm:$0xff] }
  0xe6   : > { %v764_v55 = vpop.permute.xlu2 %763  ;;  %v377_v24 = vadd.f32 %v1975_v22, %v343_v23  ;;  %vm404_vm6 = vcmp.gt.f32.partialorder %v372_v42, 0.0  ;;  %v436_v27 = vmul.f32 0.01, %v372_v42  ;;  %v344_v23 = vmul.f32 %v1970_v21, %v310_v35 }
  0xe7   : > { %858 = vst.msk [vmem:[%s1996_s24 + $0x10] sm:$0xff] %vm855_vm8, %v764_v55  ;;  %vm399_vm10 = vcmp.gt.f32.partialorder %v367_v48, 0.0  ;;  %v431_v56 = vmul.f32 0.01, %v367_v48  ;;  %v1074_v50 = vsel %vm1010_vm2, %v978_v11, %v1042_v37 }
  0xe8   : > { %vm409_vm7 = vcmp.gt.f32.partialorder %v377_v24, 0.0  ;;  %v441_v52 = vmul.f32 0.01, %v377_v24  ;;  %v468_v55 = vsel %vm404_vm6, %v372_v42, %v436_v27  ;;  %v378_v45 = vadd.f32 %v1975_v22, %v344_v23 }
  0xe9   : > { %501 = vst.msk [vmem:[%s1996_s24 + $0x50] sm:$0xff] %vm490_vm11, %v468_v55  ;;  %v463_v0 = vsel %vm399_vm10, %v367_v48, %v431_v56  ;;  %v981_v27 = vadd.f32 %v2009_v53, %v943_v34  ;;  %v909_v48 = vld [vmem:[%s1983_s21 + $0xa8] sm:$0xff]  ;;  %v1073_v55 = vsel %vm1009_vm3, %v977_v17, %v1041_v41  ;;  %v980_v56 = vadd.f32 %v2009_v53, %v942_v38 }
  0xea   : > { %v473_v61 = vsel %vm409_vm7, %v377_v24, %v441_v52  ;;  %496 = vst.msk [vmem:[%s1996_s24 + $0x28] sm:$0xff] %vm490_vm11, %v463_v0  ;;  %vm410_vm4 = vcmp.gt.f32.partialorder %v378_v45, 0.0  ;;  %v442_v52 = vmul.f32 0.01, %v378_v45  ;;  %v947_v58 = vmul.f32 %v2000_v46, %v909_v48  ;;  %v311_v48 = vld [vmem:[%s1960_s13 + $0x88] sm:$0xff] }
  0xeb   : > { %506 = vst.msk [vmem:[%s1996_s24 + $0x78] sm:$0xff] %vm490_vm11, %v473_v61  ;;  %vm1014_vm7 = vcmp.gt.f32.partialorder %v982_v26, 0.0  ;;  %v1046_v0 = vmul.f32 0.01, %v982_v26  ;;  %vm1013_vm9 = vcmp.gt.f32.partialorder %v981_v27, 0.0  ;;  %vm1012_vm10 = vcmp.gt.f32.partialorder %v980_v56, 0.0 }
  0xec   : > { %1136 = vrot.lane.b32.xlu0 %v1066_v7, %s1762_s25  ;;  %1134 = vrot.lane.b32.xlu2 %v1065_v10, %s1762_s25  ;;  %v375_v7 = vadd.f32 %v1975_v22, %v341_v28  ;;  %v380_v10 = vadd.f32 %v1975_v22, %v346_v5  ;;  %v474_v60 = vsel %vm410_vm4, %v378_v45, %v442_v52  ;;  %v1045_v3 = vmul.f32 0.01, %v981_v27  ;;  %v321_v45 = vld [vmem:[%s1960_s13 + $0xd8] sm:$0xff] }
  0xed   : > { %1132 = vrot.lane.b32.xlu1 %v1064_v14, %s1762_s25  ;;  %v946_v28 = vmul.f32 %v2000_v46, %v908_v51  ;;  %507 = vst.msk [vmem:[%s1996_s24 + $0x80] sm:$0xff] %vm490_vm11, %v474_v60  ;;  %v1044_v8 = vmul.f32 0.01, %v980_v56  ;;  %v985_v11 = vadd.f32 %v2009_v53, %v947_v58  ;;  %v950_v23 = vmul.f32 %v2000_v46, %v912_v18  ;;  %v914_v58 = vld [vmem:[%s1983_s21 + $0xd0] sm:$0xff] }
  0xee   : > { %v766_v4 = vpop.permute.xlu2 %765  ;;  %vm407_vm14 = vcmp.gt.f32.partialorder %v375_v7, 0.0  ;;  %v439_v14 = vmul.f32 0.01, %v375_v7  ;;  %vm412_vm15 = vcmp.gt.f32.partialorder %v380_v10, 0.0  ;;  %v444_v19 = vmul.f32 0.01, %v380_v10 }
  0xef   : > { %859 = vst.msk [vmem:[%s1996_s24 + $0x18] sm:$0xff] %vm855_vm8, %v766_v4  ;;  %v434_v4 = vmul.f32 0.01, %v370_v15  ;;  %v1077_v17 = vsel %vm1013_vm9, %v981_v27, %v1045_v3  ;;  %v1049_v38 = vmul.f32 0.01, %v985_v11  ;;  %v355_v27 = vmul.f32 %v1970_v21, %v321_v45 }
  0xf0   : > { %v471_v20 = vsel %vm407_vm14, %v375_v7, %v439_v14  ;;  %v476_v39 = vsel %vm412_vm15, %v380_v10, %v444_v19  ;;  %v318_v7 = vld [vmem:[%s1960_s13 + $0xc0] sm:$0xff]  ;;  %v308_v10 = vld [vmem:[%s1960_s13 + $0x70] sm:$0xff]  ;;  %v1078_v14 = vsel %vm1014_vm7, %v982_v26, %v1046_v0  ;;  %v445_v19 = vmul.f32 0.01, %v381_v12 }
  0xf1   : > { %504 = vst.msk [vmem:[%s1996_s24 + $0x68] sm:$0xff] %vm490_vm11, %v471_v20  ;;  %v466_v42 = vsel %vm402_vm0, %v370_v15, %v434_v4  ;;  %v342_v13 = vmul.f32 %v1970_v21, %v308_v10  ;;  %v984_v15 = vadd.f32 %v2009_v53, %v946_v28  ;;  %v1076_v4 = vsel %vm1012_vm10, %v980_v56, %v1044_v8  ;;  %v913_v28 = vld [vmem:[%s1983_s21 + $0xc8] sm:$0xff] }
  0xf2   : > { %509 = vst.msk [vmem:[%s1996_s24 + $0x90] sm:$0xff] %vm490_vm11, %v476_v39  ;;  %vm1017_vm14 = vcmp.gt.f32.partialorder %v985_v11, 0.0  ;;  %v477_v34 = vsel %vm413_vm12, %v381_v12, %v445_v19  ;;  %v389_v56 = vadd.f32 %v1975_v22, %v355_v27  ;;  %v319_v8 = vld [vmem:[%s1960_s13 + $0xc8] sm:$0xff] }
  0xf3   : > { %499 = vst.msk [vmem:[%s1996_s24 + $0x40] sm:$0xff] %vm490_vm11, %v466_v42  ;;  %v376_v20 = vadd.f32 %v1975_v22, %v342_v13  ;;  %v1048_v39 = vmul.f32 0.01, %v984_v15  ;;  %vm1016_vm0 = vcmp.gt.f32.partialorder %v984_v15, 0.0  ;;  %v1081_v51 = vsel %vm1017_vm14, %v985_v11, %v1049_v38  ;;  %v324_v11 = vld [vmem:[%s1960_s13 + $0xf0] sm:$0xff] }
  0xf4   : > { %1142 = vrot.lane.b32.xlu0 %v1069_v44, %s1762_s25  ;;  %1140 = vrot.lane.b32.xlu2 %v1068_v47, %s1762_s25  ;;  %v305_v44 = vld [vmem:[%s1960_s13 + $0x58] sm:$0xff]  ;;  %v1075_v47 = vsel %vm1011_vm1, %v979_v9, %v1043_v32  ;;  %v352_v9 = vmul.f32 %v1970_v21, %v318_v7  ;;  %510 = vst.msk [vmem:[%s1996_s24 + $0x98] sm:$0xff] %vm490_vm11, %v477_v34  ;;  %vm421_vm3 = vcmp.gt.f32.partialorder %v389_v56, 0.0 }
  0xf5   : > { %1138 = vrot.lane.b32.xlu1 %v1067_v49, %s1762_s25  ;;  %v339_v24 = vmul.f32 %v1970_v21, %v305_v44  ;;  %v383_v49 = vadd.f32 %v1975_v22, %v349_v43  ;;  %vm408_vm15 = vcmp.gt.f32.partialorder %v376_v20, 0.0  ;;  %v440_v35 = vmul.f32 0.01, %v376_v20 }
  0xf6   : > { %v772_v57 = vpop.permute.xlu2 %771  ;;  %v350_v44 = vmul.f32 %v1970_v21, %v316_v40  ;;  %v1080_v52 = vsel %vm1016_vm0, %v984_v15, %v1048_v39  ;;  %v952_v7 = vmul.f32 %v2000_v46, %v914_v58  ;;  %v353_v10 = vmul.f32 %v1970_v21, %v319_v8  ;;  %v916_v39 = vld [vmem:[%s1983_s21 + $0xe0] sm:$0xff] }
  0xf7   : > { %862 = vst.msk [vmem:[%s1996_s24 + $0x30] sm:$0xff] %vm855_vm8, %v772_v57  ;;  %v373_v54 = vadd.f32 %v1975_v22, %v339_v24  ;;  %vm415_vm5 = vcmp.gt.f32.partialorder %v383_v49, 0.0  ;;  %v447_v57 = vmul.f32 0.01, %v383_v49  ;;  %v472_v26 = vsel %vm408_vm15, %v376_v20, %v440_v35 }
  0xf8   : > { %505 = vst.msk [vmem:[%s1996_s24 + $0x70] sm:$0xff] %vm490_vm11, %v472_v26  ;;  %v951_v13 = vmul.f32 %v2000_v46, %v913_v28  ;;  %v358_v15 = vmul.f32 %v1970_v21, %v324_v11  ;;  %v387_v18 = vadd.f32 %v1975_v22, %v353_v10  ;;  %v320_v11 = vld [vmem:[%s1960_s13 + $0xd0] sm:$0xff] }
  0xf9   : > { %vm405_vm6 = vcmp.gt.f32.partialorder %v373_v54, 0.0  ;;  %v437_v61 = vmul.f32 0.01, %v373_v54  ;;  %v479_v5 = vsel %vm415_vm5, %v383_v49, %v447_v57  ;;  %v384_v49 = vadd.f32 %v1975_v22, %v350_v44 }
  0xfa   : > { %512 = vst.msk [vmem:[%s1996_s24 + $0xa8] sm:$0xff] %vm490_vm11, %v479_v5  ;;  %vm419_vm9 = vcmp.gt.f32.partialorder %v387_v18, 0.0 }
  0xfb   : > { %vm416_vm2 = vcmp.gt.f32.partialorder %v384_v49, 0.0 }
  0xfc   : > { %1148 = vrot.lane.b32.xlu0 %v1072_v25, %s1762_s25  ;;  %1146 = vrot.lane.b32.xlu2 %v1071_v29, %s1762_s25  ;;  %v945_v25 = vmul.f32 %v2000_v46, %v907_v59  ;;  %v469_v29 = vsel %vm405_vm6, %v373_v54, %v437_v61  ;;  %v988_v54 = vadd.f32 %v2009_v53, %v950_v23  ;;  %v448_v59 = vmul.f32 0.01, %v384_v49 }
  0xfd   : > { %1144 = vrot.lane.b32.xlu1 %v1070_v16, %s1762_s25  ;;  %v386_v16 = vadd.f32 %v1975_v22, %v352_v9  ;;  %502 = vst.msk [vmem:[%s1996_s24 + $0x58] sm:$0xff] %vm490_vm11, %v469_v29 }
  0xfe   : > { %v768_v30 = vpop.permute.xlu0 %767  ;;  %v778_v31 = vpop.permute.xlu2 %777  ;;  %v480_v1 = vsel %vm416_vm2, %v384_v49, %v448_v59  ;;  %vm1020_vm5 = vcmp.gt.f32.partialorder %v988_v54, 0.0  ;;  %v1052_v6 = vmul.f32 0.01, %v988_v54 }
  0xff   : > { %860 = vst.msk [vmem:[%s1996_s24 + $0x20] sm:$0xff] %vm855_vm8, %v768_v30  ;;  %v760_v36 = vpop.permute.xlu1 %759  ;;  %v983_v30 = vadd.f32 %v2009_v53, %v945_v25  ;;  %vm418_vm13 = vcmp.gt.f32.partialorder %v386_v16, 0.0  ;;  %v450_v32 = vmul.f32 0.01, %v386_v16 }
 0x100   : > { %865 = vst.msk [vmem:[%s1996_s24 + $0x48] sm:$0xff] %vm855_vm8, %v778_v31  ;;  %v911_v31 = vld [vmem:[%s1983_s21 + $0xb8] sm:$0xff]  ;;  %v1084_v20 = vsel %vm1020_vm5, %v988_v54, %v1052_v6 }
 0x101   : > { %856 = vst.msk [vmem:[%s1996_s24] sm:$0xff] %vm855_vm8, %v760_v36  ;;  %v949_v42 = vmul.f32 %v2000_v46, %v911_v31  ;;  %v482_v43 = vsel %vm418_vm13, %v386_v16, %v450_v32  ;;  %v1047_v24 = vmul.f32 0.01, %v983_v30  ;;  %vm1015_vm1 = vcmp.gt.f32.partialorder %v983_v30, 0.0  ;;  %v314_v16 = vld [vmem:[%s1960_s13 + $0xa0] sm:$0xff]  ;;  %v918_v32 = vld [vmem:[%s1983_s21 + $0xf0] sm:$0xff] }
 0x102   : > { %515 = vst.msk [vmem:[%s1996_s24 + $0xc0] sm:$0xff] %vm490_vm11, %v482_v43  ;;  %v348_v19 = vmul.f32 %v1970_v21, %v314_v16  ;;  %v956_v45 = vmul.f32 %v2000_v46, %v918_v32  ;;  %v1747_v32 = vld [vmem:[%s2671_s4 + $0x1] ss:$0 sm:$0xff] }
 0x103   : > { %v987_v57 = vadd.f32 %v2009_v53, %v949_v42  ;;  %v1079_v61 = vsel %vm1015_vm1, %v983_v30, %v1047_v24  ;;  %513 = vst.msk [vmem:[%s1996_s24 + $0xb0] sm:$0xff] %vm490_vm11, %v480_v1  ;;  %v392_v30 = vadd.f32 %v1975_v22, %v358_v15  ;;  %v322_v24 = vld [vmem:[%s1960_s13 + $0xe0] sm:$0xff] }
 0x104   : > { %1154 = vrot.lane.b32.xlu0 %v1075_v47, %s1762_s25  ;;  %1152 = vrot.lane.b32.xlu2 %v1074_v50, %s1762_s25  ;;  %v948_v47 = vmul.f32 %v2000_v46, %v910_v33  ;;  %v345_v50 = vmul.f32 %v1970_v21, %v311_v48  ;;  %v451_v33 = vmul.f32 0.01, %v387_v18  ;;  %v382_v34 = vadd.f32 %v1975_v22, %v348_v19 }
 0x105   : > { %1150 = vrot.lane.b32.xlu1 %v1073_v55, %s1762_s25  ;;  %v915_v55 = vld [vmem:[%s1983_s21 + $0xd8] sm:$0xff]  ;;  %vm1019_vm6 = vcmp.gt.f32.partialorder %v987_v57, 0.0  ;;  %v1051_v29 = vmul.f32 0.01, %v987_v57  ;;  %vm424_vm10 = vcmp.gt.f32.partialorder %v392_v30, 0.0  ;;  %v356_v48 = vmul.f32 %v1970_v21, %v322_v24 }
 0x106   : > { %v774_v62 = vpop.permute.xlu0 %773  ;;  %v784_v63 = vpop.permute.xlu2 %783  ;;  %v379_v60 = vadd.f32 %v1975_v22, %v345_v50  ;;  %v953_v0 = vmul.f32 %v2000_v46, %v915_v55  ;;  %v456_v38 = vmul.f32 0.01, %v392_v30  ;;  %v483_v23 = vsel %vm419_vm9, %v387_v18, %v451_v33  ;;  %v1748_v33 = vld [vmem:[%s2671_s4] ss:$0 sm:$0xff] }
 0x107   : > { %863 = vst.msk [vmem:[%s1996_s24 + $0x38] sm:$0xff] %vm855_vm8, %v774_v62  ;;  %v762_v2 = vpop.permute.xlu1 %761  ;;  %v986_v62 = vadd.f32 %v2009_v53, %v948_v47  ;;  %v1083_v31 = vsel %vm1019_vm6, %v987_v57, %v1051_v29  ;;  %vm414_vm13 = vcmp.gt.f32.partialorder %v382_v34, 0.0  ;;  %v446_v40 = vmul.f32 0.01, %v382_v34 }
 0x108   : > { %868 = vst.msk [vmem:[%s1996_s24 + $0x60] sm:$0xff] %vm855_vm8, %v784_v63  ;;  %v453_v63 = vmul.f32 0.01, %v389_v56  ;;  %vm411_vm4 = vcmp.gt.f32.partialorder %v379_v60, 0.0  ;;  %v488_v27 = vsel %vm424_vm10, %v392_v30, %v456_v38  ;;  %v954_v50 = vmul.f32 %v2000_v46, %v916_v39 }
 0x109   : > { %857 = vst.msk [vmem:[%s1996_s24 + $0x8] sm:$0xff] %vm855_vm8, %v762_v2  ;;  %v443_v2 = vmul.f32 0.01, %v379_v60  ;;  %v1050_v12 = vmul.f32 0.01, %v986_v62  ;;  %vm1018_vm7 = vcmp.gt.f32.partialorder %v986_v62, 0.0  ;;  %v390_v54 = vadd.f32 %v1975_v22, %v356_v48 }
 0x10a   : > { %v485_v9 = vsel %vm421_vm3, %v389_v56, %v453_v63  ;;  %516 = vst.msk [vmem:[%s1996_s24 + $0xc8] sm:$0xff] %vm490_vm11, %v483_v23  ;;  %v994_v58 = vadd.f32 %v2009_v53, %v956_v45  ;;  %vm1220_vm10 = vcmask 392448  }
 0x10b   : > { %518 = vst.msk [vmem:[%s1996_s24 + $0xd8] sm:$0xff] %vm490_vm11, %v485_v9  ;;  %v1082_v35 = vsel %vm1018_vm7, %v986_v62, %v1050_v12  ;;  %vm422_vm0 = vcmp.gt.f32.partialorder %v390_v54, 0.0  ;;  %v354_v12 = vmul.f32 %v1970_v21, %v320_v11 }
 0x10c   : > { %1160 = vrot.lane.b32.xlu0 %v1078_v14, %s1762_s25  ;;  %1158 = vrot.lane.b32.xlu2 %v1077_v17, %s1762_s25  ;;  %v475_v14 = vsel %vm411_vm4, %v379_v60, %v443_v2  ;;  %v991_v17 = vadd.f32 %v2009_v53, %v953_v0  ;;  %521 = vst.msk [vmem:[%s1996_s24 + $0xf0] sm:$0xff] %vm490_vm11, %v488_v27  ;;  %v919_v60 = vld [vmem:[%s1983_s21 + $0xf8] sm:$0xff]  ;;  %vm1026_vm2 = vcmp.gt.f32.partialorder %v994_v58, 0.0 }
 0x10d   : > { %1156 = vrot.lane.b32.xlu1 %v1076_v4, %s1762_s25  ;;  %v990_v4 = vadd.f32 %v2009_v53, %v952_v7  ;;  %508 = vst.msk [vmem:[%s1996_s24 + $0x88] sm:$0xff] %vm490_vm11, %v475_v14  ;;  %v992_v0 = vadd.f32 %v2009_v53, %v954_v50  ;;  %v957_v6 = vmul.f32 %v2000_v46, %v919_v60  ;;  %v325_v7 = vld [vmem:[%s1960_s13 + $0xf8] sm:$0xff] }
 0x10e   : > { %v780_v36 = vpop.permute.xlu0 %779  ;;  %v790_v37 = vpop.permute.xlu2 %789  ;;  %vm1023_vm12 = vcmp.gt.f32.partialorder %v991_v17, 0.0  ;;  %v1055_v43 = vmul.f32 0.01, %v991_v17  ;;  %v359_v9 = vmul.f32 %v1970_v21, %v325_v7 }
 0x10f   : > { %866 = vst.msk [vmem:[%s1996_s24 + $0x50] sm:$0xff] %vm855_vm8, %v780_v36  ;;  %v770_v41 = vpop.permute.xlu1 %769  ;;  %v989_v36 = vadd.f32 %v2009_v53, %v951_v13  ;;  %v1054_v44 = vmul.f32 0.01, %v990_v4  ;;  %vm1022_vm14 = vcmp.gt.f32.partialorder %v990_v4, 0.0  ;;  %v1056_v10 = vmul.f32 0.01, %v992_v0 }
 0x110   : > { %871 = vst.msk [vmem:[%s1996_s24 + $0x78] sm:$0xff] %vm855_vm8, %v790_v37  ;;  %v917_v37 = vld [vmem:[%s1983_s21 + $0xe8] sm:$0xff]  ;;  %v1087_v56 = vsel %vm1023_vm12, %v991_v17, %v1055_v43  ;;  %vm1024_vm4 = vcmp.gt.f32.partialorder %v992_v0, 0.0  ;;  %v995_v14 = vadd.f32 %v2009_v53, %v957_v6  ;;  %v1749_v17 = vld [vmem:[%s2671_s4 + $0x1] ss:$0 sm:$0xff] }
 0x111   : > { %861 = vst.msk [vmem:[%s1996_s24 + $0x28] sm:$0xff] %vm855_vm8, %v770_v41  ;;  %v955_v26 = vmul.f32 %v2000_v46, %v917_v37  ;;  %v1053_v49 = vmul.f32 0.01, %v989_v36  ;;  %vm1021_vm15 = vcmp.gt.f32.partialorder %v989_v36, 0.0  ;;  %v1086_v57 = vsel %vm1022_vm14, %v990_v4, %v1054_v44 }
 0x112   : > { %v393_v46 = vadd.f32 %v1975_v22, %v359_v9  ;;  %v388_v18 = vadd.f32 %v1749_v17, %v354_v12  ;;  %v1059_v30 = vmul.f32 0.01, %v995_v14  ;;  %vm1027_vm7 = vcmp.gt.f32.partialorder %v995_v14, 0.0 }
 0x113   : > { %v993_v59 = vadd.f32 %v2009_v53, %v955_v26  ;;  %v1085_v63 = vsel %vm1021_vm15, %v989_v36, %v1053_v49 }
 0x114   : > { %1166 = vrot.lane.b32.xlu0 %v1081_v51, %s1762_s25  ;;  %1164 = vrot.lane.b32.xlu2 %v1080_v52, %s1762_s25  ;;  %v478_v51 = vsel %vm414_vm13, %v382_v34, %v446_v40  ;;  %v317_v52 = vld [vmem:[%s1960_s13 + $0xb8] sm:$0xff]  ;;  %vm425_vm5 = vcmp.gt.f32.partialorder %v393_v46, 0.0  ;;  %v457_v16 = vmul.f32 0.01, %v393_v46  ;;  %vm420_vm6 = vcmp.gt.f32.partialorder %v388_v18, 0.0  ;;  %v323_v34 = vld [vmem:[%s1960_s13 + $0xe8] sm:$0xff]  ;;  %s2460_s13 = scalar_lea.vmem %s2670_s3, %s1815_s6 }
 0x115   : > { %1162 = vrot.lane.b32.xlu1 %v1079_v61, %s1762_s25  ;;  %v351_v55 = vmul.f32 %v1970_v21, %v317_v52  ;;  %511 = vst.msk [vmem:[%s1996_s24 + $0xa0] sm:$0xff] %vm490_vm11, %v478_v51  ;;  %v454_v61 = vmul.f32 0.01, %v390_v54  ;;  %vm1025_vm3 = vcmp.gt.f32.partialorder %v993_v59, 0.0  ;;  %v1088_v21 = vsel %vm1024_vm4, %v992_v0, %v1056_v10  ;;  %v1255_v12 = vld [vmem:[%s2460_s13 + $0x10] sm:$0xff]  ;;  %s1764_s6 = smov 48  }
 0x116   : > { %v786_v3 = vpop.permute.xlu0 %785  ;;  %v796_v5 = vpop.permute.xlu2 %795  ;;  %v452_v53 = vmul.f32 0.01, %v388_v18  ;;  %v1091_v38 = vsel %vm1027_vm7, %v995_v14, %v1059_v30  ;;  %v1253_v14 = vld [vmem:[%s2460_s13] sm:$0xff] }
 0x117   : > { %869 = vst.msk [vmem:[%s1996_s24 + $0x68] sm:$0xff] %vm855_vm8, %v786_v3  ;;  %v776_v25 = vpop.permute.xlu1 %775  ;;  %v385_v62 = vadd.f32 %v1975_v22, %v351_v55  ;;  %v486_v28 = vsel %vm422_vm0, %v390_v54, %v454_v61  ;;  %v489_v22 = vsel %vm425_vm5, %v393_v46, %v457_v16 }
 0x118   : > { %874 = vst.msk [vmem:[%s1996_s24 + $0x90] sm:$0xff] %vm855_vm8, %v796_v5  ;;  %v1058_v5 = vmul.f32 0.01, %v994_v58 }
 0x119   : > { %864 = vst.msk [vmem:[%s1996_s24 + $0x40] sm:$0xff] %vm855_vm8, %v776_v25  ;;  %vm417_vm1 = vcmp.gt.f32.partialorder %v385_v62, 0.0  ;;  %v449_v1 = vmul.f32 0.01, %v385_v62  ;;  %v1057_v25 = vmul.f32 0.01, %v993_v59 }
 0x11a   : > { %519 = vst.msk [vmem:[%s1996_s24 + $0xe0] sm:$0xff] %vm490_vm11, %v486_v28  ;;  %v1090_v13 = vsel %vm1026_vm2, %v994_v58, %v1058_v5 }
 0x11b   : > { %v481_v29 = vsel %vm417_vm1, %v385_v62, %v449_v1  ;;  %v1089_v15 = vsel %vm1025_vm3, %v993_v59, %v1057_v25  ;;  %522 = vst.msk [vmem:[%s1996_s24 + $0xf8] sm:$0xff] %vm490_vm11, %v489_v22  ;;  %v1256_v22 = vld [vmem:[%s2460_s13 + $0x18] sm:$0xff] }
 0x11c   : > { %1172 = vrot.lane.b32.xlu0 %v1084_v20, %s1762_s25  ;;  %1170 = vrot.lane.b32.xlu2 %v1083_v31, %s1762_s25  ;;  %514 = vst.msk [vmem:[%s1996_s24 + $0xb8] sm:$0xff] %vm490_vm11, %v481_v29  ;;  %v484_v31 = vsel %vm420_vm6, %v388_v18, %v452_v53  ;;  %v1258_v18 = vld [vmem:[%s2460_s13 + $0x28] sm:$0xff] }
 0x11d   : > { %1168 = vrot.lane.b32.xlu1 %v1082_v35, %s1762_s25  ;;  %v1750_v35 = vld [vmem:[%s2671_s4] ss:$0 sm:$0xff]  ;;  %517 = vst.msk [vmem:[%s1996_s24 + $0xd0] sm:$0xff] %vm490_vm11, %v484_v31 }
 0x11e   : > { %v792_v41 = vpop.permute.xlu0 %791  ;;  %v802_v42 = vpop.permute.xlu2 %801  ;;  %v357_v36 = vmul.f32 %v1750_v35, %v323_v34 }
 0x11f   : > { %872 = vst.msk [vmem:[%s1996_s24 + $0x80] sm:$0xff] %vm855_vm8, %v792_v41  ;;  %v782_v47 = vpop.permute.xlu1 %781 }
 0x120   : > { %877 = vst.msk [vmem:[%s1996_s24 + $0xa8] sm:$0xff] %vm855_vm8, %v802_v42  ;;  %v391_v37 = vadd.f32 %v1749_v17, %v357_v36 }
 0x121   : > { %867 = vst.msk [vmem:[%s1996_s24 + $0x58] sm:$0xff] %vm855_vm8, %v782_v47 }
 0x122   : > { %vm423_vm9 = vcmp.gt.f32.partialorder %v391_v37, 0.0  ;;  %v455_v39 = vmul.f32 0.01, %v391_v37 }
 0x124   : > { %1178 = vrot.lane.b32.xlu0 %v1087_v56, %s1762_s25  ;;  %1176 = vrot.lane.b32.xlu2 %v1086_v57, %s1762_s25  ;;  %v487_v42 = vsel %vm423_vm9, %v391_v37, %v455_v39 }
 0x125   : > { %1174 = vrot.lane.b32.xlu1 %v1085_v63, %s1762_s25  ;;  %520 = vst.msk [vmem:[%s1996_s24 + $0xe8] sm:$0xff] %vm490_vm11, %v487_v42  ;;  %v1261_v42 = vld [vmem:[%s2460_s13 + $0x40] sm:$0xff] }
 0x126   : > { %v798_v2 = vpop.permute.xlu0 %797  ;;  %v808_v3 = vpop.permute.xlu2 %807 }
 0x127   : > { %875 = vst.msk [vmem:[%s1996_s24 + $0x98] sm:$0xff] %vm855_vm8, %v798_v2  ;;  %v788_v8 = vpop.permute.xlu1 %787 }
 0x128   : > { %880 = vst.msk [vmem:[%s1996_s24 + $0xc0] sm:$0xff] %vm855_vm8, %v808_v3 }
 0x129   : > { %870 = vst.msk [vmem:[%s1996_s24 + $0x70] sm:$0xff] %vm855_vm8, %v788_v8 }
 0x12c   : > { %1184 = vrot.lane.b32.xlu0 %v1090_v13, %s1762_s25  ;;  %1182 = vrot.lane.b32.xlu2 %v1089_v15, %s1762_s25  ;;  %v1254_v13 = vld [vmem:[%s2460_s13 + $0x8] sm:$0xff] }
 0x12d   : > { %1180 = vrot.lane.b32.xlu1 %v1088_v21, %s1762_s25  ;;  %v1257_v21 = vld [vmem:[%s2460_s13 + $0x20] sm:$0xff] }
 0x12e   : > { %v804_v19 = vpop.permute.xlu0 %803  ;;  %v814_v20 = vpop.permute.xlu2 %813 }
 0x12f   : > { %878 = vst.msk [vmem:[%s1996_s24 + $0xb0] sm:$0xff] %vm855_vm8, %v804_v19  ;;  %v794_v4 = vpop.permute.xlu1 %793 }
 0x130   : > { %883 = vst.msk [vmem:[%s1996_s24 + $0xd8] sm:$0xff] %vm855_vm8, %v814_v20 }
 0x131   : > { %873 = vst.msk [vmem:[%s1996_s24 + $0x88] sm:$0xff] %vm855_vm8, %v794_v4 }
 0x134   : > { %1326 = vrot.lane.b32.xlu0 %v1747_v32, %s1763_s10  ;;  %1288 = vrot.lane.b32.xlu2 %v1748_v33, %s1763_s10 }
 0x135   : > { %1186 = vrot.lane.b32.xlu1 %v1091_v38, %s1762_s25 }
 0x136   : > { %v810_v23 = vpop.permute.xlu0 %809  ;;  %v820_v40 = vpop.permute.xlu2 %819 }
 0x137   : > { %881 = vst.msk [vmem:[%s1996_s24 + $0xc8] sm:$0xff] %vm855_vm8, %v810_v23  ;;  %v800_v41 = vpop.permute.xlu1 %799 }
 0x138   : > { %886 = vst.msk [vmem:[%s1996_s24 + $0xf0] sm:$0xff] %vm855_vm8, %v820_v40 }
 0x139   : > { %876 = vst.msk [vmem:[%s1996_s24 + $0xa0] sm:$0xff] %vm855_vm8, %v800_v41 }
 0x13e   : > { %v816_v43 = vpop.permute.xlu0 %815  ;;  %v1129_v44 = vpop.permute.xlu2 %1128 }
 0x13f   : > { %884 = vst.msk [vmem:[%s1996_s24 + $0xe0] sm:$0xff] %vm855_vm8, %v816_v43  ;;  %v806_v45 = vpop.permute.xlu1 %805  ;;  %v1260_v43 = vld [vmem:[%s2460_s13 + $0x38] sm:$0xff] }
 0x140   : > { %1223 = vst.msk [vmem:[%s1996_s24 + $0x10] sm:$0xff] %vm1220_vm10, %v1129_v44  ;;  %v1259_v44 = vld [vmem:[%s2460_s13 + $0x30] sm:$0xff] }
 0x141   : > { %879 = vst.msk [vmem:[%s1996_s24 + $0xb8] sm:$0xff] %vm855_vm8, %v806_v45 }
 0x146   : > { %v822_v24 = vpop.permute.xlu0 %821  ;;  %v1135_v47 = vpop.permute.xlu2 %1134 }
 0x147   : > { %887 = vst.msk [vmem:[%s1996_s24 + $0xf8] sm:$0xff] %vm855_vm8, %v822_v24  ;;  %v812_v26 = vpop.permute.xlu1 %811 }
 0x148   : > { %1226 = vst.msk [vmem:[%s1996_s24 + $0x28] sm:$0xff] %vm1220_vm10, %v1135_v47 }
 0x149   : > { %882 = vst.msk [vmem:[%s1996_s24 + $0xd0] sm:$0xff] %vm855_vm8, %v812_v26 }
 0x14e   : > { %v1125_v27 = vpop.permute.xlu0 %1124  ;;  %v1141_v48 = vpop.permute.xlu2 %1140 }
 0x14f   : > { %1221 = vst.msk [vmem:[%s1996_s24] sm:$0xff] %vm1220_vm10, %v1125_v27  ;;  %v818_v49 = vpop.permute.xlu1 %817 }
 0x150   : > { %1229 = vst.msk [vmem:[%s1996_s24 + $0x40] sm:$0xff] %vm1220_vm10, %v1141_v48 }
 0x151   : > { %885 = vst.msk [vmem:[%s1996_s24 + $0xe8] sm:$0xff] %vm855_vm8, %v818_v49 }
 0x156   : > { %v1131_v50 = vpop.permute.xlu0 %1130  ;;  %v1147_v51 = vpop.permute.xlu2 %1146 }
 0x157   : > { %1224 = vst.msk [vmem:[%s1996_s24 + $0x18] sm:$0xff] %vm1220_vm10, %v1131_v50  ;;  %v1127_v52 = vpop.permute.xlu1 %1126 }
 0x158   : > { %1232 = vst.msk [vmem:[%s1996_s24 + $0x58] sm:$0xff] %vm1220_vm10, %v1147_v51 }
 0x159   : > { %1222 = vst.msk [vmem:[%s1996_s24 + $0x8] sm:$0xff] %vm1220_vm10, %v1127_v52 }
 0x15e   : > { %v1137_v54 = vpop.permute.xlu0 %1136  ;;  %v1153_v55 = vpop.permute.xlu2 %1152 }
 0x15f   : > { %1227 = vst.msk [vmem:[%s1996_s24 + $0x30] sm:$0xff] %vm1220_vm10, %v1137_v54  ;;  %v1133_v56 = vpop.permute.xlu1 %1132 }
 0x160   : > { %1235 = vst.msk [vmem:[%s1996_s24 + $0x70] sm:$0xff] %vm1220_vm10, %v1153_v55 }
 0x161   : > { %1225 = vst.msk [vmem:[%s1996_s24 + $0x20] sm:$0xff] %vm1220_vm10, %v1133_v56  ;;  %v1264_v56 = vld [vmem:[%s2460_s13 + $0x58] sm:$0xff] }
 0x166   : > { %v1143_v57 = vpop.permute.xlu0 %1142  ;;  %v1159_v58 = vpop.permute.xlu2 %1158 }
 0x167   : > { %1230 = vst.msk [vmem:[%s1996_s24 + $0x48] sm:$0xff] %vm1220_vm10, %v1143_v57  ;;  %v1139_v59 = vpop.permute.xlu1 %1138  ;;  %v1263_v57 = vld [vmem:[%s2460_s13 + $0x50] sm:$0xff] }
 0x168   : > { %1238 = vst.msk [vmem:[%s1996_s24 + $0x88] sm:$0xff] %vm1220_vm10, %v1159_v58  ;;  %v1262_v58 = vld [vmem:[%s2460_s13 + $0x48] sm:$0xff] }
 0x169   : > { %1228 = vst.msk [vmem:[%s1996_s24 + $0x38] sm:$0xff] %vm1220_vm10, %v1139_v59 }
 0x16e   : > { %v1149_v60 = vpop.permute.xlu0 %1148  ;;  %v1165_v61 = vpop.permute.xlu2 %1164 }
 0x16f   : > { %1233 = vst.msk [vmem:[%s1996_s24 + $0x60] sm:$0xff] %vm1220_vm10, %v1149_v60  ;;  %v1145_v62 = vpop.permute.xlu1 %1144 }
 0x170   : > { %1241 = vst.msk [vmem:[%s1996_s24 + $0xa0] sm:$0xff] %vm1220_vm10, %v1165_v61 }
 0x171   : > { %1231 = vst.msk [vmem:[%s1996_s24 + $0x50] sm:$0xff] %vm1220_vm10, %v1145_v62 }
 0x176   : > { %v1155_v63 = vpop.permute.xlu0 %1154  ;;  %v1171_v0 = vpop.permute.xlu2 %1170 }
 0x177   : > { %1236 = vst.msk [vmem:[%s1996_s24 + $0x78] sm:$0xff] %vm1220_vm10, %v1155_v63  ;;  %v1151_v28 = vpop.permute.xlu1 %1150 }
 0x178   : > { %1244 = vst.msk [vmem:[%s1996_s24 + $0xb8] sm:$0xff] %vm1220_vm10, %v1171_v0 }
 0x179   : > { %1234 = vst.msk [vmem:[%s1996_s24 + $0x68] sm:$0xff] %vm1220_vm10, %v1151_v28 }
 0x17e   : > { %v1161_v1 = vpop.permute.xlu0 %1160  ;;  %v1177_v2 = vpop.permute.xlu2 %1176 }
 0x17f   : > { %1239 = vst.msk [vmem:[%s1996_s24 + $0x90] sm:$0xff] %vm1220_vm10, %v1161_v1  ;;  %v1157_v3 = vpop.permute.xlu1 %1156 }
 0x180   : > { %1247 = vst.msk [vmem:[%s1996_s24 + $0xd0] sm:$0xff] %vm1220_vm10, %v1177_v2 }
 0x181   : > { %1237 = vst.msk [vmem:[%s1996_s24 + $0x80] sm:$0xff] %vm1220_vm10, %v1157_v3 }
 0x186   : > { %v1167_v5 = vpop.permute.xlu0 %1166  ;;  %v1183_v6 = vpop.permute.xlu2 %1182 }
 0x187   : > { %1242 = vst.msk [vmem:[%s1996_s24 + $0xa8] sm:$0xff] %vm1220_vm10, %v1167_v5  ;;  %v1163_v7 = vpop.permute.xlu1 %1162 }
 0x188   : > { %1250 = vst.msk [vmem:[%s1996_s24 + $0xe8] sm:$0xff] %vm1220_vm10, %v1183_v6 }
 0x189   : > { %1240 = vst.msk [vmem:[%s1996_s24 + $0x98] sm:$0xff] %vm1220_vm10, %v1163_v7  ;;  %v1267_v7 = vld [vmem:[%s2460_s13 + $0x70] sm:$0xff] }
 0x18e   : > { %v1173_v8 = vpop.permute.xlu0 %1172  ;;  %v2466_v46 = vpop.permute.xlu2 %1288 }
 0x18f   : > { %1245 = vst.msk [vmem:[%s1996_s24 + $0xc0] sm:$0xff] %vm1220_vm10, %v1173_v8  ;;  %v1169_v25 = vpop.permute.xlu1 %1168  ;;  %v1293_v15 = vmul.f32 %v2466_v46, %v1255_v12  ;;  %v1292_v16 = vmul.f32 %v2466_v46, %v1254_v13  ;;  %v1291_v17 = vmul.f32 %v2466_v46, %v1253_v14  ;;  %v1296_v19 = vmul.f32 %v2466_v46, %v1258_v18  ;;  %v1266_v8 = vld [vmem:[%s2460_s13 + $0x68] sm:$0xff] }
 0x190   : > { %1243 = vst.msk [vmem:[%s1996_s24 + $0xb0] sm:$0xff] %vm1220_vm10, %v1169_v25  ;;  %v1295_v32 = vmul.f32 %v2466_v46, %v1257_v21  ;;  %v1294_v33 = vmul.f32 %v2466_v46, %v1256_v22  ;;  %v1299_v47 = vmul.f32 %v2466_v46, %v1261_v42  ;;  %v1298_v26 = vmul.f32 %v2466_v46, %v1260_v43  ;;  %v1265_v25 = vld [vmem:[%s2460_s13 + $0x60] sm:$0xff]  ;;  %v1270_v22 = vld [vmem:[%s2460_s13 + $0x88] sm:$0xff]  ;;  %v1271_v42 = vld [vmem:[%s2460_s13 + $0x90] sm:$0xff] }
 0x191   : > { %v1297_v48 = vmul.f32 %v2466_v46, %v1259_v44  ;;  %v1302_v61 = vmul.f32 %v2466_v46, %v1264_v56  ;;  %v1301_v62 = vmul.f32 %v2466_v46, %v1263_v57  ;;  %v1300_v0 = vmul.f32 %v2466_v46, %v1262_v58  ;;  %v1274_v56 = vld [vmem:[%s2460_s13 + $0xa8] sm:$0xff] }
 0x192   : > { %v1303_v13 = vmul.f32 %v2466_v46, %v1265_v25 }
 0x196   : > { %v1179_v29 = vpop.permute.xlu0 %1178 }
 0x197   : > { %1248 = vst.msk [vmem:[%s1996_s24 + $0xd8] sm:$0xff] %vm1220_vm10, %v1179_v29  ;;  %v1175_v9 = vpop.permute.xlu1 %1174 }
 0x198   : > { %1246 = vst.msk [vmem:[%s1996_s24 + $0xc8] sm:$0xff] %vm1220_vm10, %v1175_v9 }
 0x19e   : > { %v1185_v10 = vpop.permute.xlu0 %1184 }
 0x19f   : > { %1251 = vst.msk [vmem:[%s1996_s24 + $0xf0] sm:$0xff] %vm1220_vm10, %v1185_v10  ;;  %v1181_v11 = vpop.permute.xlu1 %1180  ;;  %v1305_v10 = vmul.f32 %v2466_v46, %v1267_v7  ;;  %v1277_v7 = vld [vmem:[%s2460_s13 + $0xc0] sm:$0xff] }
 0x1a0   : > { %1249 = vst.msk [vmem:[%s1996_s24 + $0xe0] sm:$0xff] %vm1220_vm10, %v1181_v11  ;;  %v1304_v11 = vmul.f32 %v2466_v46, %v1266_v8 }
 0x1a6   : > { %v2477_v53 = vpop.permute.xlu0 %1326 }
 0x1a7   : > { %v1187_v20 = vpop.permute.xlu1 %1186  ;;  %v1331_v4 = vadd.f32 %v2477_v53, %v1293_v15  ;;  %v1330_v30 = vadd.f32 %v2477_v53, %v1292_v16  ;;  %v1329_v31 = vadd.f32 %v2477_v53, %v1291_v17  ;;  %v1334_v39 = vadd.f32 %v2477_v53, %v1296_v19  ;;  %v1269_v19 = vld [vmem:[%s2460_s13 + $0x80] sm:$0xff] }
 0x1a8   : > { %1252 = vst.msk [vmem:[%s1996_s24 + $0xf8] sm:$0xff] %vm1220_vm10, %v1187_v20  ;;  %v1333_v23 = vadd.f32 %v2477_v53, %v1295_v32  ;;  %v1332_v41 = vadd.f32 %v2477_v53, %v1294_v33  ;;  %v1337_v51 = vadd.f32 %v2477_v53, %v1299_v47  ;;  %v1336_v52 = vadd.f32 %v2477_v53, %v1298_v26  ;;  %v1268_v20 = vld [vmem:[%s2460_s13 + $0x78] sm:$0xff] }
 0x1a9   : > { %vm1363_vm11 = vcmp.gt.f32.partialorder %v1331_v4, 0.0  ;;  %v1395_v34 = vmul.f32 0.01, %v1331_v4  ;;  %vm1362_vm8 = vcmp.gt.f32.partialorder %v1330_v30, 0.0  ;;  %v1394_v35 = vmul.f32 0.01, %v1330_v30 }
 0x1aa   : > { %vm1361_vm12 = vcmp.gt.f32.partialorder %v1329_v31, 0.0  ;;  %v1393_v36 = vmul.f32 0.01, %v1329_v31  ;;  %v1398_v45 = vmul.f32 0.01, %v1334_v39  ;;  %vm1366_vm13 = vcmp.gt.f32.partialorder %v1334_v39, 0.0 }
 0x1ab   : > { %v1427_v37 = vsel %vm1363_vm11, %v1331_v4, %v1395_v34  ;;  %v1426_v38 = vsel %vm1362_vm8, %v1330_v30, %v1394_v35  ;;  %v1397_v24 = vmul.f32 0.01, %v1333_v23  ;;  %vm1365_vm14 = vcmp.gt.f32.partialorder %v1333_v23, 0.0 }
 0x1ac   : > { %1493 = vrot.lane.b32.xlu0 %v1427_v37, %s1764_s6  ;;  %1491 = vrot.lane.b32.xlu2 %v1426_v38, %s1764_s6  ;;  %v1425_v40 = vsel %vm1361_vm12, %v1329_v31, %v1393_v36  ;;  %v1396_v27 = vmul.f32 0.01, %v1332_v41  ;;  %vm1364_vm15 = vcmp.gt.f32.partialorder %v1332_v41, 0.0  ;;  %v1430_v49 = vsel %vm1366_vm13, %v1334_v39, %v1398_v45 }
 0x1ad   : > { %1489 = vrot.lane.b32.xlu1 %v1425_v40, %s1764_s6  ;;  %v1429_v50 = vsel %vm1365_vm14, %v1333_v23, %v1397_v24  ;;  %v1335_v55 = vadd.f32 %v2477_v53, %v1297_v48  ;;  %v1401_v59 = vmul.f32 0.01, %v1337_v51  ;;  %v1400_v60 = vmul.f32 0.01, %v1336_v52  ;;  %v1273_v40 = vld [vmem:[%s2460_s13 + $0xa0] sm:$0xff] }
 0x1ae   : > { %v1428_v54 = vsel %vm1364_vm15, %v1332_v41, %v1396_v27  ;;  %vm1369_vm0 = vcmp.gt.f32.partialorder %v1337_v51, 0.0  ;;  %vm1368_vm1 = vcmp.gt.f32.partialorder %v1336_v52, 0.0  ;;  %v1340_v2 = vadd.f32 %v2477_v53, %v1302_v61  ;;  %v1272_v41 = vld [vmem:[%s2460_s13 + $0x98] sm:$0xff] }
 0x1af   : > { %v1399_v63 = vmul.f32 0.01, %v1335_v55  ;;  %vm1367_vm2 = vcmp.gt.f32.partialorder %v1335_v55, 0.0  ;;  %v1433_v28 = vsel %vm1369_vm0, %v1337_v51, %v1401_v59  ;;  %v1432_v1 = vsel %vm1368_vm1, %v1336_v52, %v1400_v60 }
 0x1b0   : > { %v1339_v3 = vadd.f32 %v2477_v53, %v1301_v62  ;;  %v1338_v6 = vadd.f32 %v2477_v53, %v1300_v0  ;;  %v1404_v29 = vmul.f32 0.01, %v1340_v2  ;;  %vm1372_vm3 = vcmp.gt.f32.partialorder %v1340_v2, 0.0 }
 0x1b1   : > { %v1431_v5 = vsel %vm1367_vm2, %v1335_v55, %v1399_v63  ;;  %v1343_v16 = vadd.f32 %v2477_v53, %v1305_v10  ;;  %v1342_v17 = vadd.f32 %v2477_v53, %v1304_v11  ;;  %v1341_v21 = vadd.f32 %v2477_v53, %v1303_v13  ;;  %v1275_v55 = vld [vmem:[%s2460_s13 + $0xb0] sm:$0xff] }
 0x1b2   : > { %v1403_v9 = vmul.f32 0.01, %v1339_v3  ;;  %vm1371_vm4 = vcmp.gt.f32.partialorder %v1339_v3, 0.0  ;;  %v1402_v12 = vmul.f32 0.01, %v1338_v6  ;;  %vm1370_vm5 = vcmp.gt.f32.partialorder %v1338_v6, 0.0 }
 0x1b3   : > { %v1436_v14 = vsel %vm1372_vm3, %v1340_v2, %v1404_v29  ;;  %v1407_v4 = vmul.f32 0.01, %v1343_v16  ;;  %v1406_v30 = vmul.f32 0.01, %v1342_v17  ;;  %v1308_v31 = vmul.f32 %v2466_v46, %v1270_v22  ;;  %v1280_v22 = vld [vmem:[%s2460_s13 + $0xd8] sm:$0xff] }
 0x1b4   : > { %1499 = vrot.lane.b32.xlu0 %v1430_v49, %s1764_s6  ;;  %1497 = vrot.lane.b32.xlu2 %v1429_v50, %s1764_s6  ;;  %v1435_v15 = vsel %vm1371_vm4, %v1339_v3, %v1403_v9  ;;  %v1434_v18 = vsel %vm1370_vm5, %v1338_v6, %v1402_v12  ;;  %v1307_v32 = vmul.f32 %v2466_v46, %v1269_v19  ;;  %vm1375_vm6 = vcmp.gt.f32.partialorder %v1343_v16, 0.0  ;;  %v1278_v6 = vld [vmem:[%s2460_s13 + $0xc8] sm:$0xff] }
 0x1b5   : > { %1495 = vrot.lane.b32.xlu1 %v1428_v54, %s1764_s6  ;;  %vm1374_vm7 = vcmp.gt.f32.partialorder %v1342_v17, 0.0  ;;  %v1405_v33 = vmul.f32 0.01, %v1341_v21  ;;  %v1306_v34 = vmul.f32 %v2466_v46, %v1268_v20  ;;  %vm1373_vm9 = vcmp.gt.f32.partialorder %v1341_v21, 0.0  ;;  %v1276_v54 = vld [vmem:[%s2460_s13 + $0xb8] sm:$0xff] }
 0x1b6   : > { %v1439_v35 = vsel %vm1375_vm6, %v1343_v16, %v1407_v4  ;;  %v1438_v36 = vsel %vm1374_vm7, %v1342_v17, %v1406_v30  ;;  %v1346_v37 = vadd.f32 %v2477_v53, %v1308_v31  ;;  %v1345_v38 = vadd.f32 %v2477_v53, %v1307_v32 }
 0x1b7   : > { %v1437_v39 = vsel %vm1373_vm9, %v1341_v21, %v1405_v33  ;;  %v1344_v23 = vadd.f32 %v2477_v53, %v1306_v34  ;;  %v1311_v45 = vmul.f32 %v2466_v46, %v1273_v40  ;;  %v1310_v24 = vmul.f32 %v2466_v46, %v1272_v41  ;;  %v1281_v21 = vld [vmem:[%s2460_s13 + $0xe0] sm:$0xff] }
 0x1b8   : > { %v1410_v43 = vmul.f32 0.01, %v1346_v37  ;;  %v1409_v44 = vmul.f32 0.01, %v1345_v38  ;;  %vm1378_vm10 = vcmp.gt.f32.partialorder %v1346_v37, 0.0  ;;  %vm1377_vm11 = vcmp.gt.f32.partialorder %v1345_v38, 0.0 }
 0x1b9   : > { %v1408_v47 = vmul.f32 0.01, %v1344_v23  ;;  %v1309_v26 = vmul.f32 %v2466_v46, %v1271_v42  ;;  %vm1376_vm8 = vcmp.gt.f32.partialorder %v1344_v23, 0.0  ;;  %v1349_v49 = vadd.f32 %v2477_v53, %v1311_v45 }
 0x1ba   : > { %v1442_v27 = vsel %vm1378_vm10, %v1346_v37, %v1410_v43  ;;  %v1441_v48 = vsel %vm1377_vm11, %v1345_v38, %v1409_v44  ;;  %v1348_v50 = vadd.f32 %v2477_v53, %v1310_v24  ;;  %v1314_v59 = vmul.f32 %v2466_v46, %v1276_v54 }
 0x1bb   : > { %v1440_v51 = vsel %vm1376_vm8, %v1344_v23, %v1408_v47  ;;  %v1347_v52 = vadd.f32 %v2477_v53, %v1309_v26  ;;  %v1413_v57 = vmul.f32 0.01, %v1349_v49  ;;  %v1313_v60 = vmul.f32 %v2466_v46, %v1275_v55  ;;  %v1283_v23 = vld [vmem:[%s2460_s13 + $0xf0] sm:$0xff] }
 0x1bc   : > { %1505 = vrot.lane.b32.xlu0 %v1433_v28, %s1764_s6  ;;  %1503 = vrot.lane.b32.xlu2 %v1432_v1, %s1764_s6  ;;  %v1412_v58 = vmul.f32 0.01, %v1348_v50  ;;  %vm1381_vm12 = vcmp.gt.f32.partialorder %v1349_v49, 0.0  ;;  %vm1380_vm13 = vcmp.gt.f32.partialorder %v1348_v50, 0.0  ;;  %v1312_v62 = vmul.f32 %v2466_v46, %v1274_v56 }
 0x1bd   : > { %1501 = vrot.lane.b32.xlu1 %v1431_v5, %s1764_s6  ;;  %v1411_v61 = vmul.f32 0.01, %v1347_v52  ;;  %vm1379_vm14 = vcmp.gt.f32.partialorder %v1347_v52, 0.0  ;;  %v1445_v63 = vsel %vm1381_vm12, %v1349_v49, %v1413_v57  ;;  %v1352_v28 = vadd.f32 %v2477_v53, %v1314_v59  ;;  %v1279_v5 = vld [vmem:[%s2460_s13 + $0xd0] sm:$0xff] }
 0x1be   : > { %v1444_v0 = vsel %vm1380_vm13, %v1348_v50, %v1412_v58  ;;  %v1351_v1 = vadd.f32 %v2477_v53, %v1313_v60  ;;  %v1350_v3 = vadd.f32 %v2477_v53, %v1312_v62  ;;  %v1317_v29 = vmul.f32 %v2466_v46, %v1279_v5 }
 0x1bf   : > { %v1443_v2 = vsel %vm1379_vm14, %v1347_v52, %v1411_v61  ;;  %v1416_v8 = vmul.f32 0.01, %v1352_v28  ;;  %v1316_v9 = vmul.f32 %v2466_v46, %v1278_v6  ;;  %vm1384_vm15 = vcmp.gt.f32.partialorder %v1352_v28, 0.0 }
 0x1c0   : > { %v1415_v25 = vmul.f32 0.01, %v1351_v1  ;;  %vm1383_vm0 = vcmp.gt.f32.partialorder %v1351_v1, 0.0  ;;  %v1414_v10 = vmul.f32 0.01, %v1350_v3  ;;  %v1315_v11 = vmul.f32 %v2466_v46, %v1277_v7 }
 0x1c1   : > { %vm1382_vm1 = vcmp.gt.f32.partialorder %v1350_v3, 0.0  ;;  %v1448_v12 = vsel %vm1384_vm15, %v1352_v28, %v1416_v8  ;;  %v1319_v30 = vmul.f32 %v2466_v46, %v1281_v21  ;;  %v1318_v32 = vmul.f32 %v2466_v46, %v1280_v22 }
 0x1c2   : > { %v1447_v13 = vsel %vm1383_vm0, %v1351_v1, %v1415_v25  ;;  %v1446_v16 = vsel %vm1382_vm1, %v1350_v3, %v1414_v10  ;;  %v1353_v17 = vadd.f32 %v2477_v53, %v1315_v11  ;;  %v1321_v44 = vmul.f32 %v2466_v46, %v1283_v23 }
 0x1c3   : > { %v1356_v38 = vadd.f32 %v2477_v53, %v1318_v32  ;;  %vm1585_vm11 = vcmask 523648  }
 0x1c4   : > { %1511 = vrot.lane.b32.xlu0 %v1436_v14, %s1764_s6  ;;  %1509 = vrot.lane.b32.xlu2 %v1435_v15, %s1764_s6  ;;  %v1355_v14 = vadd.f32 %v2477_v53, %v1317_v29  ;;  %v1354_v15 = vadd.f32 %v2477_v53, %v1316_v9  ;;  %v1417_v31 = vmul.f32 0.01, %v1353_v17  ;;  %vm1385_vm4 = vcmp.gt.f32.partialorder %v1353_v17, 0.0 }
 0x1c5   : > { %1507 = vrot.lane.b32.xlu1 %v1434_v18, %s1764_s6  ;;  %v1282_v18 = vld [vmem:[%s2460_s13 + $0xe8] sm:$0xff]  ;;  %v1420_v43 = vmul.f32 0.01, %v1356_v38  ;;  %vm1388_vm7 = vcmp.gt.f32.partialorder %v1356_v38, 0.0 }
 0x1c6   : > { %v1419_v19 = vmul.f32 0.01, %v1355_v14  ;;  %v1418_v20 = vmul.f32 0.01, %v1354_v15  ;;  %v1320_v4 = vmul.f32 %v2466_v46, %v1282_v18  ;;  %vm1387_vm2 = vcmp.gt.f32.partialorder %v1355_v14, 0.0 }
 0x1c7   : > { %vm1386_vm3 = vcmp.gt.f32.partialorder %v1354_v15, 0.0  ;;  %v1449_v37 = vsel %vm1385_vm4, %v1353_v17, %v1417_v31  ;;  %v1452_v26 = vsel %vm1388_vm7, %v1356_v38, %v1420_v43 }
 0x1c8   : > { %v1451_v33 = vsel %vm1387_vm2, %v1355_v14, %v1419_v19  ;;  %v1450_v34 = vsel %vm1386_vm3, %v1354_v15, %v1418_v20 }
 0x1cc   : > { %1517 = vrot.lane.b32.xlu0 %v1439_v35, %s1764_s6  ;;  %1515 = vrot.lane.b32.xlu2 %v1438_v36, %s1764_s6  ;;  %v1358_v35 = vadd.f32 %v2477_v53, %v1320_v4  ;;  %v1357_v36 = vadd.f32 %v2477_v53, %v1319_v30 }
 0x1cd   : > { %1513 = vrot.lane.b32.xlu1 %v1437_v39, %s1764_s6  ;;  %v1284_v39 = vld [vmem:[%s2460_s13 + $0xf8] sm:$0xff] }
 0x1ce   : > { %v1422_v40 = vmul.f32 0.01, %v1358_v35  ;;  %v1421_v41 = vmul.f32 0.01, %v1357_v36  ;;  %v1322_v42 = vmul.f32 %v2466_v46, %v1284_v39  ;;  %vm1390_vm5 = vcmp.gt.f32.partialorder %v1358_v35, 0.0 }
 0x1cf   : > { %vm1389_vm6 = vcmp.gt.f32.partialorder %v1357_v36, 0.0 }
 0x1d0   : > { %v1454_v45 = vsel %vm1390_vm5, %v1358_v35, %v1422_v40  ;;  %v1453_v24 = vsel %vm1389_vm6, %v1357_v36, %v1421_v41  ;;  %v1360_v47 = vadd.f32 %v2477_v53, %v1322_v42 }
 0x1d2   : > { %vm1392_vm9 = vcmp.gt.f32.partialorder %v1360_v47, 0.0 }
 0x1d4   : > { %1523 = vrot.lane.b32.xlu0 %v1442_v27, %s1764_s6  ;;  %1521 = vrot.lane.b32.xlu2 %v1441_v48, %s1764_s6  ;;  %v1359_v27 = vadd.f32 %v2477_v53, %v1321_v44  ;;  %v1424_v48 = vmul.f32 0.01, %v1360_v47 }
 0x1d5   : > { %1519 = vrot.lane.b32.xlu1 %v1440_v51, %s1764_s6 }
 0x1d6   : > { %v1423_v46 = vmul.f32 0.01, %v1359_v27  ;;  %vm1391_vm10 = vcmp.gt.f32.partialorder %v1359_v27, 0.0  ;;  %v1456_v49 = vsel %vm1392_vm9, %v1360_v47, %v1424_v48 }
 0x1d8   : > { %v1455_v50 = vsel %vm1391_vm10, %v1359_v27, %v1423_v46 }
 0x1dc   : > { %1529 = vrot.lane.b32.xlu0 %v1445_v63, %s1764_s6  ;;  %1527 = vrot.lane.b32.xlu2 %v1444_v0, %s1764_s6 }
 0x1dd   : > { %1525 = vrot.lane.b32.xlu1 %v1443_v2, %s1764_s6 }
 0x1e4   : > { %1535 = vrot.lane.b32.xlu0 %v1448_v12, %s1764_s6  ;;  %1533 = vrot.lane.b32.xlu2 %v1447_v13, %s1764_s6 }
 0x1e5   : > { %1531 = vrot.lane.b32.xlu1 %v1446_v16, %s1764_s6 }
 0x1ec   : > { %1541 = vrot.lane.b32.xlu0 %v1451_v33, %s1764_s6  ;;  %1539 = vrot.lane.b32.xlu2 %v1450_v34, %s1764_s6 }
 0x1ed   : > { %1537 = vrot.lane.b32.xlu1 %v1449_v37, %s1764_s6 }
 0x1f4   : > { %1547 = vrot.lane.b32.xlu0 %v1454_v45, %s1764_s6  ;;  %1545 = vrot.lane.b32.xlu2 %v1453_v24, %s1764_s6 }
 0x1f5   : > { %1543 = vrot.lane.b32.xlu1 %v1452_v26, %s1764_s6 }
 0x1fc   : > { %1551 = vrot.lane.b32.xlu2 %v1456_v49, %s1764_s6 }
 0x1fd   : > { %1549 = vrot.lane.b32.xlu1 %v1455_v50, %s1764_s6 }
 0x206   : > { %v1492_v51 = vpop.permute.xlu2 %1491 }
 0x207   : > { %1587 = vst.msk [vmem:[%s1996_s24 + $0x8] sm:$0xff] %vm1585_vm11, %v1492_v51 }
 0x20e   : > { %v1498_v53 = vpop.permute.xlu2 %1497 }
 0x20f   : > { %1590 = vst.msk [vmem:[%s1996_s24 + $0x20] sm:$0xff] %vm1585_vm11, %v1498_v53 }
 0x216   : > { %v1504_v52 = vpop.permute.xlu2 %1503 }
 0x217   : > { %1593 = vst.msk [vmem:[%s1996_s24 + $0x38] sm:$0xff] %vm1585_vm11, %v1504_v52 }
 0x21e   : > { %v1494_v54 = vpop.permute.xlu0 %1493  ;;  %v1510_v55 = vpop.permute.xlu2 %1509 }
 0x21f   : > { %1588 = vst.msk [vmem:[%s1996_s24 + $0x10] sm:$0xff] %vm1585_vm11, %v1494_v54  ;;  %v1490_v56 = vpop.permute.xlu1 %1489 }
 0x220   : > { %1596 = vst.msk [vmem:[%s1996_s24 + $0x50] sm:$0xff] %vm1585_vm11, %v1510_v55 }
 0x221   : > { %1586 = vst.msk [vmem:[%s1996_s24] sm:$0xff] %vm1585_vm11, %v1490_v56 }
 0x226   : > { %v1500_v57 = vpop.permute.xlu0 %1499  ;;  %v1516_v58 = vpop.permute.xlu2 %1515 }
 0x227   : > { %1591 = vst.msk [vmem:[%s1996_s24 + $0x28] sm:$0xff] %vm1585_vm11, %v1500_v57  ;;  %v1496_v59 = vpop.permute.xlu1 %1495 }
 0x228   : > { %1599 = vst.msk [vmem:[%s1996_s24 + $0x68] sm:$0xff] %vm1585_vm11, %v1516_v58 }
 0x229   : > { %1589 = vst.msk [vmem:[%s1996_s24 + $0x18] sm:$0xff] %vm1585_vm11, %v1496_v59 }
 0x22e   : > { %v1506_v60 = vpop.permute.xlu0 %1505  ;;  %v1522_v61 = vpop.permute.xlu2 %1521 }
 0x22f   : > { %1594 = vst.msk [vmem:[%s1996_s24 + $0x40] sm:$0xff] %vm1585_vm11, %v1506_v60  ;;  %v1502_v62 = vpop.permute.xlu1 %1501 }
 0x230   : > { %1602 = vst.msk [vmem:[%s1996_s24 + $0x80] sm:$0xff] %vm1585_vm11, %v1522_v61 }
 0x231   : > { %1592 = vst.msk [vmem:[%s1996_s24 + $0x30] sm:$0xff] %vm1585_vm11, %v1502_v62 }
 0x236   : > { %v1512_v63 = vpop.permute.xlu0 %1511  ;;  %v1528_v0 = vpop.permute.xlu2 %1527 }
 0x237   : > { %1597 = vst.msk [vmem:[%s1996_s24 + $0x58] sm:$0xff] %vm1585_vm11, %v1512_v63  ;;  %v1508_v28 = vpop.permute.xlu1 %1507 }
 0x238   : > { %1605 = vst.msk [vmem:[%s1996_s24 + $0x98] sm:$0xff] %vm1585_vm11, %v1528_v0 }
 0x239   : > { %1595 = vst.msk [vmem:[%s1996_s24 + $0x48] sm:$0xff] %vm1585_vm11, %v1508_v28 }
 0x23e   : > { %v1518_v1 = vpop.permute.xlu0 %1517  ;;  %v1534_v2 = vpop.permute.xlu2 %1533 }
 0x23f   : > { %1600 = vst.msk [vmem:[%s1996_s24 + $0x70] sm:$0xff] %vm1585_vm11, %v1518_v1  ;;  %v1514_v3 = vpop.permute.xlu1 %1513 }
 0x240   : > { %1608 = vst.msk [vmem:[%s1996_s24 + $0xb0] sm:$0xff] %vm1585_vm11, %v1534_v2 }
 0x241   : > { %1598 = vst.msk [vmem:[%s1996_s24 + $0x60] sm:$0xff] %vm1585_vm11, %v1514_v3 }
 0x246   : > { %v1524_v5 = vpop.permute.xlu0 %1523  ;;  %v1540_v6 = vpop.permute.xlu2 %1539 }
 0x247   : > { %1603 = vst.msk [vmem:[%s1996_s24 + $0x88] sm:$0xff] %vm1585_vm11, %v1524_v5  ;;  %v1520_v7 = vpop.permute.xlu1 %1519 }
 0x248   : > { %1611 = vst.msk [vmem:[%s1996_s24 + $0xc8] sm:$0xff] %vm1585_vm11, %v1540_v6 }
 0x249   : > { %1601 = vst.msk [vmem:[%s1996_s24 + $0x78] sm:$0xff] %vm1585_vm11, %v1520_v7 }
 0x24e   : > { %v1530_v8 = vpop.permute.xlu0 %1529  ;;  %v1546_v25 = vpop.permute.xlu2 %1545 }
 0x24f   : > { %1606 = vst.msk [vmem:[%s1996_s24 + $0xa0] sm:$0xff] %vm1585_vm11, %v1530_v8  ;;  %v1526_v29 = vpop.permute.xlu1 %1525 }
 0x250   : > { %1614 = vst.msk [vmem:[%s1996_s24 + $0xe0] sm:$0xff] %vm1585_vm11, %v1546_v25 }
 0x251   : > { %1604 = vst.msk [vmem:[%s1996_s24 + $0x90] sm:$0xff] %vm1585_vm11, %v1526_v29 }
 0x256   : > { %v1536_v9 = vpop.permute.xlu0 %1535  ;;  %v1552_v10 = vpop.permute.xlu2 %1551 }
 0x257   : > { %1609 = vst.msk [vmem:[%s1996_s24 + $0xb8] sm:$0xff] %vm1585_vm11, %v1536_v9  ;;  %v1532_v11 = vpop.permute.xlu1 %1531 }
 0x258   : > { %1617 = vst.msk [vmem:[%s1996_s24 + $0xf8] sm:$0xff] %vm1585_vm11, %v1552_v10 }
 0x259   : > { %1607 = vst.msk [vmem:[%s1996_s24 + $0xa8] sm:$0xff] %vm1585_vm11, %v1532_v11 }
 0x25e   : > { %v1542_v12 = vpop.permute.xlu0 %1541 }
 0x25f   : > { %1612 = vst.msk [vmem:[%s1996_s24 + $0xd0] sm:$0xff] %vm1585_vm11, %v1542_v12  ;;  %v1538_v13 = vpop.permute.xlu1 %1537 }
 0x260   : > { %1610 = vst.msk [vmem:[%s1996_s24 + $0xc0] sm:$0xff] %vm1585_vm11, %v1538_v13 }
 0x266   : > { %v1548_v14 = vpop.permute.xlu0 %1547 }
 0x267   : > { %1615 = vst.msk [vmem:[%s1996_s24 + $0xe8] sm:$0xff] %vm1585_vm11, %v1548_v14  ;;  %v1544_v15 = vpop.permute.xlu1 %1543 }
 0x268   : > { %1613 = vst.msk [vmem:[%s1996_s24 + $0xd8] sm:$0xff] %vm1585_vm11, %v1544_v15 }
 0x26f   : > { %v1550_v16 = vpop.permute.xlu1 %1549 }
 0x270   : > { %1616 = vst.msk [vmem:[%s1996_s24 + $0xf0] sm:$0xff] %vm1585_vm11, %v1550_v16 }
 0x271 PF: > { %s15_s18 = sadd.s32 1, %s1757_s18  }
 0x272   : > { %p12_p4 = scmp.ge.s32.totalorder %s15_s18, 4  }
 0x274   :  { %14 = sbr.rel (!%p12_p4) target bundleno = 1 (0x1), region = 79 }

// kernel: forward.39
= control target key start
LH: loop header
LB: loop body
LE: loop exit
PB: predicated region body
PF: predicated region fallthrough
CT: control target
= control target key end

     0   :  { %s621_s12 = smov 0   ;;  %s838_s0 = inlined_call_operand.vmem [shape: f32[512,64], index: 0, kind: input, shape index: {}]   ;;  %s839_s1 = inlined_call_operand.vmem [shape: f32[64,16], index: 1, kind: input, shape index: {}]   ;;  %s840_s2 = inlined_call_operand.vmem [shape: f32[1,16], index: 2, kind: input, shape index: {}]   ;;  %s841_s3 = inlined_call_operand.vmem [shape: f32[512,16], index: 3, kind: output, shape index: {}]  }
   0x1 LB: > { %s517_s13 = sadd.s32 4294967295, %s599_s12   ;;  %p521_p0 = scmp.ge.s32.totalorder %s599_s12, 1  ;;  %s599_s12 = sphi %s621_s12, %s13_s12  }
   0x2   : > { %p138_p1 = scmp.lt.s32.totalorder %s599_s12, 3 }
   0x4   : > { %p139_p2 = pnand %p521_p0, %p138_p1 }
   0x5   : > { %s522_s18 = sshll.u32 (!%p139_p2), %s517_s13, 5 }
   0x6   : > { %142 = sbr.rel (%p139_p2) target bundleno = 219 (0xdb), region = 32  ;;  %p163_p3 = scmp.lt.s32.totalorder (!%p139_p2), %s522_s18, 63 }
   0xb   : > { %v213_v0 = vld [vmem:[%s839_s1 + $0x38] sm:$0xff]  ;;  %v212_v1 = vld [vmem:[%s839_s1 + $0x30] sm:$0xff]  ;;  %v211_v2 = vld [vmem:[%s839_s1 + $0x28] sm:$0xff]  ;;  %s843_s18 = smov (!%p163_p3, %s522_s18), 63  ;;  %vm218_vm0 = vcmask 523264   ;;  %vm428_vm1 = vcmask 130048  }
   0xc   : > { %561 = vmatpush.msra.mxu2 %v213_v0  ;;  %562 = vmatpush.msra.mxu3 %v213_v0  ;;  %v210_v3 = vld [vmem:[%s839_s1 + $0x20] sm:$0xff]  ;;  %v209_v4 = vld [vmem:[%s839_s1 + $0x18] sm:$0xff]  ;;  %s523_s25 = sshll.u32 %s843_s18, 3  ;;  %v208_v5 = vld [vmem:[%s839_s1 + $0x10] sm:$0xff] }
   0xd   : > { %323 = vmatpush.msra.mxu0 %v213_v0  ;;  %560 = vmatpush.msra.mxu1 %v213_v0  ;;  %v207_v6 = vld [vmem:[%s839_s1 + $0x8] sm:$0xff]  ;;  %s658_s5 = scalar_lea.vmem %s838_s0, %s523_s25  ;;  %v206_v7 = vld [vmem:[%s839_s1] sm:$0xff]  ;;  %s737_s13 = scalar_lea.vmem %s841_s3, %s523_s25 }
   0xe   : > { %564 = vmatpush.msra.mxu2 %v212_v1  ;;  %565 = vmatpush.msra.mxu3 %v212_v1  ;;  %v190_v8 = vld [vmem:[%s658_s5 + $0x80] sm:$0xff]  ;;  %v191_v12 = vld [vmem:[%s658_s5 + $0x88] sm:$0xff]  ;;  %v192_v16 = vld [vmem:[%s658_s5 + $0x90] sm:$0xff] }
   0xf   : > { %324 = vmatpush.msra.mxu0 %v212_v1  ;;  %563 = vmatpush.msra.mxu1 %v212_v1  ;;  %v198_v9 = vld [vmem:[%s658_s5 + $0xc0] sm:$0xff]  ;;  %v199_v13 = vld [vmem:[%s658_s5 + $0xc8] sm:$0xff]  ;;  %v200_v17 = vld [vmem:[%s658_s5 + $0xd0] sm:$0xff] }
  0x10   : > { %567 = vmatpush.msra.mxu2 %v211_v2  ;;  %568 = vmatpush.msra.mxu3 %v211_v2  ;;  %v174_v10 = vld [vmem:[%s658_s5] sm:$0xff]  ;;  %v175_v14 = vld [vmem:[%s658_s5 + $0x8] sm:$0xff]  ;;  %v176_v18 = vld [vmem:[%s658_s5 + $0x10] sm:$0xff] }
  0x11   : > { %325 = vmatpush.msra.mxu0 %v211_v2  ;;  %566 = vmatpush.msra.mxu1 %v211_v2  ;;  %v182_v11 = vld [vmem:[%s658_s5 + $0x40] sm:$0xff]  ;;  %v183_v15 = vld [vmem:[%s658_s5 + $0x48] sm:$0xff]  ;;  %v184_v19 = vld [vmem:[%s658_s5 + $0x50] sm:$0xff] }
  0x12   : > { %570 = vmatpush.msra.mxu2 %v210_v3  ;;  %571 = vmatpush.msra.mxu3 %v210_v3  ;;  %v193_v20 = vld [vmem:[%s658_s5 + $0x98] sm:$0xff]  ;;  %v194_v24 = vld [vmem:[%s658_s5 + $0xa0] sm:$0xff]  ;;  %v195_v28 = vld [vmem:[%s658_s5 + $0xa8] sm:$0xff] }
  0x13   : > { %326 = vmatpush.msra.mxu0 %v210_v3  ;;  %569 = vmatpush.msra.mxu1 %v210_v3  ;;  %v201_v21 = vld [vmem:[%s658_s5 + $0xd8] sm:$0xff]  ;;  %v202_v25 = vld [vmem:[%s658_s5 + $0xe0] sm:$0xff]  ;;  %v203_v29 = vld [vmem:[%s658_s5 + $0xe8] sm:$0xff] }
  0x14   : > { %573 = vmatpush.msra.mxu2 %v209_v4  ;;  %574 = vmatpush.msra.mxu3 %v209_v4  ;;  %v177_v22 = vld [vmem:[%s658_s5 + $0x18] sm:$0xff]  ;;  %v178_v26 = vld [vmem:[%s658_s5 + $0x20] sm:$0xff]  ;;  %v179_v30 = vld [vmem:[%s658_s5 + $0x28] sm:$0xff] }
  0x15   : > { %327 = vmatpush.msra.mxu0 %v209_v4  ;;  %572 = vmatpush.msra.mxu1 %v209_v4  ;;  %v185_v23 = vld [vmem:[%s658_s5 + $0x58] sm:$0xff]  ;;  %v186_v27 = vld [vmem:[%s658_s5 + $0x60] sm:$0xff]  ;;  %v187_v31 = vld [vmem:[%s658_s5 + $0x68] sm:$0xff] }
  0x16   : > { %576 = vmatpush.msra.mxu2 %v208_v5  ;;  %577 = vmatpush.msra.mxu3 %v208_v5  ;;  %v196_v32 = vld [vmem:[%s658_s5 + $0xb0] sm:$0xff]  ;;  %v197_v36 = vld [vmem:[%s658_s5 + $0xb8] sm:$0xff]  ;;  %v730_v40 = vld [vmem:[%s840_s2] ss:$0 sm:$0xff] }
  0x17   : > { %328 = vmatpush.msra.mxu0 %v208_v5  ;;  %575 = vmatpush.msra.mxu1 %v208_v5  ;;  %v204_v33 = vld [vmem:[%s658_s5 + $0xf0] sm:$0xff]  ;;  %v205_v37 = vld [vmem:[%s658_s5 + $0xf8] sm:$0xff] }
  0x18   : > { %579 = vmatpush.msra.mxu2 %v207_v6  ;;  %580 = vmatpush.msra.mxu3 %v207_v6  ;;  %v180_v34 = vld [vmem:[%s658_s5 + $0x30] sm:$0xff]  ;;  %v181_v38 = vld [vmem:[%s658_s5 + $0x38] sm:$0xff] }
  0x19   : > { %329 = vmatpush.msra.mxu0 %v207_v6  ;;  %578 = vmatpush.msra.mxu1 %v207_v6  ;;  %v188_v35 = vld [vmem:[%s658_s5 + $0x70] sm:$0xff]  ;;  %v189_v39 = vld [vmem:[%s658_s5 + $0x78] sm:$0xff] }
  0x1a   : > { %582 = vmatpush.msra.mxu2 %v206_v7  ;;  %583 = vmatpush.msra.mxu3 %v206_v7 }
  0x1b   : > { %542 = vmatmul.msk.f32.vlgmr.msra.gmra.mxu2 %vm218_vm0, %v190_v8  ;;  %550 = vmatmul.msk.f32.vlgmr.msra.gmra.mxu3 %vm218_vm0, %v198_v9 }
  0x1c   : > { %330 = vmatpush.msra.mxu0 %v206_v7  ;;  %581 = vmatpush.msra.mxu1 %v206_v7 }
  0x1d   : > { %526 = vmatmul.msk.f32.vlgmr.msra.gmra.mxu0 %vm218_vm0, %v174_v10  ;;  %534 = vmatmul.msk.f32.vlgmr.msra.gmra.mxu1 %vm218_vm0, %v182_v11 }
  0x23   : > { %543 = vmatmul.msk.f32.gmra.mxu2 %vm218_vm0, %v191_v12  ;;  %551 = vmatmul.msk.f32.gmra.mxu3 %vm218_vm0, %v199_v13 }
  0x25   : > { %527 = vmatmul.msk.f32.gmra.mxu0 %vm218_vm0, %v175_v14  ;;  %535 = vmatmul.msk.f32.gmra.mxu1 %vm218_vm0, %v183_v15 }
  0x2b   : > { %544 = vmatmul.msk.f32.gmra.mxu2 %vm218_vm0, %v192_v16  ;;  %552 = vmatmul.msk.f32.gmra.mxu3 %vm218_vm0, %v200_v17 }
  0x2d   : > { %528 = vmatmul.msk.f32.gmra.mxu0 %vm218_vm0, %v176_v18  ;;  %536 = vmatmul.msk.f32.gmra.mxu1 %vm218_vm0, %v184_v19 }
  0x33   : > { %545 = vmatmul.msk.f32.gmra.mxu2 %vm218_vm0, %v193_v20  ;;  %553 = vmatmul.msk.f32.gmra.mxu3 %vm218_vm0, %v201_v21 }
  0x35   : > { %529 = vmatmul.msk.f32.gmra.mxu0 %vm218_vm0, %v177_v22  ;;  %537 = vmatmul.msk.f32.gmra.mxu1 %vm218_vm0, %v185_v23 }
  0x3b   : > { %546 = vmatmul.msk.f32.gmra.mxu2 %vm218_vm0, %v194_v24  ;;  %554 = vmatmul.msk.f32.gmra.mxu3 %vm218_vm0, %v202_v25 }
  0x3d   : > { %530 = vmatmul.msk.f32.gmra.mxu0 %vm218_vm0, %v178_v26  ;;  %538 = vmatmul.msk.f32.gmra.mxu1 %vm218_vm0, %v186_v27 }
  0x43   : > { %547 = vmatmul.msk.f32.gmra.mxu2 %vm218_vm0, %v195_v28  ;;  %555 = vmatmul.msk.f32.gmra.mxu3 %vm218_vm0, %v203_v29 }
  0x45   : > { %531 = vmatmul.msk.f32.gmra.mxu0 %vm218_vm0, %v179_v30  ;;  %539 = vmatmul.msk.f32.gmra.mxu1 %vm218_vm0, %v187_v31 }
  0x4b   : > { %548 = vmatmul.msk.f32.gmra.mxu2 %vm218_vm0, %v196_v32  ;;  %556 = vmatmul.msk.f32.gmra.mxu3 %vm218_vm0, %v204_v33 }
  0x4d   : > { %532 = vmatmul.msk.f32.gmra.mxu0 %vm218_vm0, %v180_v34  ;;  %540 = vmatmul.msk.f32.gmra.mxu1 %vm218_vm0, %v188_v35 }
  0x53   : > { %549 = vmatmul.msk.f32.gmra.mxu2 %vm218_vm0, %v197_v36  ;;  %557 = vmatmul.msk.f32.gmra.mxu3 %vm218_vm0, %v205_v37 }
  0x55   : > { %533 = vmatmul.msk.f32.gmra.mxu0 %vm218_vm0, %v181_v38  ;;  %541 = vmatmul.msk.f32.gmra.mxu1 %vm218_vm0, %v189_v39 }
  0x9a   : > { %v332_v41 = vpop.f32.mrf.mxu0  ;;  %v356_v42 = vpop.f32.mrf.mxu1 }
  0x9b   : > { %v333_v43 = vadd.f32 %v730_v40, %v332_v41  ;;  %v357_v44 = vadd.f32 %v730_v40, %v356_v42 }
  0x9d   : > { %429 = vst.msk [vmem:[%s737_s13] sm:$0xff] %vm428_vm1, %v333_v43 }
  0x9e   : > { %437 = vst.msk [vmem:[%s737_s13 + $0x40] sm:$0xff] %vm428_vm1, %v357_v44  ;;  %v380_v45 = vpop.f32.mrf.mxu2  ;;  %v404_v46 = vpop.f32.mrf.mxu3 }
  0x9f   : > { %v381_v47 = vadd.f32 %v730_v40, %v380_v45  ;;  %v405_v48 = vadd.f32 %v730_v40, %v404_v46 }
  0xa1   : > { %445 = vst.msk [vmem:[%s737_s13 + $0x80] sm:$0xff] %vm428_vm1, %v381_v47 }
  0xa2   : > { %453 = vst.msk [vmem:[%s737_s13 + $0xc0] sm:$0xff] %vm428_vm1, %v405_v48  ;;  %v335_v49 = vpop.f32.mrf.mxu0  ;;  %v359_v50 = vpop.f32.mrf.mxu1 }
  0xa3   : > { %v336_v51 = vadd.f32 %v730_v40, %v335_v49  ;;  %v360_v52 = vadd.f32 %v730_v40, %v359_v50 }
  0xa5   : > { %430 = vst.msk [vmem:[%s737_s13 + $0x8] sm:$0xff] %vm428_vm1, %v336_v51 }
  0xa6   : > { %438 = vst.msk [vmem:[%s737_s13 + $0x48] sm:$0xff] %vm428_vm1, %v360_v52  ;;  %v383_v53 = vpop.f32.mrf.mxu2  ;;  %v407_v54 = vpop.f32.mrf.mxu3 }
  0xa7   : > { %v384_v55 = vadd.f32 %v730_v40, %v383_v53  ;;  %v408_v56 = vadd.f32 %v730_v40, %v407_v54 }
  0xa9   : > { %446 = vst.msk [vmem:[%s737_s13 + $0x88] sm:$0xff] %vm428_vm1, %v384_v55 }
  0xaa   : > { %454 = vst.msk [vmem:[%s737_s13 + $0xc8] sm:$0xff] %vm428_vm1, %v408_v56  ;;  %v338_v57 = vpop.f32.mrf.mxu0  ;;  %v362_v58 = vpop.f32.mrf.mxu1 }
  0xab   : > { %v339_v59 = vadd.f32 %v730_v40, %v338_v57  ;;  %v363_v60 = vadd.f32 %v730_v40, %v362_v58 }
  0xad   : > { %431 = vst.msk [vmem:[%s737_s13 + $0x10] sm:$0xff] %vm428_vm1, %v339_v59 }
  0xae   : > { %439 = vst.msk [vmem:[%s737_s13 + $0x50] sm:$0xff] %vm428_vm1, %v363_v60  ;;  %v386_v61 = vpop.f32.mrf.mxu2  ;;  %v410_v62 = vpop.f32.mrf.mxu3 }
  0xaf   : > { %v387_v63 = vadd.f32 %v730_v40, %v386_v61  ;;  %v411_v0 = vadd.f32 %v730_v40, %v410_v62 }
  0xb1   : > { %447 = vst.msk [vmem:[%s737_s13 + $0x90] sm:$0xff] %vm428_vm1, %v387_v63 }
  0xb2   : > { %455 = vst.msk [vmem:[%s737_s13 + $0xd0] sm:$0xff] %vm428_vm1, %v411_v0  ;;  %v341_v1 = vpop.f32.mrf.mxu0  ;;  %v365_v2 = vpop.f32.mrf.mxu1 }
  0xb3   : > { %v342_v3 = vadd.f32 %v730_v40, %v341_v1  ;;  %v366_v4 = vadd.f32 %v730_v40, %v365_v2 }
  0xb5   : > { %432 = vst.msk [vmem:[%s737_s13 + $0x18] sm:$0xff] %vm428_vm1, %v342_v3 }
  0xb6   : > { %440 = vst.msk [vmem:[%s737_s13 + $0x58] sm:$0xff] %vm428_vm1, %v366_v4  ;;  %v389_v5 = vpop.f32.mrf.mxu2  ;;  %v413_v6 = vpop.f32.mrf.mxu3 }
  0xb7   : > { %v390_v7 = vadd.f32 %v730_v40, %v389_v5  ;;  %v414_v8 = vadd.f32 %v730_v40, %v413_v6 }
  0xb9   : > { %448 = vst.msk [vmem:[%s737_s13 + $0x98] sm:$0xff] %vm428_vm1, %v390_v7 }
  0xba   : > { %456 = vst.msk [vmem:[%s737_s13 + $0xd8] sm:$0xff] %vm428_vm1, %v414_v8  ;;  %v344_v9 = vpop.f32.mrf.mxu0  ;;  %v368_v10 = vpop.f32.mrf.mxu1 }
  0xbb   : > { %v345_v11 = vadd.f32 %v730_v40, %v344_v9  ;;  %v369_v12 = vadd.f32 %v730_v40, %v368_v10 }
  0xbd   : > { %433 = vst.msk [vmem:[%s737_s13 + $0x20] sm:$0xff] %vm428_vm1, %v345_v11 }
  0xbe   : > { %441 = vst.msk [vmem:[%s737_s13 + $0x60] sm:$0xff] %vm428_vm1, %v369_v12  ;;  %v392_v13 = vpop.f32.mrf.mxu2  ;;  %v416_v14 = vpop.f32.mrf.mxu3 }
  0xbf   : > { %v393_v15 = vadd.f32 %v730_v40, %v392_v13  ;;  %v417_v16 = vadd.f32 %v730_v40, %v416_v14 }
  0xc1   : > { %449 = vst.msk [vmem:[%s737_s13 + $0xa0] sm:$0xff] %vm428_vm1, %v393_v15 }
  0xc2   : > { %457 = vst.msk [vmem:[%s737_s13 + $0xe0] sm:$0xff] %vm428_vm1, %v417_v16  ;;  %v347_v17 = vpop.f32.mrf.mxu0  ;;  %v371_v18 = vpop.f32.mrf.mxu1 }
  0xc3   : > { %v348_v19 = vadd.f32 %v730_v40, %v347_v17  ;;  %v372_v20 = vadd.f32 %v730_v40, %v371_v18 }
  0xc5   : > { %434 = vst.msk [vmem:[%s737_s13 + $0x28] sm:$0xff] %vm428_vm1, %v348_v19 }
  0xc6   : > { %442 = vst.msk [vmem:[%s737_s13 + $0x68] sm:$0xff] %vm428_vm1, %v372_v20  ;;  %v395_v21 = vpop.f32.mrf.mxu2  ;;  %v419_v22 = vpop.f32.mrf.mxu3 }
  0xc7   : > { %v396_v23 = vadd.f32 %v730_v40, %v395_v21  ;;  %v420_v24 = vadd.f32 %v730_v40, %v419_v22 }
  0xc9   : > { %450 = vst.msk [vmem:[%s737_s13 + $0xa8] sm:$0xff] %vm428_vm1, %v396_v23 }
  0xca   : > { %458 = vst.msk [vmem:[%s737_s13 + $0xe8] sm:$0xff] %vm428_vm1, %v420_v24  ;;  %v350_v25 = vpop.f32.mrf.mxu0  ;;  %v374_v26 = vpop.f32.mrf.mxu1 }
  0xcb   : > { %v351_v27 = vadd.f32 %v730_v40, %v350_v25  ;;  %v375_v28 = vadd.f32 %v730_v40, %v374_v26 }
  0xcd   : > { %435 = vst.msk [vmem:[%s737_s13 + $0x30] sm:$0xff] %vm428_vm1, %v351_v27 }
  0xce   : > { %443 = vst.msk [vmem:[%s737_s13 + $0x70] sm:$0xff] %vm428_vm1, %v375_v28  ;;  %v398_v29 = vpop.f32.mrf.mxu2  ;;  %v422_v30 = vpop.f32.mrf.mxu3 }
  0xcf   : > { %v399_v31 = vadd.f32 %v730_v40, %v398_v29  ;;  %v423_v32 = vadd.f32 %v730_v40, %v422_v30 }
  0xd1   : > { %451 = vst.msk [vmem:[%s737_s13 + $0xb0] sm:$0xff] %vm428_vm1, %v399_v31 }
  0xd2   : > { %459 = vst.msk [vmem:[%s737_s13 + $0xf0] sm:$0xff] %vm428_vm1, %v423_v32  ;;  %v353_v33 = vpop.f32.mrf.mxu0  ;;  %v377_v34 = vpop.f32.mrf.mxu1 }
  0xd3   : > { %v354_v35 = vadd.f32 %v730_v40, %v353_v33  ;;  %v378_v36 = vadd.f32 %v730_v40, %v377_v34 }
  0xd5   : > { %436 = vst.msk [vmem:[%s737_s13 + $0x38] sm:$0xff] %vm428_vm1, %v354_v35 }
  0xd6   : > { %444 = vst.msk [vmem:[%s737_s13 + $0x78] sm:$0xff] %vm428_vm1, %v378_v36  ;;  %v401_v37 = vpop.f32.mrf.mxu2  ;;  %v425_v38 = vpop.f32.mrf.mxu3 }
  0xd7   : > { %v402_v39 = vadd.f32 %v730_v40, %v401_v37  ;;  %v426_v41 = vadd.f32 %v730_v40, %v425_v38 }
  0xd9   : > { %452 = vst.msk [vmem:[%s737_s13 + $0xb8] sm:$0xff] %vm428_vm1, %v402_v39 }
  0xda   : > { %460 = vst.msk [vmem:[%s737_s13 + $0xf8] sm:$0xff] %vm428_vm1, %v426_v41 }
  0xdb PF: > { %s13_s12 = sadd.s32 1, %s599_s12  }
  0xdc   : > { %p10_p4 = scmp.ge.s32.totalorder %s13_s12, 4  }
  0xde   :  { %12 = sbr.rel (!%p10_p4) target bundleno = 1 (0x1), region = 62 }

// kernel: forward.38
= control target key start
LH: loop header
LB: loop body
LE: loop exit
PB: predicated region body
PF: predicated region fallthrough
CT: control target
= control target key end

     0   :  { %s797_s6 = smov 0   ;;  %s1405_s0 = inlined_call_operand.vmem [shape: f32[2,18,1152], index: 0, kind: input, shape index: {}]   ;;  %s1406_s1 = inlined_call_operand.vmem [shape: f32[2,16,1024], index: 1, kind: output, shape index: {}]  }
   0x1 LB: > { %s757_s7 = sadd.s32 4294967295, %s784_s6   ;;  %p761_p0 = scmp.ge.s32.totalorder %s784_s6, 1  ;;  %s784_s6 = sphi %s797_s6, %s11_s6  }
   0x2   : > { %p87_p1 = scmp.lt.s32.totalorder %s784_s6, 3 }
   0x4   : > { %p88_p2 = pnand %p761_p0, %p87_p1 }
   0x6   : > { %91 = sbr.rel (%p88_p2) target bundleno = 277 (0x115), region = 24 }
   0xb   : > { %p107_p3 = scmp.lt.s32.totalorder %s757_s7, 1  ;;  %s786_s12 = smov 64   ;;  %vm286_vm0 = vcmask 1046528   ;;  %vm502_vm1 = vcmask 1045504   ;;  %vm189_vm2 = vcmask 523264  }
   0xd   : > { %s1523_s7 = smov (!%p107_p3, %s757_s7), 1 }
   0xe   : > { %s768_s8 = smul.u32 216, %s1523_s7  ;;  %s767_s13 = sshll.u32 %s1523_s7, 7 }
   0xf   : > { %s1268_s16 = scalar_lea.vmem %s1406_s1, %s767_s13 }
  0x10   : > { %s811_s11 = scalar_lea.vmem %s1405_s0, %s768_s8 }
  0x11   : > { %v814_v0 = vld [vmem:[%s811_s11 + $0x10] sm:$0xff]  ;;  %v817_v1 = vld [vmem:[%s811_s11] sm:$0xff]  ;;  %v829_v3 = vld [vmem:[%s811_s11 + $0x18] sm:$0xff] }
  0x12   : > { %157 = vrot.lane.b32.xlu1 %v814_v0, %s786_s12  ;;  %153 = vrot.lane.b32.xlu0 %v817_v1, %s786_s12  ;;  %v824_v2 = vld [vmem:[%s811_s11 + $0x20] sm:$0xff]  ;;  %v832_v4 = vld [vmem:[%s811_s11 + $0x8] sm:$0xff] }
  0x13   : > { %161 = vrot.lane.b32.xlu2 %v824_v2, %s786_s12  ;;  %v835_v5 = vld [vmem:[%s811_s11 + $0x28] sm:$0xff]  ;;  %v844_v6 = vld [vmem:[%s811_s11 + $0x38] sm:$0xff]  ;;  %v847_v7 = vld [vmem:[%s811_s11 + $0x30] sm:$0xff] }
  0x14   : > { %v850_v8 = vld [vmem:[%s811_s11 + $0x40] sm:$0xff]  ;;  %v859_v9 = vld [vmem:[%s811_s11 + $0x50] sm:$0xff]  ;;  %v862_v10 = vld [vmem:[%s811_s11 + $0x48] sm:$0xff] }
  0x15   : > { %v865_v11 = vld [vmem:[%s811_s11 + $0x58] sm:$0xff]  ;;  %v874_v12 = vld [vmem:[%s811_s11 + $0x68] sm:$0xff]  ;;  %v877_v13 = vld [vmem:[%s811_s11 + $0x60] sm:$0xff]  ;;  %v291_v22 = vrot.slane %v859_v9, 1  ;;  %v288_v24 = vrot.slane %v862_v10, 1 }
  0x16   : > { %1456 = vst [vmem:[#allocation2_spill] sm:$0xff] %v877_v13  ;;  %v880_v14 = vld [vmem:[%s811_s11 + $0x70] sm:$0xff]  ;;  %v889_v15 = vld [vmem:[%s811_s11 + $0x80] sm:$0xff]  ;;  %v892_v16 = vld [vmem:[%s811_s11 + $0x78] sm:$0xff]  ;;  %v294_v26 = vrot.slane %v865_v11, 1  ;;  %v300_v34 = vrot.slane %v874_v12, 1 }
  0x17   : > { %1457 = vst [vmem:[#allocation3_spill] sm:$0xff] %v880_v14  ;;  %v255_v17 = vld [vmem:[%s811_s11 + $0x8] sm:$0xfe]  ;;  %v254_v18 = vld [vmem:[%s811_s11] sm:$0xfe]  ;;  %v297_v36 = vrot.slane %v877_v13, 1 }
  0x18   : > { %1458 = vst [vmem:[#allocation4_spill] sm:$0xff] %v889_v15  ;;  %v897_v19 = vld [vmem:[%s811_s11 + $0x88] sm:$0xff]  ;;  %v256_v20 = vld [vmem:[%s811_s11 + $0x10] sm:$0xfe]  ;;  %v290_v21 = vrot.slane %v255_v17, 1  ;;  %v287_v23 = vrot.slane %v254_v18, 1 }
  0x19   : > { %1459 = vst [vmem:[#allocation5_spill] sm:$0xff] %v892_v16  ;;  %v293_v25 = vrot.slane %v256_v20, 1  ;;  %v258_v29 = vld [vmem:[%s811_s11 + $0x20] sm:$0xfe]  ;;  %v257_v30 = vld [vmem:[%s811_s11 + $0x18] sm:$0xfe] }
  0x1a   : > { %159 = vrot.lane.b32.xlu1 %v829_v3, %s786_s12  ;;  %155 = vrot.lane.b32.xlu0 %v832_v4, %s786_s12  ;;  %1460 = vst [vmem:[#allocation6_spill] sm:$0xff] %v897_v19  ;;  %v910_v27 = vsel %vm286_vm0, %v290_v21, %v291_v22  ;;  %v913_v28 = vsel %vm286_vm0, %v287_v23, %v288_v24  ;;  %v259_v32 = vld [vmem:[%s811_s11 + $0x28] sm:$0xfe]  ;;  %v299_v33 = vrot.slane %v258_v29, 1  ;;  %v296_v35 = vrot.slane %v257_v30, 1 }
  0x1b   : > { %163 = vrot.lane.b32.xlu2 %v835_v5, %s786_s12  ;;  %v918_v31 = vsel %vm286_vm0, %v293_v25, %v294_v26  ;;  %v302_v37 = vrot.slane %v259_v32, 1  ;;  %v303_v38 = vrot.slane %v880_v14, 1  ;;  %v261_v41 = vld [vmem:[%s811_s11 + $0x38] sm:$0xfe]  ;;  %v260_v42 = vld [vmem:[%s811_s11 + $0x30] sm:$0xfe] }
  0x1c   : > { %v931_v39 = vsel %vm286_vm0, %v299_v33, %v300_v34  ;;  %v934_v40 = vsel %vm286_vm0, %v296_v35, %v297_v36  ;;  %v359_v44 = vld [vmem:[%s811_s11 + $0x40] sm:$0xfe]  ;;  %v308_v45 = vrot.slane %v261_v41, 1  ;;  %v309_v46 = vrot.slane %v889_v15, 1  ;;  %v263_v53 = vld [vmem:[%s811_s11 + $0x98] sm:$0x1] }
  0x1d   : > { %v939_v43 = vsel %vm286_vm0, %v302_v37, %v303_v38  ;;  %v305_v47 = vrot.slane %v260_v42, 1  ;;  %v306_v48 = vrot.slane %v892_v16, 1  ;;  %v363_v49 = vrot.slane %v359_v44, 1  ;;  %v262_v54 = vld [vmem:[%s811_s11 + $0x90] sm:$0x1] }
  0x1e   : > { %v364_v50 = vrot.slane %v897_v19, 1  ;;  %v952_v51 = vsel %vm286_vm0, %v308_v45, %v309_v46  ;;  %v264_v56 = vld [vmem:[%s811_s11 + $0xa0] sm:$0x1]  ;;  %v313_v57 = vrot.slane %v263_v53, 1  ;;  %v311_v58 = vrot.slane %v262_v54, 1 }
  0x1f   : > { %v955_v52 = vsel %vm286_vm0, %v305_v47, %v306_v48  ;;  %v315_v59 = vrot.slane %v264_v56, 1  ;;  %v266_v62 = vld [vmem:[%s811_s11 + $0xb0] sm:$0x1]  ;;  %v265_v63 = vld [vmem:[%s811_s11 + $0xa8] sm:$0x1]  ;;  %v507_v45 = vrot.slane %v859_v9, 2 }
  0x20   : > { %v960_v55 = vsel %vm286_vm0, %v363_v49, %v364_v50  ;;  %v970_v60 = vsel %vm286_vm0, %v291_v22, %v313_v57  ;;  %v973_v61 = vsel %vm286_vm0, %v288_v24, %v311_v58  ;;  %v267_v18 = vld [vmem:[%s811_s11 + $0xb8] sm:$0x1]  ;;  %v319_v20 = vrot.slane %v266_v62, 1  ;;  %v269_v25 = vld [vmem:[%s811_s11 + $0xc8] sm:$0x1] }
  0x21   : > { %1461 = vst [vmem:[#allocation7_spill] sm:$0xff] %v970_v60  ;;  %v978_v17 = vsel %vm286_vm0, %v294_v26, %v315_v59  ;;  %v317_v21 = vrot.slane %v265_v63, 1  ;;  %v321_v22 = vrot.slane %v267_v18, 1  ;;  %v268_v26 = vld [vmem:[%s811_s11 + $0xc0] sm:$0x1]  ;;  %v325_v32 = vrot.slane %v269_v25, 1 }
  0x22   : > { %167 = vrot.lane.b32.xlu1 %v844_v6, %s786_s12  ;;  %165 = vrot.lane.b32.xlu0 %v847_v7, %s786_s12  ;;  %1462 = vst [vmem:[#allocation8_spill] sm:$0xff] %v973_v61  ;;  %v988_v23 = vsel %vm286_vm0, %v300_v34, %v319_v20  ;;  %v360_v30 = vld [vmem:[%s811_s11 + $0xd0] sm:$0x1]  ;;  %v323_v33 = vrot.slane %v268_v26, 1  ;;  %v471_v37 = vld [vmem:[%s811_s11 + $0x8] sm:$0xfc] }
  0x23   : > { %169 = vrot.lane.b32.xlu2 %v850_v8, %s786_s12  ;;  %1463 = vst [vmem:[#allocation9_spill] sm:$0xff] %v978_v17  ;;  %v991_v24 = vsel %vm286_vm0, %v297_v36, %v317_v21  ;;  %v996_v29 = vsel %vm286_vm0, %v303_v38, %v321_v22  ;;  %v366_v34 = vrot.slane %v360_v30, 1  ;;  %v1006_v35 = vsel %vm286_vm0, %v309_v46, %v325_v32  ;;  %v470_v38 = vld [vmem:[%s811_s11] sm:$0xfc]  ;;  %v472_v42 = vld [vmem:[%s811_s11 + $0x10] sm:$0xfc] }
  0x24   : > { %1464 = vst [vmem:[#allocation10_spill] sm:$0xff] %v988_v23  ;;  %v1009_v36 = vsel %vm286_vm0, %v306_v48, %v323_v33  ;;  %v506_v44 = vrot.slane %v471_v37, 2  ;;  %v503_v46 = vrot.slane %v470_v38, 2  ;;  %v504_v47 = vrot.slane %v862_v10, 2  ;;  %v474_v56 = vld [vmem:[%s811_s11 + $0x20] sm:$0xfc] }
  0x25   : > { %1465 = vst [vmem:[#allocation11_spill] sm:$0xff] %v991_v24  ;;  %v1014_v41 = vsel %vm286_vm0, %v364_v50, %v366_v34  ;;  %v509_v48 = vrot.slane %v472_v42, 2  ;;  %v510_v49 = vrot.slane %v865_v11, 2  ;;  %v473_v57 = vld [vmem:[%s811_s11 + $0x18] sm:$0xfc]  ;;  %v516_v62 = vrot.slane %v874_v12, 2 }
  0x26   : > { %1466 = vst [vmem:[#allocation12_spill] sm:$0xff] %v996_v29  ;;  %v1029_v53 = vsel %vm502_vm1, %v506_v44, %v507_v45  ;;  %v1032_v54 = vsel %vm502_vm1, %v503_v46, %v504_v47  ;;  %v475_v59 = vld [vmem:[%s811_s11 + $0x28] sm:$0xfc]  ;;  %v515_v63 = vrot.slane %v474_v56, 2  ;;  %v512_v18 = vrot.slane %v473_v57, 2 }
  0x27   : > { %1467 = vst [vmem:[#allocation13_spill] sm:$0xff] %v1006_v35  ;;  %v1037_v58 = vsel %vm502_vm1, %v509_v48, %v510_v49  ;;  %v513_v20 = vrot.slane %v877_v13, 2  ;;  %v518_v21 = vrot.slane %v475_v59, 2  ;;  %v519_v22 = vrot.slane %v880_v14, 2  ;;  %v477_v33 = vld [vmem:[%s811_s11 + $0x38] sm:$0xfc] }
  0x28   : > { %1468 = vst [vmem:[#allocation14_spill] sm:$0xff] %v1009_v36  ;;  %v1057_v30 = vsel %vm502_vm1, %v515_v63, %v516_v62  ;;  %v476_v34 = vld [vmem:[%s811_s11 + $0x30] sm:$0xfc]  ;;  %v575_v38 = vld [vmem:[%s811_s11 + $0x40] sm:$0xfc]  ;;  %v524_v42 = vrot.slane %v477_v33, 2 }
  0x29   : > { %1469 = vst [vmem:[#allocation15_spill] sm:$0xff] %v1014_v41  ;;  %v1060_v32 = vsel %vm502_vm1, %v512_v18, %v513_v20  ;;  %v1065_v37 = vsel %vm502_vm1, %v518_v21, %v519_v22  ;;  %v525_v44 = vrot.slane %v889_v15, 2  ;;  %v521_v46 = vrot.slane %v476_v34, 2  ;;  %v479_v21 = vld [vmem:[%s811_s11 + $0x98] sm:$0x3] }
  0x2a   : > { %173 = vrot.lane.b32.xlu1 %v859_v9, %s786_s12  ;;  %171 = vrot.lane.b32.xlu0 %v862_v10, %s786_s12  ;;  %v522_v48 = vrot.slane %v892_v16, 2  ;;  %v579_v56 = vrot.slane %v575_v38, 2  ;;  %v580_v57 = vrot.slane %v897_v19, 2  ;;  %v478_v33 = vld [vmem:[%s811_s11 + $0x90] sm:$0x3]  ;;  %v529_v38 = vrot.slane %v479_v21, 2 }
  0x2b   : > { %175 = vrot.lane.b32.xlu2 %v865_v11, %s786_s12  ;;  %v1078_v63 = vsel %vm502_vm1, %v524_v42, %v525_v44  ;;  %v527_v42 = vrot.slane %v478_v33, 2  ;;  %v483_v21 = vld [vmem:[%s811_s11 + $0xb8] sm:$0x3] }
  0x2c   : > { %1470 = vst [vmem:[#allocation16_spill] sm:$0xff] %v1078_v63  ;;  %v1081_v18 = vsel %vm502_vm1, %v521_v46, %v522_v48  ;;  %v1086_v34 = vsel %vm502_vm1, %v579_v56, %v580_v57  ;;  %v1096_v56 = vsel %vm502_vm1, %v507_v45, %v529_v38  ;;  %v537_v38 = vrot.slane %v483_v21, 2  ;;  %v484_v21 = vld [vmem:[%s811_s11 + $0xc0] sm:$0x3] }
  0x2d   : > { %1471 = vst [vmem:[#allocation17_spill] sm:$0xff] %v1081_v18 }
  0x2e   : > { %1472 = vst [vmem:[#allocation18_spill] sm:$0xff] %v1086_v34 }
  0x2f   : > { %1473 = vst [vmem:[#allocation19_spill] sm:$0xff] %v1096_v56 }
  0x32   : > { %179 = vrot.lane.b32.xlu1 %v874_v12, %s786_s12  ;;  %177 = vrot.lane.b32.xlu0 %v877_v13, %s786_s12 }
  0x33   : > { %181 = vrot.lane.b32.xlu2 %v880_v14, %s786_s12 }
  0x3a   : > { %185 = vrot.lane.b32.xlu1 %v889_v15, %s786_s12  ;;  %183 = vrot.lane.b32.xlu0 %v892_v16, %s786_s12  ;;  %v482_v16 = vld [vmem:[%s811_s11 + $0xb0] sm:$0x3] }
  0x3b   : > { %187 = vrot.lane.b32.xlu2 %v897_v19, %s786_s12  ;;  %v1099_v19 = vsel %vm502_vm1, %v504_v47, %v527_v42 }
  0x3c   : > { %1474 = vst [vmem:[#allocation20_spill] sm:$0xff] %v1099_v19 }
  0x42   : > { %370 = vrot.lane.b32.xlu1 %v910_v27, %s786_s12  ;;  %368 = vrot.lane.b32.xlu0 %v913_v28, %s786_s12 }
  0x43   : > { %372 = vrot.lane.b32.xlu2 %v918_v31, %s786_s12 }
  0x4a   : > { %376 = vrot.lane.b32.xlu1 %v931_v39, %s786_s12  ;;  %374 = vrot.lane.b32.xlu0 %v934_v40, %s786_s12 }
  0x4b   : > { %378 = vrot.lane.b32.xlu2 %v939_v43, %s786_s12 }
  0x52   : > { %382 = vrot.lane.b32.xlu1 %v952_v51, %s786_s12  ;;  %380 = vrot.lane.b32.xlu0 %v955_v52, %s786_s12 }
  0x53   : > { %384 = vrot.lane.b32.xlu2 %v960_v55, %s786_s12 }
  0x5a   : > { %388 = vrot.lane.b32.xlu1 %v970_v60, %s786_s12  ;;  %386 = vrot.lane.b32.xlu0 %v973_v61, %s786_s12 }
  0x5b   : > { %390 = vrot.lane.b32.xlu2 %v978_v17, %s786_s12  ;;  %v576_v17 = vld [vmem:[%s811_s11 + $0xd0] sm:$0x3] }
  0x62   : > { %394 = vrot.lane.b32.xlu1 %v988_v23, %s786_s12  ;;  %392 = vrot.lane.b32.xlu0 %v991_v24, %s786_s12  ;;  %v481_v24 = vld [vmem:[%s811_s11 + $0xa8] sm:$0x3] }
  0x63   : > { %396 = vrot.lane.b32.xlu2 %v996_v29, %s786_s12  ;;  %v533_v45 = vrot.slane %v481_v24, 2 }
  0x6a   : > { %400 = vrot.lane.b32.xlu1 %v1006_v35, %s786_s12  ;;  %398 = vrot.lane.b32.xlu0 %v1009_v36, %s786_s12 }
  0x6b   : > { %402 = vrot.lane.b32.xlu2 %v1014_v41, %s786_s12  ;;  %v480_v41 = vld [vmem:[%s811_s11 + $0xa0] sm:$0x3] }
  0x6c   : > { %v531_v35 = vrot.slane %v480_v41, 2  ;;  %v535_v41 = vrot.slane %v482_v16, 2 }
  0x6d   : > { %v1026_v50 = vpop.permute.xlu2 %161 }
  0x6e   : > { %v1104_v15 = vsel %vm502_vm1, %v510_v49, %v531_v35  ;;  %v1123_v24 = vsel %vm502_vm1, %v516_v62, %v535_v41 }
  0x6f   : > { %1475 = vst [vmem:[#allocation21_spill] sm:$0xff] %v1104_v15 }
  0x70   : > { %1476 = vst [vmem:[#allocation22_spill] sm:$0xff] %v1123_v24 }
  0x72   : > { %586 = vrot.lane.b32.xlu1 %v1029_v53, %s786_s12  ;;  %584 = vrot.lane.b32.xlu0 %v1032_v54, %s786_s12 }
  0x73   : > { %588 = vrot.lane.b32.xlu2 %v1037_v58, %s786_s12 }
  0x75   : > { %v1049_v25 = vpop.permute.xlu2 %163 }
  0x76   : > { %v1054_v26 = vsel %vm189_vm2, %v1026_v50, %v1049_v25 }
  0x77   : > { %v226_v14 = vmax.f32 %v824_v2, %v1054_v26 }
  0x7a   : > { %592 = vrot.lane.b32.xlu1 %v1057_v30, %s786_s12  ;;  %590 = vrot.lane.b32.xlu0 %v1060_v32, %s786_s12 }
  0x7b   : > { %594 = vrot.lane.b32.xlu2 %v1065_v37, %s786_s12 }
  0x7d   : > { %v170_v59 = vpop.permute.xlu2 %169 }
  0x82   : > { %598 = vrot.lane.b32.xlu1 %v1078_v63, %s786_s12  ;;  %596 = vrot.lane.b32.xlu0 %v1081_v18, %s786_s12 }
  0x83   : > { %600 = vrot.lane.b32.xlu2 %v1086_v34, %s786_s12  ;;  %v1131_v34 = vsel %vm502_vm1, %v519_v22, %v537_v38 }
  0x84   : > { %v158_v46 = vpop.permute.xlu1 %157  ;;  %v154_v36 = vpop.permute.xlu0 %153  ;;  %1478 = vst [vmem:[#allocation24_spill] sm:$0xff] %v1131_v34 }
  0x85   : > { %v176_v29 = vpop.permute.xlu2 %175 }
  0x8a   : > { %604 = vrot.lane.b32.xlu1 %v1096_v56, %s786_s12  ;;  %602 = vrot.lane.b32.xlu0 %v1099_v19, %s786_s12  ;;  %v485_v56 = vld [vmem:[%s811_s11 + $0xc8] sm:$0x3] }
  0x8b   : > { %606 = vrot.lane.b32.xlu2 %v1104_v15, %s786_s12  ;;  %v1126_v15 = vsel %vm502_vm1, %v513_v20, %v533_v45 }
  0x8c   : > { %v160_v47 = vpop.permute.xlu1 %159  ;;  %v156_v33 = vpop.permute.xlu0 %155  ;;  %1477 = vst [vmem:[#allocation23_spill] sm:$0xff] %v1126_v15 }
  0x8d   : > { %v1114_v35 = vsel %vm189_vm2, %v158_v46, %v160_v47  ;;  %v1118_v49 = vsel %vm189_vm2, %v160_v47, %v1026_v50  ;;  %v190_v42 = vsel %vm189_vm2, %v154_v36, %v156_v33  ;;  %v191_v19 = vsel %vm189_vm2, %v156_v33, %v158_v46  ;;  %v182_v16 = vpop.permute.xlu2 %181 }
  0x8e   : > { %v541_v36 = vrot.slane %v485_v56, 2  ;;  %v539_v50 = vrot.slane %v484_v21, 2  ;;  %v582_v46 = vrot.slane %v576_v17, 2 }
  0x90   : > { %v1151_v56 = vsel %vm502_vm1, %v525_v44, %v541_v36  ;;  %v1154_v33 = vsel %vm502_vm1, %v522_v48, %v539_v50  ;;  %v1157_v38 = vsel %vm502_vm1, %v580_v57, %v582_v46 }
  0x91   : > { %1479 = vst [vmem:[#allocation25_spill] sm:$0xff] %v1151_v56 }
  0x92   : > { %610 = vrot.lane.b32.xlu1 %v1123_v24, %s786_s12  ;;  %608 = vrot.lane.b32.xlu0 %v1126_v15, %s786_s12  ;;  %1480 = vst [vmem:[#allocation26_spill] sm:$0xff] %v1154_v33 }
  0x93   : > { %612 = vrot.lane.b32.xlu2 %v1131_v34, %s786_s12  ;;  %1481 = vst [vmem:[#allocation27_spill] sm:$0xff] %v1157_v38 }
  0x94   : > { %v168_v62 = vpop.permute.xlu1 %167  ;;  %v166_v20 = vpop.permute.xlu0 %165 }
  0x95   : > { %v1141_v41 = vsel %vm189_vm2, %v168_v62, %v170_v59  ;;  %v1145_v22 = vsel %vm189_vm2, %v1049_v25, %v166_v20  ;;  %v1148_v45 = vsel %vm189_vm2, %v166_v20, %v168_v62  ;;  %v188_v47 = vpop.permute.xlu2 %187 }
  0x9a   : > { %616 = vrot.lane.b32.xlu1 %v1151_v56, %s786_s12  ;;  %614 = vrot.lane.b32.xlu0 %v1154_v33, %s786_s12 }
  0x9b   : > { %618 = vrot.lane.b32.xlu2 %v1157_v38, %s786_s12 }
  0x9c   : > { %v174_v17 = vpop.permute.xlu1 %173  ;;  %v172_v25 = vpop.permute.xlu0 %171 }
  0x9d   : > { %v1166_v44 = vsel %vm189_vm2, %v174_v17, %v176_v29  ;;  %v1169_v48 = vsel %vm189_vm2, %v172_v25, %v174_v17  ;;  %v373_v59 = vpop.permute.xlu2 %372 }
  0xa4   : > { %v180_v57 = vpop.permute.xlu1 %179  ;;  %v178_v21 = vpop.permute.xlu0 %177 }
  0xa5   : > { %v1172_v36 = vsel %vm189_vm2, %v180_v57, %v182_v16  ;;  %v1175_v50 = vsel %vm189_vm2, %v176_v29, %v178_v21  ;;  %v1178_v62 = vsel %vm189_vm2, %v178_v21, %v180_v57  ;;  %v1180_v20 = vpop.permute.xlu2 %378 }
  0xac   : > { %v186_v46 = vpop.permute.xlu1 %185  ;;  %v184_v38 = vpop.permute.xlu0 %183 }
  0xad   : > { %v1183_v33 = vsel %vm189_vm2, %v186_v46, %v188_v47  ;;  %v1186_v17 = vsel %vm189_vm2, %v182_v16, %v184_v38  ;;  %v1189_v25 = vsel %vm189_vm2, %v184_v38, %v186_v46  ;;  %v1191_v56 = vpop.permute.xlu2 %384  ;;  %v223_v38 = vmax.f32 %v832_v4, %v191_v19 }
  0xae   : > { %1482 = vst [vmem:[#allocation28_spill] sm:$0xff] %v1183_v33  ;;  %v222_v46 = vmax.f32 %v817_v1, %v190_v42  ;;  %v224_v19 = vmax.f32 %v814_v0, %v1114_v35  ;;  %v225_v1 = vmax.f32 %v829_v3, %v1118_v49  ;;  %v229_v35 = vmax.f32 %v844_v6, %v1141_v41 }
  0xaf   : > { %1483 = vst [vmem:[#allocation29_spill] sm:$0xff] %v1186_v17  ;;  %v239_v63 = vmax.f32 %v223_v38, %v814_v0 }
  0xb0   : > { %1484 = vst [vmem:[#allocation30_spill] sm:$0xff] %v1189_v25  ;;  %v240_v13 = vmax.f32 %v224_v19, %v829_v3  ;;  %v241_v0 = vmax.f32 %v225_v1, %v824_v2  ;;  %v227_v2 = vmax.f32 %v835_v5, %v1145_v22  ;;  %v228_v3 = vmax.f32 %v847_v7, %v1148_v45 }
  0xb1   : > { %v344_v42 = vmax.f32 %v239_v63, %v910_v27  ;;  %v245_v1 = vmax.f32 %v229_v35, %v850_v8  ;;  %v230_v8 = vmax.f32 %v862_v10, %v1169_v48 }
  0xb2   : > { %v346_v41 = vmax.f32 %v241_v0, %v934_v40  ;;  %v243_v45 = vmax.f32 %v227_v2, %v847_v7 }
  0xb4   : > { %v371_v29 = vpop.permute.xlu1 %370  ;;  %v369_v34 = vpop.permute.xlu0 %368 }
  0xb5   : > { %v1193_v15 = vpop.permute.xlu2 %390  ;;  %v405_v60 = vsel %vm189_vm2, %v371_v29, %v373_v59 }
  0xbc   : > { %v377_v57 = vpop.permute.xlu1 %376  ;;  %v375_v21 = vpop.permute.xlu0 %374 }
  0xbd   : > { %v1195_v24 = vpop.permute.xlu2 %396  ;;  %v407_v49 = vsel %vm189_vm2, %v375_v21, %v377_v57 }
  0xbe   : > { %1485 = vst [vmem:[#allocation31_spill] sm:$0xff] %v1195_v24  ;;  %v238_v24 = vmax.f32 %v222_v46, %v832_v4  ;;  %v242_v4 = vmax.f32 %v226_v14, %v835_v5  ;;  %v437_v46 = vmax.f32 %v344_v42, %v405_v60  ;;  %v408_v60 = vsel %vm189_vm2, %v377_v57, %v1180_v20 }
  0xbf   : > { %v439_v19 = vmax.f32 %v346_v41, %v407_v49  ;;  %v231_v42 = vmax.f32 %v859_v9, %v1166_v44 }
  0xc0   : > { %v343_v38 = vmax.f32 %v238_v24, %v913_v28  ;;  %v455_v63 = vmax.f32 %v437_v46, %v918_v31  ;;  %v347_v28 = vmax.f32 %v242_v4, %v931_v39  ;;  %v345_v24 = vmax.f32 %v240_v13, %v918_v31 }
  0xc1   : > { %v244_v13 = vmax.f32 %v228_v3, %v844_v6  ;;  %v457_v7 = vmax.f32 %v439_v19, %v931_v39  ;;  %v350_v39 = vmax.f32 %v245_v1, %v952_v51  ;;  %v247_v0 = vmax.f32 %v231_v42, %v865_v11  ;;  %v1494_v42 = vld [vmem:[#allocation17_spill] sm:$0xff] }
  0xc2   : > { %v560_v57 = vmax.f32 %v455_v63, %v1029_v53 }
  0xc4   : > { %v383_v23 = vpop.permute.xlu1 %382  ;;  %v381_v18 = vpop.permute.xlu0 %380 }
  0xc5   : > { %v1201_v16 = vpop.permute.xlu2 %402  ;;  %v411_v6 = vsel %vm189_vm2, %v383_v23, %v1191_v56  ;;  %v409_v10 = vsel %vm189_vm2, %v1180_v20, %v381_v18  ;;  %v410_v44 = vsel %vm189_vm2, %v381_v18, %v383_v23  ;;  %v348_v56 = vmax.f32 %v243_v45, %v939_v43 }
  0xc6   : > { %1486 = vst [vmem:[#allocation32_spill] sm:$0xff] %v1201_v16  ;;  %v404_v16 = vsel %vm189_vm2, %v369_v34, %v371_v29  ;;  %v406_v34 = vsel %vm189_vm2, %v373_v59, %v375_v21  ;;  %v443_v35 = vmax.f32 %v350_v39, %v411_v6  ;;  %v246_v23 = vmax.f32 %v230_v8, %v859_v9 }
  0xc7   : > { %v436_v26 = vmax.f32 %v343_v38, %v404_v16  ;;  %v438_v16 = vmax.f32 %v345_v24, %v406_v34  ;;  %v441_v63 = vmax.f32 %v348_v56, %v409_v10  ;;  %v234_v34 = vmax.f32 %v874_v12, %v1172_v36 }
  0xc8   : > { %v232_v9 = vmax.f32 %v865_v11, %v1175_v50 }
  0xc9   : > { %v454_v14 = vmax.f32 %v436_v26, %v910_v27  ;;  %v440_v27 = vmax.f32 %v347_v28, %v408_v60  ;;  %v456_v46 = vmax.f32 %v438_v16, %v934_v40  ;;  %v349_v26 = vmax.f32 %v244_v13, %v955_v52 }
  0xca   : > { %v562_v60 = vmax.f32 %v457_v7, %v1060_v32  ;;  %v459_v36 = vmax.f32 %v441_v63, %v955_v52  ;;  %v1495_v7 = vld [vmem:[#allocation10_spill] sm:$0xff] }
  0xcb   : > { %v559_v5 = vmax.f32 %v454_v14, %v1032_v54  ;;  %v458_v54 = vmax.f32 %v440_v27, %v939_v43  ;;  %v442_v28 = vmax.f32 %v349_v26, %v410_v44  ;;  %v461_v27 = vmax.f32 %v443_v35, %v960_v55  ;;  %v1489_v55 = vld [vmem:[#allocation2_spill] sm:$0xff]  ;;  %v1497_v26 = vld [vmem:[#allocation31_spill] sm:$0xff] }
  0xcc   : > { %v1197_v47 = vpop.permute.xlu1 %388  ;;  %v1199_v33 = vpop.permute.xlu0 %386  ;;  %v233_v52 = vmax.f32 %v1489_v55, %v1178_v62 }
  0xcd   : > { %v1213_v61 = vpop.permute.xlu2 %588  ;;  %v563_v18 = vmax.f32 %v458_v54, %v1057_v30  ;;  %v460_v16 = vmax.f32 %v442_v28, %v952_v51  ;;  %v412_v11 = vsel %vm189_vm2, %v1199_v33, %v1197_v47  ;;  %v1491_v51 = vld [vmem:[#allocation8_spill] sm:$0xff]  ;;  %v248_v33 = vmax.f32 %v232_v9, %v1489_v55  ;;  %v1500_v28 = vld [vmem:[#allocation18_spill] sm:$0xff]  ;;  %v1506_v9 = vld [vmem:[#allocation5_spill] sm:$0xff] }
  0xcf   : > { %v565_v62 = vmax.f32 %v460_v16, %v1494_v42 }
  0xd4   : > { %v1205_v25 = vpop.permute.xlu1 %394  ;;  %v1207_v17 = vpop.permute.xlu0 %392 }
  0xd5   : > { %1487 = vst [vmem:[#allocation33_spill] sm:$0xff] %v1205_v25  ;;  %v1245_v29 = vpop.permute.xlu2 %594 }
  0xd6   : > { %1488 = vst [vmem:[#allocation34_spill] sm:$0xff] %v1207_v17 }
  0xdc   : > { %v1224_v17 = vpop.permute.xlu1 %400  ;;  %v1226_v25 = vpop.permute.xlu0 %398 }
  0xdd   : > { %v601_v20 = vpop.permute.xlu2 %600  ;;  %v1499_v35 = vld [vmem:[#allocation34_spill] sm:$0xff] }
  0xe4   : > { %v587_v59 = vpop.permute.xlu1 %586  ;;  %v585_v22 = vpop.permute.xlu0 %584 }
  0xe5   : > { %v621_v31 = vsel %vm189_vm2, %v587_v59, %v1213_v61  ;;  %v620_v21 = vsel %vm189_vm2, %v585_v22, %v587_v59  ;;  %v1490_v59 = vld [vmem:[#allocation7_spill] sm:$0xff] }
  0xe6   : > { %v653_v38 = vmax.f32 %v560_v57, %v621_v31  ;;  %v652_v4 = vmax.f32 %v559_v5, %v620_v21  ;;  %v352_v57 = vmax.f32 %v247_v0, %v1490_v59  ;;  %v351_v5 = vmax.f32 %v246_v23, %v1491_v51  ;;  %v1492_v22 = vld [vmem:[#allocation3_spill] sm:$0xff] }
  0xe7   : > { %v250_v45 = vmax.f32 %v234_v34, %v1492_v22 }
  0xe8   : > { %v671_v48 = vmax.f32 %v653_v38, %v1037_v58  ;;  %v670_v40 = vmax.f32 %v652_v4, %v1029_v53  ;;  %v561_v53 = vmax.f32 %v456_v46, %v1037_v58  ;;  %v444_v31 = vmax.f32 %v351_v5, %v412_v11  ;;  %v1508_v11 = vld [vmem:[#allocation20_spill] sm:$0xff] }
  0xe9   : > { %v249_v38 = vmax.f32 %v233_v52, %v874_v12  ;;  %v355_v6 = vmax.f32 %v250_v45, %v1495_v7  ;;  %v1498_v12 = vld [vmem:[#allocation33_spill] sm:$0xff]  ;;  %v1510_v45 = vld [vmem:[#allocation12_spill] sm:$0xff] }
  0xea   : > { %687 = vst [vmem:[%s1268_s16 + $0x8] sm:$0xff] %v671_v48  ;;  %v462_v56 = vmax.f32 %v444_v31, %v1490_v59  ;;  %v416_v0 = vsel %vm189_vm2, %v1498_v12, %v1497_v26  ;;  %v415_v63 = vsel %vm189_vm2, %v1499_v35, %v1498_v12  ;;  %v1516_v12 = vld [vmem:[#allocation23_spill] sm:$0xff] }
  0xeb   : > { %686 = vst [vmem:[%s1268_s16] sm:$0xff] %v670_v40  ;;  %v607_v40 = vpop.permute.xlu2 %606 }
  0xec   : > { %v593_v14 = vpop.permute.xlu1 %592  ;;  %v591_v43 = vpop.permute.xlu0 %590 }
  0xed   : > { %v624_v49 = vsel %vm189_vm2, %v593_v14, %v1245_v29  ;;  %v622_v2 = vsel %vm189_vm2, %v1213_v61, %v591_v43  ;;  %v623_v3 = vsel %vm189_vm2, %v591_v43, %v593_v14  ;;  %v413_v61 = vsel %vm189_vm2, %v1197_v47, %v1193_v15  ;;  %v1493_v47 = vld [vmem:[#allocation16_spill] sm:$0xff]  ;;  %v1503_v43 = vld [vmem:[#allocation29_spill] sm:$0xff] }
  0xee   : > { %v656_v24 = vmax.f32 %v563_v18, %v624_v49  ;;  %v654_v58 = vmax.f32 %v561_v53, %v622_v2  ;;  %v655_v41 = vmax.f32 %v562_v60, %v623_v3  ;;  %v445_v13 = vmax.f32 %v352_v57, %v413_v61  ;;  %v1501_v14 = vld [vmem:[#allocation28_spill] sm:$0xff]  ;;  %v1504_v2 = vld [vmem:[#allocation11_spill] sm:$0xff]  ;;  %v1505_v3 = vld [vmem:[#allocation30_spill] sm:$0xff] }
  0xef   : > { %v1502_v53 = vld [vmem:[#allocation4_spill] sm:$0xff]  ;;  %v235_v34 = vmax.f32 %v1492_v22, %v1503_v43 }
  0xf0   : > { %v674_v50 = vmax.f32 %v656_v24, %v1065_v37  ;;  %v672_v19 = vmax.f32 %v654_v58, %v1060_v32  ;;  %v673_v1 = vmax.f32 %v655_v41, %v1057_v30  ;;  %v566_v32 = vmax.f32 %v461_v27, %v1493_v47 }
  0xf1   : > { %v564_v30 = vmax.f32 %v459_v36, %v1065_v37  ;;  %v1496_v37 = vld [vmem:[#allocation9_spill] sm:$0xff]  ;;  %v237_v60 = vmax.f32 %v1502_v53, %v1501_v14  ;;  %v236_v24 = vmax.f32 %v1506_v9, %v1505_v3  ;;  %v448_v58 = vmax.f32 %v355_v6, %v416_v0  ;;  %v1507_v36 = vld [vmem:[#allocation19_spill] sm:$0xff] }
  0xf2   : > { %690 = vst [vmem:[%s1268_s16 + $0x20] sm:$0xff] %v674_v50  ;;  %v463_v39 = vmax.f32 %v445_v13, %v1496_v37  ;;  %v353_v49 = vmax.f32 %v248_v33, %v1496_v37  ;;  %v567_v50 = vmax.f32 %v462_v56, %v1508_v11  ;;  %v251_v52 = vmax.f32 %v235_v34, %v1506_v9  ;;  %v1515_v37 = vld [vmem:[#allocation22_spill] sm:$0xff] }
  0xf3   : > { %688 = vst [vmem:[%s1268_s16 + $0x10] sm:$0xff] %v672_v19  ;;  %v252_v51 = vmax.f32 %v236_v24, %v1502_v53  ;;  %v466_v13 = vmax.f32 %v448_v58, %v1510_v45  ;;  %v1520_v24 = vld [vmem:[#allocation26_spill] sm:$0xff] }
  0xf4   : > { %689 = vst [vmem:[%s1268_s16 + $0x18] sm:$0xff] %v673_v1  ;;  %v599_v21 = vpop.permute.xlu1 %598  ;;  %v597_v8 = vpop.permute.xlu0 %596  ;;  %v568_v16 = vmax.f32 %v463_v39, %v1507_v36  ;;  %v1509_v1 = vld [vmem:[#allocation6_spill] sm:$0xff] }
  0xf5   : > { %v627_v4 = vsel %vm189_vm2, %v599_v21, %v601_v20  ;;  %v625_v54 = vsel %vm189_vm2, %v1245_v29, %v597_v8  ;;  %v626_v46 = vsel %vm189_vm2, %v597_v8, %v599_v21  ;;  %v414_v29 = vsel %vm189_vm2, %v1193_v15, %v1499_v35  ;;  %v613_v8 = vpop.permute.xlu2 %612 }
  0xf6   : > { %v659_v10 = vmax.f32 %v566_v32, %v627_v4  ;;  %v657_v44 = vmax.f32 %v564_v30, %v625_v54  ;;  %v658_v48 = vmax.f32 %v565_v62, %v626_v46  ;;  %v354_v15 = vmax.f32 %v249_v38, %v1504_v2  ;;  %v1512_v30 = vld [vmem:[#allocation21_spill] sm:$0xff] }
  0xf7   : > { %v446_v41 = vmax.f32 %v353_v49, %v414_v29  ;;  %v253_v55 = vmax.f32 %v237_v60, %v1509_v1  ;;  %v417_v21 = vsel %vm189_vm2, %v1497_v26, %v1226_v25  ;;  %v1513_v38 = vld [vmem:[#allocation13_spill] sm:$0xff]  ;;  %v356_v54 = vmax.f32 %v251_v52, %v1510_v45  ;;  %v1518_v60 = vld [vmem:[#allocation24_spill] sm:$0xff] }
  0xf8   : > { %v677_v20 = vmax.f32 %v659_v10, %v1500_v28  ;;  %v675_v23 = vmax.f32 %v657_v44, %v1494_v42  ;;  %v676_v18 = vmax.f32 %v658_v48, %v1493_v47  ;;  %v447_v27 = vmax.f32 %v354_v15, %v415_v63  ;;  %v1511_v47 = vld [vmem:[#allocation32_spill] sm:$0xff] }
  0xf9   : > { %v464_v31 = vmax.f32 %v446_v41, %v1504_v2  ;;  %v419_v32 = vsel %vm189_vm2, %v1224_v17, %v1511_v47  ;;  %v358_v4 = vmax.f32 %v253_v55, %v1513_v38  ;;  %v418_v46 = vsel %vm189_vm2, %v1226_v25, %v1224_v17 }
  0xfa   : > { %693 = vst [vmem:[%s1268_s16 + $0x38] sm:$0xff] %v677_v20  ;;  %v465_v33 = vmax.f32 %v447_v27, %v1495_v7  ;;  %v1514_v7 = vld [vmem:[#allocation14_spill] sm:$0xff]  ;;  %v449_v44 = vmax.f32 %v356_v54, %v417_v21  ;;  %v571_v39 = vmax.f32 %v466_v13, %v1515_v37 }
  0xfb   : > { %691 = vst [vmem:[%s1268_s16 + $0x28] sm:$0xff] %v675_v23  ;;  %v357_v6 = vmax.f32 %v252_v51, %v1514_v7  ;;  %v451_v10 = vmax.f32 %v358_v4, %v419_v32  ;;  %v569_v26 = vmax.f32 %v464_v31, %v1512_v30  ;;  %v1517_v23 = vld [vmem:[#allocation15_spill] sm:$0xff] }
  0xfc   : > { %692 = vst [vmem:[%s1268_s16 + $0x30] sm:$0xff] %v676_v18  ;;  %v605_v61 = vpop.permute.xlu1 %604  ;;  %v603_v19 = vpop.permute.xlu0 %602  ;;  %v570_v0 = vmax.f32 %v465_v33, %v1516_v12  ;;  %v467_v14 = vmax.f32 %v449_v44, %v1514_v7 }
  0xfd   : > { %v629_v59 = vsel %vm189_vm2, %v605_v61, %v607_v40  ;;  %v628_v57 = vsel %vm189_vm2, %v603_v19, %v605_v61  ;;  %v450_v48 = vmax.f32 %v357_v6, %v418_v46  ;;  %v469_v18 = vmax.f32 %v451_v10, %v1517_v23  ;;  %v619_v2 = vpop.permute.xlu2 %618  ;;  %v1521_v19 = vld [vmem:[#allocation27_spill] sm:$0xff] }
  0xfe   : > { %v661_v5 = vmax.f32 %v568_v16, %v629_v59  ;;  %v660_v22 = vmax.f32 %v567_v50, %v628_v57  ;;  %v572_v9 = vmax.f32 %v467_v14, %v1518_v60 }
  0xff   : > { %v468_v53 = vmax.f32 %v450_v48, %v1513_v38 }
 0x100   : > { %v679_v42 = vmax.f32 %v661_v5, %v1512_v30  ;;  %v678_v62 = vmax.f32 %v660_v22, %v1507_v36 }
 0x101   : > { %v573_v58 = vmax.f32 %v468_v53, %v1520_v24 }
 0x102   : > { %695 = vst [vmem:[%s1268_s16 + $0x48] sm:$0xff] %v679_v42 }
 0x103   : > { %694 = vst [vmem:[%s1268_s16 + $0x40] sm:$0xff] %v678_v62 }
 0x104   : > { %v611_v56 = vpop.permute.xlu1 %610  ;;  %v609_v35 = vpop.permute.xlu0 %608 }
 0x105   : > { %v632_v17 = vsel %vm189_vm2, %v611_v56, %v613_v8  ;;  %v630_v25 = vsel %vm189_vm2, %v607_v40, %v609_v35  ;;  %v631_v29 = vsel %vm189_vm2, %v609_v35, %v611_v56  ;;  %v1519_v40 = vld [vmem:[#allocation25_spill] sm:$0xff] }
 0x106   : > { %v664_v63 = vmax.f32 %v571_v39, %v632_v17  ;;  %v662_v28 = vmax.f32 %v569_v26, %v630_v25  ;;  %v663_v20 = vmax.f32 %v570_v0, %v631_v29  ;;  %v574_v15 = vmax.f32 %v469_v18, %v1519_v40 }
 0x108   : > { %v682_v43 = vmax.f32 %v664_v63, %v1518_v60  ;;  %v680_v34 = vmax.f32 %v662_v28, %v1516_v12  ;;  %v681_v49 = vmax.f32 %v663_v20, %v1515_v37 }
 0x10a   : > { %698 = vst [vmem:[%s1268_s16 + $0x60] sm:$0xff] %v682_v43 }
 0x10b   : > { %696 = vst [vmem:[%s1268_s16 + $0x50] sm:$0xff] %v680_v34 }
 0x10c   : > { %697 = vst [vmem:[%s1268_s16 + $0x58] sm:$0xff] %v681_v49  ;;  %v617_v3 = vpop.permute.xlu1 %616  ;;  %v615_v41 = vpop.permute.xlu0 %614 }
 0x10d   : > { %v635_v27 = vsel %vm189_vm2, %v617_v3, %v619_v2  ;;  %v633_v36 = vsel %vm189_vm2, %v613_v8, %v615_v41  ;;  %v634_v16 = vsel %vm189_vm2, %v615_v41, %v617_v3 }
 0x10e   : > { %v667_v61 = vmax.f32 %v574_v15, %v635_v27  ;;  %v665_v11 = vmax.f32 %v572_v9, %v633_v36  ;;  %v666_v50 = vmax.f32 %v573_v58, %v634_v16 }
 0x110   : > { %v685_v1 = vmax.f32 %v667_v61, %v1521_v19  ;;  %v683_v55 = vmax.f32 %v665_v11, %v1520_v24  ;;  %v684_v52 = vmax.f32 %v666_v50, %v1519_v40 }
 0x112   : > { %701 = vst [vmem:[%s1268_s16 + $0x78] sm:$0xff] %v685_v1 }
 0x113   : > { %699 = vst [vmem:[%s1268_s16 + $0x68] sm:$0xff] %v683_v55 }
 0x114   : > { %700 = vst [vmem:[%s1268_s16 + $0x70] sm:$0xff] %v684_v52 }
 0x115 PF: > { %s11_s6 = sadd.s32 1, %s784_s6  }
 0x116   : > { %p8_p4 = scmp.ge.s32.totalorder %s11_s6, 4  }
 0x118   :  { %10 = sbr.rel (!%p8_p4) target bundleno = 1 (0x1), region = 54 }

// kernel: forward.49
= control target key start
LH: loop header
LB: loop body
LE: loop exit
PB: predicated region body
PF: predicated region fallthrough
CT: control target
= control target key end

     0   :  { %s621_s12 = smov 0   ;;  %s838_s0 = inlined_call_operand.vmem [shape: f32[512,64], index: 0, kind: input, shape index: {}]   ;;  %s839_s1 = inlined_call_operand.vmem [shape: f32[64,8], index: 1, kind: input, shape index: {}]   ;;  %s840_s2 = inlined_call_operand.vmem [shape: f32[1,8], index: 2, kind: input, shape index: {}]   ;;  %s841_s3 = inlined_call_operand.vmem [shape: f32[512,8], index: 3, kind: output, shape index: {}]  }
   0x1 LB: > { %s517_s13 = sadd.s32 4294967295, %s599_s12   ;;  %p521_p0 = scmp.ge.s32.totalorder %s599_s12, 1  ;;  %s599_s12 = sphi %s621_s12, %s13_s12  }
   0x2   : > { %p138_p1 = scmp.lt.s32.totalorder %s599_s12, 3 }
   0x4   : > { %p139_p2 = pnand %p521_p0, %p138_p1 }
   0x5   : > { %s522_s18 = sshll.u32 (!%p139_p2), %s517_s13, 5 }
   0x6   : > { %142 = sbr.rel (%p139_p2) target bundleno = 219 (0xdb), region = 32  ;;  %p163_p3 = scmp.lt.s32.totalorder (!%p139_p2), %s522_s18, 63 }
   0xb   : > { %v213_v0 = vld [vmem:[%s839_s1 + $0x38] sm:$0xff]  ;;  %v212_v1 = vld [vmem:[%s839_s1 + $0x30] sm:$0xff]  ;;  %v211_v2 = vld [vmem:[%s839_s1 + $0x28] sm:$0xff]  ;;  %s843_s18 = smov (!%p163_p3, %s522_s18), 63  ;;  %vm218_vm0 = vcmask 523264   ;;  %vm428_vm1 = vcmask 64512  }
   0xc   : > { %561 = vmatpush.msra.mxu2 %v213_v0  ;;  %562 = vmatpush.msra.mxu3 %v213_v0  ;;  %v210_v3 = vld [vmem:[%s839_s1 + $0x20] sm:$0xff]  ;;  %v209_v4 = vld [vmem:[%s839_s1 + $0x18] sm:$0xff]  ;;  %s523_s25 = sshll.u32 %s843_s18, 3  ;;  %v208_v5 = vld [vmem:[%s839_s1 + $0x10] sm:$0xff] }
   0xd   : > { %323 = vmatpush.msra.mxu0 %v213_v0  ;;  %560 = vmatpush.msra.mxu1 %v213_v0  ;;  %v207_v6 = vld [vmem:[%s839_s1 + $0x8] sm:$0xff]  ;;  %s658_s5 = scalar_lea.vmem %s838_s0, %s523_s25  ;;  %v206_v7 = vld [vmem:[%s839_s1] sm:$0xff]  ;;  %s737_s13 = scalar_lea.vmem %s841_s3, %s523_s25 }
   0xe   : > { %564 = vmatpush.msra.mxu2 %v212_v1  ;;  %565 = vmatpush.msra.mxu3 %v212_v1  ;;  %v190_v8 = vld [vmem:[%s658_s5 + $0x80] sm:$0xff]  ;;  %v191_v12 = vld [vmem:[%s658_s5 + $0x88] sm:$0xff]  ;;  %v192_v16 = vld [vmem:[%s658_s5 + $0x90] sm:$0xff] }
   0xf   : > { %324 = vmatpush.msra.mxu0 %v212_v1  ;;  %563 = vmatpush.msra.mxu1 %v212_v1  ;;  %v198_v9 = vld [vmem:[%s658_s5 + $0xc0] sm:$0xff]  ;;  %v199_v13 = vld [vmem:[%s658_s5 + $0xc8] sm:$0xff]  ;;  %v200_v17 = vld [vmem:[%s658_s5 + $0xd0] sm:$0xff] }
  0x10   : > { %567 = vmatpush.msra.mxu2 %v211_v2  ;;  %568 = vmatpush.msra.mxu3 %v211_v2  ;;  %v174_v10 = vld [vmem:[%s658_s5] sm:$0xff]  ;;  %v175_v14 = vld [vmem:[%s658_s5 + $0x8] sm:$0xff]  ;;  %v176_v18 = vld [vmem:[%s658_s5 + $0x10] sm:$0xff] }
  0x11   : > { %325 = vmatpush.msra.mxu0 %v211_v2  ;;  %566 = vmatpush.msra.mxu1 %v211_v2  ;;  %v182_v11 = vld [vmem:[%s658_s5 + $0x40] sm:$0xff]  ;;  %v183_v15 = vld [vmem:[%s658_s5 + $0x48] sm:$0xff]  ;;  %v184_v19 = vld [vmem:[%s658_s5 + $0x50] sm:$0xff] }
  0x12   : > { %570 = vmatpush.msra.mxu2 %v210_v3  ;;  %571 = vmatpush.msra.mxu3 %v210_v3  ;;  %v193_v20 = vld [vmem:[%s658_s5 + $0x98] sm:$0xff]  ;;  %v194_v24 = vld [vmem:[%s658_s5 + $0xa0] sm:$0xff]  ;;  %v195_v28 = vld [vmem:[%s658_s5 + $0xa8] sm:$0xff] }
  0x13   : > { %326 = vmatpush.msra.mxu0 %v210_v3  ;;  %569 = vmatpush.msra.mxu1 %v210_v3  ;;  %v201_v21 = vld [vmem:[%s658_s5 + $0xd8] sm:$0xff]  ;;  %v202_v25 = vld [vmem:[%s658_s5 + $0xe0] sm:$0xff]  ;;  %v203_v29 = vld [vmem:[%s658_s5 + $0xe8] sm:$0xff] }
  0x14   : > { %573 = vmatpush.msra.mxu2 %v209_v4  ;;  %574 = vmatpush.msra.mxu3 %v209_v4  ;;  %v177_v22 = vld [vmem:[%s658_s5 + $0x18] sm:$0xff]  ;;  %v178_v26 = vld [vmem:[%s658_s5 + $0x20] sm:$0xff]  ;;  %v179_v30 = vld [vmem:[%s658_s5 + $0x28] sm:$0xff] }
  0x15   : > { %327 = vmatpush.msra.mxu0 %v209_v4  ;;  %572 = vmatpush.msra.mxu1 %v209_v4  ;;  %v185_v23 = vld [vmem:[%s658_s5 + $0x58] sm:$0xff]  ;;  %v186_v27 = vld [vmem:[%s658_s5 + $0x60] sm:$0xff]  ;;  %v187_v31 = vld [vmem:[%s658_s5 + $0x68] sm:$0xff] }
  0x16   : > { %576 = vmatpush.msra.mxu2 %v208_v5  ;;  %577 = vmatpush.msra.mxu3 %v208_v5  ;;  %v196_v32 = vld [vmem:[%s658_s5 + $0xb0] sm:$0xff]  ;;  %v197_v36 = vld [vmem:[%s658_s5 + $0xb8] sm:$0xff]  ;;  %v730_v40 = vld [vmem:[%s840_s2] ss:$0 sm:$0xff] }
  0x17   : > { %328 = vmatpush.msra.mxu0 %v208_v5  ;;  %575 = vmatpush.msra.mxu1 %v208_v5  ;;  %v204_v33 = vld [vmem:[%s658_s5 + $0xf0] sm:$0xff]  ;;  %v205_v37 = vld [vmem:[%s658_s5 + $0xf8] sm:$0xff] }
  0x18   : > { %579 = vmatpush.msra.mxu2 %v207_v6  ;;  %580 = vmatpush.msra.mxu3 %v207_v6  ;;  %v180_v34 = vld [vmem:[%s658_s5 + $0x30] sm:$0xff]  ;;  %v181_v38 = vld [vmem:[%s658_s5 + $0x38] sm:$0xff] }
  0x19   : > { %329 = vmatpush.msra.mxu0 %v207_v6  ;;  %578 = vmatpush.msra.mxu1 %v207_v6  ;;  %v188_v35 = vld [vmem:[%s658_s5 + $0x70] sm:$0xff]  ;;  %v189_v39 = vld [vmem:[%s658_s5 + $0x78] sm:$0xff] }
  0x1a   : > { %582 = vmatpush.msra.mxu2 %v206_v7  ;;  %583 = vmatpush.msra.mxu3 %v206_v7 }
  0x1b   : > { %542 = vmatmul.msk.f32.vlgmr.msra.gmra.mxu2 %vm218_vm0, %v190_v8  ;;  %550 = vmatmul.msk.f32.vlgmr.msra.gmra.mxu3 %vm218_vm0, %v198_v9 }
  0x1c   : > { %330 = vmatpush.msra.mxu0 %v206_v7  ;;  %581 = vmatpush.msra.mxu1 %v206_v7 }
  0x1d   : > { %526 = vmatmul.msk.f32.vlgmr.msra.gmra.mxu0 %vm218_vm0, %v174_v10  ;;  %534 = vmatmul.msk.f32.vlgmr.msra.gmra.mxu1 %vm218_vm0, %v182_v11 }
  0x23   : > { %543 = vmatmul.msk.f32.gmra.mxu2 %vm218_vm0, %v191_v12  ;;  %551 = vmatmul.msk.f32.gmra.mxu3 %vm218_vm0, %v199_v13 }
  0x25   : > { %527 = vmatmul.msk.f32.gmra.mxu0 %vm218_vm0, %v175_v14  ;;  %535 = vmatmul.msk.f32.gmra.mxu1 %vm218_vm0, %v183_v15 }
  0x2b   : > { %544 = vmatmul.msk.f32.gmra.mxu2 %vm218_vm0, %v192_v16  ;;  %552 = vmatmul.msk.f32.gmra.mxu3 %vm218_vm0, %v200_v17 }
  0x2d   : > { %528 = vmatmul.msk.f32.gmra.mxu0 %vm218_vm0, %v176_v18  ;;  %536 = vmatmul.msk.f32.gmra.mxu1 %vm218_vm0, %v184_v19 }
  0x33   : > { %545 = vmatmul.msk.f32.gmra.mxu2 %vm218_vm0, %v193_v20  ;;  %553 = vmatmul.msk.f32.gmra.mxu3 %vm218_vm0, %v201_v21 }
  0x35   : > { %529 = vmatmul.msk.f32.gmra.mxu0 %vm218_vm0, %v177_v22  ;;  %537 = vmatmul.msk.f32.gmra.mxu1 %vm218_vm0, %v185_v23 }
  0x3b   : > { %546 = vmatmul.msk.f32.gmra.mxu2 %vm218_vm0, %v194_v24  ;;  %554 = vmatmul.msk.f32.gmra.mxu3 %vm218_vm0, %v202_v25 }
  0x3d   : > { %530 = vmatmul.msk.f32.gmra.mxu0 %vm218_vm0, %v178_v26  ;;  %538 = vmatmul.msk.f32.gmra.mxu1 %vm218_vm0, %v186_v27 }
  0x43   : > { %547 = vmatmul.msk.f32.gmra.mxu2 %vm218_vm0, %v195_v28  ;;  %555 = vmatmul.msk.f32.gmra.mxu3 %vm218_vm0, %v203_v29 }
  0x45   : > { %531 = vmatmul.msk.f32.gmra.mxu0 %vm218_vm0, %v179_v30  ;;  %539 = vmatmul.msk.f32.gmra.mxu1 %vm218_vm0, %v187_v31 }
  0x4b   : > { %548 = vmatmul.msk.f32.gmra.mxu2 %vm218_vm0, %v196_v32  ;;  %556 = vmatmul.msk.f32.gmra.mxu3 %vm218_vm0, %v204_v33 }
  0x4d   : > { %532 = vmatmul.msk.f32.gmra.mxu0 %vm218_vm0, %v180_v34  ;;  %540 = vmatmul.msk.f32.gmra.mxu1 %vm218_vm0, %v188_v35 }
  0x53   : > { %549 = vmatmul.msk.f32.gmra.mxu2 %vm218_vm0, %v197_v36  ;;  %557 = vmatmul.msk.f32.gmra.mxu3 %vm218_vm0, %v205_v37 }
  0x55   : > { %533 = vmatmul.msk.f32.gmra.mxu0 %vm218_vm0, %v181_v38  ;;  %541 = vmatmul.msk.f32.gmra.mxu1 %vm218_vm0, %v189_v39 }
  0x9a   : > { %v332_v41 = vpop.f32.mrf.mxu0  ;;  %v356_v42 = vpop.f32.mrf.mxu1 }
  0x9b   : > { %v333_v43 = vadd.f32 %v730_v40, %v332_v41  ;;  %v357_v44 = vadd.f32 %v730_v40, %v356_v42 }
  0x9d   : > { %429 = vst.msk [vmem:[%s737_s13] sm:$0xff] %vm428_vm1, %v333_v43 }
  0x9e   : > { %437 = vst.msk [vmem:[%s737_s13 + $0x40] sm:$0xff] %vm428_vm1, %v357_v44  ;;  %v380_v45 = vpop.f32.mrf.mxu2  ;;  %v404_v46 = vpop.f32.mrf.mxu3 }
  0x9f   : > { %v381_v47 = vadd.f32 %v730_v40, %v380_v45  ;;  %v405_v48 = vadd.f32 %v730_v40, %v404_v46 }
  0xa1   : > { %445 = vst.msk [vmem:[%s737_s13 + $0x80] sm:$0xff] %vm428_vm1, %v381_v47 }
  0xa2   : > { %453 = vst.msk [vmem:[%s737_s13 + $0xc0] sm:$0xff] %vm428_vm1, %v405_v48  ;;  %v335_v49 = vpop.f32.mrf.mxu0  ;;  %v359_v50 = vpop.f32.mrf.mxu1 }
  0xa3   : > { %v336_v51 = vadd.f32 %v730_v40, %v335_v49  ;;  %v360_v52 = vadd.f32 %v730_v40, %v359_v50 }
  0xa5   : > { %430 = vst.msk [vmem:[%s737_s13 + $0x8] sm:$0xff] %vm428_vm1, %v336_v51 }
  0xa6   : > { %438 = vst.msk [vmem:[%s737_s13 + $0x48] sm:$0xff] %vm428_vm1, %v360_v52  ;;  %v383_v53 = vpop.f32.mrf.mxu2  ;;  %v407_v54 = vpop.f32.mrf.mxu3 }
  0xa7   : > { %v384_v55 = vadd.f32 %v730_v40, %v383_v53  ;;  %v408_v56 = vadd.f32 %v730_v40, %v407_v54 }
  0xa9   : > { %446 = vst.msk [vmem:[%s737_s13 + $0x88] sm:$0xff] %vm428_vm1, %v384_v55 }
  0xaa   : > { %454 = vst.msk [vmem:[%s737_s13 + $0xc8] sm:$0xff] %vm428_vm1, %v408_v56  ;;  %v338_v57 = vpop.f32.mrf.mxu0  ;;  %v362_v58 = vpop.f32.mrf.mxu1 }
  0xab   : > { %v339_v59 = vadd.f32 %v730_v40, %v338_v57  ;;  %v363_v60 = vadd.f32 %v730_v40, %v362_v58 }
  0xad   : > { %431 = vst.msk [vmem:[%s737_s13 + $0x10] sm:$0xff] %vm428_vm1, %v339_v59 }
  0xae   : > { %439 = vst.msk [vmem:[%s737_s13 + $0x50] sm:$0xff] %vm428_vm1, %v363_v60  ;;  %v386_v61 = vpop.f32.mrf.mxu2  ;;  %v410_v62 = vpop.f32.mrf.mxu3 }
  0xaf   : > { %v387_v63 = vadd.f32 %v730_v40, %v386_v61  ;;  %v411_v0 = vadd.f32 %v730_v40, %v410_v62 }
  0xb1   : > { %447 = vst.msk [vmem:[%s737_s13 + $0x90] sm:$0xff] %vm428_vm1, %v387_v63 }
  0xb2   : > { %455 = vst.msk [vmem:[%s737_s13 + $0xd0] sm:$0xff] %vm428_vm1, %v411_v0  ;;  %v341_v1 = vpop.f32.mrf.mxu0  ;;  %v365_v2 = vpop.f32.mrf.mxu1 }
  0xb3   : > { %v342_v3 = vadd.f32 %v730_v40, %v341_v1  ;;  %v366_v4 = vadd.f32 %v730_v40, %v365_v2 }
  0xb5   : > { %432 = vst.msk [vmem:[%s737_s13 + $0x18] sm:$0xff] %vm428_vm1, %v342_v3 }
  0xb6   : > { %440 = vst.msk [vmem:[%s737_s13 + $0x58] sm:$0xff] %vm428_vm1, %v366_v4  ;;  %v389_v5 = vpop.f32.mrf.mxu2  ;;  %v413_v6 = vpop.f32.mrf.mxu3 }
  0xb7   : > { %v390_v7 = vadd.f32 %v730_v40, %v389_v5  ;;  %v414_v8 = vadd.f32 %v730_v40, %v413_v6 }
  0xb9   : > { %448 = vst.msk [vmem:[%s737_s13 + $0x98] sm:$0xff] %vm428_vm1, %v390_v7 }
  0xba   : > { %456 = vst.msk [vmem:[%s737_s13 + $0xd8] sm:$0xff] %vm428_vm1, %v414_v8  ;;  %v344_v9 = vpop.f32.mrf.mxu0  ;;  %v368_v10 = vpop.f32.mrf.mxu1 }
  0xbb   : > { %v345_v11 = vadd.f32 %v730_v40, %v344_v9  ;;  %v369_v12 = vadd.f32 %v730_v40, %v368_v10 }
  0xbd   : > { %433 = vst.msk [vmem:[%s737_s13 + $0x20] sm:$0xff] %vm428_vm1, %v345_v11 }
  0xbe   : > { %441 = vst.msk [vmem:[%s737_s13 + $0x60] sm:$0xff] %vm428_vm1, %v369_v12  ;;  %v392_v13 = vpop.f32.mrf.mxu2  ;;  %v416_v14 = vpop.f32.mrf.mxu3 }
  0xbf   : > { %v393_v15 = vadd.f32 %v730_v40, %v392_v13  ;;  %v417_v16 = vadd.f32 %v730_v40, %v416_v14 }
  0xc1   : > { %449 = vst.msk [vmem:[%s737_s13 + $0xa0] sm:$0xff] %vm428_vm1, %v393_v15 }
  0xc2   : > { %457 = vst.msk [vmem:[%s737_s13 + $0xe0] sm:$0xff] %vm428_vm1, %v417_v16  ;;  %v347_v17 = vpop.f32.mrf.mxu0  ;;  %v371_v18 = vpop.f32.mrf.mxu1 }
  0xc3   : > { %v348_v19 = vadd.f32 %v730_v40, %v347_v17  ;;  %v372_v20 = vadd.f32 %v730_v40, %v371_v18 }
  0xc5   : > { %434 = vst.msk [vmem:[%s737_s13 + $0x28] sm:$0xff] %vm428_vm1, %v348_v19 }
  0xc6   : > { %442 = vst.msk [vmem:[%s737_s13 + $0x68] sm:$0xff] %vm428_vm1, %v372_v20  ;;  %v395_v21 = vpop.f32.mrf.mxu2  ;;  %v419_v22 = vpop.f32.mrf.mxu3 }
  0xc7   : > { %v396_v23 = vadd.f32 %v730_v40, %v395_v21  ;;  %v420_v24 = vadd.f32 %v730_v40, %v419_v22 }
  0xc9   : > { %450 = vst.msk [vmem:[%s737_s13 + $0xa8] sm:$0xff] %vm428_vm1, %v396_v23 }
  0xca   : > { %458 = vst.msk [vmem:[%s737_s13 + $0xe8] sm:$0xff] %vm428_vm1, %v420_v24  ;;  %v350_v25 = vpop.f32.mrf.mxu0  ;;  %v374_v26 = vpop.f32.mrf.mxu1 }
  0xcb   : > { %v351_v27 = vadd.f32 %v730_v40, %v350_v25  ;;  %v375_v28 = vadd.f32 %v730_v40, %v374_v26 }
  0xcd   : > { %435 = vst.msk [vmem:[%s737_s13 + $0x30] sm:$0xff] %vm428_vm1, %v351_v27 }
  0xce   : > { %443 = vst.msk [vmem:[%s737_s13 + $0x70] sm:$0xff] %vm428_vm1, %v375_v28  ;;  %v398_v29 = vpop.f32.mrf.mxu2  ;;  %v422_v30 = vpop.f32.mrf.mxu3 }
  0xcf   : > { %v399_v31 = vadd.f32 %v730_v40, %v398_v29  ;;  %v423_v32 = vadd.f32 %v730_v40, %v422_v30 }
  0xd1   : > { %451 = vst.msk [vmem:[%s737_s13 + $0xb0] sm:$0xff] %vm428_vm1, %v399_v31 }
  0xd2   : > { %459 = vst.msk [vmem:[%s737_s13 + $0xf0] sm:$0xff] %vm428_vm1, %v423_v32  ;;  %v353_v33 = vpop.f32.mrf.mxu0  ;;  %v377_v34 = vpop.f32.mrf.mxu1 }
  0xd3   : > { %v354_v35 = vadd.f32 %v730_v40, %v353_v33  ;;  %v378_v36 = vadd.f32 %v730_v40, %v377_v34 }
  0xd5   : > { %436 = vst.msk [vmem:[%s737_s13 + $0x38] sm:$0xff] %vm428_vm1, %v354_v35 }
  0xd6   : > { %444 = vst.msk [vmem:[%s737_s13 + $0x78] sm:$0xff] %vm428_vm1, %v378_v36  ;;  %v401_v37 = vpop.f32.mrf.mxu2  ;;  %v425_v38 = vpop.f32.mrf.mxu3 }
  0xd7   : > { %v402_v39 = vadd.f32 %v730_v40, %v401_v37  ;;  %v426_v41 = vadd.f32 %v730_v40, %v425_v38 }
  0xd9   : > { %452 = vst.msk [vmem:[%s737_s13 + $0xb8] sm:$0xff] %vm428_vm1, %v402_v39 }
  0xda   : > { %460 = vst.msk [vmem:[%s737_s13 + $0xf8] sm:$0xff] %vm428_vm1, %v426_v41 }
  0xdb PF: > { %s13_s12 = sadd.s32 1, %s599_s12  }
  0xdc   : > { %p10_p4 = scmp.ge.s32.totalorder %s13_s12, 4  }
  0xde   :  { %12 = sbr.rel (!%p10_p4) target bundleno = 1 (0x1), region = 62 }

// kernel: tile.37
= control target key start
LH: loop header
LB: loop body
LE: loop exit
PB: predicated region body
PF: predicated region fallthrough
CT: control target
= control target key end

     0   :  { %s28_s0 = inlined_call_operand.vmem [shape: f32[8], index: 0, kind: input, shape index: {}]   ;;  %s29_s1 = inlined_call_operand.vmem [shape: f32[16,8], index: 1, kind: output, shape index: {}]  }
   0x1   :  { %v4_v0 = vld [vmem:[%s28_s0] ss:$0 sm:$0xff] }
   0x2   :  { %5 = vst [vmem:[%s29_s1] sm:$0xff] %v4_v0 }
   0x3   :  { %8 = vst [vmem:[%s29_s1 + $0x8] sm:$0xff] %v4_v0 }

// kernel: tile.39
= control target key start
LH: loop header
LB: loop body
LE: loop exit
PB: predicated region body
PF: predicated region fallthrough
CT: control target
= control target key end

     0   :  { %s131_s10 = smov 120   ;;  %s132_s11 = smov 104   ;;  %vm3_vm0 = vcmask 64512   ;;  %vm9_vm1 = vcmask 1048512   ;;  %vm15_vm2 = vcmask 982912   ;;  %vm21_vm3 = vcmask 917312   ;;  %s207_s0 = inlined_call_operand.vmem [shape: f32[16,8], index: 0, kind: input, shape index: {}]   ;;  %s208_s1 = inlined_call_operand.vmem [shape: f32[1,128], index: 1, kind: output, shape index: {}]  }
   0x1   :  { %v101_v0 = vld [vmem:[%s207_s0 + $0xf] sm:$0x1]   ;;  %v103_v1 = vld [vmem:[%s207_s0 + $0xd] sm:$0x1]   ;;  %v105_v2 = vld [vmem:[%s207_s0 + $0xb] sm:$0x1]  }
   0x2   :  { %7 = vrot.lane.b32.xlu0 %v101_v0, %s131_s10  ;;  %19 = vrot.lane.b32.xlu1 %v103_v1, %s132_s11  ;;  %s133_s14 = smov 88   ;;  %v102_v3 = vld [vmem:[%s207_s0 + $0xe] sm:$0x1]   ;;  %v104_v4 = vld [vmem:[%s207_s0 + $0xc] sm:$0x1]   ;;  %s134_s19 = smov 112  }
   0x3   :  { %31 = vrot.lane.b32.xlu2 %v105_v2, %s133_s14  ;;  %s135_s20 = smov 96   ;;  %v106_v5 = vld [vmem:[%s207_s0 + $0xa] sm:$0x1]   ;;  %s136_s23 = smov 80   ;;  %v107_v6 = vld [vmem:[%s207_s0 + $0x9] sm:$0x1]  }
   0x4   :  { %v108_v7 = vld [vmem:[%s207_s0 + $0x8] sm:$0x1]   ;;  %s137_s28 = smov 72   ;;  %s138_s29 = smov 64   ;;  %v109_v8 = vld [vmem:[%s207_s0 + $0x7] sm:$0x1]  }
   0x5   :  { %s139_s3 = smov 56   ;;  %v110_v9 = vld [vmem:[%s207_s0 + $0x6] sm:$0x1]   ;;  %v111_v10 = vld [vmem:[%s207_s0 + $0x5] sm:$0x1]   ;;  %s140_s8 = smov 48  }
   0x6   :  { %s141_s9 = smov 40   ;;  %v112_v11 = vld [vmem:[%s207_s0 + $0x4] sm:$0x1]   ;;  %s142_s12 = smov 32   ;;  %v113_v12 = vld [vmem:[%s207_s0 + $0x3] sm:$0x1]  }
   0x7   :  { %v114_v13 = vld [vmem:[%s207_s0 + $0x2] sm:$0x1]   ;;  %s143_s17 = smov 24   ;;  %s144_s18 = smov 16   ;;  %v115_v14 = vld [vmem:[%s207_s0 + $0x1] sm:$0x1]  }
   0x8   :  { %s145_s21 = smov 8   ;;  %v2_v15 = vld [vmem:[%s207_s0] sm:$0x1]   ;;  %vm27_vm4 = vcmask 851712   ;;  %vm33_vm5 = vcmask 786112   ;;  %vm39_vm6 = vcmask 720512  }
   0x9   :  { %4 = vst.msk [vmem:[#allocation0] sm:$0x1] %vm3_vm0, %v2_v15   ;;  %vm45_vm7 = vcmask 654912   ;;  %vm51_vm8 = vcmask 589312   ;;  %vm57_vm9 = vcmask 523712   ;;  %vm63_vm10 = vcmask 458112  }
   0xa   :  { %13 = vrot.lane.b32.xlu0 %v102_v3, %s134_s19  ;;  %25 = vrot.lane.b32.xlu1 %v104_v4, %s135_s20  ;;  %vm69_vm11 = vcmask 392512   ;;  %vm75_vm12 = vcmask 326912   ;;  %vm81_vm13 = vcmask 261312   ;;  %vm87_vm14 = vcmask 195712  }
   0xb   :  { %37 = vrot.lane.b32.xlu2 %v106_v5, %s136_s23  ;;  %vm93_vm15 = vcmask 130112  }
  0x12   :  { %43 = vrot.lane.b32.xlu0 %v107_v6, %s137_s28  ;;  %49 = vrot.lane.b32.xlu1 %v108_v7, %s138_s29 }
  0x13   :  { %55 = vrot.lane.b32.xlu2 %v109_v8, %s139_s3 }
  0x1a   :  { %61 = vrot.lane.b32.xlu0 %v110_v9, %s140_s8  ;;  %67 = vrot.lane.b32.xlu1 %v111_v10, %s141_s9 }
  0x1b   :  { %73 = vrot.lane.b32.xlu2 %v112_v11, %s142_s12 }
  0x22   :  { %79 = vrot.lane.b32.xlu0 %v113_v12, %s143_s17  ;;  %85 = vrot.lane.b32.xlu1 %v114_v13, %s144_s18 }
  0x23   :  { %91 = vrot.lane.b32.xlu2 %v115_v14, %s145_s21 }
  0x5d   :  { %v32_v16 = vpop.permute.xlu2 %31  }
  0x65   :  { %v38_v17 = vpop.permute.xlu2 %37  }
  0x6d   :  { %v56_v18 = vpop.permute.xlu2 %55  }
  0x74   :  { %v8_v19 = vpop.permute.xlu0 %7   ;;  %v20_v20 = vpop.permute.xlu1 %19  }
  0x75   :  { %10 = vst.msk [vmem:[#allocation0] sm:$0x1] %vm9_vm1, %v8_v19   ;;  %v74_v21 = vpop.permute.xlu2 %73  }
  0x7c   :  { %v14_v22 = vpop.permute.xlu0 %13   ;;  %v26_v23 = vpop.permute.xlu1 %25  }
  0x7d   :  { %16 = vst.msk [vmem:[#allocation0] sm:$0x1] %vm15_vm2, %v14_v22   ;;  %v92_v24 = vpop.permute.xlu2 %91  }
  0x7e   :  { %22 = vst.msk [vmem:[#allocation0] sm:$0x1] %vm21_vm3, %v20_v20  }
  0x7f   :  { %28 = vst.msk [vmem:[#allocation0] sm:$0x1] %vm27_vm4, %v26_v23  }
  0x80   :  { %34 = vst.msk [vmem:[#allocation0] sm:$0x1] %vm33_vm5, %v32_v16  }
  0x81   :  { %40 = vst.msk [vmem:[#allocation0] sm:$0x1] %vm39_vm6, %v38_v17  }
  0x84   :  { %v44_v25 = vpop.permute.xlu0 %43   ;;  %v50_v26 = vpop.permute.xlu1 %49  }
  0x85   :  { %46 = vst.msk [vmem:[#allocation0] sm:$0x1] %vm45_vm7, %v44_v25  }
  0x86   :  { %52 = vst.msk [vmem:[#allocation0] sm:$0x1] %vm51_vm8, %v50_v26  }
  0x87   :  { %58 = vst.msk [vmem:[#allocation0] sm:$0x1] %vm57_vm9, %v56_v18  }
  0x8c   :  { %v62_v27 = vpop.permute.xlu0 %61   ;;  %v68_v28 = vpop.permute.xlu1 %67  }
  0x8d   :  { %64 = vst.msk [vmem:[#allocation0] sm:$0x1] %vm63_vm10, %v62_v27  }
  0x8e   :  { %70 = vst.msk [vmem:[#allocation0] sm:$0x1] %vm69_vm11, %v68_v28  }
  0x8f   :  { %76 = vst.msk [vmem:[#allocation0] sm:$0x1] %vm75_vm12, %v74_v21  }
  0x94   :  { %v80_v29 = vpop.permute.xlu0 %79   ;;  %v86_v30 = vpop.permute.xlu1 %85  }
  0x95   :  { %82 = vst.msk [vmem:[#allocation0] sm:$0x1] %vm81_vm13, %v80_v29  }
  0x96   :  { %88 = vst.msk [vmem:[#allocation0] sm:$0x1] %vm87_vm14, %v86_v30  }
  0x97   :  { %94 = vst.msk [vmem:[#allocation0] sm:$0x1] %vm93_vm15, %v92_v24  }
  0x9e   :  { %v97_v31 = vld [vmem:[#allocation0] sm:$0x1] }
  0x9f   :  { %100 = vst [vmem:[%s208_s1] sm:$0x1] %v97_v31 }

// kernel: forward.50
= control target key start
LH: loop header
LB: loop body
LE: loop exit
PB: predicated region body
PF: predicated region fallthrough
CT: control target
= control target key end

     0   :  { %s198_s6 = smov 0   ;;  %s227_s0 = inlined_call_operand.vmem [shape: f32[32,128], index: 0, kind: input, shape index: {}]   ;;  %s228_s1 = inlined_call_operand.vmem [shape: f32[2,128], index: 1, kind: output, shape index: {}]  }
   0x1 LB: > { %s161_s7 = sadd.s32 4294967295, %s185_s6   ;;  %p164_p0 = scmp.ge.s32.totalorder %s185_s6, 1  ;;  %s185_s6 = sphi %s198_s6, %s11_s6  }
   0x2   : > { %p83_p1 = scmp.lt.s32.totalorder %s185_s6, 3 }
   0x4   : > { %p84_p2 = pnand %p164_p0, %p83_p1 }
   0x5   : > { %s165_s8 = sshll.u32 (!%p84_p2), %s161_s7, 1  ;;  %p167_p4 = scmp.ne.s32.totalorder (!%p84_p2), %s161_s7, 0 }
   0x6   : > { %87 = sbr.rel (%p84_p2) target bundleno = 38 (0x26), region = 24  ;;  %p99_p3 = scmp.lt.s32.totalorder (!%p84_p2), %s165_s8, 3 }
   0xb   : > { %s230_s8 = smov (!%p99_p3, %s165_s8), 3  ;;  %107 = sbr.rel (%p167_p4) target bundleno = 18 (0x12), region = 28 }
   0xc   : > { %s166_s9 = sshll.u32 %s230_s8, 3 }
   0xd   : > { %s102_s12 = scalar_lea.vmem %s227_s0, %s166_s9 }
  0x10   : > { %v187_v0 = vmov 0.0  }
  0x11   : > { %108 = vst [vmem:[%s228_s1] sm:$0x3] %v187_v0 }
  0x12 PF: > { %v109_v1 = vld [vmem:[%s102_s12] sm:$0xff]  ;;  %v110_v2 = vld [vmem:[%s102_s12 + $0x8] sm:$0xff] }
  0x13   : > { %v112_v3 = vadd.f32 %v110_v2, %v109_v1  ;;  %v122_v4 = vmul.f32 %v109_v1, %v109_v1  ;;  %v123_v5 = vmul.f32 %v110_v2, %v110_v2 }
  0x15   : > { %v113_v6 = vrot.slane %v112_v3, 4  ;;  %v124_v7 = vadd.f32 %v123_v5, %v122_v4 }
  0x17   : > { %v114_v8 = vadd.f32 %v113_v6, %v112_v3  ;;  %v125_v9 = vrot.slane %v124_v7, 4 }
  0x18   : > { %v111_v16 = vld [vmem:[%s228_s1] sm:$0x1]  ;;  %v121_v19 = vld [vmem:[%s228_s1 + $0x1] sm:$0x1] }
  0x19   : > { %v115_v10 = vrot.slane %v114_v8, 2  ;;  %v126_v11 = vadd.f32 %v125_v9, %v124_v7 }
  0x1b   : > { %v116_v12 = vadd.f32 %v115_v10, %v114_v8  ;;  %v127_v13 = vrot.slane %v126_v11, 2 }
  0x1d   : > { %v117_v14 = vrot.slane %v116_v12, 1  ;;  %v128_v15 = vadd.f32 %v127_v13, %v126_v11 }
  0x1f   : > { %v118_v17 = vadd.f32 %v117_v14, %v116_v12  ;;  %v129_v18 = vrot.slane %v128_v15, 1 }
  0x21   : > { %v119_v20 = vadd.f32 %v118_v17, %v111_v16  ;;  %v130_v21 = vadd.f32 %v129_v18, %v128_v15 }
  0x23   : > { %120 = vst [vmem:[%s228_s1] sm:$0x1] %v119_v20  ;;  %v131_v22 = vadd.f32 %v130_v21, %v121_v19 }
  0x25   : > { %132 = vst [vmem:[%s228_s1 + $0x1] sm:$0x1] %v131_v22 }
  0x26 PF: > { %s11_s6 = sadd.s32 1, %s185_s6  }
  0x27   : > { %p8_p5 = scmp.ge.s32.totalorder %s11_s6, 4  }
  0x29   :  { %10 = sbr.rel (!%p8_p5) target bundleno = 1 (0x1), region = 54 }

// kernel: forward.51
= control target key start
LH: loop header
LB: loop body
LE: loop exit
PB: predicated region body
PF: predicated region fallthrough
CT: control target
= control target key end

     0   :  { %s265_s9 = smov 0   ;;  %s288_s0 = inlined_call_operand.vmem [shape: f32[32,128], index: 0, kind: input, shape index: {}]   ;;  %s289_s1 = inlined_call_operand.vmem [shape: f32[2,128], index: 1, kind: input, shape index: {}]   ;;  %s290_s2 = inlined_call_operand.vmem [shape: f32[32,128], index: 2, kind: output, shape index: {}]  }
   0x1 LB: > { %s221_s10 = sadd.s32 4294967295, %s248_s9   ;;  %p225_p0 = scmp.ge.s32.totalorder %s248_s9, 1  ;;  %s248_s9 = sphi %s265_s9, %s12_s9  }
   0x2   : > { %p113_p1 = scmp.lt.s32.totalorder %s248_s9, 3 }
   0x4   : > { %p114_p2 = pnand %p225_p0, %p113_p1 }
   0x5   : > { %s226_s11 = sshll.u32 (!%p114_p2), %s221_s10, 1 }
   0x6   : > { %117 = sbr.rel (%p114_p2) target bundleno = 24 (0x18), region = 28  ;;  %p136_p3 = scmp.lt.s32.totalorder (!%p114_p2), %s226_s11, 3 }
   0xb   : > { %s292_s11 = smov (!%p136_p3, %s226_s11), 3  ;;  %v240_v0 = vld [vmem:[%s289_s1] ss:$0 sm:$0xff]  ;;  %v241_v1 = vld [vmem:[%s289_s1 + $0x1] ss:$0 sm:$0xff] }
   0xc   : > { %s227_s14 = sshll.u32 %s292_s11, 3 }
   0xd   : > { %s139_s17 = scalar_lea.vmem %s288_s0, %s227_s14  ;;  %s145_s22 = scalar_lea.vmem %s290_s2, %s227_s14 }
   0xe   : > { %v147_v2 = vld [vmem:[%s139_s17] sm:$0xff]  ;;  %v148_v3 = vld [vmem:[%s139_s17 + $0x8] sm:$0xff] }
   0xf   : > { %v151_v4 = vmul.f32 %v240_v0, %v147_v2  ;;  %v152_v5 = vmul.f32 %v240_v0, %v148_v3 }
  0x11   : > { %v155_v6 = vadd.f32 %v241_v1, %v151_v4  ;;  %v156_v7 = vadd.f32 %v241_v1, %v152_v5 }
  0x13   : > { %vm157_vm0 = vcmp.gt.f32.partialorder %v155_v6, 0.0  ;;  %v159_v8 = vmul.f32 0.0, %v155_v6  ;;  %vm158_vm1 = vcmp.gt.f32.partialorder %v156_v7, 0.0  ;;  %v160_v9 = vmul.f32 0.0, %v156_v7 }
  0x15   : > { %v161_v10 = vsel %vm157_vm0, %v155_v6, %v159_v8  ;;  %v162_v11 = vsel %vm158_vm1, %v156_v7, %v160_v9 }
  0x16   : > { %163 = vst [vmem:[%s145_s22] sm:$0xff] %v161_v10 }
  0x17   : > { %164 = vst [vmem:[%s145_s22 + $0x8] sm:$0xff] %v162_v11 }
  0x18 PF: > { %s12_s9 = sadd.s32 1, %s248_s9  }
  0x19   : > { %p9_p4 = scmp.ge.s32.totalorder %s12_s9, 4  }
  0x1b   :  { %11 = sbr.rel (!%p9_p4) target bundleno = 1 (0x1), region = 58 }

</bundles_post_ra>
